<compile_context>
chip_gen: v7x
topology: tpu7x:2x2x1
jax: 0.10.0
libtpu: 0.0.40
codegen_flags: <defaults>
</compile_context>

<pallas_src>
import functools

import jax
import jax.numpy as jnp
from jax.experimental import pallas as pl
from jax.experimental.pallas import tpu as pltpu


def _round_up(x, m):
    return (x + m - 1) // m * m


def _pick_tile(total, candidates):
    for c in candidates:
        if c <= total and total % c == 0:
            return c
    return total


# ----------------------------- Pallas kernels ------------------------------

def _fused_matmul_kernel(*refs, relu, has_residual):
    """Tiled (acc += x @ w) with fused bias[/residual][/ReLU] epilogue."""
    if has_residual:
        x_ref, w_ref, b_ref, r_ref, o_ref, acc_ref = refs
    else:
        x_ref, w_ref, b_ref, o_ref, acc_ref = refs
        r_ref = None

    @pl.when(pl.program_id(2) == 0)
    def _():
        acc_ref[...] = jnp.zeros_like(acc_ref)

    acc_ref[...] += jnp.dot(x_ref[...], w_ref[...],
                            preferred_element_type=jnp.float32)

    @pl.when(pl.program_id(2) == pl.num_programs(2) - 1)
    def _():
        y = acc_ref[...] + b_ref[...]              # f32 epilogue (v5e-safe)
        if has_residual:
            y = y + r_ref[...].astype(jnp.float32)
        if relu:
            y = jnp.maximum(y, 0.0)
        o_ref[...] = y.astype(o_ref.dtype)


def fused_matmul(x, w_p, b_p, *, n_out, residual=None, relu=False,
                 out_dtype=jnp.bfloat16):
    """y = act((x @ w_p) + b_p [+ residual]); w_p/b_p are pre-padded at init."""
    M, K = x.shape
    Kp, Np = w_p.shape
    Mp = _round_up(M, 8)

    x = x.astype(jnp.bfloat16)
    if Mp != M or Kp != K:
        x = jnp.pad(x, ((0, Mp - M), (0, Kp - K)))

    tm = _pick_tile(Mp, [256, 128, 64, 32, 16, 8])
    tn = 256 if Np % 256 == 0 else 128
    # v7x: ensure >= 2 parallel (i, j) blocks so both TensorCores get work.
    if Mp // tm == 1 and Np // tn == 1:
        if Np >= 256:
            tn = 128
        elif tm >= 16:
            tm //= 2
    tk = _pick_tile(Kp, [512, 384, 256, 128])

    has_residual = residual is not None
    inputs = [x, w_p, b_p]
    in_specs = [
        pl.BlockSpec((tm, tk), lambda i, j, k: (i, k)),
        pl.BlockSpec((tk, tn), lambda i, j, k: (k, j)),
        pl.BlockSpec((1, tn), lambda i, j, k: (0, j)),
    ]
    if has_residual:
        r = residual.astype(jnp.bfloat16)
        if Mp != M or Np != n_out:
            r = jnp.pad(r, ((0, Mp - M), (0, Np - n_out)))
        inputs.append(r)
        in_specs.append(pl.BlockSpec((tm, tn), lambda i, j, k: (i, j)))

    gi, gj, gk = Mp // tm, Np // tn, Kp // tk
    out_itemsize = jnp.dtype(out_dtype).itemsize
    bytes_accessed = (Mp * Kp * 2 * gj            # x re-read per j block
                      + Kp * Np * 2 * gi          # w re-read per i block
                      + Mp * Np * out_itemsize
                      + Np * 4 * gi
                      + (Mp * Np * 2 if has_residual else 0))

    out = pl.pallas_call(
        functools.partial(_fused_matmul_kernel, relu=relu,
                          has_residual=has_residual),
        out_shape=jax.ShapeDtypeStruct((Mp, Np), out_dtype),
        grid=(gi, gj, gk),
        in_specs=in_specs,
        out_specs=pl.BlockSpec((tm, tn), lambda i, j, k: (i, j)),
        scratch_shapes=[pltpu.VMEM((tm, tn), jnp.float32)],
        compiler_params=pltpu.CompilerParams(
            dimension_semantics=("parallel", "parallel", "arbitrary")),
        cost_estimate=pl.CostEstimate(flops=2 * Mp * Kp * Np,
                                      transcendentals=0,
                                      bytes_accessed=bytes_accessed),
    )(*inputs)
    if Mp != M or Np != n_out:
        out = out[:M, :n_out]
    return out


def _max_over_taps_kernel(x_ref, o_ref):
    o_ref[...] = jnp.max(x_ref[...], axis=0)


def maxpool_3x3_s2_p1(x):
    """PyTorch MaxPool2d(kernel_size=3, stride=2, padding=1), NHWC layout."""
    N, H, W, C = x.shape
    k, s, p = 3, 2, 1
    Ho = (H + 2 * p - k) // s + 1
    Wo = (W + 2 * p - k) // s + 1
    xp = jnp.pad(x, ((0, 0), (p, p), (p, p), (0, 0)), constant_values=-1e30)
    taps = [xp[:, i:i + Ho * s:s, j:j + Wo * s:s, :]
            for i in range(k) for j in range(k)]
    M = N * Ho * Wo
    stacked = jnp.stack(taps, axis=0).reshape(k * k, M, C)
    # Fold rows into the 128-lane dim so C<128 needs no channel padding.
    fold = 1
    if C < 128 and 128 % C == 0 and M % (128 // C) == 0:
        fold = 128 // C
    M2, C2 = M // fold, C * fold
    stacked = stacked.reshape(k * k, M2, C2)
    Mp, Cp = _round_up(M2, 8), _round_up(C2, 128)
    if Mp != M2 or Cp != C2:
        stacked = jnp.pad(stacked, ((0, 0), (0, Mp - M2), (0, Cp - C2)),
                          constant_values=-1e30)
    tm = _pick_tile(Mp, [512, 256, 128, 64, 32, 16, 8])
    out = pl.pallas_call(
        _max_over_taps_kernel,
        out_shape=jax.ShapeDtypeStruct((Mp, Cp), x.dtype),
        grid=(Mp // tm,),
        in_specs=[pl.BlockSpec((k * k, tm, Cp), lambda i: (0, i, 0))],
        out_specs=pl.BlockSpec((tm, Cp), lambda i: (i, 0)),
        compiler_params=pltpu.CompilerParams(dimension_semantics=("parallel",)),
    )(stacked)
    if Mp != M2 or Cp != C2:
        out = out[:M2, :C2]
    return out.reshape(N, Ho, Wo, C)


def _head_kernel(x_ref, w1_ref, b1_ref, w2_ref, b2_ref, o_ref):
    """AdaptiveAvgPool2d(1) + Linear(512,128) + ReLU + Linear(128,2) fused."""
    feats = jnp.mean(x_ref[...].astype(jnp.float32), axis=1)       # (Nb, 512)
    h = jnp.dot(feats.astype(jnp.bfloat16), w1_ref[...],
                preferred_element_type=jnp.float32) + b1_ref[...]
    h = jnp.maximum(h, 0.0)
    logits = jnp.dot(h.astype(jnp.bfloat16), w2_ref[...],
                     preferred_element_type=jnp.float32) + b2_ref[...]
    o_ref[...] = logits


def head_forward(params, x):
    N, H, W, C = x.shape
    Nb = _round_up(N, 8)
    xf = x.reshape(N, H * W, C)
    if Nb != N:
        xf = jnp.pad(xf, ((0, Nb - N), (0, 0), (0, 0)))
    out = pl.pallas_call(
        _head_kernel,
        out_shape=jax.ShapeDtypeStruct((Nb, 128), jnp.float32),
    )(xf, params['fc1_w'], params['fc1_b'], params['fc2_w'], params['fc2_b'])
    return out[:N, :2]


# --------------------------- Conv / block helpers ---------------------------

def _im2col(x, kh, kw, stride, padding):
    """NHWC -> [N*Ho*Wo, kh*kw*C] patches (bf16 slicing/concat glue)."""
    N, H, W, C = x.shape
    Ho = (H + 2 * padding - kh) // stride + 1
    Wo = (W + 2 * padding - kw) // stride + 1
    if padding:
        x = jnp.pad(x, ((0, 0), (padding, padding), (padding, padding), (0, 0)))
    cols = [x[:, i:i + Ho * stride:stride, j:j + Wo * stride:stride, :]
            for i in range(kh) for j in range(kw)]
    patches = cols[0] if len(cols) == 1 else jnp.concatenate(cols, axis=-1)
    return patches.reshape(N * Ho * Wo, kh * kw * C), (N, Ho, Wo)


def conv_bn(x, p, *, kh, kw, cout, stride, padding, relu, residual=None):
    """conv2d(bias=False) + folded BN + optional fused residual/ReLU."""
    patches, (N, Ho, Wo) = _im2col(x, kh, kw, stride, padding)
    res2d = residual.reshape(-1, cout) if residual is not None else None
    y = fused_matmul(patches, p['w'], p['b'], n_out=cout,
                     residual=res2d, relu=relu, out_dtype=jnp.bfloat16)
    return y.reshape(N, Ho, Wo, cout)


def basic_block(x, p, out_c, stride):
    out = conv_bn(x, p['conv1'], kh=3, kw=3, cout=out_c, stride=stride,
                  padding=1, relu=True)
    if 'down' in p:
        identity = conv_bn(x, p['down'], kh=1, kw=1, cout=out_c,
                           stride=stride, padding=0, relu=False)
    else:
        identity = x
    # conv2 + BN + residual add + ReLU, all fused in one matmul epilogue.
    return conv_bn(out, p['conv2'], kh=3, kw=3, cout=out_c, stride=1,
                   padding=1, relu=True, residual=identity)


# ------------------------------- Parameters ---------------------------------

STAGES = [(64, 1), (128, 2), (256, 2), (512, 2)]  # (out_channels, first stride)


def _prep_conv(w_key, bn_key, kh, kw, cin, cout):
    """Init conv weight + BN, fold BN scale (f32), reshape/pad/cast once."""
    fan_in = kh * kw * cin
    w = jax.random.normal(w_key, (kh, kw, cin, cout), jnp.float32) \
        * (2.0 / fan_in) ** 0.5
    k1, k2 = jax.random.split(bn_key)
    gamma = 1.0 + 0.1 * jax.random.normal(k1, (cout,), jnp.float32)
    beta = 0.1 * jax.random.normal(k2, (cout,), jnp.float32)
    running_mean = jnp.zeros((cout,), jnp.float32)
    running_var = jnp.ones((cout,), jnp.float32)
    scale = gamma * jax.lax.rsqrt(running_var + 1e-5)
    bias = beta - running_mean * scale
    w = w * scale                                   # fold BN scale in f32
    K = kh * kw * cin
    Kp, Np = _round_up(K, 128), _round_up(cout, 128)
    w2d = jnp.pad(w.reshape(K, cout), ((0, Kp - K), (0, Np - cout)))
    b2d = jnp.pad(bias.reshape(1, cout), ((0, 0), (0, Np - cout)))
    return {'w': w2d.astype(jnp.bfloat16), 'b': b2d.astype(jnp.float32)}


def init_params(key):
    keys = jax.random.split(key, 128)
    it = iter(keys)
    params = {'conv1': _prep_conv(next(it), next(it), 7, 7, 3, 64)}
    in_c = 64
    for li, (out_c, stride) in enumerate(STAGES):
        blocks = []
        for bi in range(2):
            s = stride if bi == 0 else 1
            blk = {
                'conv1': _prep_conv(next(it), next(it), 3, 3, in_c, out_c),
                'conv2': _prep_conv(next(it), next(it), 3, 3, out_c, out_c),
            }
            if s != 1 or in_c != out_c:
                blk['down'] = _prep_conv(next(it), next(it), 1, 1, in_c, out_c)
            blocks.append(blk)
            in_c = out_c
        params[f'layer{li + 1}'] = blocks
    fc1_w = jax.random.normal(next(it), (512, 128), jnp.float32) * (1.0 / 512) ** 0.5
    fc2_w = jax.random.normal(next(it), (128, 2), jnp.float32) * (1.0 / 128) ** 0.5
    params['fc1_w'] = fc1_w.astype(jnp.bfloat16)
    params['fc1_b'] = jnp.zeros((1, 128), jnp.float32)
    params['fc2_w'] = jnp.pad(fc2_w, ((0, 0), (0, 126))).astype(jnp.bfloat16)
    params['fc2_b'] = jnp.zeros((1, 128), jnp.float32)
    return params


# --------------------------------- Forward ----------------------------------

def classifier_model_forward(params, x_nchw):
    # x_nchw is NCHW (PyTorch convention); converted to NHWC / bf16.
    x = jnp.transpose(x_nchw, (0, 2, 3, 1)).astype(jnp.bfloat16)
    x = conv_bn(x, params['conv1'], kh=7, kw=7, cout=64, stride=2, padding=3,
                relu=True)
    x = maxpool_3x3_s2_p1(x)
    for li, (out_c, stride) in enumerate(STAGES):
        blocks = params[f'layer{li + 1}']
        x = basic_block(x, blocks[0], out_c, stride)
        x = basic_block(x, blocks[1], out_c, 1)
    # AdaptiveAvgPool2d(1) + classifier head fused into a single kernel.
    return head_forward(params, x)            # [N, 2] f32


if __name__ == "__main__":
    key = jax.random.PRNGKey(0)
    pkey, xkey = jax.random.split(key)
    params = init_params(pkey)
    x = jax.random.normal(xkey, (2, 3, 32, 32), jnp.float32)  # NCHW like PyTorch

    fwd = jax.jit(classifier_model_forward)
    out = jax.block_until_ready(fwd(params, x))
    assert out.shape == (2, 2), out.shape
    assert bool(jnp.all(jnp.isfinite(out)))
    print("KERNEL_OK")
</pallas_src>

<mosaic_0001>
module attributes {stable_mosaic.version = 11 : i64} {
  func.func @_fused_matmul_kernel(%arg0: i32, %arg1: i32, %arg2: i32, %arg3: memref<256x256xbf16, #tpu.memory_space<vmem>>, %arg4: memref<256x128xbf16, #tpu.memory_space<vmem>>, %arg5: memref<1x128xf32, #tpu.memory_space<vmem>>, %arg6: memref<256x128xbf16, #tpu.memory_space<vmem>>, %arg7: memref<256x128xf32, #tpu.memory_space<vmem>>) attributes {dimension_semantics = [#tpu.dimension_semantics<parallel>, #tpu.dimension_semantics<parallel>, #tpu.dimension_semantics<arbitrary>], iteration_bounds = array<i64: 2, 1, 1>, scalar_prefetch = 0 : i64, scratch_operands = 1 : i64, tpu.core_type = #tpu.core_type<tc>, window_params = [{transform_indices = @transform_0, window_bounds = array<i64: 256, 256>}, {transform_indices = @transform_1, window_bounds = array<i64: 256, 128>}, {transform_indices = @transform_2, window_bounds = array<i64: 1, 128>}, {transform_indices = @transform_3, window_bounds = array<i64: 256, 128>}]} {
    %c0_i32 = arith.constant 0 : i32
    %0 = arith.cmpi eq, %arg2, %c0_i32 : i32
    %1 = arith.extui %0 : i1 to i32
    %c0_i32_0 = arith.constant 0 : i32
    %2 = arith.cmpi ne, %1, %c0_i32_0 : i32
    scf.if %2 {
      %cst_10 = arith.constant 0.000000e+00 : f32
      %12 = vector.broadcast %cst_10 : f32 to vector<256x128xf32>
      %c0_11 = arith.constant 0 : index
      %c0_12 = arith.constant 0 : index
      %13 = vector.load %arg7[%c0_11, %c0_12] : memref<256x128xf32, #tpu.memory_space<vmem>>, vector<256x128xf32>
      tpu.vector_store %arg7[%c0_11, %c0_12], %12 {strides = array<i32>} : memref<256x128xf32, #tpu.memory_space<vmem>>, vector<256x128xf32>,
    } else {
    }
    %c0 = arith.constant 0 : index
    %c0_1 = arith.constant 0 : index
    %3 = vector.load %arg7[%c0, %c0_1] : memref<256x128xf32, #tpu.memory_space<vmem>>, vector<256x128xf32>
    %c0_2 = arith.constant 0 : index
    %c0_3 = arith.constant 0 : index
    %4 = vector.load %arg3[%c0_2, %c0_3] : memref<256x256xbf16, #tpu.memory_space<vmem>>, vector<256x256xbf16>
    %c0_4 = arith.constant 0 : index
    %c0_5 = arith.constant 0 : index
    %5 = vector.load %arg4[%c0_4, %c0_5] : memref<256x128xbf16, #tpu.memory_space<vmem>>, vector<256x128xbf16>
    %cst = arith.constant dense<0.000000e+00> : vector<256x128xf32>
    %6 = tpu.matmul %4, %5, %cst {dimension_numbers = #tpu.dot_dimension_numbers<[1], [0], [0], [1], [0, 0, 1, 1], [], []>} : vector<256x256xbf16>, vector<256x128xbf16>, vector<256x128xf32> -> vector<256x128xf32>
    %7 = arith.addf %3, %6 : vector<256x128xf32>
    %c0_6 = arith.constant 0 : index
    %c0_7 = arith.constant 0 : index
    %8 = vector.load %arg7[%c0_6, %c0_7] : memref<256x128xf32, #tpu.memory_space<vmem>>, vector<256x128xf32>
    tpu.vector_store %arg7[%c0_6, %c0_7], %7 {strides = array<i32>} : memref<256x128xf32, #tpu.memory_space<vmem>>, vector<256x128xf32>,
    %c0_i32_8 = arith.constant 0 : i32
    %9 = arith.cmpi eq, %arg2, %c0_i32_8 : i32
    %10 = arith.extui %9 : i1 to i32
    %c0_i32_9 = arith.constant 0 : i32
    %11 = arith.cmpi ne, %10, %c0_i32_9 : i32
    scf.if %11 {
      %c0_10 = arith.constant 0 : index
      %c0_11 = arith.constant 0 : index
      %12 = vector.load %arg7[%c0_10, %c0_11] : memref<256x128xf32, #tpu.memory_space<vmem>>, vector<256x128xf32>
      %c0_12 = arith.constant 0 : index
      %c0_13 = arith.constant 0 : index
      %13 = vector.load %arg5[%c0_12, %c0_13] : memref<1x128xf32, #tpu.memory_space<vmem>>, vector<1x128xf32>
      %14 = vector.broadcast %13 : vector<1x128xf32> to vector<256x128xf32>
      %15 = arith.addf %12, %14 : vector<256x128xf32>
      %cst_14 = arith.constant 0.000000e+00 : f32
      %16 = vector.broadcast %cst_14 : f32 to vector<256x128xf32>
      %17 = arith.maximumf %15, %16 : vector<256x128xf32>
      %18 = arith.truncf %17 : vector<256x128xf32> to vector<256x128xbf16>
      %c0_15 = arith.constant 0 : index
      %c0_16 = arith.constant 0 : index
      %19 = vector.load %arg6[%c0_15, %c0_16] : memref<256x128xbf16, #tpu.memory_space<vmem>>, vector<256x128xbf16>
      tpu.vector_store %arg6[%c0_15, %c0_16], %18 {strides = array<i32>} : memref<256x128xbf16, #tpu.memory_space<vmem>>, vector<256x128xbf16>,
    } else {
    }
    return
  }
  func.func @transform_0(%arg0: i32, %arg1: i32, %arg2: i32) -> (i32, i32) {
    %c0_i32 = arith.constant 0 : i32
    return %arg0, %arg2 : i32, i32
  }
  func.func @transform_1(%arg0: i32, %arg1: i32, %arg2: i32) -> (i32, i32) {
    %c0_i32 = arith.constant 0 : i32
    return %arg2, %arg1 : i32, i32
  }
  func.func @transform_2(%arg0: i32, %arg1: i32, %arg2: i32) -> (i32, i32) {
    %c0_i32 = arith.constant 0 : i32
    %c0_i32_0 = arith.constant 0 : i32
    return %c0_i32, %arg1 : i32, i32
  }
  func.func @transform_3(%arg0: i32, %arg1: i32, %arg2: i32) -> (i32, i32) {
    %c0_i32 = arith.constant 0 : i32
    return %arg0, %arg1 : i32, i32
  }
}

module attributes {stable_mosaic.version = 11 : i64} {
  func.func @_max_over_taps_kernel(%arg0: i32, %arg1: memref<9x64x128xbf16, #tpu.memory_space<vmem>>, %arg2: memref<64x128xbf16, #tpu.memory_space<vmem>>) attributes {dimension_semantics = [#tpu.dimension_semantics<parallel>], iteration_bounds = array<i64: 1>, scalar_prefetch = 0 : i64, scratch_operands = 0 : i64, tpu.core_type = #tpu.core_type<tc>, window_params = [{transform_indices = @transform_0, window_bounds = array<i64: 9, 64, 128>}, {transform_indices = @transform_1, window_bounds = array<i64: 64, 128>}]} {
    %c0 = arith.constant 0 : index
    %c0_0 = arith.constant 0 : index
    %c0_1 = arith.constant 0 : index
    %0 = vector.load %arg1[%c0, %c0_0, %c0_1] : memref<9x64x128xbf16, #tpu.memory_space<vmem>>, vector<9x64x128xbf16>
    %cst = arith.constant dense<0xFF80> : vector<64x128xbf16>
    %1 = vector.multi_reduction <maximumf>, %0, %cst [0] : vector<9x64x128xbf16> to vector<64x128xbf16>
    %c0_2 = arith.constant 0 : index
    %c0_3 = arith.constant 0 : index
    %2 = vector.load %arg2[%c0_2, %c0_3] : memref<64x128xbf16, #tpu.memory_space<vmem>>, vector<64x128xbf16>
    tpu.vector_store %arg2[%c0_2, %c0_3], %1 {strides = array<i32>} : memref<64x128xbf16, #tpu.memory_space<vmem>>, vector<64x128xbf16>,
    return
  }
  func.func @transform_0(%arg0: i32) -> (i32, i32, i32) {
    %c0_i32 = arith.constant 0 : i32
    %c0_i32_0 = arith.constant 0 : i32
    %c0_i32_1 = arith.constant 0 : i32
    return %c0_i32, %arg0, %c0_i32_0 : i32, i32, i32
  }
  func.func @transform_1(%arg0: i32) -> (i32, i32) {
    %c0_i32 = arith.constant 0 : i32
    %c0_i32_0 = arith.constant 0 : i32
    return %arg0, %c0_i32 : i32, i32
  }
}

module attributes {stable_mosaic.version = 11 : i64} {
  func.func @_fused_matmul_kernel(%arg0: i32, %arg1: i32, %arg2: i32, %arg3: memref<64x128xbf16, #tpu.memory_space<vmem>>, %arg4: memref<128x128xbf16, #tpu.memory_space<vmem>>, %arg5: memref<1x128xf32, #tpu.memory_space<vmem>>, %arg6: memref<64x128xbf16, #tpu.memory_space<vmem>>, %arg7: memref<64x128xf32, #tpu.memory_space<vmem>>) attributes {dimension_semantics = [#tpu.dimension_semantics<parallel>, #tpu.dimension_semantics<parallel>, #tpu.dimension_semantics<arbitrary>], iteration_bounds = array<i64: 2, 1, 5>, scalar_prefetch = 0 : i64, scratch_operands = 1 : i64, tpu.core_type = #tpu.core_type<tc>, window_params = [{transform_indices = @transform_0, window_bounds = array<i64: 64, 128>}, {transform_indices = @transform_1, window_bounds = array<i64: 128, 128>}, {transform_indices = @transform_2, window_bounds = array<i64: 1, 128>}, {transform_indices = @transform_3, window_bounds = array<i64: 64, 128>}]} {
    %c0_i32 = arith.constant 0 : i32
    %0 = arith.cmpi eq, %arg2, %c0_i32 : i32
    %1 = arith.extui %0 : i1 to i32
    %c0_i32_0 = arith.constant 0 : i32
    %2 = arith.cmpi ne, %1, %c0_i32_0 : i32
    scf.if %2 {
      %cst_9 = arith.constant 0.000000e+00 : f32
      %12 = vector.broadcast %cst_9 : f32 to vector<64x128xf32>
      %c0_10 = arith.constant 0 : index
      %c0_11 = arith.constant 0 : index
      %13 = vector.load %arg7[%c0_10, %c0_11] : memref<64x128xf32, #tpu.memory_space<vmem>>, vector<64x128xf32>
      tpu.vector_store %arg7[%c0_10, %c0_11], %12 {strides = array<i32>} : memref<64x128xf32, #tpu.memory_space<vmem>>, vector<64x128xf32>,
    } else {
    }
    %c0 = arith.constant 0 : index
    %c0_1 = arith.constant 0 : index
    %3 = vector.load %arg7[%c0, %c0_1] : memref<64x128xf32, #tpu.memory_space<vmem>>, vector<64x128xf32>
    %c0_2 = arith.constant 0 : index
    %c0_3 = arith.constant 0 : index
    %4 = vector.load %arg3[%c0_2, %c0_3] : memref<64x128xbf16, #tpu.memory_space<vmem>>, vector<64x128xbf16>
    %c0_4 = arith.constant 0 : index
    %c0_5 = arith.constant 0 : index
    %5 = vector.load %arg4[%c0_4, %c0_5] : memref<128x128xbf16, #tpu.memory_space<vmem>>, vector<128x128xbf16>
    %cst = arith.constant dense<0.000000e+00> : vector<64x128xf32>
    %6 = tpu.matmul %4, %5, %cst {dimension_numbers = #tpu.dot_dimension_numbers<[1], [0], [0], [1], [0, 0, 1, 1], [], []>} : vector<64x128xbf16>, vector<128x128xbf16>, vector<64x128xf32> -> vector<64x128xf32>
    %7 = arith.addf %3, %6 : vector<64x128xf32>
    %c0_6 = arith.constant 0 : index
    %c0_7 = arith.constant 0 : index
    %8 = vector.load %arg7[%c0_6, %c0_7] : memref<64x128xf32, #tpu.memory_space<vmem>>, vector<64x128xf32>
    tpu.vector_store %arg7[%c0_6, %c0_7], %7 {strides = array<i32>} : memref<64x128xf32, #tpu.memory_space<vmem>>, vector<64x128xf32>,
    %c4_i32 = arith.constant 4 : i32
    %9 = arith.cmpi eq, %arg2, %c4_i32 : i32
    %10 = arith.extui %9 : i1 to i32
    %c0_i32_8 = arith.constant 0 : i32
    %11 = arith.cmpi ne, %10, %c0_i32_8 : i32
    scf.if %11 {
      %c0_9 = arith.constant 0 : index
      %c0_10 = arith.constant 0 : index
      %12 = vector.load %arg7[%c0_9, %c0_10] : memref<64x128xf32, #tpu.memory_space<vmem>>, vector<64x128xf32>
      %c0_11 = arith.constant 0 : index
      %c0_12 = arith.constant 0 : index
      %13 = vector.load %arg5[%c0_11, %c0_12] : memref<1x128xf32, #tpu.memory_space<vmem>>, vector<1x128xf32>
      %14 = vector.broadcast %13 : vector<1x128xf32> to vector<64x128xf32>
      %15 = arith.addf %12, %14 : vector<64x128xf32>
      %cst_13 = arith.constant 0.000000e+00 : f32
      %16 = vector.broadcast %cst_13 : f32 to vector<64x128xf32>
      %17 = arith.maximumf %15, %16 : vector<64x128xf32>
      %18 = arith.truncf %17 : vector<64x128xf32> to vector<64x128xbf16>
      %c0_14 = arith.constant 0 : index
      %c0_15 = arith.constant 0 : index
      %19 = vector.load %arg6[%c0_14, %c0_15] : memref<64x128xbf16, #tpu.memory_space<vmem>>, vector<64x128xbf16>
      tpu.vector_store %arg6[%c0_14, %c0_15], %18 {strides = array<i32>} : memref<64x128xbf16, #tpu.memory_space<vmem>>, vector<64x128xbf16>,
    } else {
    }
    return
  }
  func.func @transform_0(%arg0: i32, %arg1: i32, %arg2: i32) -> (i32, i32) {
    %c0_i32 = arith.constant 0 : i32
    return %arg0, %arg2 : i32, i32
  }
  func.func @transform_1(%arg0: i32, %arg1: i32, %arg2: i32) -> (i32, i32) {
    %c0_i32 = arith.constant 0 : i32
    return %arg2, %arg1 : i32, i32
  }
  func.func @transform_2(%arg0: i32, %arg1: i32, %arg2: i32) -> (i32, i32) {
    %c0_i32 = arith.constant 0 : i32
    %c0_i32_0 = arith.constant 0 : i32
    return %c0_i32, %arg1 : i32, i32
  }
  func.func @transform_3(%arg0: i32, %arg1: i32, %arg2: i32) -> (i32, i32) {
    %c0_i32 = arith.constant 0 : i32
    return %arg0, %arg1 : i32, i32
  }
}

module attributes {stable_mosaic.version = 11 : i64} {
  func.func @_fused_matmul_kernel(%arg0: i32, %arg1: i32, %arg2: i32, %arg3: memref<64x128xbf16, #tpu.memory_space<vmem>>, %arg4: memref<128x128xbf16, #tpu.memory_space<vmem>>, %arg5: memref<1x128xf32, #tpu.memory_space<vmem>>, %arg6: memref<64x128xbf16, #tpu.memory_space<vmem>>, %arg7: memref<64x128xbf16, #tpu.memory_space<vmem>>, %arg8: memref<64x128xf32, #tpu.memory_space<vmem>>) attributes {dimension_semantics = [#tpu.dimension_semantics<parallel>, #tpu.dimension_semantics<parallel>, #tpu.dimension_semantics<arbitrary>], iteration_bounds = array<i64: 2, 1, 5>, scalar_prefetch = 0 : i64, scratch_operands = 1 : i64, tpu.core_type = #tpu.core_type<tc>, window_params = [{transform_indices = @transform_0, window_bounds = array<i64: 64, 128>}, {transform_indices = @transform_1, window_bounds = array<i64: 128, 128>}, {transform_indices = @transform_2, window_bounds = array<i64: 1, 128>}, {transform_indices = @transform_3, window_bounds = array<i64: 64, 128>}, {transform_indices = @transform_4, window_bounds = array<i64: 64, 128>}]} {
    %c0_i32 = arith.constant 0 : i32
    %0 = arith.cmpi eq, %arg2, %c0_i32 : i32
    %1 = arith.extui %0 : i1 to i32
    %c0_i32_0 = arith.constant 0 : i32
    %2 = arith.cmpi ne, %1, %c0_i32_0 : i32
    scf.if %2 {
      %cst_9 = arith.constant 0.000000e+00 : f32
      %12 = vector.broadcast %cst_9 : f32 to vector<64x128xf32>
      %c0_10 = arith.constant 0 : index
      %c0_11 = arith.constant 0 : index
      %13 = vector.load %arg8[%c0_10, %c0_11] : memref<64x128xf32, #tpu.memory_space<vmem>>, vector<64x128xf32>
      tpu.vector_store %arg8[%c0_10, %c0_11], %12 {strides = array<i32>} : memref<64x128xf32, #tpu.memory_space<vmem>>, vector<64x128xf32>,
    } else {
    }
    %c0 = arith.constant 0 : index
    %c0_1 = arith.constant 0 : index
    %3 = vector.load %arg8[%c0, %c0_1] : memref<64x128xf32, #tpu.memory_space<vmem>>, vector<64x128xf32>
    %c0_2 = arith.constant 0 : index
    %c0_3 = arith.constant 0 : index
    %4 = vector.load %arg3[%c0_2, %c0_3] : memref<64x128xbf16, #tpu.memory_space<vmem>>, vector<64x128xbf16>
    %c0_4 = arith.constant 0 : index
    %c0_5 = arith.constant 0 : index
    %5 = vector.load %arg4[%c0_4, %c0_5] : memref<128x128xbf16, #tpu.memory_space<vmem>>, vector<128x128xbf16>
    %cst = arith.constant dense<0.000000e+00> : vector<64x128xf32>
    %6 = tpu.matmul %4, %5, %cst {dimension_numbers = #tpu.dot_dimension_numbers<[1], [0], [0], [1], [0, 0, 1, 1], [], []>} : vector<64x128xbf16>, vector<128x128xbf16>, vector<64x128xf32> -> vector<64x128xf32>
    %7 = arith.addf %3, %6 : vector<64x128xf32>
    %c0_6 = arith.constant 0 : index
    %c0_7 = arith.constant 0 : index
    %8 = vector.load %arg8[%c0_6, %c0_7] : memref<64x128xf32, #tpu.memory_space<vmem>>, vector<64x128xf32>
    tpu.vector_store %arg8[%c0_6, %c0_7], %7 {strides = array<i32>} : memref<64x128xf32, #tpu.memory_space<vmem>>, vector<64x128xf32>,
    %c4_i32 = arith.constant 4 : i32
    %9 = arith.cmpi eq, %arg2, %c4_i32 : i32
    %10 = arith.extui %9 : i1 to i32
    %c0_i32_8 = arith.constant 0 : i32
    %11 = arith.cmpi ne, %10, %c0_i32_8 : i32
    scf.if %11 {
      %c0_9 = arith.constant 0 : index
      %c0_10 = arith.constant 0 : index
      %12 = vector.load %arg8[%c0_9, %c0_10] : memref<64x128xf32, #tpu.memory_space<vmem>>, vector<64x128xf32>
      %c0_11 = arith.constant 0 : index
      %c0_12 = arith.constant 0 : index
      %13 = vector.load %arg5[%c0_11, %c0_12] : memref<1x128xf32, #tpu.memory_space<vmem>>, vector<1x128xf32>
      %14 = vector.broadcast %13 : vector<1x128xf32> to vector<64x128xf32>
      %15 = arith.addf %12, %14 : vector<64x128xf32>
      %c0_13 = arith.constant 0 : index
      %c0_14 = arith.constant 0 : index
      %16 = vector.load %arg6[%c0_13, %c0_14] : memref<64x128xbf16, #tpu.memory_space<vmem>>, vector<64x128xbf16>
      %17 = arith.extf %16 : vector<64x128xbf16> to vector<64x128xf32>
      %18 = arith.addf %15, %17 : vector<64x128xf32>
      %cst_15 = arith.constant 0.000000e+00 : f32
      %19 = vector.broadcast %cst_15 : f32 to vector<64x128xf32>
      %20 = arith.maximumf %18, %19 : vector<64x128xf32>
      %21 = arith.truncf %20 : vector<64x128xf32> to vector<64x128xbf16>
      %c0_16 = arith.constant 0 : index
      %c0_17 = arith.constant 0 : index
      %22 = vector.load %arg7[%c0_16, %c0_17] : memref<64x128xbf16, #tpu.memory_space<vmem>>, vector<64x128xbf16>
      tpu.vector_store %arg7[%c0_16, %c0_17], %21 {strides = array<i32>} : memref<64x128xbf16, #tpu.memory_space<vmem>>, vector<64x128xbf16>,
    } else {
    }
    return
  }
  func.func @transform_0(%arg0: i32, %arg1: i32, %arg2: i32) -> (i32, i32) {
    %c0_i32 = arith.constant 0 : i32
    return %arg0, %arg2 : i32, i32
  }
  func.func @transform_1(%arg0: i32, %arg1: i32, %arg2: i32) -> (i32, i32) {
    %c0_i32 = arith.constant 0 : i32
    return %arg2, %arg1 : i32, i32
  }
  func.func @transform_2(%arg0: i32, %arg1: i32, %arg2: i32) -> (i32, i32) {
    %c0_i32 = arith.constant 0 : i32
    %c0_i32_0 = arith.constant 0 : i32
    return %c0_i32, %arg1 : i32, i32
  }
  func.func @transform_3(%arg0: i32, %arg1: i32, %arg2: i32) -> (i32, i32) {
    %c0_i32 = arith.constant 0 : i32
    return %arg0, %arg1 : i32, i32
  }
  func.func @transform_4(%arg0: i32, %arg1: i32, %arg2: i32) -> (i32, i32) {
    %c0_i32 = arith.constant 0 : i32
    return %arg0, %arg1 : i32, i32
  }
}

module attributes {stable_mosaic.version = 11 : i64} {
  func.func @_fused_matmul_kernel(%arg0: i32, %arg1: i32, %arg2: i32, %arg3: memref<16x128xbf16, #tpu.memory_space<vmem>>, %arg4: memref<128x128xbf16, #tpu.memory_space<vmem>>, %arg5: memref<1x128xf32, #tpu.memory_space<vmem>>, %arg6: memref<16x128xbf16, #tpu.memory_space<vmem>>, %arg7: memref<16x128xf32, #tpu.memory_space<vmem>>) attributes {dimension_semantics = [#tpu.dimension_semantics<parallel>, #tpu.dimension_semantics<parallel>, #tpu.dimension_semantics<arbitrary>], iteration_bounds = array<i64: 2, 1, 5>, scalar_prefetch = 0 : i64, scratch_operands = 1 : i64, tpu.core_type = #tpu.core_type<tc>, window_params = [{transform_indices = @transform_0, window_bounds = array<i64: 16, 128>}, {transform_indices = @transform_1, window_bounds = array<i64: 128, 128>}, {transform_indices = @transform_2, window_bounds = array<i64: 1, 128>}, {transform_indices = @transform_3, window_bounds = array<i64: 16, 128>}]} {
    %c0_i32 = arith.constant 0 : i32
    %0 = arith.cmpi eq, %arg2, %c0_i32 : i32
    %1 = arith.extui %0 : i1 to i32
    %c0_i32_0 = arith.constant 0 : i32
    %2 = arith.cmpi ne, %1, %c0_i32_0 : i32
    scf.if %2 {
      %cst_9 = arith.constant 0.000000e+00 : f32
      %12 = vector.broadcast %cst_9 : f32 to vector<16x128xf32>
      %c0_10 = arith.constant 0 : index
      %c0_11 = arith.constant 0 : index
      %13 = vector.load %arg7[%c0_10, %c0_11] : memref<16x128xf32, #tpu.memory_space<vmem>>, vector<16x128xf32>
      tpu.vector_store %arg7[%c0_10, %c0_11], %12 {strides = array<i32>} : memref<16x128xf32, #tpu.memory_space<vmem>>, vector<16x128xf32>,
    } else {
    }
    %c0 = arith.constant 0 : index
    %c0_1 = arith.constant 0 : index
    %3 = vector.load %arg7[%c0, %c0_1] : memref<16x128xf32, #tpu.memory_space<vmem>>, vector<16x128xf32>
    %c0_2 = arith.constant 0 : index
    %c0_3 = arith.constant 0 : index
    %4 = vector.load %arg3[%c0_2, %c0_3] : memref<16x128xbf16, #tpu.memory_space<vmem>>, vector<16x128xbf16>
    %c0_4 = arith.constant 0 : index
    %c0_5 = arith.constant 0 : index
    %5 = vector.load %arg4[%c0_4, %c0_5] : memref<128x128xbf16, #tpu.memory_space<vmem>>, vector<128x128xbf16>
    %cst = arith.constant dense<0.000000e+00> : vector<16x128xf32>
    %6 = tpu.matmul %4, %5, %cst {dimension_numbers = #tpu.dot_dimension_numbers<[1], [0], [0], [1], [0, 0, 1, 1], [], []>} : vector<16x128xbf16>, vector<128x128xbf16>, vector<16x128xf32> -> vector<16x128xf32>
    %7 = arith.addf %3, %6 : vector<16x128xf32>
    %c0_6 = arith.constant 0 : index
    %c0_7 = arith.constant 0 : index
    %8 = vector.load %arg7[%c0_6, %c0_7] : memref<16x128xf32, #tpu.memory_space<vmem>>, vector<16x128xf32>
    tpu.vector_store %arg7[%c0_6, %c0_7], %7 {strides = array<i32>} : memref<16x128xf32, #tpu.memory_space<vmem>>, vector<16x128xf32>,
    %c4_i32 = arith.constant 4 : i32
    %9 = arith.cmpi eq, %arg2, %c4_i32 : i32
    %10 = arith.extui %9 : i1 to i32
    %c0_i32_8 = arith.constant 0 : i32
    %11 = arith.cmpi ne, %10, %c0_i32_8 : i32
    scf.if %11 {
      %c0_9 = arith.constant 0 : index
      %c0_10 = arith.constant 0 : index
      %12 = vector.load %arg7[%c0_9, %c0_10] : memref<16x128xf32, #tpu.memory_space<vmem>>, vector<16x128xf32>
      %c0_11 = arith.constant 0 : index
      %c0_12 = arith.constant 0 : index
      %13 = vector.load %arg5[%c0_11, %c0_12] : memref<1x128xf32, #tpu.memory_space<vmem>>, vector<1x128xf32>
      %14 = vector.broadcast %13 : vector<1x128xf32> to vector<16x128xf32>
      %15 = arith.addf %12, %14 : vector<16x128xf32>
      %cst_13 = arith.constant 0.000000e+00 : f32
      %16 = vector.broadcast %cst_13 : f32 to vector<16x128xf32>
      %17 = arith.maximumf %15, %16 : vector<16x128xf32>
      %18 = arith.truncf %17 : vector<16x128xf32> to vector<16x128xbf16>
      %c0_14 = arith.constant 0 : index
      %c0_15 = arith.constant 0 : index
      %19 = vector.load %arg6[%c0_14, %c0_15] : memref<16x128xbf16, #tpu.memory_space<vmem>>, vector<16x128xbf16>
      tpu.vector_store %arg6[%c0_14, %c0_15], %18 {strides = array<i32>} : memref<16x128xbf16, #tpu.memory_space<vmem>>, vector<16x128xbf16>,
    } else {
    }
    return
  }
  func.func @transform_0(%arg0: i32, %arg1: i32, %arg2: i32) -> (i32, i32) {
    %c0_i32 = arith.constant 0 : i32
    return %arg0, %arg2 : i32, i32
  }
  func.func @transform_1(%arg0: i32, %arg1: i32, %arg2: i32) -> (i32, i32) {
    %c0_i32 = arith.constant 0 : i32
    return %arg2, %arg1 : i32, i32
  }
  func.func @transform_2(%arg0: i32, %arg1: i32, %arg2: i32) -> (i32, i32) {
    %c0_i32 = arith.constant 0 : i32
    %c0_i32_0 = arith.constant 0 : i32
    return %c0_i32, %arg1 : i32, i32
  }
  func.func @transform_3(%arg0: i32, %arg1: i32, %arg2: i32) -> (i32, i32) {
    %c0_i32 = arith.constant 0 : i32
    return %arg0, %arg1 : i32, i32
  }
}

module attributes {stable_mosaic.version = 11 : i64} {
  func.func @_fused_matmul_kernel(%arg0: i32, %arg1: i32, %arg2: i32, %arg3: memref<16x384xbf16, #tpu.memory_space<vmem>>, %arg4: memref<384x128xbf16, #tpu.memory_space<vmem>>, %arg5: memref<1x128xf32, #tpu.memory_space<vmem>>, %arg6: memref<16x128xbf16, #tpu.memory_space<vmem>>, %arg7: memref<16x128xf32, #tpu.memory_space<vmem>>) attributes {dimension_semantics = [#tpu.dimension_semantics<parallel>, #tpu.dimension_semantics<parallel>, #tpu.dimension_semantics<arbitrary>], iteration_bounds = array<i64: 2, 1, 3>, scalar_prefetch = 0 : i64, scratch_operands = 1 : i64, tpu.core_type = #tpu.core_type<tc>, window_params = [{transform_indices = @transform_0, window_bounds = array<i64: 16, 384>}, {transform_indices = @transform_1, window_bounds = array<i64: 384, 128>}, {transform_indices = @transform_2, window_bounds = array<i64: 1, 128>}, {transform_indices = @transform_3, window_bounds = array<i64: 16, 128>}]} {
    %c0_i32 = arith.constant 0 : i32
    %0 = arith.cmpi eq, %arg2, %c0_i32 : i32
    %1 = arith.extui %0 : i1 to i32
    %c0_i32_0 = arith.constant 0 : i32
    %2 = arith.cmpi ne, %1, %c0_i32_0 : i32
    scf.if %2 {
      %cst_9 = arith.constant 0.000000e+00 : f32
      %12 = vector.broadcast %cst_9 : f32 to vector<16x128xf32>
      %c0_10 = arith.constant 0 : index
      %c0_11 = arith.constant 0 : index
      %13 = vector.load %arg7[%c0_10, %c0_11] : memref<16x128xf32, #tpu.memory_space<vmem>>, vector<16x128xf32>
      tpu.vector_store %arg7[%c0_10, %c0_11], %12 {strides = array<i32>} : memref<16x128xf32, #tpu.memory_space<vmem>>, vector<16x128xf32>,
    } else {
    }
    %c0 = arith.constant 0 : index
    %c0_1 = arith.constant 0 : index
    %3 = vector.load %arg7[%c0, %c0_1] : memref<16x128xf32, #tpu.memory_space<vmem>>, vector<16x128xf32>
    %c0_2 = arith.constant 0 : index
    %c0_3 = arith.constant 0 : index
    %4 = vector.load %arg3[%c0_2, %c0_3] : memref<16x384xbf16, #tpu.memory_space<vmem>>, vector<16x384xbf16>
    %c0_4 = arith.constant 0 : index
    %c0_5 = arith.constant 0 : index
    %5 = vector.load %arg4[%c0_4, %c0_5] : memref<384x128xbf16, #tpu.memory_space<vmem>>, vector<384x128xbf16>
    %cst = arith.constant dense<0.000000e+00> : vector<16x128xf32>
    %6 = tpu.matmul %4, %5, %cst {dimension_numbers = #tpu.dot_dimension_numbers<[1], [0], [0], [1], [0, 0, 1, 1], [], []>} : vector<16x384xbf16>, vector<384x128xbf16>, vector<16x128xf32> -> vector<16x128xf32>
    %7 = arith.addf %3, %6 : vector<16x128xf32>
    %c0_6 = arith.constant 0 : index
    %c0_7 = arith.constant 0 : index
    %8 = vector.load %arg7[%c0_6, %c0_7] : memref<16x128xf32, #tpu.memory_space<vmem>>, vector<16x128xf32>
    tpu.vector_store %arg7[%c0_6, %c0_7], %7 {strides = array<i32>} : memref<16x128xf32, #tpu.memory_space<vmem>>, vector<16x128xf32>,
    %c2_i32 = arith.constant 2 : i32
    %9 = arith.cmpi eq, %arg2, %c2_i32 : i32
    %10 = arith.extui %9 : i1 to i32
    %c0_i32_8 = arith.constant 0 : i32
    %11 = arith.cmpi ne, %10, %c0_i32_8 : i32
    scf.if %11 {
      %c0_9 = arith.constant 0 : index
      %c0_10 = arith.constant 0 : index
      %12 = vector.load %arg7[%c0_9, %c0_10] : memref<16x128xf32, #tpu.memory_space<vmem>>, vector<16x128xf32>
      %c0_11 = arith.constant 0 : index
      %c0_12 = arith.constant 0 : index
      %13 = vector.load %arg5[%c0_11, %c0_12] : memref<1x128xf32, #tpu.memory_space<vmem>>, vector<1x128xf32>
      %14 = vector.broadcast %13 : vector<1x128xf32> to vector<16x128xf32>
      %15 = arith.addf %12, %14 : vector<16x128xf32>
      %cst_13 = arith.constant 0.000000e+00 : f32
      %16 = vector.broadcast %cst_13 : f32 to vector<16x128xf32>
      %17 = arith.maximumf %15, %16 : vector<16x128xf32>
      %18 = arith.truncf %17 : vector<16x128xf32> to vector<16x128xbf16>
      %c0_14 = arith.constant 0 : index
      %c0_15 = arith.constant 0 : index
      %19 = vector.load %arg6[%c0_14, %c0_15] : memref<16x128xbf16, #tpu.memory_space<vmem>>, vector<16x128xbf16>
      tpu.vector_store %arg6[%c0_14, %c0_15], %18 {strides = array<i32>} : memref<16x128xbf16, #tpu.memory_space<vmem>>, vector<16x128xbf16>,
    } else {
    }
    return
  }
  func.func @transform_0(%arg0: i32, %arg1: i32, %arg2: i32) -> (i32, i32) {
    %c0_i32 = arith.constant 0 : i32
    return %arg0, %arg2 : i32, i32
  }
  func.func @transform_1(%arg0: i32, %arg1: i32, %arg2: i32) -> (i32, i32) {
    %c0_i32 = arith.constant 0 : i32
    return %arg2, %arg1 : i32, i32
  }
  func.func @transform_2(%arg0: i32, %arg1: i32, %arg2: i32) -> (i32, i32) {
    %c0_i32 = arith.constant 0 : i32
    %c0_i32_0 = arith.constant 0 : i32
    return %c0_i32, %arg1 : i32, i32
  }
  func.func @transform_3(%arg0: i32, %arg1: i32, %arg2: i32) -> (i32, i32) {
    %c0_i32 = arith.constant 0 : i32
    return %arg0, %arg1 : i32, i32
  }
}

module attributes {stable_mosaic.version = 11 : i64} {
  func.func @_fused_matmul_kernel(%arg0: i32, %arg1: i32, %arg2: i32, %arg3: memref<16x128xbf16, #tpu.memory_space<vmem>>, %arg4: memref<128x128xbf16, #tpu.memory_space<vmem>>, %arg5: memref<1x128xf32, #tpu.memory_space<vmem>>, %arg6: memref<16x128xbf16, #tpu.memory_space<vmem>>, %arg7: memref<16x128xf32, #tpu.memory_space<vmem>>) attributes {dimension_semantics = [#tpu.dimension_semantics<parallel>, #tpu.dimension_semantics<parallel>, #tpu.dimension_semantics<arbitrary>], iteration_bounds = array<i64: 2, 1, 1>, scalar_prefetch = 0 : i64, scratch_operands = 1 : i64, tpu.core_type = #tpu.core_type<tc>, window_params = [{transform_indices = @transform_0, window_bounds = array<i64: 16, 128>}, {transform_indices = @transform_1, window_bounds = array<i64: 128, 128>}, {transform_indices = @transform_2, window_bounds = array<i64: 1, 128>}, {transform_indices = @transform_3, window_bounds = array<i64: 16, 128>}]} {
    %c0_i32 = arith.constant 0 : i32
    %0 = arith.cmpi eq, %arg2, %c0_i32 : i32
    %1 = arith.extui %0 : i1 to i32
    %c0_i32_0 = arith.constant 0 : i32
    %2 = arith.cmpi ne, %1, %c0_i32_0 : i32
    scf.if %2 {
      %cst_10 = arith.constant 0.000000e+00 : f32
      %12 = vector.broadcast %cst_10 : f32 to vector<16x128xf32>
      %c0_11 = arith.constant 0 : index
      %c0_12 = arith.constant 0 : index
      %13 = vector.load %arg7[%c0_11, %c0_12] : memref<16x128xf32, #tpu.memory_space<vmem>>, vector<16x128xf32>
      tpu.vector_store %arg7[%c0_11, %c0_12], %12 {strides = array<i32>} : memref<16x128xf32, #tpu.memory_space<vmem>>, vector<16x128xf32>,
    } else {
    }
    %c0 = arith.constant 0 : index
    %c0_1 = arith.constant 0 : index
    %3 = vector.load %arg7[%c0, %c0_1] : memref<16x128xf32, #tpu.memory_space<vmem>>, vector<16x128xf32>
    %c0_2 = arith.constant 0 : index
    %c0_3 = arith.constant 0 : index
    %4 = vector.load %arg3[%c0_2, %c0_3] : memref<16x128xbf16, #tpu.memory_space<vmem>>, vector<16x128xbf16>
    %c0_4 = arith.constant 0 : index
    %c0_5 = arith.constant 0 : index
    %5 = vector.load %arg4[%c0_4, %c0_5] : memref<128x128xbf16, #tpu.memory_space<vmem>>, vector<128x128xbf16>
    %cst = arith.constant dense<0.000000e+00> : vector<16x128xf32>
    %6 = tpu.matmul %4, %5, %cst {dimension_numbers = #tpu.dot_dimension_numbers<[1], [0], [0], [1], [0, 0, 1, 1], [], []>} : vector<16x128xbf16>, vector<128x128xbf16>, vector<16x128xf32> -> vector<16x128xf32>
    %7 = arith.addf %3, %6 : vector<16x128xf32>
    %c0_6 = arith.constant 0 : index
    %c0_7 = arith.constant 0 : index
    %8 = vector.load %arg7[%c0_6, %c0_7] : memref<16x128xf32, #tpu.memory_space<vmem>>, vector<16x128xf32>
    tpu.vector_store %arg7[%c0_6, %c0_7], %7 {strides = array<i32>} : memref<16x128xf32, #tpu.memory_space<vmem>>, vector<16x128xf32>,
    %c0_i32_8 = arith.constant 0 : i32
    %9 = arith.cmpi eq, %arg2, %c0_i32_8 : i32
    %10 = arith.extui %9 : i1 to i32
    %c0_i32_9 = arith.constant 0 : i32
    %11 = arith.cmpi ne, %10, %c0_i32_9 : i32
    scf.if %11 {
      %c0_10 = arith.constant 0 : index
      %c0_11 = arith.constant 0 : index
      %12 = vector.load %arg7[%c0_10, %c0_11] : memref<16x128xf32, #tpu.memory_space<vmem>>, vector<16x128xf32>
      %c0_12 = arith.constant 0 : index
      %c0_13 = arith.constant 0 : index
      %13 = vector.load %arg5[%c0_12, %c0_13] : memref<1x128xf32, #tpu.memory_space<vmem>>, vector<1x128xf32>
      %14 = vector.broadcast %13 : vector<1x128xf32> to vector<16x128xf32>
      %15 = arith.addf %12, %14 : vector<16x128xf32>
      %16 = arith.truncf %15 : vector<16x128xf32> to vector<16x128xbf16>
      %c0_14 = arith.constant 0 : index
      %c0_15 = arith.constant 0 : index
      %17 = vector.load %arg6[%c0_14, %c0_15] : memref<16x128xbf16, #tpu.memory_space<vmem>>, vector<16x128xbf16>
      tpu.vector_store %arg6[%c0_14, %c0_15], %16 {strides = array<i32>} : memref<16x128xbf16, #tpu.memory_space<vmem>>, vector<16x128xbf16>,
    } else {
    }
    return
  }
  func.func @transform_0(%arg0: i32, %arg1: i32, %arg2: i32) -> (i32, i32) {
    %c0_i32 = arith.constant 0 : i32
    return %arg0, %arg2 : i32, i32
  }
  func.func @transform_1(%arg0: i32, %arg1: i32, %arg2: i32) -> (i32, i32) {
    %c0_i32 = arith.constant 0 : i32
    return %arg2, %arg1 : i32, i32
  }
  func.func @transform_2(%arg0: i32, %arg1: i32, %arg2: i32) -> (i32, i32) {
    %c0_i32 = arith.constant 0 : i32
    %c0_i32_0 = arith.constant 0 : i32
    return %c0_i32, %arg1 : i32, i32
  }
  func.func @transform_3(%arg0: i32, %arg1: i32, %arg2: i32) -> (i32, i32) {
    %c0_i32 = arith.constant 0 : i32
    return %arg0, %arg1 : i32, i32
  }
}

module attributes {stable_mosaic.version = 11 : i64} {
  func.func @_fused_matmul_kernel(%arg0: i32, %arg1: i32, %arg2: i32, %arg3: memref<16x384xbf16, #tpu.memory_space<vmem>>, %arg4: memref<384x128xbf16, #tpu.memory_space<vmem>>, %arg5: memref<1x128xf32, #tpu.memory_space<vmem>>, %arg6: memref<16x128xbf16, #tpu.memory_space<vmem>>, %arg7: memref<16x128xbf16, #tpu.memory_space<vmem>>, %arg8: memref<16x128xf32, #tpu.memory_space<vmem>>) attributes {dimension_semantics = [#tpu.dimension_semantics<parallel>, #tpu.dimension_semantics<parallel>, #tpu.dimension_semantics<arbitrary>], iteration_bounds = array<i64: 2, 1, 3>, scalar_prefetch = 0 : i64, scratch_operands = 1 : i64, tpu.core_type = #tpu.core_type<tc>, window_params = [{transform_indices = @transform_0, window_bounds = array<i64: 16, 384>}, {transform_indices = @transform_1, window_bounds = array<i64: 384, 128>}, {transform_indices = @transform_2, window_bounds = array<i64: 1, 128>}, {transform_indices = @transform_3, window_bounds = array<i64: 16, 128>}, {transform_indices = @transform_4, window_bounds = array<i64: 16, 128>}]} {
    %c0_i32 = arith.constant 0 : i32
    %0 = arith.cmpi eq, %arg2, %c0_i32 : i32
    %1 = arith.extui %0 : i1 to i32
    %c0_i32_0 = arith.constant 0 : i32
    %2 = arith.cmpi ne, %1, %c0_i32_0 : i32
    scf.if %2 {
      %cst_9 = arith.constant 0.000000e+00 : f32
      %12 = vector.broadcast %cst_9 : f32 to vector<16x128xf32>
      %c0_10 = arith.constant 0 : index
      %c0_11 = arith.constant 0 : index
      %13 = vector.load %arg8[%c0_10, %c0_11] : memref<16x128xf32, #tpu.memory_space<vmem>>, vector<16x128xf32>
      tpu.vector_store %arg8[%c0_10, %c0_11], %12 {strides = array<i32>} : memref<16x128xf32, #tpu.memory_space<vmem>>, vector<16x128xf32>,
    } else {
    }
    %c0 = arith.constant 0 : index
    %c0_1 = arith.constant 0 : index
    %3 = vector.load %arg8[%c0, %c0_1] : memref<16x128xf32, #tpu.memory_space<vmem>>, vector<16x128xf32>
    %c0_2 = arith.constant 0 : index
    %c0_3 = arith.constant 0 : index
    %4 = vector.load %arg3[%c0_2, %c0_3] : memref<16x384xbf16, #tpu.memory_space<vmem>>, vector<16x384xbf16>
    %c0_4 = arith.constant 0 : index
    %c0_5 = arith.constant 0 : index
    %5 = vector.load %arg4[%c0_4, %c0_5] : memref<384x128xbf16, #tpu.memory_space<vmem>>, vector<384x128xbf16>
    %cst = arith.constant dense<0.000000e+00> : vector<16x128xf32>
    %6 = tpu.matmul %4, %5, %cst {dimension_numbers = #tpu.dot_dimension_numbers<[1], [0], [0], [1], [0, 0, 1, 1], [], []>} : vector<16x384xbf16>, vector<384x128xbf16>, vector<16x128xf32> -> vector<16x128xf32>
    %7 = arith.addf %3, %6 : vector<16x128xf32>
    %c0_6 = arith.constant 0 : index
    %c0_7 = arith.constant 0 : index
    %8 = vector.load %arg8[%c0_6, %c0_7] : memref<16x128xf32, #tpu.memory_space<vmem>>, vector<16x128xf32>
    tpu.vector_store %arg8[%c0_6, %c0_7], %7 {strides = array<i32>} : memref<16x128xf32, #tpu.memory_space<vmem>>, vector<16x128xf32>,
    %c2_i32 = arith.constant 2 : i32
    %9 = arith.cmpi eq, %arg2, %c2_i32 : i32
    %10 = arith.extui %9 : i1 to i32
    %c0_i32_8 = arith.constant 0 : i32
    %11 = arith.cmpi ne, %10, %c0_i32_8 : i32
    scf.if %11 {
      %c0_9 = arith.constant 0 : index
      %c0_10 = arith.constant 0 : index
      %12 = vector.load %arg8[%c0_9, %c0_10] : memref<16x128xf32, #tpu.memory_space<vmem>>, vector<16x128xf32>
      %c0_11 = arith.constant 0 : index
      %c0_12 = arith.constant 0 : index
      %13 = vector.load %arg5[%c0_11, %c0_12] : memref<1x128xf32, #tpu.memory_space<vmem>>, vector<1x128xf32>
      %14 = vector.broadcast %13 : vector<1x128xf32> to vector<16x128xf32>
      %15 = arith.addf %12, %14 : vector<16x128xf32>
      %c0_13 = arith.constant 0 : index
      %c0_14 = arith.constant 0 : index
      %16 = vector.load %arg6[%c0_13, %c0_14] : memref<16x128xbf16, #tpu.memory_space<vmem>>, vector<16x128xbf16>
      %17 = arith.extf %16 : vector<16x128xbf16> to vector<16x128xf32>
      %18 = arith.addf %15, %17 : vector<16x128xf32>
      %cst_15 = arith.constant 0.000000e+00 : f32
      %19 = vector.broadcast %cst_15 : f32 to vector<16x128xf32>
      %20 = arith.maximumf %18, %19 : vector<16x128xf32>
      %21 = arith.truncf %20 : vector<16x128xf32> to vector<16x128xbf16>
      %c0_16 = arith.constant 0 : index
      %c0_17 = arith.constant 0 : index
      %22 = vector.load %arg7[%c0_16, %c0_17] : memref<16x128xbf16, #tpu.memory_space<vmem>>, vector<16x128xbf16>
      tpu.vector_store %arg7[%c0_16, %c0_17], %21 {strides = array<i32>} : memref<16x128xbf16, #tpu.memory_space<vmem>>, vector<16x128xbf16>,
    } else {
    }
    return
  }
  func.func @transform_0(%arg0: i32, %arg1: i32, %arg2: i32) -> (i32, i32) {
    %c0_i32 = arith.constant 0 : i32
    return %arg0, %arg2 : i32, i32
  }
  func.func @transform_1(%arg0: i32, %arg1: i32, %arg2: i32) -> (i32, i32) {
    %c0_i32 = arith.constant 0 : i32
    return %arg2, %arg1 : i32, i32
  }
  func.func @transform_2(%arg0: i32, %arg1: i32, %arg2: i32) -> (i32, i32) {
    %c0_i32 = arith.constant 0 : i32
    %c0_i32_0 = arith.constant 0 : i32
    return %c0_i32, %arg1 : i32, i32
  }
  func.func @transform_3(%arg0: i32, %arg1: i32, %arg2: i32) -> (i32, i32) {
    %c0_i32 = arith.constant 0 : i32
    return %arg0, %arg1 : i32, i32
  }
  func.func @transform_4(%arg0: i32, %arg1: i32, %arg2: i32) -> (i32, i32) {
    %c0_i32 = arith.constant 0 : i32
    return %arg0, %arg1 : i32, i32
  }
}

module attributes {stable_mosaic.version = 11 : i64} {
  func.func @_fused_matmul_kernel(%arg0: i32, %arg1: i32, %arg2: i32, %arg3: memref<8x384xbf16, #tpu.memory_space<vmem>>, %arg4: memref<384x128xbf16, #tpu.memory_space<vmem>>, %arg5: memref<1x128xf32, #tpu.memory_space<vmem>>, %arg6: memref<8x128xbf16, #tpu.memory_space<vmem>>, %arg7: memref<8x128xf32, #tpu.memory_space<vmem>>) attributes {dimension_semantics = [#tpu.dimension_semantics<parallel>, #tpu.dimension_semantics<parallel>, #tpu.dimension_semantics<arbitrary>], iteration_bounds = array<i64: 1, 2, 3>, scalar_prefetch = 0 : i64, scratch_operands = 1 : i64, tpu.core_type = #tpu.core_type<tc>, window_params = [{transform_indices = @transform_0, window_bounds = array<i64: 8, 384>}, {transform_indices = @transform_1, window_bounds = array<i64: 384, 128>}, {transform_indices = @transform_2, window_bounds = array<i64: 1, 128>}, {transform_indices = @transform_3, window_bounds = array<i64: 8, 128>}]} {
    %c0_i32 = arith.constant 0 : i32
    %0 = arith.cmpi eq, %arg2, %c0_i32 : i32
    %1 = arith.extui %0 : i1 to i32
    %c0_i32_0 = arith.constant 0 : i32
    %2 = arith.cmpi ne, %1, %c0_i32_0 : i32
    scf.if %2 {
      %cst_9 = arith.constant 0.000000e+00 : f32
      %12 = vector.broadcast %cst_9 : f32 to vector<8x128xf32>
      %c0_10 = arith.constant 0 : index
      %c0_11 = arith.constant 0 : index
      %13 = vector.load %arg7[%c0_10, %c0_11] : memref<8x128xf32, #tpu.memory_space<vmem>>, vector<8x128xf32>
      tpu.vector_store %arg7[%c0_10, %c0_11], %12 {strides = array<i32>} : memref<8x128xf32, #tpu.memory_space<vmem>>, vector<8x128xf32>,
    } else {
    }
    %c0 = arith.constant 0 : index
    %c0_1 = arith.constant 0 : index
    %3 = vector.load %arg7[%c0, %c0_1] : memref<8x128xf32, #tpu.memory_space<vmem>>, vector<8x128xf32>
    %c0_2 = arith.constant 0 : index
    %c0_3 = arith.constant 0 : index
    %4 = vector.load %arg3[%c0_2, %c0_3] : memref<8x384xbf16, #tpu.memory_space<vmem>>, vector<8x384xbf16>
    %c0_4 = arith.constant 0 : index
    %c0_5 = arith.constant 0 : index
    %5 = vector.load %arg4[%c0_4, %c0_5] : memref<384x128xbf16, #tpu.memory_space<vmem>>, vector<384x128xbf16>
    %cst = arith.constant dense<0.000000e+00> : vector<8x128xf32>
    %6 = tpu.matmul %4, %5, %cst {dimension_numbers = #tpu.dot_dimension_numbers<[1], [0], [0], [1], [0, 0, 1, 1], [], []>} : vector<8x384xbf16>, vector<384x128xbf16>, vector<8x128xf32> -> vector<8x128xf32>
    %7 = arith.addf %3, %6 : vector<8x128xf32>
    %c0_6 = arith.constant 0 : index
    %c0_7 = arith.constant 0 : index
    %8 = vector.load %arg7[%c0_6, %c0_7] : memref<8x128xf32, #tpu.memory_space<vmem>>, vector<8x128xf32>
    tpu.vector_store %arg7[%c0_6, %c0_7], %7 {strides = array<i32>} : memref<8x128xf32, #tpu.memory_space<vmem>>, vector<8x128xf32>,
    %c2_i32 = arith.constant 2 : i32
    %9 = arith.cmpi eq, %arg2, %c2_i32 : i32
    %10 = arith.extui %9 : i1 to i32
    %c0_i32_8 = arith.constant 0 : i32
    %11 = arith.cmpi ne, %10, %c0_i32_8 : i32
    scf.if %11 {
      %c0_9 = arith.constant 0 : index
      %c0_10 = arith.constant 0 : index
      %12 = vector.load %arg7[%c0_9, %c0_10] : memref<8x128xf32, #tpu.memory_space<vmem>>, vector<8x128xf32>
      %c0_11 = arith.constant 0 : index
      %c0_12 = arith.constant 0 : index
      %13 = vector.load %arg5[%c0_11, %c0_12] : memref<1x128xf32, #tpu.memory_space<vmem>>, vector<1x128xf32>
      %14 = vector.broadcast %13 : vector<1x128xf32> to vector<8x128xf32>
      %15 = arith.addf %12, %14 : vector<8x128xf32>
      %cst_13 = arith.constant 0.000000e+00 : f32
      %16 = vector.broadcast %cst_13 : f32 to vector<8x128xf32>
      %17 = arith.maximumf %15, %16 : vector<8x128xf32>
      %18 = arith.truncf %17 : vector<8x128xf32> to vector<8x128xbf16>
      %c0_14 = arith.constant 0 : index
      %c0_15 = arith.constant 0 : index
      %19 = vector.load %arg6[%c0_14, %c0_15] : memref<8x128xbf16, #tpu.memory_space<vmem>>, vector<8x128xbf16>
      tpu.vector_store %arg6[%c0_14, %c0_15], %18 {strides = array<i32>} : memref<8x128xbf16, #tpu.memory_space<vmem>>, vector<8x128xbf16>,
    } else {
    }
    return
  }
  func.func @transform_0(%arg0: i32, %arg1: i32, %arg2: i32) -> (i32, i32) {
    %c0_i32 = arith.constant 0 : i32
    return %arg0, %arg2 : i32, i32
  }
  func.func @transform_1(%arg0: i32, %arg1: i32, %arg2: i32) -> (i32, i32) {
    %c0_i32 = arith.constant 0 : i32
    return %arg2, %arg1 : i32, i32
  }
  func.func @transform_2(%arg0: i32, %arg1: i32, %arg2: i32) -> (i32, i32) {
    %c0_i32 = arith.constant 0 : i32
    %c0_i32_0 = arith.constant 0 : i32
    return %c0_i32, %arg1 : i32, i32
  }
  func.func @transform_3(%arg0: i32, %arg1: i32, %arg2: i32) -> (i32, i32) {
    %c0_i32 = arith.constant 0 : i32
    return %arg0, %arg1 : i32, i32
  }
}

module attributes {stable_mosaic.version = 11 : i64} {
  func.func @_fused_matmul_kernel(%arg0: i32, %arg1: i32, %arg2: i32, %arg3: memref<8x384xbf16, #tpu.memory_space<vmem>>, %arg4: memref<384x128xbf16, #tpu.memory_space<vmem>>, %arg5: memref<1x128xf32, #tpu.memory_space<vmem>>, %arg6: memref<8x128xbf16, #tpu.memory_space<vmem>>, %arg7: memref<8x128xbf16, #tpu.memory_space<vmem>>, %arg8: memref<8x128xf32, #tpu.memory_space<vmem>>) attributes {dimension_semantics = [#tpu.dimension_semantics<parallel>, #tpu.dimension_semantics<parallel>, #tpu.dimension_semantics<arbitrary>], iteration_bounds = array<i64: 1, 2, 6>, scalar_prefetch = 0 : i64, scratch_operands = 1 : i64, tpu.core_type = #tpu.core_type<tc>, window_params = [{transform_indices = @transform_0, window_bounds = array<i64: 8, 384>}, {transform_indices = @transform_1, window_bounds = array<i64: 384, 128>}, {transform_indices = @transform_2, window_bounds = array<i64: 1, 128>}, {transform_indices = @transform_3, window_bounds = array<i64: 8, 128>}, {transform_indices = @transform_4, window_bounds = array<i64: 8, 128>}]} {
    %c0_i32 = arith.constant 0 : i32
    %0 = arith.cmpi eq, %arg2, %c0_i32 : i32
    %1 = arith.extui %0 : i1 to i32
    %c0_i32_0 = arith.constant 0 : i32
    %2 = arith.cmpi ne, %1, %c0_i32_0 : i32
    scf.if %2 {
      %cst_9 = arith.constant 0.000000e+00 : f32
      %12 = vector.broadcast %cst_9 : f32 to vector<8x128xf32>
      %c0_10 = arith.constant 0 : index
      %c0_11 = arith.constant 0 : index
      %13 = vector.load %arg8[%c0_10, %c0_11] : memref<8x128xf32, #tpu.memory_space<vmem>>, vector<8x128xf32>
      tpu.vector_store %arg8[%c0_10, %c0_11], %12 {strides = array<i32>} : memref<8x128xf32, #tpu.memory_space<vmem>>, vector<8x128xf32>,
    } else {
    }
    %c0 = arith.constant 0 : index
    %c0_1 = arith.constant 0 : index
    %3 = vector.load %arg8[%c0, %c0_1] : memref<8x128xf32, #tpu.memory_space<vmem>>, vector<8x128xf32>
    %c0_2 = arith.constant 0 : index
    %c0_3 = arith.constant 0 : index
    %4 = vector.load %arg3[%c0_2, %c0_3] : memref<8x384xbf16, #tpu.memory_space<vmem>>, vector<8x384xbf16>
    %c0_4 = arith.constant 0 : index
    %c0_5 = arith.constant 0 : index
    %5 = vector.load %arg4[%c0_4, %c0_5] : memref<384x128xbf16, #tpu.memory_space<vmem>>, vector<384x128xbf16>
    %cst = arith.constant dense<0.000000e+00> : vector<8x128xf32>
    %6 = tpu.matmul %4, %5, %cst {dimension_numbers = #tpu.dot_dimension_numbers<[1], [0], [0], [1], [0, 0, 1, 1], [], []>} : vector<8x384xbf16>, vector<384x128xbf16>, vector<8x128xf32> -> vector<8x128xf32>
    %7 = arith.addf %3, %6 : vector<8x128xf32>
    %c0_6 = arith.constant 0 : index
    %c0_7 = arith.constant 0 : index
    %8 = vector.load %arg8[%c0_6, %c0_7] : memref<8x128xf32, #tpu.memory_space<vmem>>, vector<8x128xf32>
    tpu.vector_store %arg8[%c0_6, %c0_7], %7 {strides = array<i32>} : memref<8x128xf32, #tpu.memory_space<vmem>>, vector<8x128xf32>,
    %c5_i32 = arith.constant 5 : i32
    %9 = arith.cmpi eq, %arg2, %c5_i32 : i32
    %10 = arith.extui %9 : i1 to i32
    %c0_i32_8 = arith.constant 0 : i32
    %11 = arith.cmpi ne, %10, %c0_i32_8 : i32
    scf.if %11 {
      %c0_9 = arith.constant 0 : index
      %c0_10 = arith.constant 0 : index
      %12 = vector.load %arg8[%c0_9, %c0_10] : memref<8x128xf32, #tpu.memory_space<vmem>>, vector<8x128xf32>
      %c0_11 = arith.constant 0 : index
      %c0_12 = arith.constant 0 : index
      %13 = vector.load %arg5[%c0_11, %c0_12] : memref<1x128xf32, #tpu.memory_space<vmem>>, vector<1x128xf32>
      %14 = vector.broadcast %13 : vector<1x128xf32> to vector<8x128xf32>
      %15 = arith.addf %12, %14 : vector<8x128xf32>
      %c0_13 = arith.constant 0 : index
      %c0_14 = arith.constant 0 : index
      %16 = vector.load %arg6[%c0_13, %c0_14] : memref<8x128xbf16, #tpu.memory_space<vmem>>, vector<8x128xbf16>
      %17 = arith.extf %16 : vector<8x128xbf16> to vector<8x128xf32>
      %18 = arith.addf %15, %17 : vector<8x128xf32>
      %cst_15 = arith.constant 0.000000e+00 : f32
      %19 = vector.broadcast %cst_15 : f32 to vector<8x128xf32>
      %20 = arith.maximumf %18, %19 : vector<8x128xf32>
      %21 = arith.truncf %20 : vector<8x128xf32> to vector<8x128xbf16>
      %c0_16 = arith.constant 0 : index
      %c0_17 = arith.constant 0 : index
      %22 = vector.load %arg7[%c0_16, %c0_17] : memref<8x128xbf16, #tpu.memory_space<vmem>>, vector<8x128xbf16>
      tpu.vector_store %arg7[%c0_16, %c0_17], %21 {strides = array<i32>} : memref<8x128xbf16, #tpu.memory_space<vmem>>, vector<8x128xbf16>,
    } else {
    }
    return
  }
  func.func @transform_0(%arg0: i32, %arg1: i32, %arg2: i32) -> (i32, i32) {
    %c0_i32 = arith.constant 0 : i32
    return %arg0, %arg2 : i32, i32
  }
  func.func @transform_1(%arg0: i32, %arg1: i32, %arg2: i32) -> (i32, i32) {
    %c0_i32 = arith.constant 0 : i32
    return %arg2, %arg1 : i32, i32
  }
  func.func @transform_2(%arg0: i32, %arg1: i32, %arg2: i32) -> (i32, i32) {
    %c0_i32 = arith.constant 0 : i32
    %c0_i32_0 = arith.constant 0 : i32
    return %c0_i32, %arg1 : i32, i32
  }
  func.func @transform_3(%arg0: i32, %arg1: i32, %arg2: i32) -> (i32, i32) {
    %c0_i32 = arith.constant 0 : i32
    return %arg0, %arg1 : i32, i32
  }
  func.func @transform_4(%arg0: i32, %arg1: i32, %arg2: i32) -> (i32, i32) {
    %c0_i32 = arith.constant 0 : i32
    return %arg0, %arg1 : i32, i32
  }
}

module attributes {stable_mosaic.version = 11 : i64} {
  func.func @_fused_matmul_kernel(%arg0: i32, %arg1: i32, %arg2: i32, %arg3: memref<8x128xbf16, #tpu.memory_space<vmem>>, %arg4: memref<128x128xbf16, #tpu.memory_space<vmem>>, %arg5: memref<1x128xf32, #tpu.memory_space<vmem>>, %arg6: memref<8x128xbf16, #tpu.memory_space<vmem>>, %arg7: memref<8x128xf32, #tpu.memory_space<vmem>>) attributes {dimension_semantics = [#tpu.dimension_semantics<parallel>, #tpu.dimension_semantics<parallel>, #tpu.dimension_semantics<arbitrary>], iteration_bounds = array<i64: 1, 2, 1>, scalar_prefetch = 0 : i64, scratch_operands = 1 : i64, tpu.core_type = #tpu.core_type<tc>, window_params = [{transform_indices = @transform_0, window_bounds = array<i64: 8, 128>}, {transform_indices = @transform_1, window_bounds = array<i64: 128, 128>}, {transform_indices = @transform_2, window_bounds = array<i64: 1, 128>}, {transform_indices = @transform_3, window_bounds = array<i64: 8, 128>}]} {
    %c0_i32 = arith.constant 0 : i32
    %0 = arith.cmpi eq, %arg2, %c0_i32 : i32
    %1 = arith.extui %0 : i1 to i32
    %c0_i32_0 = arith.constant 0 : i32
    %2 = arith.cmpi ne, %1, %c0_i32_0 : i32
    scf.if %2 {
      %cst_10 = arith.constant 0.000000e+00 : f32
      %12 = vector.broadcast %cst_10 : f32 to vector<8x128xf32>
      %c0_11 = arith.constant 0 : index
      %c0_12 = arith.constant 0 : index
      %13 = vector.load %arg7[%c0_11, %c0_12] : memref<8x128xf32, #tpu.memory_space<vmem>>, vector<8x128xf32>
      tpu.vector_store %arg7[%c0_11, %c0_12], %12 {strides = array<i32>} : memref<8x128xf32, #tpu.memory_space<vmem>>, vector<8x128xf32>,
    } else {
    }
    %c0 = arith.constant 0 : index
    %c0_1 = arith.constant 0 : index
    %3 = vector.load %arg7[%c0, %c0_1] : memref<8x128xf32, #tpu.memory_space<vmem>>, vector<8x128xf32>
    %c0_2 = arith.constant 0 : index
    %c0_3 = arith.constant 0 : index
    %4 = vector.load %arg3[%c0_2, %c0_3] : memref<8x128xbf16, #tpu.memory_space<vmem>>, vector<8x128xbf16>
    %c0_4 = arith.constant 0 : index
    %c0_5 = arith.constant 0 : index
    %5 = vector.load %arg4[%c0_4, %c0_5] : memref<128x128xbf16, #tpu.memory_space<vmem>>, vector<128x128xbf16>
    %cst = arith.constant dense<0.000000e+00> : vector<8x128xf32>
    %6 = tpu.matmul %4, %5, %cst {dimension_numbers = #tpu.dot_dimension_numbers<[1], [0], [0], [1], [0, 0, 1, 1], [], []>} : vector<8x128xbf16>, vector<128x128xbf16>, vector<8x128xf32> -> vector<8x128xf32>
    %7 = arith.addf %3, %6 : vector<8x128xf32>
    %c0_6 = arith.constant 0 : index
    %c0_7 = arith.constant 0 : index
    %8 = vector.load %arg7[%c0_6, %c0_7] : memref<8x128xf32, #tpu.memory_space<vmem>>, vector<8x128xf32>
    tpu.vector_store %arg7[%c0_6, %c0_7], %7 {strides = array<i32>} : memref<8x128xf32, #tpu.memory_space<vmem>>, vector<8x128xf32>,
    %c0_i32_8 = arith.constant 0 : i32
    %9 = arith.cmpi eq, %arg2, %c0_i32_8 : i32
    %10 = arith.extui %9 : i1 to i32
    %c0_i32_9 = arith.constant 0 : i32
    %11 = arith.cmpi ne, %10, %c0_i32_9 : i32
    scf.if %11 {
      %c0_10 = arith.constant 0 : index
      %c0_11 = arith.constant 0 : index
      %12 = vector.load %arg7[%c0_10, %c0_11] : memref<8x128xf32, #tpu.memory_space<vmem>>, vector<8x128xf32>
      %c0_12 = arith.constant 0 : index
      %c0_13 = arith.constant 0 : index
      %13 = vector.load %arg5[%c0_12, %c0_13] : memref<1x128xf32, #tpu.memory_space<vmem>>, vector<1x128xf32>
      %14 = vector.broadcast %13 : vector<1x128xf32> to vector<8x128xf32>
      %15 = arith.addf %12, %14 : vector<8x128xf32>
      %16 = arith.truncf %15 : vector<8x128xf32> to vector<8x128xbf16>
      %c0_14 = arith.constant 0 : index
      %c0_15 = arith.constant 0 : index
      %17 = vector.load %arg6[%c0_14, %c0_15] : memref<8x128xbf16, #tpu.memory_space<vmem>>, vector<8x128xbf16>
      tpu.vector_store %arg6[%c0_14, %c0_15], %16 {strides = array<i32>} : memref<8x128xbf16, #tpu.memory_space<vmem>>, vector<8x128xbf16>,
    } else {
    }
    return
  }
  func.func @transform_0(%arg0: i32, %arg1: i32, %arg2: i32) -> (i32, i32) {
    %c0_i32 = arith.constant 0 : i32
    return %arg0, %arg2 : i32, i32
  }
  func.func @transform_1(%arg0: i32, %arg1: i32, %arg2: i32) -> (i32, i32) {
    %c0_i32 = arith.constant 0 : i32
    return %arg2, %arg1 : i32, i32
  }
  func.func @transform_2(%arg0: i32, %arg1: i32, %arg2: i32) -> (i32, i32) {
    %c0_i32 = arith.constant 0 : i32
    %c0_i32_0 = arith.constant 0 : i32
    return %c0_i32, %arg1 : i32, i32
  }
  func.func @transform_3(%arg0: i32, %arg1: i32, %arg2: i32) -> (i32, i32) {
    %c0_i32 = arith.constant 0 : i32
    return %arg0, %arg1 : i32, i32
  }
}

module attributes {stable_mosaic.version = 11 : i64} {
  func.func @_fused_matmul_kernel(%arg0: i32, %arg1: i32, %arg2: i32, %arg3: memref<8x384xbf16, #tpu.memory_space<vmem>>, %arg4: memref<384x128xbf16, #tpu.memory_space<vmem>>, %arg5: memref<1x128xf32, #tpu.memory_space<vmem>>, %arg6: memref<8x128xbf16, #tpu.memory_space<vmem>>, %arg7: memref<8x128xf32, #tpu.memory_space<vmem>>) attributes {dimension_semantics = [#tpu.dimension_semantics<parallel>, #tpu.dimension_semantics<parallel>, #tpu.dimension_semantics<arbitrary>], iteration_bounds = array<i64: 1, 2, 6>, scalar_prefetch = 0 : i64, scratch_operands = 1 : i64, tpu.core_type = #tpu.core_type<tc>, window_params = [{transform_indices = @transform_0, window_bounds = array<i64: 8, 384>}, {transform_indices = @transform_1, window_bounds = array<i64: 384, 128>}, {transform_indices = @transform_2, window_bounds = array<i64: 1, 128>}, {transform_indices = @transform_3, window_bounds = array<i64: 8, 128>}]} {
    %c0_i32 = arith.constant 0 : i32
    %0 = arith.cmpi eq, %arg2, %c0_i32 : i32
    %1 = arith.extui %0 : i1 to i32
    %c0_i32_0 = arith.constant 0 : i32
    %2 = arith.cmpi ne, %1, %c0_i32_0 : i32
    scf.if %2 {
      %cst_9 = arith.constant 0.000000e+00 : f32
      %12 = vector.broadcast %cst_9 : f32 to vector<8x128xf32>
      %c0_10 = arith.constant 0 : index
      %c0_11 = arith.constant 0 : index
      %13 = vector.load %arg7[%c0_10, %c0_11] : memref<8x128xf32, #tpu.memory_space<vmem>>, vector<8x128xf32>
      tpu.vector_store %arg7[%c0_10, %c0_11], %12 {strides = array<i32>} : memref<8x128xf32, #tpu.memory_space<vmem>>, vector<8x128xf32>,
    } else {
    }
    %c0 = arith.constant 0 : index
    %c0_1 = arith.constant 0 : index
    %3 = vector.load %arg7[%c0, %c0_1] : memref<8x128xf32, #tpu.memory_space<vmem>>, vector<8x128xf32>
    %c0_2 = arith.constant 0 : index
    %c0_3 = arith.constant 0 : index
    %4 = vector.load %arg3[%c0_2, %c0_3] : memref<8x384xbf16, #tpu.memory_space<vmem>>, vector<8x384xbf16>
    %c0_4 = arith.constant 0 : index
    %c0_5 = arith.constant 0 : index
    %5 = vector.load %arg4[%c0_4, %c0_5] : memref<384x128xbf16, #tpu.memory_space<vmem>>, vector<384x128xbf16>
    %cst = arith.constant dense<0.000000e+00> : vector<8x128xf32>
    %6 = tpu.matmul %4, %5, %cst {dimension_numbers = #tpu.dot_dimension_numbers<[1], [0], [0], [1], [0, 0, 1, 1], [], []>} : vector<8x384xbf16>, vector<384x128xbf16>, vector<8x128xf32> -> vector<8x128xf32>
    %7 = arith.addf %3, %6 : vector<8x128xf32>
    %c0_6 = arith.constant 0 : index
    %c0_7 = arith.constant 0 : index
    %8 = vector.load %arg7[%c0_6, %c0_7] : memref<8x128xf32, #tpu.memory_space<vmem>>, vector<8x128xf32>
    tpu.vector_store %arg7[%c0_6, %c0_7], %7 {strides = array<i32>} : memref<8x128xf32, #tpu.memory_space<vmem>>, vector<8x128xf32>,
    %c5_i32 = arith.constant 5 : i32
    %9 = arith.cmpi eq, %arg2, %c5_i32 : i32
    %10 = arith.extui %9 : i1 to i32
    %c0_i32_8 = arith.constant 0 : i32
    %11 = arith.cmpi ne, %10, %c0_i32_8 : i32
    scf.if %11 {
      %c0_9 = arith.constant 0 : index
      %c0_10 = arith.constant 0 : index
      %12 = vector.load %arg7[%c0_9, %c0_10] : memref<8x128xf32, #tpu.memory_space<vmem>>, vector<8x128xf32>
      %c0_11 = arith.constant 0 : index
      %c0_12 = arith.constant 0 : index
      %13 = vector.load %arg5[%c0_11, %c0_12] : memref<1x128xf32, #tpu.memory_space<vmem>>, vector<1x128xf32>
      %14 = vector.broadcast %13 : vector<1x128xf32> to vector<8x128xf32>
      %15 = arith.addf %12, %14 : vector<8x128xf32>
      %cst_13 = arith.constant 0.000000e+00 : f32
      %16 = vector.broadcast %cst_13 : f32 to vector<8x128xf32>
      %17 = arith.maximumf %15, %16 : vector<8x128xf32>
      %18 = arith.truncf %17 : vector<8x128xf32> to vector<8x128xbf16>
      %c0_14 = arith.constant 0 : index
      %c0_15 = arith.constant 0 : index
      %19 = vector.load %arg6[%c0_14, %c0_15] : memref<8x128xbf16, #tpu.memory_space<vmem>>, vector<8x128xbf16>
      tpu.vector_store %arg6[%c0_14, %c0_15], %18 {strides = array<i32>} : memref<8x128xbf16, #tpu.memory_space<vmem>>, vector<8x128xbf16>,
    } else {
    }
    return
  }
  func.func @transform_0(%arg0: i32, %arg1: i32, %arg2: i32) -> (i32, i32) {
    %c0_i32 = arith.constant 0 : i32
    return %arg0, %arg2 : i32, i32
  }
  func.func @transform_1(%arg0: i32, %arg1: i32, %arg2: i32) -> (i32, i32) {
    %c0_i32 = arith.constant 0 : i32
    return %arg2, %arg1 : i32, i32
  }
  func.func @transform_2(%arg0: i32, %arg1: i32, %arg2: i32) -> (i32, i32) {
    %c0_i32 = arith.constant 0 : i32
    %c0_i32_0 = arith.constant 0 : i32
    return %c0_i32, %arg1 : i32, i32
  }
  func.func @transform_3(%arg0: i32, %arg1: i32, %arg2: i32) -> (i32, i32) {
    %c0_i32 = arith.constant 0 : i32
    return %arg0, %arg1 : i32, i32
  }
}

module attributes {stable_mosaic.version = 11 : i64} {
  func.func @_fused_matmul_kernel(%arg0: i32, %arg1: i32, %arg2: i32, %arg3: memref<8x384xbf16, #tpu.memory_space<vmem>>, %arg4: memref<384x256xbf16, #tpu.memory_space<vmem>>, %arg5: memref<1x256xf32, #tpu.memory_space<vmem>>, %arg6: memref<8x256xbf16, #tpu.memory_space<vmem>>, %arg7: memref<8x256xf32, #tpu.memory_space<vmem>>) attributes {dimension_semantics = [#tpu.dimension_semantics<parallel>, #tpu.dimension_semantics<parallel>, #tpu.dimension_semantics<arbitrary>], iteration_bounds = array<i64: 1, 2, 6>, scalar_prefetch = 0 : i64, scratch_operands = 1 : i64, tpu.core_type = #tpu.core_type<tc>, window_params = [{transform_indices = @transform_0, window_bounds = array<i64: 8, 384>}, {transform_indices = @transform_1, window_bounds = array<i64: 384, 256>}, {transform_indices = @transform_2, window_bounds = array<i64: 1, 256>}, {transform_indices = @transform_3, window_bounds = array<i64: 8, 256>}]} {
    %c0_i32 = arith.constant 0 : i32
    %0 = arith.cmpi eq, %arg2, %c0_i32 : i32
    %1 = arith.extui %0 : i1 to i32
    %c0_i32_0 = arith.constant 0 : i32
    %2 = arith.cmpi ne, %1, %c0_i32_0 : i32
    scf.if %2 {
      %cst_9 = arith.constant 0.000000e+00 : f32
      %12 = vector.broadcast %cst_9 : f32 to vector<8x256xf32>
      %c0_10 = arith.constant 0 : index
      %c0_11 = arith.constant 0 : index
      %13 = vector.load %arg7[%c0_10, %c0_11] : memref<8x256xf32, #tpu.memory_space<vmem>>, vector<8x256xf32>
      tpu.vector_store %arg7[%c0_10, %c0_11], %12 {strides = array<i32>} : memref<8x256xf32, #tpu.memory_space<vmem>>, vector<8x256xf32>,
    } else {
    }
    %c0 = arith.constant 0 : index
    %c0_1 = arith.constant 0 : index
    %3 = vector.load %arg7[%c0, %c0_1] : memref<8x256xf32, #tpu.memory_space<vmem>>, vector<8x256xf32>
    %c0_2 = arith.constant 0 : index
    %c0_3 = arith.constant 0 : index
    %4 = vector.load %arg3[%c0_2, %c0_3] : memref<8x384xbf16, #tpu.memory_space<vmem>>, vector<8x384xbf16>
    %c0_4 = arith.constant 0 : index
    %c0_5 = arith.constant 0 : index
    %5 = vector.load %arg4[%c0_4, %c0_5] : memref<384x256xbf16, #tpu.memory_space<vmem>>, vector<384x256xbf16>
    %cst = arith.constant dense<0.000000e+00> : vector<8x256xf32>
    %6 = tpu.matmul %4, %5, %cst {dimension_numbers = #tpu.dot_dimension_numbers<[1], [0], [0], [1], [0, 0, 1, 1], [], []>} : vector<8x384xbf16>, vector<384x256xbf16>, vector<8x256xf32> -> vector<8x256xf32>
    %7 = arith.addf %3, %6 : vector<8x256xf32>
    %c0_6 = arith.constant 0 : index
    %c0_7 = arith.constant 0 : index
    %8 = vector.load %arg7[%c0_6, %c0_7] : memref<8x256xf32, #tpu.memory_space<vmem>>, vector<8x256xf32>
    tpu.vector_store %arg7[%c0_6, %c0_7], %7 {strides = array<i32>} : memref<8x256xf32, #tpu.memory_space<vmem>>, vector<8x256xf32>,
    %c5_i32 = arith.constant 5 : i32
    %9 = arith.cmpi eq, %arg2, %c5_i32 : i32
    %10 = arith.extui %9 : i1 to i32
    %c0_i32_8 = arith.constant 0 : i32
    %11 = arith.cmpi ne, %10, %c0_i32_8 : i32
    scf.if %11 {
      %c0_9 = arith.constant 0 : index
      %c0_10 = arith.constant 0 : index
      %12 = vector.load %arg7[%c0_9, %c0_10] : memref<8x256xf32, #tpu.memory_space<vmem>>, vector<8x256xf32>
      %c0_11 = arith.constant 0 : index
      %c0_12 = arith.constant 0 : index
      %13 = vector.load %arg5[%c0_11, %c0_12] : memref<1x256xf32, #tpu.memory_space<vmem>>, vector<1x256xf32>
      %14 = vector.broadcast %13 : vector<1x256xf32> to vector<8x256xf32>
      %15 = arith.addf %12, %14 : vector<8x256xf32>
      %cst_13 = arith.constant 0.000000e+00 : f32
      %16 = vector.broadcast %cst_13 : f32 to vector<8x256xf32>
      %17 = arith.maximumf %15, %16 : vector<8x256xf32>
      %18 = arith.truncf %17 : vector<8x256xf32> to vector<8x256xbf16>
      %c0_14 = arith.constant 0 : index
      %c0_15 = arith.constant 0 : index
      %19 = vector.load %arg6[%c0_14, %c0_15] : memref<8x256xbf16, #tpu.memory_space<vmem>>, vector<8x256xbf16>
      tpu.vector_store %arg6[%c0_14, %c0_15], %18 {strides = array<i32>} : memref<8x256xbf16, #tpu.memory_space<vmem>>, vector<8x256xbf16>,
    } else {
    }
    return
  }
  func.func @transform_0(%arg0: i32, %arg1: i32, %arg2: i32) -> (i32, i32) {
    %c0_i32 = arith.constant 0 : i32
    return %arg0, %arg2 : i32, i32
  }
  func.func @transform_1(%arg0: i32, %arg1: i32, %arg2: i32) -> (i32, i32) {
    %c0_i32 = arith.constant 0 : i32
    return %arg2, %arg1 : i32, i32
  }
  func.func @transform_2(%arg0: i32, %arg1: i32, %arg2: i32) -> (i32, i32) {
    %c0_i32 = arith.constant 0 : i32
    %c0_i32_0 = arith.constant 0 : i32
    return %c0_i32, %arg1 : i32, i32
  }
  func.func @transform_3(%arg0: i32, %arg1: i32, %arg2: i32) -> (i32, i32) {
    %c0_i32 = arith.constant 0 : i32
    return %arg0, %arg1 : i32, i32
  }
}

module attributes {stable_mosaic.version = 11 : i64} {
  func.func @_fused_matmul_kernel(%arg0: i32, %arg1: i32, %arg2: i32, %arg3: memref<8x512xbf16, #tpu.memory_space<vmem>>, %arg4: memref<512x256xbf16, #tpu.memory_space<vmem>>, %arg5: memref<1x256xf32, #tpu.memory_space<vmem>>, %arg6: memref<8x256xbf16, #tpu.memory_space<vmem>>, %arg7: memref<8x256xbf16, #tpu.memory_space<vmem>>, %arg8: memref<8x256xf32, #tpu.memory_space<vmem>>) attributes {dimension_semantics = [#tpu.dimension_semantics<parallel>, #tpu.dimension_semantics<parallel>, #tpu.dimension_semantics<arbitrary>], iteration_bounds = array<i64: 1, 2, 9>, scalar_prefetch = 0 : i64, scratch_operands = 1 : i64, tpu.core_type = #tpu.core_type<tc>, window_params = [{transform_indices = @transform_0, window_bounds = array<i64: 8, 512>}, {transform_indices = @transform_1, window_bounds = array<i64: 512, 256>}, {transform_indices = @transform_2, window_bounds = array<i64: 1, 256>}, {transform_indices = @transform_3, window_bounds = array<i64: 8, 256>}, {transform_indices = @transform_4, window_bounds = array<i64: 8, 256>}]} {
    %c0_i32 = arith.constant 0 : i32
    %0 = arith.cmpi eq, %arg2, %c0_i32 : i32
    %1 = arith.extui %0 : i1 to i32
    %c0_i32_0 = arith.constant 0 : i32
    %2 = arith.cmpi ne, %1, %c0_i32_0 : i32
    scf.if %2 {
      %cst_9 = arith.constant 0.000000e+00 : f32
      %12 = vector.broadcast %cst_9 : f32 to vector<8x256xf32>
      %c0_10 = arith.constant 0 : index
      %c0_11 = arith.constant 0 : index
      %13 = vector.load %arg8[%c0_10, %c0_11] : memref<8x256xf32, #tpu.memory_space<vmem>>, vector<8x256xf32>
      tpu.vector_store %arg8[%c0_10, %c0_11], %12 {strides = array<i32>} : memref<8x256xf32, #tpu.memory_space<vmem>>, vector<8x256xf32>,
    } else {
    }
    %c0 = arith.constant 0 : index
    %c0_1 = arith.constant 0 : index
    %3 = vector.load %arg8[%c0, %c0_1] : memref<8x256xf32, #tpu.memory_space<vmem>>, vector<8x256xf32>
    %c0_2 = arith.constant 0 : index
    %c0_3 = arith.constant 0 : index
    %4 = vector.load %arg3[%c0_2, %c0_3] : memref<8x512xbf16, #tpu.memory_space<vmem>>, vector<8x512xbf16>
    %c0_4 = arith.constant 0 : index
    %c0_5 = arith.constant 0 : index
    %5 = vector.load %arg4[%c0_4, %c0_5] : memref<512x256xbf16, #tpu.memory_space<vmem>>, vector<512x256xbf16>
    %cst = arith.constant dense<0.000000e+00> : vector<8x256xf32>
    %6 = tpu.matmul %4, %5, %cst {dimension_numbers = #tpu.dot_dimension_numbers<[1], [0], [0], [1], [0, 0, 1, 1], [], []>} : vector<8x512xbf16>, vector<512x256xbf16>, vector<8x256xf32> -> vector<8x256xf32>
    %7 = arith.addf %3, %6 : vector<8x256xf32>
    %c0_6 = arith.constant 0 : index
    %c0_7 = arith.constant 0 : index
    %8 = vector.load %arg8[%c0_6, %c0_7] : memref<8x256xf32, #tpu.memory_space<vmem>>, vector<8x256xf32>
    tpu.vector_store %arg8[%c0_6, %c0_7], %7 {strides = array<i32>} : memref<8x256xf32, #tpu.memory_space<vmem>>, vector<8x256xf32>,
    %c8_i32 = arith.constant 8 : i32
    %9 = arith.cmpi eq, %arg2, %c8_i32 : i32
    %10 = arith.extui %9 : i1 to i32
    %c0_i32_8 = arith.constant 0 : i32
    %11 = arith.cmpi ne, %10, %c0_i32_8 : i32
    scf.if %11 {
      %c0_9 = arith.constant 0 : index
      %c0_10 = arith.constant 0 : index
      %12 = vector.load %arg8[%c0_9, %c0_10] : memref<8x256xf32, #tpu.memory_space<vmem>>, vector<8x256xf32>
      %c0_11 = arith.constant 0 : index
      %c0_12 = arith.constant 0 : index
      %13 = vector.load %arg5[%c0_11, %c0_12] : memref<1x256xf32, #tpu.memory_space<vmem>>, vector<1x256xf32>
      %14 = vector.broadcast %13 : vector<1x256xf32> to vector<8x256xf32>
      %15 = arith.addf %12, %14 : vector<8x256xf32>
      %c0_13 = arith.constant 0 : index
      %c0_14 = arith.constant 0 : index
      %16 = vector.load %arg6[%c0_13, %c0_14] : memref<8x256xbf16, #tpu.memory_space<vmem>>, vector<8x256xbf16>
      %17 = arith.extf %16 : vector<8x256xbf16> to vector<8x256xf32>
      %18 = arith.addf %15, %17 : vector<8x256xf32>
      %cst_15 = arith.constant 0.000000e+00 : f32
      %19 = vector.broadcast %cst_15 : f32 to vector<8x256xf32>
      %20 = arith.maximumf %18, %19 : vector<8x256xf32>
      %21 = arith.truncf %20 : vector<8x256xf32> to vector<8x256xbf16>
      %c0_16 = arith.constant 0 : index
      %c0_17 = arith.constant 0 : index
      %22 = vector.load %arg7[%c0_16, %c0_17] : memref<8x256xbf16, #tpu.memory_space<vmem>>, vector<8x256xbf16>
      tpu.vector_store %arg7[%c0_16, %c0_17], %21 {strides = array<i32>} : memref<8x256xbf16, #tpu.memory_space<vmem>>, vector<8x256xbf16>,
    } else {
    }
    return
  }
  func.func @transform_0(%arg0: i32, %arg1: i32, %arg2: i32) -> (i32, i32) {
    %c0_i32 = arith.constant 0 : i32
    return %arg0, %arg2 : i32, i32
  }
  func.func @transform_1(%arg0: i32, %arg1: i32, %arg2: i32) -> (i32, i32) {
    %c0_i32 = arith.constant 0 : i32
    return %arg2, %arg1 : i32, i32
  }
  func.func @transform_2(%arg0: i32, %arg1: i32, %arg2: i32) -> (i32, i32) {
    %c0_i32 = arith.constant 0 : i32
    %c0_i32_0 = arith.constant 0 : i32
    return %c0_i32, %arg1 : i32, i32
  }
  func.func @transform_3(%arg0: i32, %arg1: i32, %arg2: i32) -> (i32, i32) {
    %c0_i32 = arith.constant 0 : i32
    return %arg0, %arg1 : i32, i32
  }
  func.func @transform_4(%arg0: i32, %arg1: i32, %arg2: i32) -> (i32, i32) {
    %c0_i32 = arith.constant 0 : i32
    return %arg0, %arg1 : i32, i32
  }
}

module attributes {stable_mosaic.version = 11 : i64} {
  func.func @_fused_matmul_kernel(%arg0: i32, %arg1: i32, %arg2: i32, %arg3: memref<8x256xbf16, #tpu.memory_space<vmem>>, %arg4: memref<256x256xbf16, #tpu.memory_space<vmem>>, %arg5: memref<1x256xf32, #tpu.memory_space<vmem>>, %arg6: memref<8x256xbf16, #tpu.memory_space<vmem>>, %arg7: memref<8x256xf32, #tpu.memory_space<vmem>>) attributes {dimension_semantics = [#tpu.dimension_semantics<parallel>, #tpu.dimension_semantics<parallel>, #tpu.dimension_semantics<arbitrary>], iteration_bounds = array<i64: 1, 2, 1>, scalar_prefetch = 0 : i64, scratch_operands = 1 : i64, tpu.core_type = #tpu.core_type<tc>, window_params = [{transform_indices = @transform_0, window_bounds = array<i64: 8, 256>}, {transform_indices = @transform_1, window_bounds = array<i64: 256, 256>}, {transform_indices = @transform_2, window_bounds = array<i64: 1, 256>}, {transform_indices = @transform_3, window_bounds = array<i64: 8, 256>}]} {
    %c0_i32 = arith.constant 0 : i32
    %0 = arith.cmpi eq, %arg2, %c0_i32 : i32
    %1 = arith.extui %0 : i1 to i32
    %c0_i32_0 = arith.constant 0 : i32
    %2 = arith.cmpi ne, %1, %c0_i32_0 : i32
    scf.if %2 {
      %cst_10 = arith.constant 0.000000e+00 : f32
      %12 = vector.broadcast %cst_10 : f32 to vector<8x256xf32>
      %c0_11 = arith.constant 0 : index
      %c0_12 = arith.constant 0 : index
      %13 = vector.load %arg7[%c0_11, %c0_12] : memref<8x256xf32, #tpu.memory_space<vmem>>, vector<8x256xf32>
      tpu.vector_store %arg7[%c0_11, %c0_12], %12 {strides = array<i32>} : memref<8x256xf32, #tpu.memory_space<vmem>>, vector<8x256xf32>,
    } else {
    }
    %c0 = arith.constant 0 : index
    %c0_1 = arith.constant 0 : index
    %3 = vector.load %arg7[%c0, %c0_1] : memref<8x256xf32, #tpu.memory_space<vmem>>, vector<8x256xf32>
    %c0_2 = arith.constant 0 : index
    %c0_3 = arith.constant 0 : index
    %4 = vector.load %arg3[%c0_2, %c0_3] : memref<8x256xbf16, #tpu.memory_space<vmem>>, vector<8x256xbf16>
    %c0_4 = arith.constant 0 : index
    %c0_5 = arith.constant 0 : index
    %5 = vector.load %arg4[%c0_4, %c0_5] : memref<256x256xbf16, #tpu.memory_space<vmem>>, vector<256x256xbf16>
    %cst = arith.constant dense<0.000000e+00> : vector<8x256xf32>
    %6 = tpu.matmul %4, %5, %cst {dimension_numbers = #tpu.dot_dimension_numbers<[1], [0], [0], [1], [0, 0, 1, 1], [], []>} : vector<8x256xbf16>, vector<256x256xbf16>, vector<8x256xf32> -> vector<8x256xf32>
    %7 = arith.addf %3, %6 : vector<8x256xf32>
    %c0_6 = arith.constant 0 : index
    %c0_7 = arith.constant 0 : index
    %8 = vector.load %arg7[%c0_6, %c0_7] : memref<8x256xf32, #tpu.memory_space<vmem>>, vector<8x256xf32>
    tpu.vector_store %arg7[%c0_6, %c0_7], %7 {strides = array<i32>} : memref<8x256xf32, #tpu.memory_space<vmem>>, vector<8x256xf32>,
    %c0_i32_8 = arith.constant 0 : i32
    %9 = arith.cmpi eq, %arg2, %c0_i32_8 : i32
    %10 = arith.extui %9 : i1 to i32
    %c0_i32_9 = arith.constant 0 : i32
    %11 = arith.cmpi ne, %10, %c0_i32_9 : i32
    scf.if %11 {
      %c0_10 = arith.constant 0 : index
      %c0_11 = arith.constant 0 : index
      %12 = vector.load %arg7[%c0_10, %c0_11] : memref<8x256xf32, #tpu.memory_space<vmem>>, vector<8x256xf32>
      %c0_12 = arith.constant 0 : index
      %c0_13 = arith.constant 0 : index
      %13 = vector.load %arg5[%c0_12, %c0_13] : memref<1x256xf32, #tpu.memory_space<vmem>>, vector<1x256xf32>
      %14 = vector.broadcast %13 : vector<1x256xf32> to vector<8x256xf32>
      %15 = arith.addf %12, %14 : vector<8x256xf32>
      %16 = arith.truncf %15 : vector<8x256xf32> to vector<8x256xbf16>
      %c0_14 = arith.constant 0 : index
      %c0_15 = arith.constant 0 : index
      %17 = vector.load %arg6[%c0_14, %c0_15] : memref<8x256xbf16, #tpu.memory_space<vmem>>, vector<8x256xbf16>
      tpu.vector_store %arg6[%c0_14, %c0_15], %16 {strides = array<i32>} : memref<8x256xbf16, #tpu.memory_space<vmem>>, vector<8x256xbf16>,
    } else {
    }
    return
  }
  func.func @transform_0(%arg0: i32, %arg1: i32, %arg2: i32) -> (i32, i32) {
    %c0_i32 = arith.constant 0 : i32
    return %arg0, %arg2 : i32, i32
  }
  func.func @transform_1(%arg0: i32, %arg1: i32, %arg2: i32) -> (i32, i32) {
    %c0_i32 = arith.constant 0 : i32
    return %arg2, %arg1 : i32, i32
  }
  func.func @transform_2(%arg0: i32, %arg1: i32, %arg2: i32) -> (i32, i32) {
    %c0_i32 = arith.constant 0 : i32
    %c0_i32_0 = arith.constant 0 : i32
    return %c0_i32, %arg1 : i32, i32
  }
  func.func @transform_3(%arg0: i32, %arg1: i32, %arg2: i32) -> (i32, i32) {
    %c0_i32 = arith.constant 0 : i32
    return %arg0, %arg1 : i32, i32
  }
}

module attributes {stable_mosaic.version = 11 : i64} {
  func.func @_fused_matmul_kernel(%arg0: i32, %arg1: i32, %arg2: i32, %arg3: memref<8x512xbf16, #tpu.memory_space<vmem>>, %arg4: memref<512x256xbf16, #tpu.memory_space<vmem>>, %arg5: memref<1x256xf32, #tpu.memory_space<vmem>>, %arg6: memref<8x256xbf16, #tpu.memory_space<vmem>>, %arg7: memref<8x256xf32, #tpu.memory_space<vmem>>) attributes {dimension_semantics = [#tpu.dimension_semantics<parallel>, #tpu.dimension_semantics<parallel>, #tpu.dimension_semantics<arbitrary>], iteration_bounds = array<i64: 1, 2, 9>, scalar_prefetch = 0 : i64, scratch_operands = 1 : i64, tpu.core_type = #tpu.core_type<tc>, window_params = [{transform_indices = @transform_0, window_bounds = array<i64: 8, 512>}, {transform_indices = @transform_1, window_bounds = array<i64: 512, 256>}, {transform_indices = @transform_2, window_bounds = array<i64: 1, 256>}, {transform_indices = @transform_3, window_bounds = array<i64: 8, 256>}]} {
    %c0_i32 = arith.constant 0 : i32
    %0 = arith.cmpi eq, %arg2, %c0_i32 : i32
    %1 = arith.extui %0 : i1 to i32
    %c0_i32_0 = arith.constant 0 : i32
    %2 = arith.cmpi ne, %1, %c0_i32_0 : i32
    scf.if %2 {
      %cst_9 = arith.constant 0.000000e+00 : f32
      %12 = vector.broadcast %cst_9 : f32 to vector<8x256xf32>
      %c0_10 = arith.constant 0 : index
      %c0_11 = arith.constant 0 : index
      %13 = vector.load %arg7[%c0_10, %c0_11] : memref<8x256xf32, #tpu.memory_space<vmem>>, vector<8x256xf32>
      tpu.vector_store %arg7[%c0_10, %c0_11], %12 {strides = array<i32>} : memref<8x256xf32, #tpu.memory_space<vmem>>, vector<8x256xf32>,
    } else {
    }
    %c0 = arith.constant 0 : index
    %c0_1 = arith.constant 0 : index
    %3 = vector.load %arg7[%c0, %c0_1] : memref<8x256xf32, #tpu.memory_space<vmem>>, vector<8x256xf32>
    %c0_2 = arith.constant 0 : index
    %c0_3 = arith.constant 0 : index
    %4 = vector.load %arg3[%c0_2, %c0_3] : memref<8x512xbf16, #tpu.memory_space<vmem>>, vector<8x512xbf16>
    %c0_4 = arith.constant 0 : index
    %c0_5 = arith.constant 0 : index
    %5 = vector.load %arg4[%c0_4, %c0_5] : memref<512x256xbf16, #tpu.memory_space<vmem>>, vector<512x256xbf16>
    %cst = arith.constant dense<0.000000e+00> : vector<8x256xf32>
    %6 = tpu.matmul %4, %5, %cst {dimension_numbers = #tpu.dot_dimension_numbers<[1], [0], [0], [1], [0, 0, 1, 1], [], []>} : vector<8x512xbf16>, vector<512x256xbf16>, vector<8x256xf32> -> vector<8x256xf32>
    %7 = arith.addf %3, %6 : vector<8x256xf32>
    %c0_6 = arith.constant 0 : index
    %c0_7 = arith.constant 0 : index
    %8 = vector.load %arg7[%c0_6, %c0_7] : memref<8x256xf32, #tpu.memory_space<vmem>>, vector<8x256xf32>
    tpu.vector_store %arg7[%c0_6, %c0_7], %7 {strides = array<i32>} : memref<8x256xf32, #tpu.memory_space<vmem>>, vector<8x256xf32>,
    %c8_i32 = arith.constant 8 : i32
    %9 = arith.cmpi eq, %arg2, %c8_i32 : i32
    %10 = arith.extui %9 : i1 to i32
    %c0_i32_8 = arith.constant 0 : i32
    %11 = arith.cmpi ne, %10, %c0_i32_8 : i32
    scf.if %11 {
      %c0_9 = arith.constant 0 : index
      %c0_10 = arith.constant 0 : index
      %12 = vector.load %arg7[%c0_9, %c0_10] : memref<8x256xf32, #tpu.memory_space<vmem>>, vector<8x256xf32>
      %c0_11 = arith.constant 0 : index
      %c0_12 = arith.constant 0 : index
      %13 = vector.load %arg5[%c0_11, %c0_12] : memref<1x256xf32, #tpu.memory_space<vmem>>, vector<1x256xf32>
      %14 = vector.broadcast %13 : vector<1x256xf32> to vector<8x256xf32>
      %15 = arith.addf %12, %14 : vector<8x256xf32>
      %cst_13 = arith.constant 0.000000e+00 : f32
      %16 = vector.broadcast %cst_13 : f32 to vector<8x256xf32>
      %17 = arith.maximumf %15, %16 : vector<8x256xf32>
      %18 = arith.truncf %17 : vector<8x256xf32> to vector<8x256xbf16>
      %c0_14 = arith.constant 0 : index
      %c0_15 = arith.constant 0 : index
      %19 = vector.load %arg6[%c0_14, %c0_15] : memref<8x256xbf16, #tpu.memory_space<vmem>>, vector<8x256xbf16>
      tpu.vector_store %arg6[%c0_14, %c0_15], %18 {strides = array<i32>} : memref<8x256xbf16, #tpu.memory_space<vmem>>, vector<8x256xbf16>,
    } else {
    }
    return
  }
  func.func @transform_0(%arg0: i32, %arg1: i32, %arg2: i32) -> (i32, i32) {
    %c0_i32 = arith.constant 0 : i32
    return %arg0, %arg2 : i32, i32
  }
  func.func @transform_1(%arg0: i32, %arg1: i32, %arg2: i32) -> (i32, i32) {
    %c0_i32 = arith.constant 0 : i32
    return %arg2, %arg1 : i32, i32
  }
  func.func @transform_2(%arg0: i32, %arg1: i32, %arg2: i32) -> (i32, i32) {
    %c0_i32 = arith.constant 0 : i32
    %c0_i32_0 = arith.constant 0 : i32
    return %c0_i32, %arg1 : i32, i32
  }
  func.func @transform_3(%arg0: i32, %arg1: i32, %arg2: i32) -> (i32, i32) {
    %c0_i32 = arith.constant 0 : i32
    return %arg0, %arg1 : i32, i32
  }
}

module attributes {stable_mosaic.version = 11 : i64} {
  func.func @_head_kernel(%arg0: memref<8x1x512xbf16, #tpu.memory_space<vmem>>, %arg1: memref<512x128xbf16, #tpu.memory_space<vmem>>, %arg2: memref<1x128xf32, #tpu.memory_space<vmem>>, %arg3: memref<128x128xbf16, #tpu.memory_space<vmem>>, %arg4: memref<1x128xf32, #tpu.memory_space<vmem>>, %arg5: memref<8x128xf32, #tpu.memory_space<vmem>>) attributes {dimension_semantics = [], scalar_prefetch = 0 : i64, scratch_operands = 0 : i64, tpu.core_type = #tpu.core_type<tc>} {
    %c0 = arith.constant 0 : index
    %c0_0 = arith.constant 0 : index
    %c0_1 = arith.constant 0 : index
    %0 = vector.load %arg0[%c0, %c0_0, %c0_1] : memref<8x1x512xbf16, #tpu.memory_space<vmem>>, vector<8x1x512xbf16>
    %1 = arith.extf %0 : vector<8x1x512xbf16> to vector<8x1x512xf32>
    %cst = arith.constant dense<0.000000e+00> : vector<8x512xf32>
    %2 = vector.multi_reduction <add>, %1, %cst [1] : vector<8x1x512xf32> to vector<8x512xf32>
    %cst_2 = arith.constant 1.000000e+00 : f32
    %3 = vector.broadcast %cst_2 : f32 to vector<8x512xf32>
    %4 = arith.divf %2, %3 : vector<8x512xf32>
    %5 = arith.truncf %4 : vector<8x512xf32> to vector<8x512xbf16>
    %c0_3 = arith.constant 0 : index
    %c0_4 = arith.constant 0 : index
    %6 = vector.load %arg1[%c0_3, %c0_4] : memref<512x128xbf16, #tpu.memory_space<vmem>>, vector<512x128xbf16>
    %cst_5 = arith.constant dense<0.000000e+00> : vector<8x128xf32>
    %7 = tpu.matmul %5, %6, %cst_5 {dimension_numbers = #tpu.dot_dimension_numbers<[1], [0], [0], [1], [0, 0, 1, 1], [], []>} : vector<8x512xbf16>, vector<512x128xbf16>, vector<8x128xf32> -> vector<8x128xf32>
    %c0_6 = arith.constant 0 : index
    %c0_7 = arith.constant 0 : index
    %8 = vector.load %arg2[%c0_6, %c0_7] : memref<1x128xf32, #tpu.memory_space<vmem>>, vector<1x128xf32>
    %9 = vector.broadcast %8 : vector<1x128xf32> to vector<8x128xf32>
    %10 = arith.addf %7, %9 : vector<8x128xf32>
    %cst_8 = arith.constant 0.000000e+00 : f32
    %11 = vector.broadcast %cst_8 : f32 to vector<8x128xf32>
    %12 = arith.maximumf %10, %11 : vector<8x128xf32>
    %13 = arith.truncf %12 : vector<8x128xf32> to vector<8x128xbf16>
    %c0_9 = arith.constant 0 : index
    %c0_10 = arith.constant 0 : index
    %14 = vector.load %arg3[%c0_9, %c0_10] : memref<128x128xbf16, #tpu.memory_space<vmem>>, vector<128x128xbf16>
    %cst_11 = arith.constant dense<0.000000e+00> : vector<8x128xf32>
    %15 = tpu.matmul %13, %14, %cst_11 {dimension_numbers = #tpu.dot_dimension_numbers<[1], [0], [0], [1], [0, 0, 1, 1], [], []>} : vector<8x128xbf16>, vector<128x128xbf16>, vector<8x128xf32> -> vector<8x128xf32>
    %c0_12 = arith.constant 0 : index
    %c0_13 = arith.constant 0 : index
    %16 = vector.load %arg4[%c0_12, %c0_13] : memref<1x128xf32, #tpu.memory_space<vmem>>, vector<1x128xf32>
    %17 = vector.broadcast %16 : vector<1x128xf32> to vector<8x128xf32>
    %18 = arith.addf %15, %17 : vector<8x128xf32>
    %c0_14 = arith.constant 0 : index
    %c0_15 = arith.constant 0 : index
    %19 = vector.load %arg5[%c0_14, %c0_15] : memref<8x128xf32, #tpu.memory_space<vmem>>, vector<8x128xf32>
    tpu.vector_store %arg5[%c0_14, %c0_15], %18 {strides = array<i32>} : memref<8x128xf32, #tpu.memory_space<vmem>>, vector<8x128xf32>,
    return
  }
}

</mosaic_0001>

<bundles_post_ra>
// kernel: classifier_model_forward.22
= control target key start
LH: loop header
LB: loop body
LE: loop exit
PB: predicated region body
PF: predicated region fallthrough
CT: control target
= control target key end

     0   :  { %s1744_s12 = smov 0   ;;  %s1746_s13 = smov 0   ;;  %s1918_s0 = inlined_call_operand.vmem [shape: bf16[512,256], index: 0, kind: input, shape index: {}]   ;;  %s1919_s1 = inlined_call_operand.vmem [shape: bf16[256,128], index: 1, kind: input, shape index: {}]   ;;  %s1920_s2 = inlined_call_operand.vmem [shape: f32[1,128], index: 2, kind: input, shape index: {}]   ;;  %s1921_s3 = inlined_call_operand.vmem [shape: bf16[512,128], index: 3, kind: output, shape index: {}]  }
   0x1   :  { %s1748_s14 = smov 0  }
   0x2 LB: > { %s32_s15 = sadd.s32 1, %s1718_s13  ;;  %p1267_p0 = scmp.ge.s32.totalorder %s1722_s14, 1  ;;  %s1722_s14 = sphi %s1748_s14, %s13_s14   ;;  %s1718_s13 = sphi %s1746_s13, %s1923_s13   ;;  %s1714_s12 = sphi %s1744_s12, %s1922_s12  }
   0x3   : > { %p34_p1 = scmp.ge.s32.totalorder %s32_s15, 2  ;;  %p191_p2 = scmp.lt.s32.totalorder %s1722_s14, 3 }
   0x5   : > { %s1925_s15 = smov (%p34_p1, %s32_s15), 0  ;;  %p192_p3 = pnand %p1267_p0, %p191_p2 }
   0x6   : > { %v1636_v0 = vld [vmem:[%s1919_s1 + $0x40] sm:$0xff] (!%p192_p3)   ;;  %s1268_s18 = sshll.u32 (!%p192_p3), %s1714_s12, 5  ;;  %v1638_v2 = vld [vmem:[%s1919_s1 + $0x48] sm:$0xff] (!%p192_p3)   ;;  %v1640_v4 = vld [vmem:[%s1919_s1 + $0x50] sm:$0xff] (!%p192_p3)  }
   0x7   : > { %195 = sbr.rel (%p192_p3) target bundleno = 320 (0x140), region = 32  ;;  %v1637_v1 = vld [vmem:[%s1919_s1] sm:$0xff] (!%p192_p3)   ;;  %1484 = vmatprep.subr.bf16.mxu0 (!%p192_p3), %v1636_v0  ;;  %1596 = vmatprep.subr.bf16.mxu1 (!%p192_p3), %v1636_v0  ;;  %v1639_v3 = vld [vmem:[%s1919_s1 + $0x8] sm:$0xff] (!%p192_p3)   ;;  %p236_p4 = scmp.lt.s32.totalorder (!%p192_p3), %s1268_s18, 63  ;;  %v1641_v5 = vld [vmem:[%s1919_s1 + $0x10] sm:$0xff] (!%p192_p3)  }
   0x8   : > { %1485 = vmatpush3.bf16.msra.mxu0 (!%p192_p3), %v1637_v1  ;;  %1604 = vmatpush3.bf16.msra.mxu1 (!%p192_p3), %v1637_v1  ;;  %v1642_v6 = vld [vmem:[%s1919_s1 + $0x58] sm:$0xff] (!%p192_p3)   ;;  %v1644_v8 = vld [vmem:[%s1919_s1 + $0x60] sm:$0xff] (!%p192_p3)   ;;  %v1646_v10 = vld [vmem:[%s1919_s1 + $0x68] sm:$0xff] (!%p192_p3)  }
   0x9   : > { %1486 = vmatprep.subr.bf16.mxu0 (!%p192_p3), %v1638_v2  ;;  %1597 = vmatprep.subr.bf16.mxu1 (!%p192_p3), %v1638_v2  ;;  %v1643_v7 = vld [vmem:[%s1919_s1 + $0x18] sm:$0xff] (!%p192_p3)   ;;  %v1645_v9 = vld [vmem:[%s1919_s1 + $0x20] sm:$0xff] (!%p192_p3)   ;;  %v1647_v13 = vld [vmem:[%s1919_s1 + $0x28] sm:$0xff] (!%p192_p3)  }
   0xa   : > { %v1648_v14 = vld [vmem:[%s1919_s1 + $0x70] sm:$0xff] (!%p192_p3)   ;;  %v1650_v16 = vld [vmem:[%s1919_s1 + $0x78] sm:$0xff] (!%p192_p3)   ;;  %v1853_v51 = vld [vmem:[%s1920_s2] ss:$0 sm:$0xff] (!%p192_p3) }
   0xb   : > { %v1649_v15 = vld [vmem:[%s1919_s1 + $0x30] sm:$0xff] (!%p192_p3)   ;;  %v1651_v17 = vld [vmem:[%s1919_s1 + $0x38] sm:$0xff] (!%p192_p3)  }
   0xc   : > { %1487 = vmatpush3.bf16.msra.mxu0 (!%p192_p3), %v1639_v3  ;;  %1605 = vmatpush3.bf16.msra.mxu1 (!%p192_p3), %v1639_v3 }
   0xd   : > { %1488 = vmatprep.subr.bf16.mxu0 (!%p192_p3), %v1640_v4  ;;  %1598 = vmatprep.subr.bf16.mxu1 (!%p192_p3), %v1640_v4 }
   0xe   : > { %s1927_s18 = smov (!%p236_p4, %s1268_s18), 63 }
   0xf   : > { %s1356_s6 = sshll.u32 %s1927_s18, 3  ;;  %s1272_s5 = sshll.u32 %s1927_s18, 2 }
  0x10   : > { %1489 = vmatpush3.bf16.msra.mxu0 %v1641_v5  ;;  %1606 = vmatpush3.bf16.msra.mxu1 %v1641_v5  ;;  %s1795_s11 = scalar_lea.vmem %s1918_s0, %s1356_s6  ;;  %s1863_s8 = scalar_lea.vmem %s1921_s3, %s1272_s5 }
  0x11   : > { %1490 = vmatprep.subr.bf16.mxu0 %v1642_v6  ;;  %1599 = vmatprep.subr.bf16.mxu1 %v1642_v6  ;;  %v1654_v11 = vld [vmem:[%s1795_s11 + $0x4] ss:$8 sps:$4 sm:$0xff]   ;;  %v1652_v18 = vld [vmem:[%s1795_s11] ss:$8 sps:$4 sm:$0xff]   ;;  %v1658_v20 = vld [vmem:[%s1795_s11 + $0x14] ss:$8 sps:$4 sm:$0xff]  }
  0x12   : > { %v1657_v12 = vld [vmem:[%s1795_s11 + $0x84] ss:$8 sps:$4 sm:$0xff]   ;;  %688 = vmatprep.mubr.bf16.mxu0 %v1654_v11  ;;  %v1655_v19 = vld [vmem:[%s1795_s11 + $0x80] ss:$8 sps:$4 sm:$0xff]   ;;  %v1660_v21 = vld [vmem:[%s1795_s11 + $0x94] ss:$8 sps:$4 sm:$0xff]  }
  0x13   : > { %752 = vmatprep.mubr.bf16.mxu1 %v1657_v12  ;;  %v1662_v22 = vld [vmem:[%s1795_s11 + $0x10] ss:$8 sps:$4 sm:$0xff]   ;;  %v1664_v24 = vld [vmem:[%s1795_s11 + $0x24] ss:$8 sps:$4 sm:$0xff]   ;;  %v1668_v26 = vld [vmem:[%s1795_s11 + $0x20] ss:$8 sps:$4 sm:$0xff]  }
  0x14   : > { %1491 = vmatpush3.bf16.msra.mxu0 %v1643_v7  ;;  %1607 = vmatpush3.bf16.msra.mxu1 %v1643_v7  ;;  %v1663_v23 = vld [vmem:[%s1795_s11 + $0x90] ss:$8 sps:$4 sm:$0xff]   ;;  %v1666_v25 = vld [vmem:[%s1795_s11 + $0xa4] ss:$8 sps:$4 sm:$0xff]   ;;  %v1669_v27 = vld [vmem:[%s1795_s11 + $0xa0] ss:$8 sps:$4 sm:$0xff]  }
  0x15   : > { %1492 = vmatprep.subr.bf16.mxu0 %v1644_v8  ;;  %1600 = vmatprep.subr.bf16.mxu1 %v1644_v8  ;;  %v1670_v28 = vld [vmem:[%s1795_s11 + $0x34] ss:$8 sps:$4 sm:$0xff]   ;;  %v1674_v30 = vld [vmem:[%s1795_s11 + $0x30] ss:$8 sps:$4 sm:$0xff]   ;;  %v1676_v32 = vld [vmem:[%s1795_s11 + $0x44] ss:$8 sps:$4 sm:$0xff]  }
  0x16   : > { %v1672_v29 = vld [vmem:[%s1795_s11 + $0xb4] ss:$8 sps:$4 sm:$0xff]   ;;  %v1675_v31 = vld [vmem:[%s1795_s11 + $0xb0] ss:$8 sps:$4 sm:$0xff]   ;;  %v1678_v33 = vld [vmem:[%s1795_s11 + $0xc4] ss:$8 sps:$4 sm:$0xff]  }
  0x17   : > { %v1680_v34 = vld [vmem:[%s1795_s11 + $0x40] ss:$8 sps:$4 sm:$0xff]   ;;  %v1682_v36 = vld [vmem:[%s1795_s11 + $0x54] ss:$8 sps:$4 sm:$0xff]   ;;  %v1686_v38 = vld [vmem:[%s1795_s11 + $0x50] ss:$8 sps:$4 sm:$0xff]  }
  0x18   : > { %1493 = vmatpush3.bf16.msra.mxu0 %v1645_v9  ;;  %1608 = vmatpush3.bf16.msra.mxu1 %v1645_v9  ;;  %v1681_v35 = vld [vmem:[%s1795_s11 + $0xc0] ss:$8 sps:$4 sm:$0xff]   ;;  %v1684_v37 = vld [vmem:[%s1795_s11 + $0xd4] ss:$8 sps:$4 sm:$0xff]   ;;  %v1687_v39 = vld [vmem:[%s1795_s11 + $0xd0] ss:$8 sps:$4 sm:$0xff]  }
  0x19   : > { %1494 = vmatprep.subr.bf16.mxu0 %v1646_v10  ;;  %1601 = vmatprep.subr.bf16.mxu1 %v1646_v10  ;;  %v1688_v40 = vld [vmem:[%s1795_s11 + $0x64] ss:$8 sps:$4 sm:$0xff]   ;;  %v1692_v42 = vld [vmem:[%s1795_s11 + $0x60] ss:$8 sps:$4 sm:$0xff]   ;;  %v1694_v44 = vld [vmem:[%s1795_s11 + $0x74] ss:$8 sps:$4 sm:$0xff]  }
  0x1a   : > { %v1690_v41 = vld [vmem:[%s1795_s11 + $0xe4] ss:$8 sps:$4 sm:$0xff]   ;;  %v1693_v43 = vld [vmem:[%s1795_s11 + $0xe0] ss:$8 sps:$4 sm:$0xff]   ;;  %v1696_v45 = vld [vmem:[%s1795_s11 + $0xf4] ss:$8 sps:$4 sm:$0xff]  }
  0x1b   : > { %v1698_v46 = vld [vmem:[%s1795_s11 + $0x70] ss:$8 sps:$4 sm:$0xff]  }
  0x1c   : > { %1495 = vmatpush3.bf16.msra.mxu0 %v1647_v13  ;;  %1609 = vmatpush3.bf16.msra.mxu1 %v1647_v13  ;;  %v1699_v47 = vld [vmem:[%s1795_s11 + $0xf0] ss:$8 sps:$4 sm:$0xff]  }
  0x1d   : > { %1496 = vmatprep.subr.bf16.mxu0 %v1648_v14  ;;  %1602 = vmatprep.subr.bf16.mxu1 %v1648_v14 }
  0x20   : > { %1497 = vmatpush3.bf16.msra.mxu0 %v1649_v15  ;;  %1610 = vmatpush3.bf16.msra.mxu1 %v1649_v15 }
  0x21   : > { %1498 = vmatprep.subr.bf16.mxu0 %v1650_v16  ;;  %1603 = vmatprep.subr.bf16.mxu1 %v1650_v16 }
  0x24   : > { %1499 = vmatpush3.bf16.msra.mxu0 %v1651_v17  ;;  %1611 = vmatpush3.bf16.msra.mxu1 %v1651_v17 }
  0x27   : > { %689 = vmatmul.mubr.bf16.vlgmr.msra.gmra.mrb[0].mxu0 %v1652_v18  ;;  %753 = vmatmul.mubr.bf16.vlgmr.msra.gmra.mrb[0].mxu1 %v1655_v19 }
  0x28   : > { %696 = vmatprep.mubr.bf16.mxu0 %v1658_v20  ;;  %760 = vmatprep.mubr.bf16.mxu1 %v1660_v21 }
  0x2f   : > { %697 = vmatmul.mubr.bf16.gmra.mrb[4].mxu0 %v1662_v22  ;;  %761 = vmatmul.mubr.bf16.gmra.mrb[4].mxu1 %v1663_v23 }
  0x30   : > { %704 = vmatprep.mubr.bf16.mxu0 %v1664_v24  ;;  %768 = vmatprep.mubr.bf16.mxu1 %v1666_v25 }
  0x37   : > { %705 = vmatmul.mubr.bf16.gmra.mrb[8].mxu0 %v1668_v26  ;;  %769 = vmatmul.mubr.bf16.gmra.mrb[8].mxu1 %v1669_v27 }
  0x38   : > { %712 = vmatprep.mubr.bf16.mxu0 %v1670_v28  ;;  %776 = vmatprep.mubr.bf16.mxu1 %v1672_v29 }
  0x3f   : > { %713 = vmatmul.mubr.bf16.gmra.mrb[12].mxu0 %v1674_v30  ;;  %777 = vmatmul.mubr.bf16.gmra.mrb[12].mxu1 %v1675_v31 }
  0x40   : > { %720 = vmatprep.mubr.bf16.mxu0 %v1676_v32  ;;  %784 = vmatprep.mubr.bf16.mxu1 %v1678_v33 }
  0x47   : > { %721 = vmatmul.mubr.bf16.gmra.mrb[16].mxu0 %v1680_v34  ;;  %785 = vmatmul.mubr.bf16.gmra.mrb[16].mxu1 %v1681_v35 }
  0x48   : > { %728 = vmatprep.mubr.bf16.mxu0 %v1682_v36  ;;  %792 = vmatprep.mubr.bf16.mxu1 %v1684_v37 }
  0x4f   : > { %729 = vmatmul.mubr.bf16.gmra.mrb[20].mxu0 %v1686_v38  ;;  %793 = vmatmul.mubr.bf16.gmra.mrb[20].mxu1 %v1687_v39 }
  0x50   : > { %736 = vmatprep.mubr.bf16.mxu0 %v1688_v40  ;;  %800 = vmatprep.mubr.bf16.mxu1 %v1690_v41 }
  0x57   : > { %737 = vmatmul.mubr.bf16.gmra.mrb[24].mxu0 %v1692_v42  ;;  %801 = vmatmul.mubr.bf16.gmra.mrb[24].mxu1 %v1693_v43 }
  0x58   : > { %744 = vmatprep.mubr.bf16.mxu0 %v1694_v44  ;;  %808 = vmatprep.mubr.bf16.mxu1 %v1696_v45 }
  0x5f   : > { %745 = vmatmul.mubr.bf16.gmra.mrb[28].mxu0 %v1698_v46  ;;  %809 = vmatmul.mubr.bf16.gmra.mrb[28].mxu1 %v1699_v47 }
  0xfa   : > { %v1500_v48 = vpop.f32.mrb[0].mxu0  ;;  %v1548_v49 = vpop.f32.mrb[0].mxu1 }
  0xfb   : > { %v1501_v50 = vpop.f32.mrb[1].mxu0  ;;  %v1549_v52 = vpop.f32.mrb[1].mxu1 }
  0xfc   : > { %v1502_v53 = vadd.f32 %v1501_v50, %v1500_v48  ;;  %v1550_v54 = vadd.f32 %v1549_v52, %v1548_v49  ;;  %v1503_v55 = vpop.f32.mrb[2].mxu0  ;;  %v1551_v56 = vpop.f32.mrb[2].mxu1 }
  0xfd   : > { %v1504_v57 = vpop.f32.mrb[3].mxu0  ;;  %v1552_v58 = vpop.f32.mrb[3].mxu1 }
  0xfe   : > { %v923_v59 = vadd.f32 %v1502_v53, %v1853_v51  ;;  %v939_v60 = vadd.f32 %v1550_v54, %v1853_v51  ;;  %v1505_v61 = vadd.f32 %v1504_v57, %v1503_v55  ;;  %v1553_v62 = vadd.f32 %v1552_v58, %v1551_v56 }
 0x100   : > { %v924_v63 = vadd.f32 %v1505_v61, %v1853_v51  ;;  %v940_v0 = vadd.f32 %v1553_v62, %v1853_v51  ;;  %v955_v1 = vmax.f32 %v923_v59, 0.0  ;;  %v971_v2 = vmax.f32 %v939_v60, 0.0 }
 0x102   : > { %v956_v3 = vmax.f32 %v924_v63, 0.0  ;;  %v972_v4 = vmax.f32 %v940_v0, 0.0  ;;  %v1506_v5 = vpop.f32.mrb[4].mxu0  ;;  %v1554_v6 = vpop.f32.mrb[4].mxu1 }
 0x103   : > { %v1507_v7 = vpop.f32.mrb[5].mxu0  ;;  %v1555_v8 = vpop.f32.mrb[5].mxu1 }
 0x104   : > { %v1392_v9 = vpack.c.bf16 %v956_v3, %v955_v1  ;;  %v1432_v10 = vpack.c.bf16 %v972_v4, %v971_v2  ;;  %v1508_v11 = vadd.f32 %v1507_v7, %v1506_v5  ;;  %v1556_v12 = vadd.f32 %v1555_v8, %v1554_v6  ;;  %v1509_v13 = vpop.f32.mrb[6].mxu0  ;;  %v1557_v14 = vpop.f32.mrb[6].mxu1 }
 0x105   : > { %v1510_v15 = vpop.f32.mrb[7].mxu0  ;;  %v1558_v16 = vpop.f32.mrb[7].mxu1 }
 0x106   : > { %1393 = vst [vmem:[%s1863_s8] sm:$0xff] %v1392_v9   ;;  %1476 = vst [vmem:[%s1863_s8 + $0x40] sm:$0xff] %v1432_v10   ;;  %v925_v17 = vadd.f32 %v1508_v11, %v1853_v51  ;;  %v941_v18 = vadd.f32 %v1556_v12, %v1853_v51  ;;  %v1511_v19 = vadd.f32 %v1510_v15, %v1509_v13 }
 0x107   : > { %v1559_v20 = vadd.f32 %v1558_v16, %v1557_v14 }
 0x108   : > { %v926_v21 = vadd.f32 %v1511_v19, %v1853_v51  ;;  %v957_v23 = vmax.f32 %v925_v17, 0.0  ;;  %v973_v24 = vmax.f32 %v941_v18, 0.0 }
 0x109   : > { %v942_v22 = vadd.f32 %v1559_v20, %v1853_v51 }
 0x10a   : > { %v958_v25 = vmax.f32 %v926_v21, 0.0  ;;  %v1512_v27 = vpop.f32.mrb[8].mxu0  ;;  %v1560_v28 = vpop.f32.mrb[8].mxu1 }
 0x10b   : > { %v974_v26 = vmax.f32 %v942_v22, 0.0  ;;  %v1513_v29 = vpop.f32.mrb[9].mxu0  ;;  %v1561_v30 = vpop.f32.mrb[9].mxu1 }
 0x10c   : > { %v1397_v31 = vpack.c.bf16 %v958_v25, %v957_v23  ;;  %v1514_v33 = vadd.f32 %v1513_v29, %v1512_v27  ;;  %v1562_v34 = vadd.f32 %v1561_v30, %v1560_v28  ;;  %v1515_v35 = vpop.f32.mrb[10].mxu0  ;;  %v1563_v36 = vpop.f32.mrb[10].mxu1 }
 0x10d   : > { %v1437_v32 = vpack.c.bf16 %v974_v26, %v973_v24  ;;  %v1516_v37 = vpop.f32.mrb[11].mxu0  ;;  %v1564_v38 = vpop.f32.mrb[11].mxu1 }
 0x10e   : > { %1469 = vst [vmem:[%s1863_s8 + $0x8] sm:$0xff] %v1397_v31   ;;  %v927_v39 = vadd.f32 %v1514_v33, %v1853_v51  ;;  %v943_v40 = vadd.f32 %v1562_v34, %v1853_v51  ;;  %v1517_v41 = vadd.f32 %v1516_v37, %v1515_v35  ;;  %v1565_v42 = vadd.f32 %v1564_v38, %v1563_v36 }
 0x10f   : > { %1477 = vst [vmem:[%s1863_s8 + $0x48] sm:$0xff] %v1437_v32  }
 0x110   : > { %v928_v43 = vadd.f32 %v1517_v41, %v1853_v51  ;;  %v944_v44 = vadd.f32 %v1565_v42, %v1853_v51  ;;  %v959_v45 = vmax.f32 %v927_v39, 0.0  ;;  %v975_v46 = vmax.f32 %v943_v40, 0.0 }
 0x112   : > { %v960_v47 = vmax.f32 %v928_v43, 0.0  ;;  %v976_v48 = vmax.f32 %v944_v44, 0.0  ;;  %v1518_v49 = vpop.f32.mrb[12].mxu0  ;;  %v1566_v50 = vpop.f32.mrb[12].mxu1 }
 0x113   : > { %v1519_v52 = vpop.f32.mrb[13].mxu0  ;;  %v1567_v53 = vpop.f32.mrb[13].mxu1 }
 0x114   : > { %v1402_v54 = vpack.c.bf16 %v960_v47, %v959_v45  ;;  %v1442_v55 = vpack.c.bf16 %v976_v48, %v975_v46  ;;  %v1520_v56 = vadd.f32 %v1519_v52, %v1518_v49  ;;  %v1568_v57 = vadd.f32 %v1567_v53, %v1566_v50  ;;  %v1521_v58 = vpop.f32.mrb[14].mxu0  ;;  %v1569_v59 = vpop.f32.mrb[14].mxu1 }
 0x115   : > { %v1522_v60 = vpop.f32.mrb[15].mxu0  ;;  %v1570_v61 = vpop.f32.mrb[15].mxu1 }
 0x116   : > { %1470 = vst [vmem:[%s1863_s8 + $0x10] sm:$0xff] %v1402_v54   ;;  %1478 = vst [vmem:[%s1863_s8 + $0x50] sm:$0xff] %v1442_v55   ;;  %v929_v62 = vadd.f32 %v1520_v56, %v1853_v51  ;;  %v945_v63 = vadd.f32 %v1568_v57, %v1853_v51  ;;  %v1523_v0 = vadd.f32 %v1522_v60, %v1521_v58 }
 0x117   : > { %v1571_v1 = vadd.f32 %v1570_v61, %v1569_v59 }
 0x118   : > { %v930_v2 = vadd.f32 %v1523_v0, %v1853_v51  ;;  %v961_v4 = vmax.f32 %v929_v62, 0.0  ;;  %v977_v5 = vmax.f32 %v945_v63, 0.0 }
 0x119   : > { %v946_v3 = vadd.f32 %v1571_v1, %v1853_v51 }
 0x11a   : > { %v962_v6 = vmax.f32 %v930_v2, 0.0  ;;  %v1524_v8 = vpop.f32.mrb[16].mxu0  ;;  %v1572_v9 = vpop.f32.mrb[16].mxu1 }
 0x11b   : > { %v978_v7 = vmax.f32 %v946_v3, 0.0  ;;  %v1525_v10 = vpop.f32.mrb[17].mxu0  ;;  %v1573_v11 = vpop.f32.mrb[17].mxu1 }
 0x11c   : > { %v1407_v12 = vpack.c.bf16 %v962_v6, %v961_v4  ;;  %v1526_v14 = vadd.f32 %v1525_v10, %v1524_v8  ;;  %v1574_v15 = vadd.f32 %v1573_v11, %v1572_v9  ;;  %v1527_v16 = vpop.f32.mrb[18].mxu0  ;;  %v1575_v17 = vpop.f32.mrb[18].mxu1 }
 0x11d   : > { %v1447_v13 = vpack.c.bf16 %v978_v7, %v977_v5  ;;  %v1528_v18 = vpop.f32.mrb[19].mxu0  ;;  %v1576_v19 = vpop.f32.mrb[19].mxu1 }
 0x11e   : > { %1471 = vst [vmem:[%s1863_s8 + $0x18] sm:$0xff] %v1407_v12   ;;  %v931_v20 = vadd.f32 %v1526_v14, %v1853_v51  ;;  %v947_v21 = vadd.f32 %v1574_v15, %v1853_v51  ;;  %v1529_v22 = vadd.f32 %v1528_v18, %v1527_v16  ;;  %v1577_v23 = vadd.f32 %v1576_v19, %v1575_v17 }
 0x11f   : > { %1479 = vst [vmem:[%s1863_s8 + $0x58] sm:$0xff] %v1447_v13  }
 0x120   : > { %v932_v24 = vadd.f32 %v1529_v22, %v1853_v51  ;;  %v948_v25 = vadd.f32 %v1577_v23, %v1853_v51  ;;  %v963_v26 = vmax.f32 %v931_v20, 0.0  ;;  %v979_v27 = vmax.f32 %v947_v21, 0.0 }
 0x122   : > { %v964_v28 = vmax.f32 %v932_v24, 0.0  ;;  %v980_v29 = vmax.f32 %v948_v25, 0.0  ;;  %v1530_v30 = vpop.f32.mrb[20].mxu0  ;;  %v1578_v31 = vpop.f32.mrb[20].mxu1 }
 0x123   : > { %v1531_v32 = vpop.f32.mrb[21].mxu0  ;;  %v1579_v33 = vpop.f32.mrb[21].mxu1 }
 0x124   : > { %v1412_v34 = vpack.c.bf16 %v964_v28, %v963_v26  ;;  %v1452_v35 = vpack.c.bf16 %v980_v29, %v979_v27  ;;  %v1532_v36 = vadd.f32 %v1531_v32, %v1530_v30  ;;  %v1580_v37 = vadd.f32 %v1579_v33, %v1578_v31  ;;  %v1533_v38 = vpop.f32.mrb[22].mxu0  ;;  %v1581_v39 = vpop.f32.mrb[22].mxu1 }
 0x125   : > { %v1534_v40 = vpop.f32.mrb[23].mxu0  ;;  %v1582_v41 = vpop.f32.mrb[23].mxu1 }
 0x126   : > { %1472 = vst [vmem:[%s1863_s8 + $0x20] sm:$0xff] %v1412_v34   ;;  %1480 = vst [vmem:[%s1863_s8 + $0x60] sm:$0xff] %v1452_v35   ;;  %v933_v42 = vadd.f32 %v1532_v36, %v1853_v51  ;;  %v949_v43 = vadd.f32 %v1580_v37, %v1853_v51  ;;  %v1535_v44 = vadd.f32 %v1534_v40, %v1533_v38 }
 0x127   : > { %v1583_v45 = vadd.f32 %v1582_v41, %v1581_v39 }
 0x128   : > { %v934_v46 = vadd.f32 %v1535_v44, %v1853_v51  ;;  %v965_v48 = vmax.f32 %v933_v42, 0.0  ;;  %v981_v49 = vmax.f32 %v949_v43, 0.0 }
 0x129   : > { %v950_v47 = vadd.f32 %v1583_v45, %v1853_v51 }
 0x12a   : > { %v966_v50 = vmax.f32 %v934_v46, 0.0  ;;  %v1536_v53 = vpop.f32.mrb[24].mxu0  ;;  %v1584_v54 = vpop.f32.mrb[24].mxu1 }
 0x12b   : > { %v982_v52 = vmax.f32 %v950_v47, 0.0  ;;  %v1537_v55 = vpop.f32.mrb[25].mxu0  ;;  %v1585_v56 = vpop.f32.mrb[25].mxu1 }
 0x12c   : > { %v1417_v57 = vpack.c.bf16 %v966_v50, %v965_v48  ;;  %v1538_v59 = vadd.f32 %v1537_v55, %v1536_v53  ;;  %v1586_v60 = vadd.f32 %v1585_v56, %v1584_v54  ;;  %v1539_v61 = vpop.f32.mrb[26].mxu0  ;;  %v1587_v62 = vpop.f32.mrb[26].mxu1 }
 0x12d   : > { %v1457_v58 = vpack.c.bf16 %v982_v52, %v981_v49  ;;  %v1540_v63 = vpop.f32.mrb[27].mxu0  ;;  %v1588_v0 = vpop.f32.mrb[27].mxu1 }
 0x12e   : > { %1473 = vst [vmem:[%s1863_s8 + $0x28] sm:$0xff] %v1417_v57   ;;  %v935_v1 = vadd.f32 %v1538_v59, %v1853_v51  ;;  %v951_v2 = vadd.f32 %v1586_v60, %v1853_v51  ;;  %v1541_v3 = vadd.f32 %v1540_v63, %v1539_v61  ;;  %v1589_v4 = vadd.f32 %v1588_v0, %v1587_v62 }
 0x12f   : > { %1481 = vst [vmem:[%s1863_s8 + $0x68] sm:$0xff] %v1457_v58  }
 0x130   : > { %v936_v5 = vadd.f32 %v1541_v3, %v1853_v51  ;;  %v952_v6 = vadd.f32 %v1589_v4, %v1853_v51  ;;  %v967_v7 = vmax.f32 %v935_v1, 0.0  ;;  %v983_v8 = vmax.f32 %v951_v2, 0.0 }
 0x132   : > { %v968_v9 = vmax.f32 %v936_v5, 0.0  ;;  %v984_v10 = vmax.f32 %v952_v6, 0.0  ;;  %v1542_v11 = vpop.f32.mrb[28].mxu0  ;;  %v1590_v12 = vpop.f32.mrb[28].mxu1 }
 0x133   : > { %v1543_v13 = vpop.f32.mrb[29].mxu0  ;;  %v1591_v14 = vpop.f32.mrb[29].mxu1 }
 0x134   : > { %v1422_v15 = vpack.c.bf16 %v968_v9, %v967_v7  ;;  %v1462_v16 = vpack.c.bf16 %v984_v10, %v983_v8  ;;  %v1544_v17 = vadd.f32 %v1543_v13, %v1542_v11  ;;  %v1592_v18 = vadd.f32 %v1591_v14, %v1590_v12  ;;  %v1545_v19 = vpop.f32.mrb[30].mxu0  ;;  %v1593_v20 = vpop.f32.mrb[30].mxu1 }
 0x135   : > { %v1546_v21 = vpop.f32.mrb[31].mxu0  ;;  %v1594_v22 = vpop.f32.mrb[31].mxu1 }
 0x136   : > { %1474 = vst [vmem:[%s1863_s8 + $0x30] sm:$0xff] %v1422_v15   ;;  %1482 = vst [vmem:[%s1863_s8 + $0x70] sm:$0xff] %v1462_v16   ;;  %v937_v23 = vadd.f32 %v1544_v17, %v1853_v51  ;;  %v953_v24 = vadd.f32 %v1592_v18, %v1853_v51  ;;  %v1547_v25 = vadd.f32 %v1546_v21, %v1545_v19 }
 0x137   : > { %v1595_v26 = vadd.f32 %v1594_v22, %v1593_v20 }
 0x138   : > { %v938_v27 = vadd.f32 %v1547_v25, %v1853_v51  ;;  %v969_v29 = vmax.f32 %v937_v23, 0.0  ;;  %v985_v30 = vmax.f32 %v953_v24, 0.0 }
 0x139   : > { %v954_v28 = vadd.f32 %v1595_v26, %v1853_v51 }
 0x13a   : > { %v970_v31 = vmax.f32 %v938_v27, 0.0 }
 0x13b   : > { %v986_v32 = vmax.f32 %v954_v28, 0.0 }
 0x13c   : > { %v1427_v33 = vpack.c.bf16 %v970_v31, %v969_v29 }
 0x13d   : > { %v1467_v34 = vpack.c.bf16 %v986_v32, %v985_v30 }
 0x13e   : > { %1475 = vst [vmem:[%s1863_s8 + $0x38] sm:$0xff] %v1427_v33  }
 0x13f   : > { %1483 = vst [vmem:[%s1863_s8 + $0x78] sm:$0xff] %v1467_v34  }
 0x140 PF: > { %s13_s14 = sadd.s32 1, %s1722_s14   ;;  %s1922_s12 = smov %s1718_s13 }
 0x141   : > { %p10_p5 = scmp.ge.s32.totalorder %s13_s14, 4   ;;  %s1923_s13 = smov %s1925_s15 }
 0x143   :  { %12 = sbr.rel (!%p10_p5) target bundleno = 2 (0x2), region = 76 }

// kernel: classifier_model_forward.23
= control target key start
LH: loop header
LB: loop body
LE: loop exit
PB: predicated region body
PF: predicated region fallthrough
CT: control target
= control target key end

     0   :  { %vm81_vm0 = vcmask 1043456   ;;  %s712_s0 = inlined_call_operand.vmem [shape: bf16[9,64,128], index: 0, kind: input, shape index: {}]   ;;  %s713_s1 = inlined_call_operand.vmem [shape: bf16[64,128], index: 1, kind: output, shape index: {}]  }
   0x1   :  { %v9_v0 = vld [vmem:[%s712_s0] sm:$0xf]  ;;  %v10_v3 = vld [vmem:[%s712_s0 + $0x4] sm:$0xf]  ;;  %v11_v39 = vld [vmem:[%s712_s0 + $0x8] sm:$0xf] }
   0x2   :  { %v17_v1 = vld [vmem:[%s712_s0 + $0x20] sm:$0xf]  ;;  %v18_v4 = vld [vmem:[%s712_s0 + $0x24] sm:$0xf]  ;;  %v84_v7 = vsel %vm81_vm0, %v9_v0, 4286644096 }
   0x3   :  { %v25_v2 = vld [vmem:[%s712_s0 + $0x40] sm:$0xf]  ;;  %v26_v5 = vld [vmem:[%s712_s0 + $0x44] sm:$0xf]  ;;  %v87_v8 = vsel %vm81_vm0, %v17_v1, 4286644096 }
   0x4   :  { %v33_v6 = vld [vmem:[%s712_s0 + $0x60] sm:$0xf]  ;;  %v91_v9 = vsel %vm81_vm0, %v25_v2, 4286644096  ;;  %v89_v11 = vmax.bf16 %v87_v8, %v84_v7  ;;  %v34_v12 = vld [vmem:[%s712_s0 + $0x64] sm:$0xf] }
   0x5   :  { %v41_v10 = vld [vmem:[%s712_s0 + $0x80] sm:$0xf]  ;;  %v95_v14 = vsel %vm81_vm0, %v33_v6, 4286644096  ;;  %v119_v16 = vsel %vm81_vm0, %v10_v3, 4286644096 }
   0x6   :  { %v49_v13 = vld [vmem:[%s712_s0 + $0xa0] sm:$0xf]  ;;  %v93_v15 = vmax.bf16 %v91_v9, %v89_v11  ;;  %v122_v17 = vsel %vm81_vm0, %v18_v4, 4286644096  ;;  %v126_v18 = vsel %vm81_vm0, %v26_v5, 4286644096 }
   0x7   :  { %v42_v19 = vld [vmem:[%s712_s0 + $0x84] sm:$0xf]  ;;  %v99_v20 = vsel %vm81_vm0, %v41_v10, 4286644096  ;;  %v124_v21 = vmax.bf16 %v122_v17, %v119_v16  ;;  %v57_v23 = vld [vmem:[%s712_s0 + $0xc0] sm:$0xf] }
   0x8   :  { %v50_v22 = vld [vmem:[%s712_s0 + $0xa4] sm:$0xf]  ;;  %v97_v24 = vmax.bf16 %v95_v14, %v93_v15  ;;  %v130_v25 = vsel %vm81_vm0, %v34_v12, 4286644096  ;;  %v103_v27 = vsel %vm81_vm0, %v49_v13, 4286644096 }
   0x9   :  { %v58_v26 = vld [vmem:[%s712_s0 + $0xc4] sm:$0xf]  ;;  %v128_v28 = vmax.bf16 %v126_v18, %v124_v21  ;;  %v65_v29 = vld [vmem:[%s712_s0 + $0xe0] sm:$0xf]  ;;  %v134_v32 = vsel %vm81_vm0, %v42_v19, 4286644096 }
   0xa   :  { %v73_v30 = vld [vmem:[%s712_s0 + $0x100] sm:$0xf]  ;;  %v101_v31 = vmax.bf16 %v99_v20, %v97_v24  ;;  %v66_v33 = vld [vmem:[%s712_s0 + $0xe4] sm:$0xf]  ;;  %v107_v34 = vsel %vm81_vm0, %v57_v23, 4286644096 }
   0xb   :  { %v132_v35 = vmax.bf16 %v130_v25, %v128_v28  ;;  %v138_v36 = vsel %vm81_vm0, %v50_v22, 4286644096  ;;  %v74_v37 = vld [vmem:[%s712_s0 + $0x104] sm:$0xf]  ;;  %v19_v40 = vld [vmem:[%s712_s0 + $0x28] sm:$0xf] }
   0xc   :  { %v105_v38 = vmax.bf16 %v103_v27, %v101_v31  ;;  %v27_v41 = vld [vmem:[%s712_s0 + $0x48] sm:$0xf]  ;;  %v111_v42 = vsel %vm81_vm0, %v65_v29, 4286644096  ;;  %v115_v43 = vsel %vm81_vm0, %v73_v30, 4286644096 }
   0xd   :  { %v136_v44 = vmax.bf16 %v134_v32, %v132_v35  ;;  %v142_v45 = vsel %vm81_vm0, %v58_v26, 4286644096  ;;  %v12_v47 = vld [vmem:[%s712_s0 + $0xc] sm:$0xf]  ;;  %v35_v48 = vld [vmem:[%s712_s0 + $0x68] sm:$0xf] }
   0xe   :  { %v109_v46 = vmax.bf16 %v107_v34, %v105_v38  ;;  %v43_v49 = vld [vmem:[%s712_s0 + $0x88] sm:$0xf]  ;;  %v154_v51 = vsel %vm81_vm0, %v11_v39, 4286644096  ;;  %v157_v52 = vsel %vm81_vm0, %v19_v40, 4286644096 }
   0xf   :  { %v140_v50 = vmax.bf16 %v138_v36, %v136_v44  ;;  %v161_v53 = vsel %vm81_vm0, %v27_v41, 4286644096  ;;  %v146_v55 = vsel %vm81_vm0, %v66_v33, 4286644096  ;;  %v20_v56 = vld [vmem:[%s712_s0 + $0x2c] sm:$0xf]  ;;  %v159_v58 = vmax.bf16 %v157_v52, %v154_v51 }
  0x10   :  { %v113_v54 = vmax.bf16 %v111_v42, %v109_v46  ;;  %v28_v57 = vld [vmem:[%s712_s0 + $0x4c] sm:$0xf]  ;;  %v150_v60 = vsel %vm81_vm0, %v74_v37, 4286644096  ;;  %v165_v62 = vsel %vm81_vm0, %v35_v48, 4286644096 }
  0x11   :  { %v144_v59 = vmax.bf16 %v142_v45, %v140_v50  ;;  %v36_v61 = vld [vmem:[%s712_s0 + $0x6c] sm:$0xf]  ;;  %v51_v63 = vld [vmem:[%s712_s0 + $0xa8] sm:$0xf]  ;;  %v163_v0 = vmax.bf16 %v161_v53, %v159_v58  ;;  %v169_v1 = vsel %vm81_vm0, %v43_v49, 4286644096 }
  0x12   :  { %v189_v2 = vsel %vm81_vm0, %v12_v47, 4286644096  ;;  %v117_v3 = vmax.bf16 %v115_v43, %v113_v54  ;;  %v192_v5 = vsel %vm81_vm0, %v20_v56, 4286644096  ;;  %v196_v6 = vsel %vm81_vm0, %v28_v57, 4286644096 }
  0x13   :  { %v148_v4 = vmax.bf16 %v146_v55, %v144_v59  ;;  %v44_v7 = vld [vmem:[%s712_s0 + $0x8c] sm:$0xf]  ;;  %v59_v8 = vld [vmem:[%s712_s0 + $0xc8] sm:$0xf]  ;;  %v167_v9 = vmax.bf16 %v165_v62, %v163_v0  ;;  %v194_v10 = vmax.bf16 %v192_v5, %v189_v2  ;;  %v173_v12 = vsel %vm81_vm0, %v51_v63, 4286644096 }
  0x14   :  { %v200_v13 = vsel %vm81_vm0, %v36_v61, 4286644096  ;;  %v52_v14 = vld [vmem:[%s712_s0 + $0xac] sm:$0xf]  ;;  %v67_v16 = vld [vmem:[%s712_s0 + $0xe8] sm:$0xf] }
  0x15   :  { %v152_v11 = vmax.bf16 %v150_v60, %v148_v4  ;;  %v60_v15 = vld [vmem:[%s712_s0 + $0xcc] sm:$0xf]  ;;  %v171_v17 = vmax.bf16 %v169_v1, %v167_v9  ;;  %v198_v18 = vmax.bf16 %v196_v6, %v194_v10  ;;  %v75_v20 = vld [vmem:[%s712_s0 + $0x108] sm:$0xf]  ;;  %v177_v21 = vsel %vm81_vm0, %v59_v8, 4286644096 }
  0x16   :  { %v204_v22 = vsel %vm81_vm0, %v44_v7, 4286644096  ;;  %v68_v23 = vld [vmem:[%s712_s0 + $0xec] sm:$0xf]  ;;  %v13_v26 = vld [vmem:[%s712_s0 + $0x10] sm:$0xf] }
  0x17   :  { %v395_v19 = vcombine.low %v117_v3, %v152_v11  ;;  %v175_v24 = vmax.bf16 %v173_v12, %v171_v17  ;;  %v202_v25 = vmax.bf16 %v200_v13, %v198_v18  ;;  %v21_v27 = vld [vmem:[%s712_s0 + $0x30] sm:$0xf]  ;;  %v76_v29 = vld [vmem:[%s712_s0 + $0x10c] sm:$0xf]  ;;  %v181_v30 = vsel %vm81_vm0, %v67_v16, 4286644096 }
  0x18   :  { %v29_v28 = vld [vmem:[%s712_s0 + $0x50] sm:$0xf]  ;;  %v208_v31 = vsel %vm81_vm0, %v52_v14, 4286644096  ;;  %v185_v33 = vsel %vm81_vm0, %v75_v20, 4286644096 }
  0x19   :  { %379 = vst [vmem:[%s713_s1] sm:$0xff] %v395_v19   ;;  %v179_v32 = vmax.bf16 %v177_v21, %v175_v24  ;;  %v206_v34 = vmax.bf16 %v204_v22, %v202_v25  ;;  %v212_v35 = vsel %vm81_vm0, %v60_v15, 4286644096  ;;  %v37_v36 = vld [vmem:[%s712_s0 + $0x70] sm:$0xf]  ;;  %v224_v37 = vsel %vm81_vm0, %v13_v26, 4286644096 }
  0x1a   :  { %v227_v38 = vsel %vm81_vm0, %v21_v27, 4286644096  ;;  %v231_v39 = vsel %vm81_vm0, %v29_v28, 4286644096  ;;  %v14_v42 = vld [vmem:[%s712_s0 + $0x14] sm:$0xf] }
  0x1b   :  { %v183_v40 = vmax.bf16 %v181_v30, %v179_v32  ;;  %v210_v41 = vmax.bf16 %v208_v31, %v206_v34  ;;  %v22_v43 = vld [vmem:[%s712_s0 + $0x34] sm:$0xf]  ;;  %v45_v44 = vld [vmem:[%s712_s0 + $0x90] sm:$0xf]  ;;  %v229_v45 = vmax.bf16 %v227_v38, %v224_v37  ;;  %v216_v46 = vsel %vm81_vm0, %v68_v23, 4286644096 }
  0x1c   :  { %v30_v47 = vld [vmem:[%s712_s0 + $0x54] sm:$0xf]  ;;  %v235_v48 = vsel %vm81_vm0, %v37_v36, 4286644096  ;;  %v220_v50 = vsel %vm81_vm0, %v76_v29, 4286644096 }
  0x1d   :  { %v214_v49 = vmax.bf16 %v212_v35, %v210_v41  ;;  %v38_v51 = vld [vmem:[%s712_s0 + $0x74] sm:$0xf]  ;;  %v53_v52 = vld [vmem:[%s712_s0 + $0xb0] sm:$0xf]  ;;  %v233_v53 = vmax.bf16 %v231_v39, %v229_v45  ;;  %v187_v54 = vmax.bf16 %v185_v33, %v183_v40  ;;  %v239_v55 = vsel %vm81_vm0, %v45_v44, 4286644096 }
  0x1e   :  { %v259_v56 = vsel %vm81_vm0, %v14_v42, 4286644096  ;;  %v262_v57 = vsel %vm81_vm0, %v22_v43, 4286644096  ;;  %v46_v59 = vld [vmem:[%s712_s0 + $0x94] sm:$0xf] }
  0x1f   :  { %v218_v58 = vmax.bf16 %v216_v46, %v214_v49  ;;  %v61_v60 = vld [vmem:[%s712_s0 + $0xd0] sm:$0xf]  ;;  %v237_v61 = vmax.bf16 %v235_v48, %v233_v53  ;;  %v264_v62 = vmax.bf16 %v262_v57, %v259_v56  ;;  %v266_v63 = vsel %vm81_vm0, %v30_v47, 4286644096  ;;  %v54_v3 = vld [vmem:[%s712_s0 + $0xb4] sm:$0xf] }
  0x20   :  { %v243_v0 = vsel %vm81_vm0, %v53_v52, 4286644096  ;;  %v270_v1 = vsel %vm81_vm0, %v38_v51, 4286644096  ;;  %v62_v4 = vld [vmem:[%s712_s0 + $0xd4] sm:$0xf] }
  0x21   :  { %v222_v2 = vmax.bf16 %v220_v50, %v218_v58  ;;  %v69_v5 = vld [vmem:[%s712_s0 + $0xf0] sm:$0xf]  ;;  %v241_v6 = vmax.bf16 %v239_v55, %v237_v61  ;;  %v268_v7 = vmax.bf16 %v266_v63, %v264_v62  ;;  %v247_v9 = vsel %vm81_vm0, %v61_v60, 4286644096  ;;  %v70_v12 = vld [vmem:[%s712_s0 + $0xf4] sm:$0xf] }
  0x22   :  { %v77_v8 = vld [vmem:[%s712_s0 + $0x110] sm:$0xf]  ;;  %v274_v10 = vsel %vm81_vm0, %v46_v59, 4286644096  ;;  %v15_v15 = vld [vmem:[%s712_s0 + $0x18] sm:$0xf] }
  0x23   :  { %v396_v11 = vcombine.low %v187_v54, %v222_v2  ;;  %v245_v13 = vmax.bf16 %v243_v0, %v241_v6  ;;  %v272_v14 = vmax.bf16 %v270_v1, %v268_v7  ;;  %v23_v16 = vld [vmem:[%s712_s0 + $0x38] sm:$0xf]  ;;  %v78_v18 = vld [vmem:[%s712_s0 + $0x114] sm:$0xf]  ;;  %v251_v19 = vsel %vm81_vm0, %v69_v5, 4286644096 }
  0x24   :  { %v31_v17 = vld [vmem:[%s712_s0 + $0x58] sm:$0xf]  ;;  %v278_v20 = vsel %vm81_vm0, %v54_v3, 4286644096  ;;  %v282_v23 = vsel %vm81_vm0, %v62_v4, 4286644096 }
  0x25   :  { %397 = vst [vmem:[%s713_s1 + $0x8] sm:$0xff] %v396_v11   ;;  %v249_v21 = vmax.bf16 %v247_v9, %v245_v13  ;;  %v276_v22 = vmax.bf16 %v274_v10, %v272_v14  ;;  %v16_v24 = vld [vmem:[%s712_s0 + $0x1c] sm:$0xf]  ;;  %v39_v25 = vld [vmem:[%s712_s0 + $0x78] sm:$0xf] }
  0x26   :  { %v294_v26 = vsel %vm81_vm0, %v15_v15, 4286644096  ;;  %v297_v27 = vsel %vm81_vm0, %v23_v16, 4286644096  ;;  %v301_v28 = vsel %vm81_vm0, %v31_v17, 4286644096 }
  0x27   :  { %v253_v29 = vmax.bf16 %v251_v19, %v249_v21  ;;  %v255_v30 = vsel %vm81_vm0, %v77_v8, 4286644096  ;;  %v280_v31 = vmax.bf16 %v278_v20, %v276_v22  ;;  %v24_v32 = vld [vmem:[%s712_s0 + $0x3c] sm:$0xf]  ;;  %v47_v33 = vld [vmem:[%s712_s0 + $0x98] sm:$0xf]  ;;  %v299_v34 = vmax.bf16 %v297_v27, %v294_v26 }
  0x28   :  { %v286_v35 = vsel %vm81_vm0, %v70_v12, 4286644096  ;;  %v32_v36 = vld [vmem:[%s712_s0 + $0x5c] sm:$0xf]  ;;  %v305_v37 = vsel %vm81_vm0, %v39_v25, 4286644096 }
  0x29   :  { %v284_v38 = vmax.bf16 %v282_v23, %v280_v31  ;;  %v290_v39 = vsel %vm81_vm0, %v78_v18, 4286644096  ;;  %v40_v40 = vld [vmem:[%s712_s0 + $0x7c] sm:$0xf]  ;;  %v55_v41 = vld [vmem:[%s712_s0 + $0xb8] sm:$0xf]  ;;  %v303_v42 = vmax.bf16 %v301_v28, %v299_v34  ;;  %v257_v43 = vmax.bf16 %v255_v30, %v253_v29 }
  0x2a   :  { %v309_v44 = vsel %vm81_vm0, %v47_v33, 4286644096  ;;  %v329_v45 = vsel %vm81_vm0, %v16_v24, 4286644096  ;;  %v332_v46 = vsel %vm81_vm0, %v24_v32, 4286644096 }
  0x2b   :  { %v288_v47 = vmax.bf16 %v286_v35, %v284_v38  ;;  %v48_v48 = vld [vmem:[%s712_s0 + $0x9c] sm:$0xf]  ;;  %v63_v49 = vld [vmem:[%s712_s0 + $0xd8] sm:$0xf]  ;;  %v307_v50 = vmax.bf16 %v305_v37, %v303_v42  ;;  %v334_v51 = vmax.bf16 %v332_v46, %v329_v45  ;;  %v336_v52 = vsel %vm81_vm0, %v32_v36, 4286644096 }
  0x2c   :  { %v313_v53 = vsel %vm81_vm0, %v55_v41, 4286644096  ;;  %v340_v54 = vsel %vm81_vm0, %v40_v40, 4286644096  ;;  %v56_v56 = vld [vmem:[%s712_s0 + $0xbc] sm:$0xf] }
  0x2d   :  { %v292_v55 = vmax.bf16 %v290_v39, %v288_v47  ;;  %v71_v57 = vld [vmem:[%s712_s0 + $0xf8] sm:$0xf]  ;;  %v311_v58 = vmax.bf16 %v309_v44, %v307_v50  ;;  %v338_v59 = vmax.bf16 %v336_v52, %v334_v51  ;;  %v317_v60 = vsel %vm81_vm0, %v63_v49, 4286644096  ;;  %v64_v63 = vld [vmem:[%s712_s0 + $0xdc] sm:$0xf] }
  0x2e   :  { %v344_v61 = vsel %vm81_vm0, %v48_v48, 4286644096  ;;  %v321_v2 = vsel %vm81_vm0, %v71_v57, 4286644096  ;;  %v348_v3 = vsel %vm81_vm0, %v56_v56, 4286644096 }
  0x2f   :  { %v398_v62 = vcombine.low %v257_v43, %v292_v55  ;;  %v315_v0 = vmax.bf16 %v313_v53, %v311_v58  ;;  %v342_v1 = vmax.bf16 %v340_v54, %v338_v59  ;;  %v72_v4 = vld [vmem:[%s712_s0 + $0xfc] sm:$0xf]  ;;  %v79_v5 = vld [vmem:[%s712_s0 + $0x118] sm:$0xf]  ;;  %v352_v8 = vsel %vm81_vm0, %v64_v63, 4286644096 }
  0x30   :  { %v80_v9 = vld [vmem:[%s712_s0 + $0x11c] sm:$0xf]  ;;  %v325_v12 = vsel %vm81_vm0, %v79_v5, 4286644096  ;;  %v356_v13 = vsel %vm81_vm0, %v72_v4, 4286644096 }
  0x31   :  { %399 = vst [vmem:[%s713_s1 + $0x10] sm:$0xff] %v398_v62   ;;  %v319_v6 = vmax.bf16 %v317_v60, %v315_v0  ;;  %v346_v7 = vmax.bf16 %v344_v61, %v342_v1  ;;  %v360_v15 = vsel %vm81_vm0, %v80_v9, 4286644096 }
  0x33   :  { %v323_v10 = vmax.bf16 %v321_v2, %v319_v6  ;;  %v350_v11 = vmax.bf16 %v348_v3, %v346_v7 }
  0x35   :  { %v354_v14 = vmax.bf16 %v352_v8, %v350_v11  ;;  %v327_v16 = vmax.bf16 %v325_v12, %v323_v10 }
  0x37   :  { %v358_v17 = vmax.bf16 %v356_v13, %v354_v14 }
  0x39   :  { %v362_v18 = vmax.bf16 %v360_v15, %v358_v17 }
  0x3b   :  { %v400_v19 = vcombine.low %v327_v16, %v362_v18 }
  0x3d   :  { %401 = vst [vmem:[%s713_s1 + $0x18] sm:$0xff] %v400_v19  }

// kernel: classifier_model_forward.24
= control target key start
LH: loop header
LB: loop body
LE: loop exit
PB: predicated region body
PF: predicated region fallthrough
CT: control target
= control target key end

     0   :  { %s980_s12 = smov 0   ;;  %s982_s13 = smov 0   ;;  %s1099_s0 = inlined_call_operand.vmem [shape: bf16[128,640], index: 0, kind: input, shape index: {}]   ;;  %s1100_s1 = inlined_call_operand.vmem [shape: bf16[640,128], index: 1, kind: input, shape index: {}]   ;;  %s1101_s2 = inlined_call_operand.vmem [shape: f32[1,128], index: 2, kind: input, shape index: {}]   ;;  %s1102_s3 = inlined_call_operand.vmem [shape: bf16[128,128], index: 3, kind: output, shape index: {}]  }
   0x1   :  { %s984_s14 = smov 0   ;;  %s986_s15 = smov 0  }
   0x2   :  { %s988_s16 = smov 0   ;;  %s990_s17 = smov 0  }
   0x3   :  { %s992_s18 = smov 0  }
   0x4 LB: > { %s25_s19 = sadd.s32 1, %s949_s16  ;;  %s32_s20 = sadd.s32 1, %s953_s17  ;;  %s957_s18 = sphi %s992_s18, %s13_s18   ;;  %s953_s17 = sphi %s990_s17, %s1108_s17   ;;  %s949_s16 = sphi %s988_s16, %s1107_s16   ;;  %s945_s15 = sphi %s986_s15, %s1106_s15   ;;  %s941_s14 = sphi %s984_s14, %s1105_s14   ;;  %s937_s13 = sphi %s982_s13, %s1104_s13   ;;  %s933_s12 = sphi %s980_s12, %s1103_s12  }
   0x5   : > { %p26_p0 = scmp.ge.s32.totalorder %s25_s19, 5  ;;  %p48_p1 = scmp.ne.s32.totalorder %s937_s13, %s933_s12 }
   0x6   : > { %p49_p2 = scmp.eq.s32.totalorder %s957_s18, 0  ;;  %s41_s24 = sadd.s32 1, %s937_s13 }
   0x7   : > { %s1110_s19 = smov (%p26_p0, %s25_s19), 0  ;;  %s1112_s20 = smov (!%p26_p0, %s32_s20), %s953_s17 }
   0x8   : > { %p50_p3 = por %p49_p2, %p48_p1  ;;  %p34_p4 = scmp.ge.s32.totalorder %s1112_s20, 2 }
   0x9   : > { %s37_s21 = ssub.s32 %s949_s16, %s1110_s19  ;;  %p714_p6 = scmp.ge.s32.totalorder %s957_s18, 10 }
   0xa   : > { %s1114_s20 = smov (%p34_p4, %s1112_s20), 0 }
   0xb   : > { %s36_s22 = ssub.s32 %s953_s17, %s1114_s20  ;;  %162 = sbr.rel (%p714_p6) target bundleno = 30 (0x1e), region = 20 }
   0xc   : > { %s38_s23 = sor.u32 %s37_s21, %s36_s22 }
   0xd   : > { %p39_p5 = scmp.eq.s32.totalorder %s38_s23, 0 }
   0xf   : > { %s1031_s25 = scalar_select %p39_p5, %s937_s13, %s41_s24  }
  0x12   : > { %165 = sbr.rel (!%p50_p3) target bundleno = 30 (0x1e), region = 24  ;;  %s167_s26 = sand.u32 (%p50_p3), 1, %s937_s13  }
  0x13   : > { %s833_s27 = smul.u32 (%p50_p3), 40, %s953_s17  ;;  %s715_s28 = sshll.u32 (%p50_p3), %s167_s26, 5 }
  0x14   : > { %s169_s7 = scalar_lea.vmem (%p50_p3), [#allocation3], %s715_s28 }
  0x15   : > { %s172_s29 = sadd.s32 (%p50_p3), %s949_s16, %s833_s27 }
  0x16   : > { %s718_s30 = sshll.u32 (%p50_p3), %s172_s29, 2 }
  0x17   : > { %s174_s6 = scalar_lea.vmem (%p50_p3), %s1099_s0, %s718_s30 }
  0x18   : > { %v190_v0 = vld [vmem:[%s174_s6] sm:$0xf] (%p50_p3)  ;;  %v192_v1 = vld [vmem:[%s174_s6 + $0x14] sm:$0xf] (%p50_p3)  ;;  %v194_v2 = vld [vmem:[%s174_s6 + $0x28] sm:$0xf] (%p50_p3) }
  0x19   : > { %191 = vst [vmem:[%s169_s7] sm:$0xf] %v190_v0  ;;  %193 = vst [vmem:[%s169_s7 + $0x4] sm:$0xf] %v192_v1  ;;  %v196_v3 = vld [vmem:[%s174_s6 + $0x3c] sm:$0xf] }
  0x1a   : > { %195 = vst [vmem:[%s169_s7 + $0x8] sm:$0xf] %v194_v2  ;;  %v198_v4 = vld [vmem:[%s174_s6 + $0x50] sm:$0xf]  ;;  %v200_v5 = vld [vmem:[%s174_s6 + $0x64] sm:$0xf] }
  0x1b   : > { %197 = vst [vmem:[%s169_s7 + $0xc] sm:$0xf] %v196_v3  ;;  %199 = vst [vmem:[%s169_s7 + $0x10] sm:$0xf] %v198_v4  ;;  %v202_v6 = vld [vmem:[%s174_s6 + $0x78] sm:$0xf] }
  0x1c   : > { %201 = vst [vmem:[%s169_s7 + $0x14] sm:$0xf] %v200_v5  ;;  %v204_v7 = vld [vmem:[%s174_s6 + $0x8c] sm:$0xf]  ;;  %203 = vst [vmem:[%s169_s7 + $0x18] sm:$0xf] %v202_v6 }
  0x1d   : > { %205 = vst [vmem:[%s169_s7 + $0x1c] sm:$0xf] %v204_v7 }
  0x1e PF: > { %p719_p7 = scmp.ge.s32.totalorder %s957_s18, 1  ;;  %p255_p8 = scmp.lt.s32.totalorder %s957_s18, 11 }
  0x20   : > { %p256_p9 = pnand %p719_p7, %p255_p8 }
  0x21   : > { %s262_s8 = sand.u32 (!%p256_p9), 1, %s933_s12   ;;  %s721_s9 = sshll.u32 (!%p256_p9), %s941_s14, 4 }
  0x22   : > { %259 = sbr.rel (%p256_p9) target bundleno = 317 (0x13d), region = 69  ;;  %s720_s10 = sshll.u32 (!%p256_p9), %s262_s8, 5 }
  0x23   : > { %p301_p10 = scmp.lt.s32.totalorder (!%p256_p9), %s721_s9, 79  ;;  %s723_s11 = sshll.u32 (!%p256_p9), %s945_s15, 3 }
  0x24   : > { %p313_p11 = scmp.lt.s32.totalorder (!%p256_p9), %s723_s11, 15  ;;  %s1055_s12 = scalar_lea.vmem (!%p256_p9), [#allocation3], %s720_s10 }
  0x25   : > { %p725_p12 = scmp.ne.s32.totalorder (!%p256_p9), %s941_s14, 0 }
  0x29   : > { %s1116_s9 = smov (!%p301_p10, %s721_s9), 79  ;;  %s1118_s11 = smov (!%p313_p11, %s723_s11), 15 }
  0x2a   : > { %s722_s21 = sshll.u32 %s1116_s9, 2  ;;  %s724_s26 = sshll.u32 %s1118_s11, 2  ;;  %v959_v8 = vmov (!%p725_p12), 0.0  }
  0x2b   : > { %s1048_s24 = scalar_lea.vmem %s1100_s1, %s722_s21  ;;  %s1053_s29 = scalar_lea.vmem %s1102_s3, %s724_s26  ;;  %326 = vst [vmem:[#allocation2] sm:$0xff] (!%p725_p12), %v959_v8  ;;  %327 = vst [vmem:[#allocation2 + $0x8] sm:$0xff] (!%p725_p12), %v959_v8 }
  0x2c   : > { %325 = sbr.rel (%p725_p12) target bundleno = 51 (0x33), region = 77  ;;  %328 = vst [vmem:[#allocation2 + $0x10] sm:$0xff] (!%p725_p12), %v959_v8  ;;  %329 = vst [vmem:[#allocation2 + $0x18] sm:$0xff] (!%p725_p12), %v959_v8 }
  0x2d   : > { %330 = vst [vmem:[#allocation2 + $0x20] sm:$0xff] (!%p725_p12), %v959_v8  ;;  %331 = vst [vmem:[#allocation2 + $0x28] sm:$0xff] (!%p725_p12), %v959_v8 }
  0x2e   : > { %332 = vst [vmem:[#allocation2 + $0x30] sm:$0xff] (!%p725_p12), %v959_v8  ;;  %333 = vst [vmem:[#allocation2 + $0x38] sm:$0xff] (!%p725_p12), %v959_v8 }
  0x33 PF: > { %v891_v9 = vld [vmem:[%s1048_s24] sm:$0xff]   ;;  %v892_v10 = vld [vmem:[%s1048_s24 + $0x8] sm:$0xff]   ;;  %v893_v11 = vld [vmem:[%s1048_s24 + $0x10] sm:$0xff]   ;;  %p738_p13 = scmp.ne.s32.totalorder %s941_s14, 4 }
  0x34   : > { %793 = vmatprep.subr.bf16.mxu0 %v891_v9  ;;  %817 = vmatprep.subr.bf16.mxu1 %v891_v9  ;;  %v894_v12 = vld [vmem:[%s1048_s24 + $0x18] sm:$0xff]   ;;  %v899_v13 = vld [vmem:[%s1055_s12] sm:$0xff]   ;;  %v900_v14 = vld [vmem:[%s1055_s12 + $0x10] sm:$0xff]  }
  0x35   : > { %794 = vmatpush3.bf16.msra.mxu0 %v891_v9  ;;  %825 = vmatpush3.bf16.msra.mxu1 %v891_v9  ;;  %v895_v15 = vld [vmem:[%s1048_s24 + $0x20] sm:$0xff]   ;;  %v896_v16 = vld [vmem:[%s1048_s24 + $0x28] sm:$0xff]   ;;  %v897_v17 = vld [vmem:[%s1048_s24 + $0x30] sm:$0xff]  }
  0x36   : > { %795 = vmatprep.subr.bf16.mxu0 %v892_v10  ;;  %818 = vmatprep.subr.bf16.mxu1 %v892_v10  ;;  %v898_v18 = vld [vmem:[%s1048_s24 + $0x38] sm:$0xff]   ;;  %v901_v19 = vld [vmem:[%s1055_s12 + $0x8] sm:$0xff]   ;;  %v336_v21 = vld [vmem:[#allocation2 + $0x10] sm:$0xff] }
  0x37   : > { %809 = vmatprep.mubr.bf16.mxu0 %v899_v13  ;;  %813 = vmatprep.mubr.bf16.mxu1 %v900_v14  ;;  %v902_v20 = vld [vmem:[%s1055_s12 + $0x18] sm:$0xff]   ;;  %v340_v22 = vld [vmem:[#allocation2 + $0x30] sm:$0xff]  ;;  %v334_v23 = vld [vmem:[#allocation2] sm:$0xff] }
  0x38   : > { %v338_v24 = vld [vmem:[#allocation2 + $0x20] sm:$0xff]  ;;  %v337_v27 = vld [vmem:[#allocation2 + $0x18] sm:$0xff]  ;;  %v335_v33 = vld [vmem:[#allocation2 + $0x8] sm:$0xff] }
  0x39   : > { %796 = vmatpush3.bf16.msra.mxu0 %v892_v10  ;;  %826 = vmatpush3.bf16.msra.mxu1 %v892_v10  ;;  %v341_v28 = vld [vmem:[#allocation2 + $0x38] sm:$0xff]  ;;  %v339_v34 = vld [vmem:[#allocation2 + $0x28] sm:$0xff]  ;;  %v739_v47 = vld [vmem:[%s1101_s2] ss:$0 sm:$0xff] (!%p738_p13) }
  0x3a   : > { %797 = vmatprep.subr.bf16.mxu0 %v893_v11  ;;  %819 = vmatprep.subr.bf16.mxu1 %v893_v11 }
  0x3d   : > { %798 = vmatpush3.bf16.msra.mxu0 %v893_v11  ;;  %827 = vmatpush3.bf16.msra.mxu1 %v893_v11 }
  0x3e   : > { %799 = vmatprep.subr.bf16.mxu0 %v894_v12  ;;  %820 = vmatprep.subr.bf16.mxu1 %v894_v12 }
  0x41   : > { %800 = vmatpush3.bf16.msra.mxu0 %v894_v12  ;;  %828 = vmatpush3.bf16.msra.mxu1 %v894_v12 }
  0x42   : > { %801 = vmatprep.subr.bf16.mxu0 %v895_v15  ;;  %821 = vmatprep.subr.bf16.mxu1 %v895_v15 }
  0x45   : > { %802 = vmatpush3.bf16.msra.mxu0 %v895_v15  ;;  %829 = vmatpush3.bf16.msra.mxu1 %v895_v15 }
  0x46   : > { %803 = vmatprep.subr.bf16.mxu0 %v896_v16  ;;  %822 = vmatprep.subr.bf16.mxu1 %v896_v16 }
  0x49   : > { %804 = vmatpush3.bf16.msra.mxu0 %v896_v16  ;;  %830 = vmatpush3.bf16.msra.mxu1 %v896_v16 }
  0x4a   : > { %805 = vmatprep.subr.bf16.mxu0 %v897_v17  ;;  %823 = vmatprep.subr.bf16.mxu1 %v897_v17 }
  0x4d   : > { %806 = vmatpush3.bf16.msra.mxu0 %v897_v17  ;;  %831 = vmatpush3.bf16.msra.mxu1 %v897_v17 }
  0x4e   : > { %807 = vmatprep.subr.bf16.mxu0 %v898_v18  ;;  %824 = vmatprep.subr.bf16.mxu1 %v898_v18 }
  0x51   : > { %808 = vmatpush3.bf16.msra.mxu0 %v898_v18  ;;  %832 = vmatpush3.bf16.msra.mxu1 %v898_v18 }
  0x54   : > { %810 = vmatmul.mubr.bf16.vlgmr.msra.gmra.mrb[0].mxu0 %v901_v19  ;;  %814 = vmatmul.mubr.bf16.vlgmr.msra.gmra.mrb[0].mxu1 %v902_v20 }
 0x127   : > { %v811_v25 = vpop.f32.mrb[0].mxu0  ;;  %v815_v26 = vpop.f32.mrb[0].mxu1  ;;  %522 = sbr.rel (%p738_p13) target bundleno = 317 (0x13d), region = 81 }
 0x128   : > { %v505_v29 = vadd.f32 %v811_v25, %v336_v21  ;;  %v509_v30 = vadd.f32 %v815_v26, %v340_v22  ;;  %v472_v31 = vpop.f32.mrb[1].mxu0  ;;  %v488_v32 = vpop.f32.mrb[1].mxu1 }
 0x129   : > { %v503_v35 = vadd.f32 %v472_v31, %v334_v23  ;;  %v507_v36 = vadd.f32 %v488_v32, %v338_v24  ;;  %v812_v37 = vpop.f32.mrb[2].mxu0  ;;  %v816_v38 = vpop.f32.mrb[2].mxu1 }
 0x12a   : > { %513 = vst [vmem:[#allocation2 + $0x10] sm:$0xff] %v505_v29  ;;  %517 = vst [vmem:[#allocation2 + $0x30] sm:$0xff] %v509_v30  ;;  %v506_v39 = vadd.f32 %v812_v37, %v337_v27  ;;  %v510_v40 = vadd.f32 %v816_v38, %v341_v28  ;;  %v475_v41 = vpop.f32.mrb[3].mxu0  ;;  %v491_v42 = vpop.f32.mrb[3].mxu1 }
 0x12b   : > { %511 = vst [vmem:[#allocation2] sm:$0xff] %v503_v35  ;;  %515 = vst [vmem:[#allocation2 + $0x20] sm:$0xff] %v507_v36  ;;  %v504_v43 = vadd.f32 %v475_v41, %v335_v33  ;;  %v508_v44 = vadd.f32 %v491_v42, %v339_v34 }
 0x12c   : > { %514 = vst [vmem:[#allocation2 + $0x18] sm:$0xff] %v506_v39  ;;  %518 = vst [vmem:[#allocation2 + $0x38] sm:$0xff] %v510_v40 }
 0x12d   : > { %512 = vst [vmem:[#allocation2 + $0x8] sm:$0xff] %v504_v43  ;;  %516 = vst [vmem:[#allocation2 + $0x28] sm:$0xff] %v508_v44 }
 0x131   : > { %v525_v50 = vld [vmem:[#allocation2 + $0x10] sm:$0xff] }
 0x132   : > { %v523_v45 = vld [vmem:[#allocation2] sm:$0xff]  ;;  %v540_v53 = vadd.f32 %v739_v47, %v525_v50  ;;  %v529_v57 = vld [vmem:[#allocation2 + $0x30] sm:$0xff] }
 0x133   : > { %v538_v48 = vadd.f32 %v739_v47, %v523_v45  ;;  %v526_v51 = vld [vmem:[#allocation2 + $0x18] sm:$0xff]  ;;  %v527_v52 = vld [vmem:[#allocation2 + $0x20] sm:$0xff]  ;;  %v544_v62 = vadd.f32 %v739_v47, %v529_v57 }
 0x134   : > { %v524_v46 = vld [vmem:[#allocation2 + $0x8] sm:$0xff]  ;;  %v541_v54 = vadd.f32 %v739_v47, %v526_v51  ;;  %v542_v56 = vadd.f32 %v739_v47, %v527_v52  ;;  %v530_v58 = vld [vmem:[#allocation2 + $0x38] sm:$0xff]  ;;  %v548_v63 = vmax.f32 %v540_v53, 0.0 }
 0x135   : > { %v539_v49 = vadd.f32 %v739_v47, %v524_v46  ;;  %v528_v55 = vld [vmem:[#allocation2 + $0x28] sm:$0xff]  ;;  %v546_v59 = vmax.f32 %v538_v48, 0.0  ;;  %v545_v2 = vadd.f32 %v739_v47, %v530_v58  ;;  %v552_v5 = vmax.f32 %v544_v62, 0.0 }
 0x136   : > { %v543_v61 = vadd.f32 %v739_v47, %v528_v55  ;;  %v549_v0 = vmax.f32 %v541_v54, 0.0  ;;  %v550_v1 = vmax.f32 %v542_v56, 0.0 }
 0x137   : > { %v547_v60 = vmax.f32 %v539_v49, 0.0  ;;  %v553_v7 = vmax.f32 %v545_v2, 0.0 }
 0x138   : > { %v551_v4 = vmax.f32 %v543_v61, 0.0  ;;  %v766_v6 = vpack.c.bf16 %v549_v0, %v548_v63 }
 0x139   : > { %v761_v3 = vpack.c.bf16 %v547_v60, %v546_v59  ;;  %v776_v9 = vpack.c.bf16 %v553_v7, %v552_v5 }
 0x13a   : > { %v771_v8 = vpack.c.bf16 %v551_v4, %v550_v1  ;;  %778 = vst [vmem:[%s1053_s29 + $0x8] sm:$0xff] %v766_v6  }
 0x13b   : > { %762 = vst [vmem:[%s1053_s29] sm:$0xff] %v761_v3   ;;  %780 = vst [vmem:[%s1053_s29 + $0x18] sm:$0xff] %v776_v9  }
 0x13c   : > { %779 = vst [vmem:[%s1053_s29 + $0x10] sm:$0xff] %v771_v8  }
 0x13d PF: > { %s13_s18 = sadd.s32 1, %s957_s18   ;;  %s1103_s12 = smov %s937_s13 }
 0x13e   : > { %p10_p0 = scmp.ge.s32.totalorder %s13_s18, 12   ;;  %s1104_s13 = smov %s1031_s25 }
 0x13f   : > { %s1105_s14 = smov %s949_s16  ;;  %s1106_s15 = smov %s953_s17 }
 0x140   : > { %s1107_s16 = smov %s1110_s19  ;;  %s1108_s17 = smov %s1114_s20 }
 0x141   :  { %12 = sbr.rel (!%p10_p0) target bundleno = 4 (0x4), region = 122 }

// kernel: classifier_model_forward.25
= control target key start
LH: loop header
LB: loop body
LE: loop exit
PB: predicated region body
PF: predicated region fallthrough
CT: control target
= control target key end

     0   :  { %s1105_s15 = smov 0   ;;  %s1107_s16 = smov 0   ;;  %s1233_s0 = inlined_call_operand.vmem [shape: bf16[128,640], index: 0, kind: input, shape index: {}]   ;;  %s1234_s1 = inlined_call_operand.vmem [shape: bf16[640,128], index: 1, kind: input, shape index: {}]   ;;  %s1235_s2 = inlined_call_operand.vmem [shape: f32[1,128], index: 2, kind: input, shape index: {}]   ;;  %s1236_s3 = inlined_call_operand.vmem [shape: bf16[128,128], index: 3, kind: input, shape index: {}]   ;;  %s1237_s4 = inlined_call_operand.vmem [shape: bf16[128,128], index: 4, kind: output, shape index: {}]  }
   0x1   :  { %s1109_s17 = smov 0   ;;  %s1111_s18 = smov 0  }
   0x2   :  { %s1113_s19 = smov 0   ;;  %s1115_s20 = smov 0  }
   0x3   :  { %s1117_s21 = smov 0  }
   0x4 LB: > { %s26_s22 = sadd.s32 1, %s1069_s19  ;;  %s33_s23 = sadd.s32 1, %s1073_s20  ;;  %s1077_s21 = sphi %s1117_s21, %s14_s21   ;;  %s1073_s20 = sphi %s1115_s20, %s1243_s20   ;;  %s1069_s19 = sphi %s1113_s19, %s1242_s19   ;;  %s1065_s18 = sphi %s1111_s18, %s1241_s18   ;;  %s1061_s17 = sphi %s1109_s17, %s1240_s17   ;;  %s1057_s16 = sphi %s1107_s16, %s1239_s16   ;;  %s1053_s15 = sphi %s1105_s15, %s1238_s15  }
   0x5   : > { %p27_p0 = scmp.ge.s32.totalorder %s26_s22, 5  ;;  %p49_p1 = scmp.ne.s32.totalorder %s1057_s16, %s1053_s15 }
   0x6   : > { %p50_p2 = scmp.eq.s32.totalorder %s1077_s21, 0  ;;  %s42_s27 = sadd.s32 1, %s1057_s16 }
   0x7   : > { %s1245_s22 = smov (%p27_p0, %s26_s22), 0  ;;  %s1247_s23 = smov (!%p27_p0, %s33_s23), %s1073_s20 }
   0x8   : > { %p51_p3 = por %p50_p2, %p49_p1  ;;  %p35_p4 = scmp.ge.s32.totalorder %s1247_s23, 2 }
   0x9   : > { %s38_s24 = ssub.s32 %s1069_s19, %s1245_s22  ;;  %p813_p6 = scmp.ge.s32.totalorder %s1077_s21, 10 }
   0xa   : > { %s1249_s23 = smov (%p35_p4, %s1247_s23), 0 }
   0xb   : > { %s37_s25 = ssub.s32 %s1073_s20, %s1249_s23  ;;  %191 = sbr.rel (%p813_p6) target bundleno = 30 (0x1e), region = 20 }
   0xc   : > { %s39_s26 = sor.u32 %s38_s24, %s37_s25 }
   0xd   : > { %p40_p5 = scmp.eq.s32.totalorder %s39_s26, 0 }
   0xf   : > { %s1156_s28 = scalar_select %p40_p5, %s1057_s16, %s42_s27  }
  0x12   : > { %194 = sbr.rel (!%p51_p3) target bundleno = 30 (0x1e), region = 24  ;;  %s196_s29 = sand.u32 (%p51_p3), 1, %s1057_s16  }
  0x13   : > { %s953_s30 = smul.u32 (%p51_p3), 40, %s1073_s20  ;;  %s814_s5 = sshll.u32 (%p51_p3), %s196_s29, 5 }
  0x14   : > { %s198_s11 = scalar_lea.vmem (%p51_p3), [#allocation3], %s814_s5 }
  0x15   : > { %s201_s6 = sadd.s32 (%p51_p3), %s1069_s19, %s953_s30 }
  0x16   : > { %s817_s7 = sshll.u32 (%p51_p3), %s201_s6, 2 }
  0x17   : > { %s203_s10 = scalar_lea.vmem (%p51_p3), %s1233_s0, %s817_s7 }
  0x18   : > { %v219_v0 = vld [vmem:[%s203_s10] sm:$0xf] (%p51_p3)  ;;  %v221_v1 = vld [vmem:[%s203_s10 + $0x14] sm:$0xf] (%p51_p3)  ;;  %v223_v2 = vld [vmem:[%s203_s10 + $0x28] sm:$0xf] (%p51_p3) }
  0x19   : > { %220 = vst [vmem:[%s198_s11] sm:$0xf] %v219_v0  ;;  %222 = vst [vmem:[%s198_s11 + $0x4] sm:$0xf] %v221_v1  ;;  %v225_v3 = vld [vmem:[%s203_s10 + $0x3c] sm:$0xf] }
  0x1a   : > { %224 = vst [vmem:[%s198_s11 + $0x8] sm:$0xf] %v223_v2  ;;  %v227_v4 = vld [vmem:[%s203_s10 + $0x50] sm:$0xf]  ;;  %v229_v5 = vld [vmem:[%s203_s10 + $0x64] sm:$0xf] }
  0x1b   : > { %226 = vst [vmem:[%s198_s11 + $0xc] sm:$0xf] %v225_v3  ;;  %228 = vst [vmem:[%s198_s11 + $0x10] sm:$0xf] %v227_v4  ;;  %v231_v6 = vld [vmem:[%s203_s10 + $0x78] sm:$0xf] }
  0x1c   : > { %230 = vst [vmem:[%s198_s11 + $0x14] sm:$0xf] %v229_v5  ;;  %v233_v7 = vld [vmem:[%s203_s10 + $0x8c] sm:$0xf]  ;;  %232 = vst [vmem:[%s198_s11 + $0x18] sm:$0xf] %v231_v6 }
  0x1d   : > { %234 = vst [vmem:[%s198_s11 + $0x1c] sm:$0xf] %v233_v7 }
  0x1e PF: > { %p818_p7 = scmp.ge.s32.totalorder %s1077_s21, 1  ;;  %p296_p8 = scmp.lt.s32.totalorder %s1077_s21, 11 }
  0x20   : > { %p297_p9 = pnand %p818_p7, %p296_p8 }
  0x21   : > { %s303_s12 = sand.u32 (!%p297_p9), 1, %s1053_s15   ;;  %s820_s13 = sshll.u32 (!%p297_p9), %s1061_s17, 4 }
  0x22   : > { %300 = sbr.rel (%p297_p9) target bundleno = 319 (0x13f), region = 73  ;;  %s819_s14 = sshll.u32 (!%p297_p9), %s303_s12, 5 }
  0x23   : > { %p352_p10 = scmp.lt.s32.totalorder (!%p297_p9), %s820_s13, 79  ;;  %s822_s24 = sshll.u32 (!%p297_p9), %s1065_s18, 3 }
  0x24   : > { %p364_p11 = scmp.lt.s32.totalorder (!%p297_p9), %s822_s24, 15  ;;  %s1185_s18 = scalar_lea.vmem (!%p297_p9), [#allocation3], %s819_s14 }
  0x25   : > { %p826_p12 = scmp.ne.s32.totalorder (!%p297_p9), %s1061_s17, 0 }
  0x29   : > { %s1251_s13 = smov (!%p352_p10, %s820_s13), 79  ;;  %s1253_s24 = smov (!%p364_p11, %s822_s24), 15 }
  0x2a   : > { %s821_s25 = sshll.u32 %s1251_s13, 2  ;;  %s823_s30 = sshll.u32 %s1253_s24, 2  ;;  %v1079_v8 = vmov (!%p826_p12), 0.0  }
  0x2b   : > { %s1173_s29 = scalar_lea.vmem %s1234_s1, %s821_s25  ;;  %s1178_s7 = scalar_lea.vmem %s1236_s3, %s823_s30  ;;  %386 = vst [vmem:[#allocation2] sm:$0xff] (!%p826_p12), %v1079_v8  ;;  %387 = vst [vmem:[#allocation2 + $0x8] sm:$0xff] (!%p826_p12), %v1079_v8 }
  0x2c   : > { %s1183_s9 = scalar_lea.vmem %s1237_s4, %s823_s30  ;;  %385 = sbr.rel (%p826_p12) target bundleno = 51 (0x33), region = 81  ;;  %388 = vst [vmem:[#allocation2 + $0x10] sm:$0xff] (!%p826_p12), %v1079_v8  ;;  %389 = vst [vmem:[#allocation2 + $0x18] sm:$0xff] (!%p826_p12), %v1079_v8 }
  0x2d   : > { %390 = vst [vmem:[#allocation2 + $0x20] sm:$0xff] (!%p826_p12), %v1079_v8  ;;  %391 = vst [vmem:[#allocation2 + $0x28] sm:$0xff] (!%p826_p12), %v1079_v8 }
  0x2e   : > { %392 = vst [vmem:[#allocation2 + $0x30] sm:$0xff] (!%p826_p12), %v1079_v8  ;;  %393 = vst [vmem:[#allocation2 + $0x38] sm:$0xff] (!%p826_p12), %v1079_v8 }
  0x33 PF: > { %v1011_v9 = vld [vmem:[%s1173_s29] sm:$0xff]   ;;  %v1012_v10 = vld [vmem:[%s1173_s29 + $0x8] sm:$0xff]   ;;  %v1013_v11 = vld [vmem:[%s1173_s29 + $0x10] sm:$0xff]   ;;  %p839_p13 = scmp.ne.s32.totalorder %s1061_s17, 4 }
  0x34   : > { %913 = vmatprep.subr.bf16.mxu0 %v1011_v9  ;;  %937 = vmatprep.subr.bf16.mxu1 %v1011_v9  ;;  %v1014_v12 = vld [vmem:[%s1173_s29 + $0x18] sm:$0xff]   ;;  %v1019_v13 = vld [vmem:[%s1185_s18] sm:$0xff]   ;;  %v1020_v14 = vld [vmem:[%s1185_s18 + $0x10] sm:$0xff]  }
  0x35   : > { %914 = vmatpush3.bf16.msra.mxu0 %v1011_v9  ;;  %945 = vmatpush3.bf16.msra.mxu1 %v1011_v9  ;;  %v1015_v15 = vld [vmem:[%s1173_s29 + $0x20] sm:$0xff]   ;;  %v1016_v16 = vld [vmem:[%s1173_s29 + $0x28] sm:$0xff]   ;;  %v1017_v17 = vld [vmem:[%s1173_s29 + $0x30] sm:$0xff]  }
  0x36   : > { %915 = vmatprep.subr.bf16.mxu0 %v1012_v10  ;;  %938 = vmatprep.subr.bf16.mxu1 %v1012_v10  ;;  %v1018_v18 = vld [vmem:[%s1173_s29 + $0x38] sm:$0xff]   ;;  %v1021_v19 = vld [vmem:[%s1185_s18 + $0x8] sm:$0xff]   ;;  %v396_v21 = vld [vmem:[#allocation2 + $0x10] sm:$0xff] }
  0x37   : > { %929 = vmatprep.mubr.bf16.mxu0 %v1019_v13  ;;  %933 = vmatprep.mubr.bf16.mxu1 %v1020_v14  ;;  %v1022_v20 = vld [vmem:[%s1185_s18 + $0x18] sm:$0xff]   ;;  %v400_v22 = vld [vmem:[#allocation2 + $0x30] sm:$0xff]  ;;  %v394_v23 = vld [vmem:[#allocation2] sm:$0xff] }
  0x38   : > { %v398_v24 = vld [vmem:[#allocation2 + $0x20] sm:$0xff]  ;;  %v397_v27 = vld [vmem:[#allocation2 + $0x18] sm:$0xff]  ;;  %v395_v33 = vld [vmem:[#allocation2 + $0x8] sm:$0xff] }
  0x39   : > { %916 = vmatpush3.bf16.msra.mxu0 %v1012_v10  ;;  %946 = vmatpush3.bf16.msra.mxu1 %v1012_v10  ;;  %v401_v28 = vld [vmem:[#allocation2 + $0x38] sm:$0xff]  ;;  %v399_v34 = vld [vmem:[#allocation2 + $0x28] sm:$0xff]  ;;  %v840_v47 = vld [vmem:[%s1235_s2] ss:$0 sm:$0xff] (!%p839_p13) }
  0x3a   : > { %917 = vmatprep.subr.bf16.mxu0 %v1013_v11  ;;  %939 = vmatprep.subr.bf16.mxu1 %v1013_v11  ;;  %v860_v50 = vld [vmem:[%s1178_s7] sm:$0xff] (!%p839_p13)   ;;  %v895_v57 = vld [vmem:[%s1178_s7 + $0x8] sm:$0xff] (!%p839_p13)   ;;  %v896_v0 = vld [vmem:[%s1178_s7 + $0x10] sm:$0xff] (!%p839_p13)  }
  0x3b   : > { %v861_v53 = vunpack.c.l.bf16 (!%p839_p13), %v860_v50  ;;  %v862_v54 = vunpack.c.h.bf16 (!%p839_p13), %v860_v50  ;;  %v865_v60 = vunpack.c.l.bf16 (!%p839_p13), %v895_v57  ;;  %v866_v61 = vunpack.c.h.bf16 (!%p839_p13), %v895_v57  ;;  %v897_v7 = vld [vmem:[%s1178_s7 + $0x18] sm:$0xff] (!%p839_p13)  }
  0x3c   : > { %v869_v5 = vunpack.c.l.bf16 (!%p839_p13), %v896_v0  ;;  %v870_v6 = vunpack.c.h.bf16 (!%p839_p13), %v896_v0 }
  0x3d   : > { %918 = vmatpush3.bf16.msra.mxu0 %v1013_v11  ;;  %947 = vmatpush3.bf16.msra.mxu1 %v1013_v11 }
  0x3e   : > { %919 = vmatprep.subr.bf16.mxu0 %v1014_v12  ;;  %940 = vmatprep.subr.bf16.mxu1 %v1014_v12 }
  0x41   : > { %920 = vmatpush3.bf16.msra.mxu0 %v1014_v12  ;;  %948 = vmatpush3.bf16.msra.mxu1 %v1014_v12 }
  0x42   : > { %921 = vmatprep.subr.bf16.mxu0 %v1015_v15  ;;  %941 = vmatprep.subr.bf16.mxu1 %v1015_v15 }
  0x45   : > { %922 = vmatpush3.bf16.msra.mxu0 %v1015_v15  ;;  %949 = vmatpush3.bf16.msra.mxu1 %v1015_v15 }
  0x46   : > { %923 = vmatprep.subr.bf16.mxu0 %v1016_v16  ;;  %942 = vmatprep.subr.bf16.mxu1 %v1016_v16 }
  0x49   : > { %924 = vmatpush3.bf16.msra.mxu0 %v1016_v16  ;;  %950 = vmatpush3.bf16.msra.mxu1 %v1016_v16 }
  0x4a   : > { %925 = vmatprep.subr.bf16.mxu0 %v1017_v17  ;;  %943 = vmatprep.subr.bf16.mxu1 %v1017_v17 }
  0x4d   : > { %926 = vmatpush3.bf16.msra.mxu0 %v1017_v17  ;;  %951 = vmatpush3.bf16.msra.mxu1 %v1017_v17 }
  0x4e   : > { %927 = vmatprep.subr.bf16.mxu0 %v1018_v18  ;;  %944 = vmatprep.subr.bf16.mxu1 %v1018_v18 }
  0x51   : > { %928 = vmatpush3.bf16.msra.mxu0 %v1018_v18  ;;  %952 = vmatpush3.bf16.msra.mxu1 %v1018_v18  ;;  %v873_v18 = vunpack.c.l.bf16 (!%p839_p13), %v897_v7 }
  0x54   : > { %930 = vmatmul.mubr.bf16.vlgmr.msra.gmra.mrb[0].mxu0 %v1021_v19  ;;  %934 = vmatmul.mubr.bf16.vlgmr.msra.gmra.mrb[0].mxu1 %v1022_v20  ;;  %v874_v19 = vunpack.c.h.bf16 (!%p839_p13), %v897_v7 }
 0x127   : > { %v931_v25 = vpop.f32.mrb[0].mxu0  ;;  %v935_v26 = vpop.f32.mrb[0].mxu1  ;;  %582 = sbr.rel (%p839_p13) target bundleno = 319 (0x13f), region = 85 }
 0x128   : > { %v565_v29 = vadd.f32 %v931_v25, %v396_v21  ;;  %v569_v30 = vadd.f32 %v935_v26, %v400_v22  ;;  %v532_v31 = vpop.f32.mrb[1].mxu0  ;;  %v548_v32 = vpop.f32.mrb[1].mxu1 }
 0x129   : > { %v563_v35 = vadd.f32 %v532_v31, %v394_v23  ;;  %v567_v36 = vadd.f32 %v548_v32, %v398_v24  ;;  %v932_v37 = vpop.f32.mrb[2].mxu0  ;;  %v936_v38 = vpop.f32.mrb[2].mxu1 }
 0x12a   : > { %573 = vst [vmem:[#allocation2 + $0x10] sm:$0xff] %v565_v29  ;;  %577 = vst [vmem:[#allocation2 + $0x30] sm:$0xff] %v569_v30  ;;  %v566_v39 = vadd.f32 %v932_v37, %v397_v27  ;;  %v570_v40 = vadd.f32 %v936_v38, %v401_v28  ;;  %v535_v41 = vpop.f32.mrb[3].mxu0  ;;  %v551_v42 = vpop.f32.mrb[3].mxu1 }
 0x12b   : > { %571 = vst [vmem:[#allocation2] sm:$0xff] %v563_v35  ;;  %575 = vst [vmem:[#allocation2 + $0x20] sm:$0xff] %v567_v36  ;;  %v564_v43 = vadd.f32 %v535_v41, %v395_v33  ;;  %v568_v44 = vadd.f32 %v551_v42, %v399_v34 }
 0x12c   : > { %574 = vst [vmem:[#allocation2 + $0x18] sm:$0xff] %v566_v39  ;;  %578 = vst [vmem:[#allocation2 + $0x38] sm:$0xff] %v570_v40 }
 0x12d   : > { %572 = vst [vmem:[#allocation2 + $0x8] sm:$0xff] %v564_v43  ;;  %576 = vst [vmem:[#allocation2 + $0x28] sm:$0xff] %v568_v44 }
 0x131   : > { %v585_v51 = vld [vmem:[#allocation2 + $0x10] sm:$0xff] }
 0x132   : > { %v583_v45 = vld [vmem:[#allocation2] sm:$0xff]  ;;  %v600_v55 = vadd.f32 %v840_v47, %v585_v51  ;;  %v589_v1 = vld [vmem:[#allocation2 + $0x30] sm:$0xff] }
 0x133   : > { %v598_v48 = vadd.f32 %v840_v47, %v583_v45  ;;  %v586_v52 = vld [vmem:[#allocation2 + $0x18] sm:$0xff]  ;;  %v587_v58 = vld [vmem:[#allocation2 + $0x20] sm:$0xff]  ;;  %v604_v10 = vadd.f32 %v840_v47, %v589_v1 }
 0x134   : > { %v584_v46 = vld [vmem:[#allocation2 + $0x8] sm:$0xff]  ;;  %v601_v56 = vadd.f32 %v840_v47, %v586_v52  ;;  %v602_v62 = vadd.f32 %v840_v47, %v587_v58  ;;  %v590_v2 = vld [vmem:[#allocation2 + $0x38] sm:$0xff]  ;;  %v624_v8 = vadd.f32 %v865_v60, %v600_v55 }
 0x135   : > { %v599_v49 = vadd.f32 %v840_v47, %v584_v46  ;;  %v588_v59 = vld [vmem:[#allocation2 + $0x28] sm:$0xff]  ;;  %v622_v3 = vadd.f32 %v861_v53, %v598_v48  ;;  %v605_v11 = vadd.f32 %v840_v47, %v590_v2  ;;  %v628_v24 = vadd.f32 %v873_v18, %v604_v10 }
 0x136   : > { %v603_v63 = vadd.f32 %v840_v47, %v588_v59  ;;  %v625_v9 = vadd.f32 %v866_v61, %v601_v56  ;;  %v626_v14 = vadd.f32 %v869_v5, %v602_v62  ;;  %v632_v16 = vmax.f32 %v624_v8, 0.0 }
 0x137   : > { %v623_v4 = vadd.f32 %v862_v54, %v599_v49  ;;  %v630_v12 = vmax.f32 %v622_v3, 0.0  ;;  %v629_v25 = vadd.f32 %v874_v19, %v605_v11  ;;  %v636_v27 = vmax.f32 %v628_v24, 0.0 }
 0x138   : > { %v627_v15 = vadd.f32 %v870_v6, %v603_v63  ;;  %v633_v17 = vmax.f32 %v625_v9, 0.0  ;;  %v634_v21 = vmax.f32 %v626_v14, 0.0 }
 0x139   : > { %v631_v13 = vmax.f32 %v623_v4, 0.0  ;;  %v637_v28 = vmax.f32 %v629_v25, 0.0 }
 0x13a   : > { %v635_v22 = vmax.f32 %v627_v15, 0.0  ;;  %v883_v23 = vpack.c.bf16 %v633_v17, %v632_v16 }
 0x13b   : > { %v878_v20 = vpack.c.bf16 %v631_v13, %v630_v12  ;;  %v893_v29 = vpack.c.bf16 %v637_v28, %v636_v27 }
 0x13c   : > { %v888_v26 = vpack.c.bf16 %v635_v22, %v634_v21  ;;  %898 = vst [vmem:[%s1183_s9 + $0x8] sm:$0xff] %v883_v23  }
 0x13d   : > { %879 = vst [vmem:[%s1183_s9] sm:$0xff] %v878_v20   ;;  %900 = vst [vmem:[%s1183_s9 + $0x18] sm:$0xff] %v893_v29  }
 0x13e   : > { %899 = vst [vmem:[%s1183_s9 + $0x10] sm:$0xff] %v888_v26  }
 0x13f PF: > { %s14_s21 = sadd.s32 1, %s1077_s21   ;;  %s1238_s15 = smov %s1057_s16 }
 0x140   : > { %p11_p0 = scmp.ge.s32.totalorder %s14_s21, 12   ;;  %s1239_s16 = smov %s1156_s28 }
 0x141   : > { %s1240_s17 = smov %s1069_s19  ;;  %s1241_s18 = smov %s1073_s20 }
 0x142   : > { %s1242_s19 = smov %s1245_s22  ;;  %s1243_s20 = smov %s1249_s23 }
 0x143   :  { %13 = sbr.rel (!%p11_p0) target bundleno = 4 (0x4), region = 129 }

// kernel: classifier_model_forward.28
= control target key start
LH: loop header
LB: loop body
LE: loop exit
PB: predicated region body
PF: predicated region fallthrough
CT: control target
= control target key end

     0   :  { %s781_s12 = smov 0   ;;  %s783_s13 = smov 0   ;;  %s896_s0 = inlined_call_operand.vmem [shape: bf16[32,640], index: 0, kind: input, shape index: {}]   ;;  %s897_s1 = inlined_call_operand.vmem [shape: bf16[640,128], index: 1, kind: input, shape index: {}]   ;;  %s898_s2 = inlined_call_operand.vmem [shape: f32[1,128], index: 2, kind: input, shape index: {}]   ;;  %s899_s3 = inlined_call_operand.vmem [shape: bf16[32,128], index: 3, kind: output, shape index: {}]  }
   0x1   :  { %s785_s14 = smov 0   ;;  %s787_s15 = smov 0  }
   0x2   :  { %s789_s16 = smov 0   ;;  %s791_s17 = smov 0  }
   0x3   :  { %s793_s18 = smov 0  }
   0x4 LB: > { %s25_s19 = sadd.s32 1, %s748_s16  ;;  %s32_s20 = sadd.s32 1, %s752_s17  ;;  %s756_s18 = sphi %s793_s18, %s13_s18   ;;  %s752_s17 = sphi %s791_s17, %s905_s17   ;;  %s748_s16 = sphi %s789_s16, %s904_s16   ;;  %s744_s15 = sphi %s787_s15, %s903_s15   ;;  %s740_s14 = sphi %s785_s14, %s902_s14   ;;  %s736_s13 = sphi %s783_s13, %s901_s13   ;;  %s732_s12 = sphi %s781_s12, %s900_s12  }
   0x5   : > { %p26_p0 = scmp.ge.s32.totalorder %s25_s19, 5  ;;  %p48_p1 = scmp.ne.s32.totalorder %s736_s13, %s732_s12 }
   0x6   : > { %p49_p2 = scmp.eq.s32.totalorder %s756_s18, 0  ;;  %s41_s24 = sadd.s32 1, %s736_s13 }
   0x7   : > { %s907_s19 = smov (%p26_p0, %s25_s19), 0  ;;  %s909_s20 = smov (!%p26_p0, %s32_s20), %s752_s17 }
   0x8   : > { %p50_p3 = por %p49_p2, %p48_p1  ;;  %p34_p4 = scmp.ge.s32.totalorder %s909_s20, 2 }
   0x9   : > { %s37_s21 = ssub.s32 %s748_s16, %s907_s19  ;;  %p570_p6 = scmp.ge.s32.totalorder %s756_s18, 10 }
   0xa   : > { %s911_s20 = smov (%p34_p4, %s909_s20), 0 }
   0xb   : > { %s36_s22 = ssub.s32 %s752_s17, %s911_s20  ;;  %162 = sbr.rel (%p570_p6) target bundleno = 26 (0x1a), region = 20 }
   0xc   : > { %s38_s23 = sor.u32 %s37_s21, %s36_s22 }
   0xd   : > { %p39_p5 = scmp.eq.s32.totalorder %s38_s23, 0 }
   0xf   : > { %s832_s25 = scalar_select %p39_p5, %s736_s13, %s41_s24  }
  0x12   : > { %165 = sbr.rel (!%p50_p3) target bundleno = 26 (0x1a), region = 24  ;;  %s167_s26 = sand.u32 (%p50_p3), 1, %s736_s13  }
  0x13   : > { %s633_s27 = smul.u32 (%p50_p3), 10, %s752_s17  ;;  %s571_s28 = sshll.u32 (%p50_p3), %s167_s26, 3 }
  0x14   : > { %s169_s7 = scalar_lea.vmem (%p50_p3), [#allocation3], %s571_s28 }
  0x15   : > { %s172_s29 = sadd.s32 (%p50_p3), %s748_s16, %s633_s27 }
  0x16   : > { %s574_s30 = sshll.u32 (%p50_p3), %s172_s29, 2 }
  0x17   : > { %s174_s6 = scalar_lea.vmem (%p50_p3), %s896_s0, %s574_s30 }
  0x18   : > { %v190_v0 = vld [vmem:[%s174_s6] sm:$0xf] (%p50_p3)  ;;  %v192_v1 = vld [vmem:[%s174_s6 + $0x14] sm:$0xf] (%p50_p3) }
  0x19   : > { %191 = vst [vmem:[%s169_s7] sm:$0xf] %v190_v0  ;;  %193 = vst [vmem:[%s169_s7 + $0x4] sm:$0xf] %v192_v1 }
  0x1a PF: > { %p575_p7 = scmp.ge.s32.totalorder %s756_s18, 1  ;;  %p231_p8 = scmp.lt.s32.totalorder %s756_s18, 11 }
  0x1c   : > { %p232_p9 = pnand %p575_p7, %p231_p8 }
  0x1d   : > { %s238_s8 = sand.u32 (!%p232_p9), 1, %s732_s12   ;;  %s577_s9 = sshll.u32 (!%p232_p9), %s740_s14, 4 }
  0x1e   : > { %235 = sbr.rel (%p232_p9) target bundleno = 311 (0x137), region = 69  ;;  %s845_s10 = sshll.u32 (!%p232_p9), %s238_s8, 3 }
  0x1f   : > { %p277_p10 = scmp.lt.s32.totalorder (!%p232_p9), %s577_s9, 79  ;;  %s579_s11 = sshll.u32 (!%p232_p9), %s744_s15, 1 }
  0x20   : > { %p289_p11 = scmp.lt.s32.totalorder (!%p232_p9), %s579_s11, 3  ;;  %s240_s29 = scalar_lea.vmem (!%p232_p9), [#allocation3], %s845_s10 }
  0x21   : > { %p581_p12 = scmp.ne.s32.totalorder (!%p232_p9), %s740_s14, 0 }
  0x25   : > { %s913_s9 = smov (!%p277_p10, %s577_s9), 79  ;;  %s915_s11 = smov (!%p289_p11, %s579_s11), 3 }
  0x26   : > { %s578_s21 = sshll.u32 %s913_s9, 2  ;;  %s580_s26 = sshll.u32 %s915_s11, 2  ;;  %v758_v2 = vmov (!%p581_p12), 0.0  }
  0x27   : > { %s851_s24 = scalar_lea.vmem %s897_s1, %s578_s21  ;;  %s856_s12 = scalar_lea.vmem %s899_s3, %s580_s26  ;;  %302 = vst [vmem:[#allocation2] sm:$0xff] (!%p581_p12), %v758_v2  ;;  %303 = vst [vmem:[#allocation2 + $0x8] sm:$0xff] (!%p581_p12), %v758_v2 }
  0x28   : > { %301 = sbr.rel (%p581_p12) target bundleno = 47 (0x2f), region = 77 }
  0x2f PF: > { %v693_v3 = vld [vmem:[%s851_s24] sm:$0xff]   ;;  %v759_v4 = vmov 0.0   ;;  %v694_v5 = vld [vmem:[%s851_s24 + $0x8] sm:$0xff]   ;;  %vm760_vm0 = vmmov 0   ;;  %v695_v6 = vld [vmem:[%s851_s24 + $0x10] sm:$0xff]   ;;  %p591_p13 = scmp.ne.s32.totalorder %s740_s14, 4 }
  0x30   : > { %613 = vmatprep.subr.bf16.mxu0 %v759_v4  ;;  %629 = vmatprep.mubr.msk.bf16.mxu0 %vm760_vm0, %v759_v4  ;;  %v696_v7 = vld [vmem:[%s851_s24 + $0x18] sm:$0xff]   ;;  %v697_v8 = vld [vmem:[%s851_s24 + $0x20] sm:$0xff]   ;;  %v698_v9 = vld [vmem:[%s851_s24 + $0x28] sm:$0xff]  }
  0x31   : > { %614 = vmatpush3.bf16.msra.mxu0 %v693_v3  ;;  %v699_v10 = vld [vmem:[%s851_s24 + $0x30] sm:$0xff]   ;;  %v700_v11 = vld [vmem:[%s851_s24 + $0x38] sm:$0xff]   ;;  %v304_v13 = vld [vmem:[#allocation2] sm:$0xff] }
  0x32   : > { %615 = vmatprep.subr.bf16.mxu0 %v759_v4  ;;  %v701_v12 = vld [vmem:[%s240_s29] sm:$0xff]   ;;  %v305_v15 = vld [vmem:[#allocation2 + $0x8] sm:$0xff]  ;;  %v592_v23 = vld [vmem:[%s898_s2] ss:$0 sm:$0xff] (!%p591_p13) }
  0x35   : > { %616 = vmatpush3.bf16.msra.mxu0 %v694_v5 }
  0x36   : > { %617 = vmatprep.subr.bf16.mxu0 %v759_v4 }
  0x39   : > { %618 = vmatpush3.bf16.msra.mxu0 %v695_v6 }
  0x3a   : > { %619 = vmatprep.subr.bf16.mxu0 %v759_v4 }
  0x3d   : > { %620 = vmatpush3.bf16.msra.mxu0 %v696_v7 }
  0x3e   : > { %621 = vmatprep.subr.bf16.mxu0 %v759_v4 }
  0x41   : > { %622 = vmatpush3.bf16.msra.mxu0 %v697_v8 }
  0x42   : > { %623 = vmatprep.subr.bf16.mxu0 %v759_v4 }
  0x45   : > { %624 = vmatpush3.bf16.msra.mxu0 %v698_v9 }
  0x46   : > { %625 = vmatprep.subr.bf16.mxu0 %v759_v4 }
  0x49   : > { %626 = vmatpush3.bf16.msra.mxu0 %v699_v10 }
  0x4a   : > { %627 = vmatprep.subr.bf16.mxu0 %v759_v4 }
  0x4d   : > { %628 = vmatpush3.bf16.msra.mxu0 %v700_v11 }
  0x50   : > { %630 = vmatmul.mubr.bf16.vlgmr.msra.gmra.mrb[0].mxu0 %v701_v12 }
 0x122   : > { %426 = sbr.rel (%p591_p13) target bundleno = 311 (0x137), region = 81 }
 0x123   : > { %v412_v14 = vpop.f32.mrb[0].mxu0 }
 0x124   : > { %v419_v16 = vadd.f32 %v412_v14, %v304_v13  ;;  %v631_v17 = vpop.f32.mrb[1].mxu0 }
 0x125   : > { %v415_v18 = vpop.f32.mrb[2].mxu0 }
 0x126   : > { %421 = vst [vmem:[#allocation2] sm:$0xff] %v419_v16  ;;  %v420_v19 = vadd.f32 %v415_v18, %v305_v15  ;;  %v632_v20 = vpop.f32.mrb[3].mxu0 }
 0x128   : > { %422 = vst [vmem:[#allocation2 + $0x8] sm:$0xff] %v420_v19 }
 0x12d   : > { %v427_v21 = vld [vmem:[#allocation2] sm:$0xff] }
 0x12e   : > { %v436_v24 = vadd.f32 %v592_v23, %v427_v21 }
 0x12f   : > { %v428_v22 = vld [vmem:[#allocation2 + $0x8] sm:$0xff] }
 0x130   : > { %v437_v25 = vadd.f32 %v592_v23, %v428_v22  ;;  %v438_v26 = vmax.f32 %v436_v24, 0.0 }
 0x132   : > { %v439_v27 = vmax.f32 %v437_v25, 0.0 }
 0x134   : > { %v602_v28 = vpack.c.bf16 %v439_v27, %v438_v26 }
 0x136   : > { %603 = vst [vmem:[%s856_s12] sm:$0xff] %v602_v28  }
 0x137 PF: > { %s13_s18 = sadd.s32 1, %s756_s18   ;;  %s900_s12 = smov %s736_s13 }
 0x138   : > { %p10_p0 = scmp.ge.s32.totalorder %s13_s18, 12   ;;  %s901_s13 = smov %s832_s25 }
 0x139   : > { %s902_s14 = smov %s748_s16  ;;  %s903_s15 = smov %s752_s17 }
 0x13a   : > { %s904_s16 = smov %s907_s19  ;;  %s905_s17 = smov %s911_s20 }
 0x13b   :  { %12 = sbr.rel (!%p10_p0) target bundleno = 4 (0x4), region = 122 }

// kernel: classifier_model_forward.31
= control target key start
LH: loop header
LB: loop body
LE: loop exit
PB: predicated region body
PF: predicated region fallthrough
CT: control target
= control target key end

     0   :  { %s1020_s12 = smov 0   ;;  %s1022_s13 = smov 0   ;;  %s1151_s0 = inlined_call_operand.vmem [shape: bf16[32,1152], index: 0, kind: input, shape index: {}]   ;;  %s1152_s1 = inlined_call_operand.vmem [shape: bf16[1152,128], index: 1, kind: input, shape index: {}]   ;;  %s1153_s2 = inlined_call_operand.vmem [shape: f32[1,128], index: 2, kind: input, shape index: {}]   ;;  %s1154_s3 = inlined_call_operand.vmem [shape: bf16[32,128], index: 3, kind: output, shape index: {}]  }
   0x1   :  { %s1024_s14 = smov 0   ;;  %s1026_s15 = smov 0  }
   0x2   :  { %s1028_s16 = smov 0   ;;  %s1030_s17 = smov 0  }
   0x3   :  { %s1032_s18 = smov 0  }
   0x4 LB: > { %s25_s19 = sadd.s32 1, %s987_s16  ;;  %s32_s20 = sadd.s32 1, %s991_s17  ;;  %s995_s18 = sphi %s1032_s18, %s13_s18   ;;  %s991_s17 = sphi %s1030_s17, %s1160_s17   ;;  %s987_s16 = sphi %s1028_s16, %s1159_s16   ;;  %s983_s15 = sphi %s1026_s15, %s1158_s15   ;;  %s979_s14 = sphi %s1024_s14, %s1157_s14   ;;  %s975_s13 = sphi %s1022_s13, %s1156_s13   ;;  %s971_s12 = sphi %s1020_s12, %s1155_s12  }
   0x5   : > { %p26_p0 = scmp.ge.s32.totalorder %s25_s19, 3  ;;  %p48_p1 = scmp.ne.s32.totalorder %s975_s13, %s971_s12 }
   0x6   : > { %p49_p2 = scmp.eq.s32.totalorder %s995_s18, 0  ;;  %s41_s24 = sadd.s32 1, %s975_s13 }
   0x7   : > { %s1162_s19 = smov (%p26_p0, %s25_s19), 0  ;;  %s1164_s20 = smov (!%p26_p0, %s32_s20), %s991_s17 }
   0x8   : > { %p50_p3 = por %p49_p2, %p48_p1  ;;  %p34_p4 = scmp.ge.s32.totalorder %s1164_s20, 2 }
   0x9   : > { %s37_s21 = ssub.s32 %s987_s16, %s1162_s19  ;;  %p747_p6 = scmp.ge.s32.totalorder %s995_s18, 6 }
   0xa   : > { %s1166_s20 = smov (%p34_p4, %s1164_s20), 0 }
   0xb   : > { %s36_s22 = ssub.s32 %s991_s17, %s1166_s20  ;;  %162 = sbr.rel (%p747_p6) target bundleno = 29 (0x1d), region = 20 }
   0xc   : > { %s38_s23 = sor.u32 %s37_s21, %s36_s22 }
   0xd   : > { %p39_p5 = scmp.eq.s32.totalorder %s38_s23, 0 }
   0xf   : > { %s1071_s25 = scalar_select %p39_p5, %s975_s13, %s41_s24  }
  0x12   : > { %165 = sbr.rel (!%p50_p3) target bundleno = 29 (0x1d), region = 24  ;;  %s167_s26 = sand.u32 (%p50_p3), 1, %s975_s13  }
  0x13   : > { %s171_s27 = smul.u32 (%p50_p3), 3, %s987_s16 }
  0x14   : > { %s851_s28 = smul.u32 (%p50_p3), 24, %s167_s26 }
  0x15   : > { %s852_s29 = smul.u32 (%p50_p3), 18, %s991_s17 }
  0x16   : > { %s169_s8 = scalar_lea.vmem (%p50_p3), [#allocation3], %s851_s28 }
  0x17   : > { %s173_s30 = sadd.s32 (%p50_p3), %s852_s29, %s171_s27 }
  0x18   : > { %s750_s4 = sshll.u32 (%p50_p3), %s173_s30, 2 }
  0x19   : > { %s175_s7 = scalar_lea.vmem %s1151_s0, %s750_s4 }
  0x1a   : > { %v190_v0 = vld [vmem:[%s175_s7] sm:$0xff]  ;;  %v751_v2 = vld [vmem:[%s175_s7 + $0x8] sm:$0xf]  ;;  %v753_v3 = vld [vmem:[%s175_s7 + $0x2c] sm:$0xf] }
  0x1b   : > { %v192_v1 = vld [vmem:[%s175_s7 + $0x24] sm:$0xff]  ;;  %191 = vst [vmem:[%s169_s8] sm:$0xff] %v190_v0  ;;  %752 = vst [vmem:[%s169_s8 + $0x8] sm:$0xf] %v751_v2 }
  0x1c   : > { %193 = vst [vmem:[%s169_s8 + $0xc] sm:$0xff] %v192_v1  ;;  %754 = vst [vmem:[%s169_s8 + $0x14] sm:$0xf] %v753_v3 }
  0x1d PF: > { %p755_p7 = scmp.ge.s32.totalorder %s995_s18, 1  ;;  %p221_p8 = scmp.lt.s32.totalorder %s995_s18, 7 }
  0x1f   : > { %p222_p9 = pnand %p755_p7, %p221_p8 }
  0x20   : > { %s228_s9 = sand.u32 (!%p222_p9), 1, %s971_s12   ;;  %s267_s10 = smul.u32 (!%p222_p9), 48, %s979_s14 }
  0x21   : > { %225 = sbr.rel (%p222_p9) target bundleno = 319 (0x13f), region = 54  ;;  %s757_s21 = sshll.u32 (!%p222_p9), %s983_s15, 1 }
  0x22   : > { %s853_s11 = smul.u32 (!%p222_p9), 24, %s228_s9  ;;  %p268_p10 = scmp.lt.s32.totalorder (!%p222_p9), %s267_s10, 143 }
  0x23   : > { %p280_p11 = scmp.lt.s32.totalorder (!%p222_p9), %s757_s21, 3  ;;  %p759_p12 = scmp.ne.s32.totalorder (!%p222_p9), %s979_s14, 0 }
  0x24   : > { %s1095_s12 = scalar_lea.vmem (!%p222_p9), [#allocation3], %s853_s11 }
  0x28   : > { %s1168_s10 = smov (!%p268_p10, %s267_s10), 143  ;;  %s1170_s21 = smov (!%p280_p11, %s757_s21), 3 }
  0x29   : > { %s756_s22 = sshll.u32 %s1168_s10, 2  ;;  %s758_s27 = sshll.u32 %s1170_s21, 2  ;;  %v997_v4 = vmov (!%p759_p12), 0.0  }
  0x2a   : > { %s1088_s26 = scalar_lea.vmem %s1152_s1, %s756_s22  ;;  %s1093_s30 = scalar_lea.vmem %s1154_s3, %s758_s27  ;;  %293 = vst [vmem:[#allocation2] sm:$0xff] (!%p759_p12), %v997_v4  ;;  %294 = vst [vmem:[#allocation2 + $0x8] sm:$0xff] (!%p759_p12), %v997_v4 }
  0x2b   : > { %292 = sbr.rel (%p759_p12) target bundleno = 50 (0x32), region = 62 }
  0x32 PF: > { %v913_v5 = vld [vmem:[%s1088_s26 + $0x40] sm:$0xff]   ;;  %v998_v6 = vmov 0.0   ;;  %vm999_vm0 = vmmov 0   ;;  %v916_v9 = vld [vmem:[%s1088_s26 + $0x48] sm:$0xff]   ;;  %v919_v12 = vld [vmem:[%s1088_s26 + $0x50] sm:$0xff]   ;;  %p787_p13 = scmp.ne.s32.totalorder %s979_s14, 2 }
  0x33   : > { %831 = vmatprep.subr.bf16.mxu1 %v998_v6  ;;  %v914_v7 = vld [vmem:[%s1088_s26] sm:$0xff]   ;;  %800 = vmatprep.subr.bf16.mxu0 %v913_v5  ;;  %v917_v10 = vld [vmem:[%s1088_s26 + $0x8] sm:$0xff]   ;;  %v920_v13 = vld [vmem:[%s1088_s26 + $0x10] sm:$0xff]  }
  0x34   : > { %v915_v8 = vld [vmem:[%s1088_s26 + $0x80] sm:$0xff]   ;;  %847 = vmatprep.mubr.msk.bf16.mxu1 %vm999_vm0, %v998_v6  ;;  %801 = vmatpush3.bf16.msra.mxu0 %v914_v7  ;;  %v918_v11 = vld [vmem:[%s1088_s26 + $0x88] sm:$0xff]   ;;  %v921_v14 = vld [vmem:[%s1088_s26 + $0x90] sm:$0xff]  }
  0x35   : > { %832 = vmatpush3.bf16.msra.mxu1 %v915_v8  ;;  %802 = vmatprep.subr.bf16.mxu0 %v916_v9  ;;  %v922_v15 = vld [vmem:[%s1088_s26 + $0x58] sm:$0xff]   ;;  %v925_v18 = vld [vmem:[%s1088_s26 + $0x60] sm:$0xff]   ;;  %v928_v21 = vld [vmem:[%s1088_s26 + $0x68] sm:$0xff]  }
  0x36   : > { %833 = vmatprep.subr.bf16.mxu1 %v998_v6  ;;  %v923_v16 = vld [vmem:[%s1088_s26 + $0x18] sm:$0xff]   ;;  %v926_v19 = vld [vmem:[%s1088_s26 + $0x20] sm:$0xff]   ;;  %v929_v22 = vld [vmem:[%s1088_s26 + $0x28] sm:$0xff]  }
  0x37   : > { %v924_v17 = vld [vmem:[%s1088_s26 + $0x98] sm:$0xff]   ;;  %v927_v20 = vld [vmem:[%s1088_s26 + $0xa0] sm:$0xff]   ;;  %v930_v23 = vld [vmem:[%s1088_s26 + $0xa8] sm:$0xff]  }
  0x38   : > { %803 = vmatpush3.bf16.msra.mxu0 %v917_v10  ;;  %v931_v24 = vld [vmem:[%s1088_s26 + $0x70] sm:$0xff]   ;;  %v934_v27 = vld [vmem:[%s1088_s26 + $0x78] sm:$0xff]   ;;  %v295_v39 = vld [vmem:[#allocation2] sm:$0xff] }
  0x39   : > { %834 = vmatpush3.bf16.msra.mxu1 %v918_v11  ;;  %804 = vmatprep.subr.bf16.mxu0 %v919_v12  ;;  %v932_v25 = vld [vmem:[%s1088_s26 + $0x30] sm:$0xff]   ;;  %v935_v29 = vld [vmem:[%s1088_s26 + $0x38] sm:$0xff]   ;;  %v296_v45 = vld [vmem:[#allocation2 + $0x8] sm:$0xff] }
  0x3a   : > { %835 = vmatprep.subr.bf16.mxu1 %v998_v6  ;;  %v933_v26 = vld [vmem:[%s1088_s26 + $0xb0] sm:$0xff]   ;;  %v936_v30 = vld [vmem:[%s1088_s26 + $0xb8] sm:$0xff]   ;;  %v788_v51 = vld [vmem:[%s1153_s2] ss:$0 sm:$0xff] (!%p787_p13) }
  0x3b   : > { %v939_v28 = vld [vmem:[%s1095_s12 + $0x4] ss:$12 sps:$4 sm:$0xff]   ;;  %v937_v31 = vld [vmem:[%s1095_s12] ss:$12 sps:$4 sm:$0xff]   ;;  %v940_v32 = vld [vmem:[%s1095_s12 + $0x8] ss:$12 sps:$4 sm:$0xff]  }
  0x3c   : > { %805 = vmatpush3.bf16.msra.mxu0 %v920_v13  ;;  %541 = vmatprep.mubr.bf16.mxu0 %v939_v28 }
  0x3d   : > { %836 = vmatpush3.bf16.msra.mxu1 %v921_v14  ;;  %806 = vmatprep.subr.bf16.mxu0 %v922_v15 }
  0x3e   : > { %837 = vmatprep.subr.bf16.mxu1 %v998_v6 }
  0x40   : > { %807 = vmatpush3.bf16.msra.mxu0 %v923_v16 }
  0x41   : > { %838 = vmatpush3.bf16.msra.mxu1 %v924_v17  ;;  %808 = vmatprep.subr.bf16.mxu0 %v925_v18 }
  0x42   : > { %839 = vmatprep.subr.bf16.mxu1 %v998_v6 }
  0x44   : > { %809 = vmatpush3.bf16.msra.mxu0 %v926_v19 }
  0x45   : > { %840 = vmatpush3.bf16.msra.mxu1 %v927_v20  ;;  %810 = vmatprep.subr.bf16.mxu0 %v928_v21 }
  0x46   : > { %841 = vmatprep.subr.bf16.mxu1 %v998_v6 }
  0x48   : > { %811 = vmatpush3.bf16.msra.mxu0 %v929_v22 }
  0x49   : > { %842 = vmatpush3.bf16.msra.mxu1 %v930_v23  ;;  %812 = vmatprep.subr.bf16.mxu0 %v931_v24 }
  0x4a   : > { %843 = vmatprep.subr.bf16.mxu1 %v998_v6 }
  0x4c   : > { %813 = vmatpush3.bf16.msra.mxu0 %v932_v25 }
  0x4d   : > { %844 = vmatpush3.bf16.msra.mxu1 %v933_v26  ;;  %814 = vmatprep.subr.bf16.mxu0 %v934_v27 }
  0x4e   : > { %845 = vmatprep.subr.bf16.mxu1 %v998_v6 }
  0x50   : > { %815 = vmatpush3.bf16.msra.mxu0 %v935_v29 }
  0x51   : > { %846 = vmatpush3.bf16.msra.mxu1 %v936_v30 }
  0x53   : > { %542 = vmatmul.mubr.bf16.vlgmr.msra.gmra.mrb[0].mxu0 %v937_v31 }
  0x54   : > { %848 = vmatmul.mubr.bf16.vlgmr.msra.gmra.mrb[0].mxu1 %v940_v32 }
 0x126   : > { %v816_v33 = vpop.f32.mrb[0].mxu0 }
 0x127   : > { %v584_v34 = vpop.f32.mrb[0].mxu1  ;;  %v817_v35 = vpop.f32.mrb[1].mxu0 }
 0x128   : > { %v818_v36 = vadd.f32 %v817_v35, %v816_v33  ;;  %v849_v37 = vpop.f32.mrb[1].mxu1  ;;  %v819_v38 = vpop.f32.mrb[2].mxu0 }
 0x129   : > { %v587_v40 = vpop.f32.mrb[2].mxu1  ;;  %v820_v41 = vpop.f32.mrb[3].mxu0 }
 0x12a   : > { %v585_v42 = vadd.f32 %v818_v36, %v584_v34  ;;  %v821_v43 = vadd.f32 %v820_v41, %v819_v38  ;;  %v850_v44 = vpop.f32.mrb[3].mxu1  ;;  %598 = sbr.rel (%p787_p13) target bundleno = 319 (0x13f), region = 66 }
 0x12c   : > { %v591_v46 = vadd.f32 %v585_v42, %v295_v39  ;;  %v588_v47 = vadd.f32 %v821_v43, %v587_v40 }
 0x12e   : > { %593 = vst [vmem:[#allocation2] sm:$0xff] %v591_v46  ;;  %v592_v48 = vadd.f32 %v588_v47, %v296_v45 }
 0x130   : > { %594 = vst [vmem:[#allocation2 + $0x8] sm:$0xff] %v592_v48 }
 0x135   : > { %v599_v49 = vld [vmem:[#allocation2] sm:$0xff] }
 0x136   : > { %v608_v52 = vadd.f32 %v788_v51, %v599_v49 }
 0x137   : > { %v600_v50 = vld [vmem:[#allocation2 + $0x8] sm:$0xff] }
 0x138   : > { %v609_v53 = vadd.f32 %v788_v51, %v600_v50  ;;  %v610_v54 = vmax.f32 %v608_v52, 0.0 }
 0x13a   : > { %v611_v55 = vmax.f32 %v609_v53, 0.0 }
 0x13c   : > { %v798_v56 = vpack.c.bf16 %v611_v55, %v610_v54 }
 0x13e   : > { %799 = vst [vmem:[%s1093_s30] sm:$0xff] %v798_v56  }
 0x13f PF: > { %s13_s18 = sadd.s32 1, %s995_s18   ;;  %s1155_s12 = smov %s975_s13 }
 0x140   : > { %p10_p0 = scmp.ge.s32.totalorder %s13_s18, 8   ;;  %s1156_s13 = smov %s1071_s25 }
 0x141   : > { %s1157_s14 = smov %s987_s16  ;;  %s1158_s15 = smov %s991_s17 }
 0x142   : > { %s1159_s16 = smov %s1162_s19  ;;  %s1160_s17 = smov %s1166_s20 }
 0x143   :  { %12 = sbr.rel (!%p10_p0) target bundleno = 4 (0x4), region = 113 }

// kernel: classifier_model_forward.29
= control target key start
LH: loop header
LB: loop body
LE: loop exit
PB: predicated region body
PF: predicated region fallthrough
CT: control target
= control target key end

     0   :  { %s662_s12 = smov 0   ;;  %s664_s13 = smov 0   ;;  %s725_s0 = inlined_call_operand.vmem [shape: bf16[32,128], index: 0, kind: input, shape index: {}]   ;;  %s726_s1 = inlined_call_operand.vmem [shape: bf16[128,128], index: 1, kind: input, shape index: {}]   ;;  %s727_s2 = inlined_call_operand.vmem [shape: f32[1,128], index: 2, kind: input, shape index: {}]   ;;  %s728_s3 = inlined_call_operand.vmem [shape: bf16[32,128], index: 3, kind: output, shape index: {}]  }
   0x1   :  { %s666_s14 = smov 0  }
   0x2 LB: > { %s32_s15 = sadd.s32 1, %s634_s13  ;;  %p526_p0 = scmp.ge.s32.totalorder %s638_s14, 1  ;;  %s638_s14 = sphi %s666_s14, %s13_s14   ;;  %s634_s13 = sphi %s664_s13, %s730_s13   ;;  %s630_s12 = sphi %s662_s12, %s729_s12  }
   0x3   : > { %p34_p1 = scmp.ge.s32.totalorder %s32_s15, 2  ;;  %p188_p2 = scmp.lt.s32.totalorder %s638_s14, 3 }
   0x5   : > { %s732_s15 = smov (%p34_p1, %s32_s15), 0  ;;  %p189_p3 = pnand %p526_p0, %p188_p2 }
   0x6   : > { %v607_v0 = vld [vmem:[%s726_s1] sm:$0xff] (!%p189_p3)   ;;  %v640_v1 = vmov (!%p189_p3), 0.0   ;;  %v608_v2 = vld [vmem:[%s726_s1 + $0x8] sm:$0xff] (!%p189_p3)   ;;  %vm641_vm0 = vmmov (!%p189_p3), 0   ;;  %s527_s20 = sshll.u32 (!%p189_p3), %s630_s12, 1  ;;  %v609_v3 = vld [vmem:[%s726_s1 + $0x10] sm:$0xff] (!%p189_p3)  }
   0x7   : > { %192 = sbr.rel (%p189_p3) target bundleno = 258 (0x102), region = 32  ;;  %561 = vmatprep.subr.bf16.mxu0 (!%p189_p3), %v640_v1  ;;  %577 = vmatprep.mubr.msk.bf16.mxu0 (!%p189_p3), %vm641_vm0, %v640_v1  ;;  %p230_p4 = scmp.lt.s32.totalorder (!%p189_p3), %s527_s20, 3  ;;  %v610_v4 = vld [vmem:[%s726_s1 + $0x18] sm:$0xff] (!%p189_p3)   ;;  %v611_v5 = vld [vmem:[%s726_s1 + $0x20] sm:$0xff] (!%p189_p3)   ;;  %v612_v6 = vld [vmem:[%s726_s1 + $0x28] sm:$0xff] (!%p189_p3)  }
   0x8   : > { %562 = vmatpush3.bf16.msra.mxu0 (!%p189_p3), %v607_v0  ;;  %v613_v7 = vld [vmem:[%s726_s1 + $0x30] sm:$0xff] (!%p189_p3)   ;;  %v614_v8 = vld [vmem:[%s726_s1 + $0x38] sm:$0xff] (!%p189_p3)   ;;  %v540_v11 = vld [vmem:[%s727_s2] ss:$0 sm:$0xff] (!%p189_p3) }
   0x9   : > { %563 = vmatprep.subr.bf16.mxu0 (!%p189_p3), %v640_v1 }
   0xc   : > { %564 = vmatpush3.bf16.msra.mxu0 (!%p189_p3), %v608_v2 }
   0xd   : > { %565 = vmatprep.subr.bf16.mxu0 (!%p189_p3), %v640_v1 }
   0xe   : > { %s734_s20 = smov (!%p230_p4, %s527_s20), 3 }
   0xf   : > { %s528_s23 = sshll.u32 %s734_s20, 2 }
  0x10   : > { %s236_s26 = scalar_lea.vmem %s725_s0, %s528_s23  ;;  %566 = vmatpush3.bf16.msra.mxu0 %v609_v3  ;;  %s257_s17 = scalar_lea.vmem %s728_s3, %s528_s23 }
  0x11   : > { %567 = vmatprep.subr.bf16.mxu0 %v640_v1  ;;  %v615_v9 = vld [vmem:[%s236_s26] sm:$0xff]  }
  0x14   : > { %568 = vmatpush3.bf16.msra.mxu0 %v610_v4 }
  0x15   : > { %569 = vmatprep.subr.bf16.mxu0 %v640_v1 }
  0x18   : > { %570 = vmatpush3.bf16.msra.mxu0 %v611_v5 }
  0x19   : > { %571 = vmatprep.subr.bf16.mxu0 %v640_v1 }
  0x1c   : > { %572 = vmatpush3.bf16.msra.mxu0 %v612_v6 }
  0x1d   : > { %573 = vmatprep.subr.bf16.mxu0 %v640_v1 }
  0x20   : > { %574 = vmatpush3.bf16.msra.mxu0 %v613_v7 }
  0x21   : > { %575 = vmatprep.subr.bf16.mxu0 %v640_v1 }
  0x24   : > { %576 = vmatpush3.bf16.msra.mxu0 %v614_v8 }
  0x27   : > { %578 = vmatmul.mubr.bf16.vlgmr.msra.gmra.mrb[0].mxu0 %v615_v9 }
  0xfa   : > { %v374_v10 = vpop.f32.mrb[0].mxu0 }
  0xfb   : > { %v579_v12 = vpop.f32.mrb[1].mxu0  ;;  %v397_v14 = vadd.f32 %v540_v11, %v374_v10 }
  0xfc   : > { %v377_v13 = vpop.f32.mrb[2].mxu0 }
  0xfd   : > { %v398_v15 = vadd.f32 %v540_v11, %v377_v13  ;;  %v580_v16 = vpop.f32.mrb[3].mxu0 }
  0xff   : > { %v550_v17 = vpack.c.bf16 %v398_v15, %v397_v14 }
 0x101   : > { %551 = vst [vmem:[%s257_s17] sm:$0xff] %v550_v17  }
 0x102 PF: > { %s13_s14 = sadd.s32 1, %s638_s14   ;;  %s729_s12 = smov %s634_s13 }
 0x103   : > { %p10_p5 = scmp.ge.s32.totalorder %s13_s14, 4   ;;  %s730_s13 = smov %s732_s15 }
 0x105   :  { %12 = sbr.rel (!%p10_p5) target bundleno = 2 (0x2), region = 76 }

// kernel: classifier_model_forward.30
= control target key start
LH: loop header
LB: loop body
LE: loop exit
PB: predicated region body
PF: predicated region fallthrough
CT: control target
= control target key end

     0   :  { %s1112_s15 = smov 0   ;;  %s1114_s16 = smov 0   ;;  %s1249_s0 = inlined_call_operand.vmem [shape: bf16[32,1152], index: 0, kind: input, shape index: {}]   ;;  %s1250_s1 = inlined_call_operand.vmem [shape: bf16[1152,128], index: 1, kind: input, shape index: {}]   ;;  %s1251_s2 = inlined_call_operand.vmem [shape: f32[1,128], index: 2, kind: input, shape index: {}]   ;;  %s1252_s3 = inlined_call_operand.vmem [shape: bf16[32,128], index: 3, kind: input, shape index: {}]   ;;  %s1253_s4 = inlined_call_operand.vmem [shape: bf16[32,128], index: 4, kind: output, shape index: {}]  }
   0x1   :  { %s1116_s17 = smov 0   ;;  %s1118_s18 = smov 0  }
   0x2   :  { %s1120_s19 = smov 0   ;;  %s1122_s20 = smov 0  }
   0x3   :  { %s1124_s21 = smov 0  }
   0x4 LB: > { %s26_s22 = sadd.s32 1, %s1074_s19  ;;  %s33_s23 = sadd.s32 1, %s1078_s20  ;;  %s1082_s21 = sphi %s1124_s21, %s14_s21   ;;  %s1078_s20 = sphi %s1122_s20, %s1259_s20   ;;  %s1074_s19 = sphi %s1120_s19, %s1258_s19   ;;  %s1070_s18 = sphi %s1118_s18, %s1257_s18   ;;  %s1066_s17 = sphi %s1116_s17, %s1256_s17   ;;  %s1062_s16 = sphi %s1114_s16, %s1255_s16   ;;  %s1058_s15 = sphi %s1112_s15, %s1254_s15  }
   0x5   : > { %p27_p0 = scmp.ge.s32.totalorder %s26_s22, 3  ;;  %p49_p1 = scmp.ne.s32.totalorder %s1062_s16, %s1058_s15 }
   0x6   : > { %p50_p2 = scmp.eq.s32.totalorder %s1082_s21, 0  ;;  %s42_s27 = sadd.s32 1, %s1062_s16 }
   0x7   : > { %s1261_s22 = smov (%p27_p0, %s26_s22), 0  ;;  %s1263_s23 = smov (!%p27_p0, %s33_s23), %s1078_s20 }
   0x8   : > { %p51_p3 = por %p50_p2, %p49_p1  ;;  %p35_p4 = scmp.ge.s32.totalorder %s1263_s23, 2 }
   0x9   : > { %s38_s24 = ssub.s32 %s1074_s19, %s1261_s22  ;;  %p828_p6 = scmp.ge.s32.totalorder %s1082_s21, 6 }
   0xa   : > { %s1265_s23 = smov (%p35_p4, %s1263_s23), 0 }
   0xb   : > { %s37_s25 = ssub.s32 %s1078_s20, %s1265_s23  ;;  %191 = sbr.rel (%p828_p6) target bundleno = 29 (0x1d), region = 20 }
   0xc   : > { %s39_s26 = sor.u32 %s38_s24, %s37_s25 }
   0xd   : > { %p40_p5 = scmp.eq.s32.totalorder %s39_s26, 0 }
   0xf   : > { %s1163_s28 = scalar_select %p40_p5, %s1062_s16, %s42_s27  }
  0x12   : > { %194 = sbr.rel (!%p51_p3) target bundleno = 29 (0x1d), region = 24  ;;  %s196_s29 = sand.u32 (%p51_p3), 1, %s1062_s16  }
  0x13   : > { %s200_s30 = smul.u32 (%p51_p3), 3, %s1074_s19 }
  0x14   : > { %s938_s5 = smul.u32 (%p51_p3), 24, %s196_s29 }
  0x15   : > { %s939_s6 = smul.u32 (%p51_p3), 18, %s1078_s20 }
  0x16   : > { %s198_s12 = scalar_lea.vmem (%p51_p3), [#allocation3], %s938_s5 }
  0x17   : > { %s202_s7 = sadd.s32 (%p51_p3), %s939_s6, %s200_s30 }
  0x18   : > { %s831_s8 = sshll.u32 (%p51_p3), %s202_s7, 2 }
  0x19   : > { %s204_s11 = scalar_lea.vmem %s1249_s0, %s831_s8 }
  0x1a   : > { %v219_v0 = vld [vmem:[%s204_s11] sm:$0xff]  ;;  %v832_v2 = vld [vmem:[%s204_s11 + $0x8] sm:$0xf]  ;;  %v834_v3 = vld [vmem:[%s204_s11 + $0x2c] sm:$0xf] }
  0x1b   : > { %v221_v1 = vld [vmem:[%s204_s11 + $0x24] sm:$0xff]  ;;  %220 = vst [vmem:[%s198_s12] sm:$0xff] %v219_v0  ;;  %833 = vst [vmem:[%s198_s12 + $0x8] sm:$0xf] %v832_v2 }
  0x1c   : > { %222 = vst [vmem:[%s198_s12 + $0xc] sm:$0xff] %v221_v1  ;;  %835 = vst [vmem:[%s198_s12 + $0x14] sm:$0xf] %v834_v3 }
  0x1d PF: > { %p836_p7 = scmp.ge.s32.totalorder %s1082_s21, 1  ;;  %p262_p8 = scmp.lt.s32.totalorder %s1082_s21, 7 }
  0x1f   : > { %p263_p9 = pnand %p836_p7, %p262_p8 }
  0x20   : > { %s269_s13 = sand.u32 (!%p263_p9), 1, %s1058_s15   ;;  %s318_s14 = smul.u32 (!%p263_p9), 48, %s1066_s17 }
  0x21   : > { %266 = sbr.rel (%p263_p9) target bundleno = 321 (0x141), region = 58  ;;  %s838_s25 = sshll.u32 (!%p263_p9), %s1070_s18, 1 }
  0x22   : > { %s940_s24 = smul.u32 (!%p263_p9), 24, %s269_s13  ;;  %p319_p10 = scmp.lt.s32.totalorder (!%p263_p9), %s318_s14, 143 }
  0x23   : > { %p331_p11 = scmp.lt.s32.totalorder (!%p263_p9), %s838_s25, 3  ;;  %p842_p12 = scmp.ne.s32.totalorder (!%p263_p9), %s1066_s17, 0 }
  0x24   : > { %s1192_s10 = scalar_lea.vmem (!%p263_p9), [#allocation3], %s940_s24 }
  0x28   : > { %s1267_s14 = smov (!%p319_p10, %s318_s14), 143  ;;  %s1269_s25 = smov (!%p331_p11, %s838_s25), 3 }
  0x29   : > { %s837_s26 = sshll.u32 %s1267_s14, 2  ;;  %s839_s5 = sshll.u32 %s1269_s25, 2  ;;  %v1084_v4 = vmov (!%p842_p12), 0.0  }
  0x2a   : > { %s1180_s30 = scalar_lea.vmem %s1250_s1, %s837_s26  ;;  %s1185_s8 = scalar_lea.vmem %s1252_s3, %s839_s5  ;;  %353 = vst [vmem:[#allocation2] sm:$0xff] (!%p842_p12), %v1084_v4  ;;  %354 = vst [vmem:[#allocation2 + $0x8] sm:$0xff] (!%p842_p12), %v1084_v4 }
  0x2b   : > { %s1190_s18 = scalar_lea.vmem %s1253_s4, %s839_s5  ;;  %352 = sbr.rel (%p842_p12) target bundleno = 50 (0x32), region = 66 }
  0x32 PF: > { %v1000_v5 = vld [vmem:[%s1180_s30 + $0x40] sm:$0xff]   ;;  %v1085_v6 = vmov 0.0   ;;  %vm1086_vm0 = vmmov 0   ;;  %v1003_v9 = vld [vmem:[%s1180_s30 + $0x48] sm:$0xff]   ;;  %v1006_v12 = vld [vmem:[%s1180_s30 + $0x50] sm:$0xff]   ;;  %p870_p13 = scmp.ne.s32.totalorder %s1066_s17, 2 }
  0x33   : > { %918 = vmatprep.subr.bf16.mxu1 %v1085_v6  ;;  %v1001_v7 = vld [vmem:[%s1180_s30] sm:$0xff]   ;;  %887 = vmatprep.subr.bf16.mxu0 %v1000_v5  ;;  %v1004_v10 = vld [vmem:[%s1180_s30 + $0x8] sm:$0xff]   ;;  %v1007_v13 = vld [vmem:[%s1180_s30 + $0x10] sm:$0xff]  }
  0x34   : > { %v1002_v8 = vld [vmem:[%s1180_s30 + $0x80] sm:$0xff]   ;;  %934 = vmatprep.mubr.msk.bf16.mxu1 %vm1086_vm0, %v1085_v6  ;;  %888 = vmatpush3.bf16.msra.mxu0 %v1001_v7  ;;  %v1005_v11 = vld [vmem:[%s1180_s30 + $0x88] sm:$0xff]   ;;  %v1008_v14 = vld [vmem:[%s1180_s30 + $0x90] sm:$0xff]  }
  0x35   : > { %919 = vmatpush3.bf16.msra.mxu1 %v1002_v8  ;;  %889 = vmatprep.subr.bf16.mxu0 %v1003_v9  ;;  %v1009_v15 = vld [vmem:[%s1180_s30 + $0x58] sm:$0xff]   ;;  %v1012_v18 = vld [vmem:[%s1180_s30 + $0x60] sm:$0xff]   ;;  %v1015_v21 = vld [vmem:[%s1180_s30 + $0x68] sm:$0xff]  }
  0x36   : > { %920 = vmatprep.subr.bf16.mxu1 %v1085_v6  ;;  %v1010_v16 = vld [vmem:[%s1180_s30 + $0x18] sm:$0xff]   ;;  %v1013_v19 = vld [vmem:[%s1180_s30 + $0x20] sm:$0xff]   ;;  %v1016_v22 = vld [vmem:[%s1180_s30 + $0x28] sm:$0xff]  }
  0x37   : > { %v1011_v17 = vld [vmem:[%s1180_s30 + $0x98] sm:$0xff]   ;;  %v1014_v20 = vld [vmem:[%s1180_s30 + $0xa0] sm:$0xff]   ;;  %v1017_v23 = vld [vmem:[%s1180_s30 + $0xa8] sm:$0xff]  }
  0x38   : > { %890 = vmatpush3.bf16.msra.mxu0 %v1004_v10  ;;  %v1018_v24 = vld [vmem:[%s1180_s30 + $0x70] sm:$0xff]   ;;  %v1021_v27 = vld [vmem:[%s1180_s30 + $0x78] sm:$0xff]   ;;  %v355_v39 = vld [vmem:[#allocation2] sm:$0xff] }
  0x39   : > { %921 = vmatpush3.bf16.msra.mxu1 %v1005_v11  ;;  %891 = vmatprep.subr.bf16.mxu0 %v1006_v12  ;;  %v1019_v25 = vld [vmem:[%s1180_s30 + $0x30] sm:$0xff]   ;;  %v1022_v29 = vld [vmem:[%s1180_s30 + $0x38] sm:$0xff]   ;;  %v356_v45 = vld [vmem:[#allocation2 + $0x8] sm:$0xff] }
  0x3a   : > { %922 = vmatprep.subr.bf16.mxu1 %v1085_v6  ;;  %v1020_v26 = vld [vmem:[%s1180_s30 + $0xb0] sm:$0xff]   ;;  %v1023_v30 = vld [vmem:[%s1180_s30 + $0xb8] sm:$0xff]   ;;  %v871_v51 = vld [vmem:[%s1251_s2] ss:$0 sm:$0xff] (!%p870_p13) }
  0x3b   : > { %v1026_v28 = vld [vmem:[%s1192_s10 + $0x4] ss:$12 sps:$4 sm:$0xff]   ;;  %v1024_v31 = vld [vmem:[%s1192_s10] ss:$12 sps:$4 sm:$0xff]   ;;  %v1027_v32 = vld [vmem:[%s1192_s10 + $0x8] ss:$12 sps:$4 sm:$0xff]  }
  0x3c   : > { %892 = vmatpush3.bf16.msra.mxu0 %v1007_v13  ;;  %601 = vmatprep.mubr.bf16.mxu0 %v1026_v28  ;;  %v879_v54 = vld [vmem:[%s1185_s8] sm:$0xff] (!%p870_p13)  }
  0x3d   : > { %923 = vmatpush3.bf16.msra.mxu1 %v1008_v14  ;;  %893 = vmatprep.subr.bf16.mxu0 %v1009_v15  ;;  %v880_v55 = vunpack.c.l.bf16 (!%p870_p13), %v879_v54  ;;  %v881_v56 = vunpack.c.h.bf16 (!%p870_p13), %v879_v54 }
  0x3e   : > { %924 = vmatprep.subr.bf16.mxu1 %v1085_v6 }
  0x40   : > { %894 = vmatpush3.bf16.msra.mxu0 %v1010_v16 }
  0x41   : > { %925 = vmatpush3.bf16.msra.mxu1 %v1011_v17  ;;  %895 = vmatprep.subr.bf16.mxu0 %v1012_v18 }
  0x42   : > { %926 = vmatprep.subr.bf16.mxu1 %v1085_v6 }
  0x44   : > { %896 = vmatpush3.bf16.msra.mxu0 %v1013_v19 }
  0x45   : > { %927 = vmatpush3.bf16.msra.mxu1 %v1014_v20  ;;  %897 = vmatprep.subr.bf16.mxu0 %v1015_v21 }
  0x46   : > { %928 = vmatprep.subr.bf16.mxu1 %v1085_v6 }
  0x48   : > { %898 = vmatpush3.bf16.msra.mxu0 %v1016_v22 }
  0x49   : > { %929 = vmatpush3.bf16.msra.mxu1 %v1017_v23  ;;  %899 = vmatprep.subr.bf16.mxu0 %v1018_v24 }
  0x4a   : > { %930 = vmatprep.subr.bf16.mxu1 %v1085_v6 }
  0x4c   : > { %900 = vmatpush3.bf16.msra.mxu0 %v1019_v25 }
  0x4d   : > { %931 = vmatpush3.bf16.msra.mxu1 %v1020_v26  ;;  %901 = vmatprep.subr.bf16.mxu0 %v1021_v27 }
  0x4e   : > { %932 = vmatprep.subr.bf16.mxu1 %v1085_v6 }
  0x50   : > { %902 = vmatpush3.bf16.msra.mxu0 %v1022_v29 }
  0x51   : > { %933 = vmatpush3.bf16.msra.mxu1 %v1023_v30 }
  0x53   : > { %602 = vmatmul.mubr.bf16.vlgmr.msra.gmra.mrb[0].mxu0 %v1024_v31 }
  0x54   : > { %935 = vmatmul.mubr.bf16.vlgmr.msra.gmra.mrb[0].mxu1 %v1027_v32 }
 0x126   : > { %v903_v33 = vpop.f32.mrb[0].mxu0 }
 0x127   : > { %v644_v34 = vpop.f32.mrb[0].mxu1  ;;  %v904_v35 = vpop.f32.mrb[1].mxu0 }
 0x128   : > { %v905_v36 = vadd.f32 %v904_v35, %v903_v33  ;;  %v936_v37 = vpop.f32.mrb[1].mxu1  ;;  %v906_v38 = vpop.f32.mrb[2].mxu0 }
 0x129   : > { %v647_v40 = vpop.f32.mrb[2].mxu1  ;;  %v907_v41 = vpop.f32.mrb[3].mxu0 }
 0x12a   : > { %v645_v42 = vadd.f32 %v905_v36, %v644_v34  ;;  %v908_v43 = vadd.f32 %v907_v41, %v906_v38  ;;  %v937_v44 = vpop.f32.mrb[3].mxu1  ;;  %658 = sbr.rel (%p870_p13) target bundleno = 321 (0x141), region = 70 }
 0x12c   : > { %v651_v46 = vadd.f32 %v645_v42, %v355_v39  ;;  %v648_v47 = vadd.f32 %v908_v43, %v647_v40 }
 0x12e   : > { %653 = vst [vmem:[#allocation2] sm:$0xff] %v651_v46  ;;  %v652_v48 = vadd.f32 %v648_v47, %v356_v45 }
 0x130   : > { %654 = vst [vmem:[#allocation2 + $0x8] sm:$0xff] %v652_v48 }
 0x135   : > { %v659_v49 = vld [vmem:[#allocation2] sm:$0xff] }
 0x136   : > { %v668_v52 = vadd.f32 %v871_v51, %v659_v49 }
 0x137   : > { %v660_v50 = vld [vmem:[#allocation2 + $0x8] sm:$0xff] }
 0x138   : > { %v669_v53 = vadd.f32 %v871_v51, %v660_v50  ;;  %v674_v57 = vadd.f32 %v880_v55, %v668_v52 }
 0x13a   : > { %v675_v58 = vadd.f32 %v881_v56, %v669_v53  ;;  %v676_v59 = vmax.f32 %v674_v57, 0.0 }
 0x13c   : > { %v677_v60 = vmax.f32 %v675_v58, 0.0 }
 0x13e   : > { %v885_v61 = vpack.c.bf16 %v677_v60, %v676_v59 }
 0x140   : > { %886 = vst [vmem:[%s1190_s18] sm:$0xff] %v885_v61  }
 0x141 PF: > { %s14_s21 = sadd.s32 1, %s1082_s21   ;;  %s1254_s15 = smov %s1062_s16 }
 0x142   : > { %p11_p0 = scmp.ge.s32.totalorder %s14_s21, 8   ;;  %s1255_s16 = smov %s1163_s28 }
 0x143   : > { %s1256_s17 = smov %s1074_s19  ;;  %s1257_s18 = smov %s1078_s20 }
 0x144   : > { %s1258_s19 = smov %s1261_s22  ;;  %s1259_s20 = smov %s1265_s23 }
 0x145   :  { %13 = sbr.rel (!%p11_p0) target bundleno = 4 (0x4), region = 120 }

// kernel: classifier_model_forward.33
= control target key start
LH: loop header
LB: loop body
LE: loop exit
PB: predicated region body
PF: predicated region fallthrough
CT: control target
= control target key end

     0   :  { %s1171_s12 = smov 0   ;;  %s1173_s13 = smov 0   ;;  %s1411_s0 = inlined_call_operand.vmem [shape: bf16[8,1152], index: 0, kind: input, shape index: {}]   ;;  %s1412_s1 = inlined_call_operand.vmem [shape: bf16[1152,256], index: 1, kind: input, shape index: {}]   ;;  %s1413_s2 = inlined_call_operand.vmem [shape: f32[1,256], index: 2, kind: input, shape index: {}]   ;;  %s1414_s3 = inlined_call_operand.vmem [shape: bf16[8,256], index: 3, kind: output, shape index: {}]  }
   0x1   :  { %s1175_s14 = smov 0   ;;  %s1177_s15 = smov 0  }
   0x2   :  { %s1179_s16 = smov 0   ;;  %s1181_s17 = smov 0  }
   0x3   :  { %s1183_s18 = smov 0  }
   0x4 LB: > { %s25_s19 = sadd.s32 1, %s1138_s16  ;;  %s28_s20 = sadd.s32 1, %s1142_s17  ;;  %s1146_s18 = sphi %s1183_s18, %s13_s18   ;;  %s1142_s17 = sphi %s1181_s17, %s1420_s17   ;;  %s1138_s16 = sphi %s1179_s16, %s1419_s16   ;;  %s1134_s15 = sphi %s1177_s15, %s1418_s15   ;;  %s1130_s14 = sphi %s1175_s14, %s1417_s14   ;;  %s1126_s13 = sphi %s1173_s13, %s1416_s13   ;;  %s1122_s12 = sphi %s1171_s12, %s1415_s12  }
   0x5   : > { %p26_p0 = scmp.ge.s32.totalorder %s25_s19, 3  ;;  %p76_p1 = scmp.ne.s32.totalorder %s1126_s13, %s1122_s12 }
   0x6   : > { %p77_p2 = scmp.eq.s32.totalorder %s1146_s18, 0  ;;  %s69_s24 = sadd.s32 1, %s1126_s13 }
   0x7   : > { %s1422_s19 = smov (%p26_p0, %s25_s19), 0  ;;  %s1424_s20 = smov (!%p26_p0, %s28_s20), %s1142_s17 }
   0x8   : > { %p78_p3 = por %p77_p2, %p76_p1  ;;  %p30_p4 = scmp.ge.s32.totalorder %s1424_s20, 2 }
   0x9   : > { %s64_s21 = ssub.s32 %s1138_s16, %s1422_s19  ;;  %p914_p6 = scmp.ge.s32.totalorder %s1146_s18, 6 }
   0xa   : > { %s1426_s20 = smov (%p30_p4, %s1424_s20), 0 }
   0xb   : > { %s65_s22 = ssub.s32 %s1142_s17, %s1426_s20  ;;  %156 = sbr.rel (%p914_p6) target bundleno = 57 (0x39), region = 16 }
   0xc   : > { %s66_s23 = sor.u32 %s65_s22, %s64_s21 }
   0xd   : > { %p67_p5 = scmp.eq.s32.totalorder %s66_s23, 0 }
   0xf   : > { %s1222_s25 = scalar_select %p67_p5, %s1126_s13, %s69_s24  }
  0x12   : > { %172 = sbr.rel (!%p78_p3) target bundleno = 57 (0x39), region = 24  ;;  %s174_s26 = sand.u32 (%p78_p3), 1, %s1126_s13  }
  0x13   : > { %s952_s27 = smul.u32 (%p78_p3), 96, %s1138_s16 }
  0x14   : > { %s1004_s28 = smul.u32 (%p78_p3), 192, %s174_s26 }
  0x15   : > { %s179_s29 = sadd.s32 (%p78_p3), %s1142_s17, %s952_s27 }
  0x16   : > { %s916_s30 = sshll.u32 (%p78_p3), %s179_s29, 2  ;;  %s1236_s7 = scalar_lea.vmem (%p78_p3), [#allocation3], %s1004_s28 }
  0x17   : > { %s1231_s6 = scalar_lea.vmem (%p78_p3), %s1412_s1, %s916_s30 }
  0x18   : > { %v197_v0 = vld [vmem:[%s1231_s6] sm:$0xf] (%p78_p3)  ;;  %v199_v1 = vld [vmem:[%s1231_s6 + $0x8] sm:$0xf] (%p78_p3)  ;;  %v201_v2 = vld [vmem:[%s1231_s6 + $0x10] sm:$0xf] (%p78_p3) }
  0x19   : > { %198 = vst [vmem:[%s1236_s7] sm:$0xf] %v197_v0  ;;  %200 = vst [vmem:[%s1236_s7 + $0x4] sm:$0xf] %v199_v1  ;;  %v203_v3 = vld [vmem:[%s1231_s6 + $0x18] sm:$0xf] }
  0x1a   : > { %202 = vst [vmem:[%s1236_s7 + $0x8] sm:$0xf] %v201_v2  ;;  %v205_v4 = vld [vmem:[%s1231_s6 + $0x20] sm:$0xf]  ;;  %v207_v5 = vld [vmem:[%s1231_s6 + $0x28] sm:$0xf] }
  0x1b   : > { %204 = vst [vmem:[%s1236_s7 + $0xc] sm:$0xf] %v203_v3  ;;  %206 = vst [vmem:[%s1236_s7 + $0x10] sm:$0xf] %v205_v4  ;;  %v209_v6 = vld [vmem:[%s1231_s6 + $0x30] sm:$0xf] }
  0x1c   : > { %208 = vst [vmem:[%s1236_s7 + $0x14] sm:$0xf] %v207_v5  ;;  %v211_v7 = vld [vmem:[%s1231_s6 + $0x38] sm:$0xf]  ;;  %v213_v8 = vld [vmem:[%s1231_s6 + $0x40] sm:$0xf] }
  0x1d   : > { %210 = vst [vmem:[%s1236_s7 + $0x18] sm:$0xf] %v209_v6  ;;  %212 = vst [vmem:[%s1236_s7 + $0x1c] sm:$0xf] %v211_v7  ;;  %v215_v9 = vld [vmem:[%s1231_s6 + $0x48] sm:$0xf] }
  0x1e   : > { %214 = vst [vmem:[%s1236_s7 + $0x20] sm:$0xf] %v213_v8  ;;  %v217_v10 = vld [vmem:[%s1231_s6 + $0x50] sm:$0xf]  ;;  %v219_v11 = vld [vmem:[%s1231_s6 + $0x58] sm:$0xf] }
  0x1f   : > { %216 = vst [vmem:[%s1236_s7 + $0x24] sm:$0xf] %v215_v9  ;;  %218 = vst [vmem:[%s1236_s7 + $0x28] sm:$0xf] %v217_v10  ;;  %v221_v12 = vld [vmem:[%s1231_s6 + $0x60] sm:$0xf] }
  0x20   : > { %220 = vst [vmem:[%s1236_s7 + $0x2c] sm:$0xf] %v219_v11  ;;  %v223_v13 = vld [vmem:[%s1231_s6 + $0x68] sm:$0xf]  ;;  %v225_v14 = vld [vmem:[%s1231_s6 + $0x70] sm:$0xf] }
  0x21   : > { %222 = vst [vmem:[%s1236_s7 + $0x30] sm:$0xf] %v221_v12  ;;  %224 = vst [vmem:[%s1236_s7 + $0x34] sm:$0xf] %v223_v13  ;;  %v227_v15 = vld [vmem:[%s1231_s6 + $0x78] sm:$0xf] }
  0x22   : > { %226 = vst [vmem:[%s1236_s7 + $0x38] sm:$0xf] %v225_v14  ;;  %v229_v16 = vld [vmem:[%s1231_s6 + $0x80] sm:$0xf]  ;;  %v231_v17 = vld [vmem:[%s1231_s6 + $0x88] sm:$0xf] }
  0x23   : > { %228 = vst [vmem:[%s1236_s7 + $0x3c] sm:$0xf] %v227_v15  ;;  %230 = vst [vmem:[%s1236_s7 + $0x40] sm:$0xf] %v229_v16  ;;  %v233_v18 = vld [vmem:[%s1231_s6 + $0x90] sm:$0xf] }
  0x24   : > { %232 = vst [vmem:[%s1236_s7 + $0x44] sm:$0xf] %v231_v17  ;;  %v235_v19 = vld [vmem:[%s1231_s6 + $0x98] sm:$0xf]  ;;  %v237_v20 = vld [vmem:[%s1231_s6 + $0xa0] sm:$0xf] }
  0x25   : > { %234 = vst [vmem:[%s1236_s7 + $0x48] sm:$0xf] %v233_v18  ;;  %236 = vst [vmem:[%s1236_s7 + $0x4c] sm:$0xf] %v235_v19  ;;  %v239_v21 = vld [vmem:[%s1231_s6 + $0xa8] sm:$0xf] }
  0x26   : > { %238 = vst [vmem:[%s1236_s7 + $0x50] sm:$0xf] %v237_v20  ;;  %v241_v22 = vld [vmem:[%s1231_s6 + $0xb0] sm:$0xf]  ;;  %v243_v23 = vld [vmem:[%s1231_s6 + $0xb8] sm:$0xf] }
  0x27   : > { %240 = vst [vmem:[%s1236_s7 + $0x54] sm:$0xf] %v239_v21  ;;  %242 = vst [vmem:[%s1236_s7 + $0x58] sm:$0xf] %v241_v22  ;;  %v245_v24 = vld [vmem:[%s1231_s6 + $0xc0] sm:$0xf] }
  0x28   : > { %244 = vst [vmem:[%s1236_s7 + $0x5c] sm:$0xf] %v243_v23  ;;  %v247_v25 = vld [vmem:[%s1231_s6 + $0xc8] sm:$0xf]  ;;  %v249_v26 = vld [vmem:[%s1231_s6 + $0xd0] sm:$0xf] }
  0x29   : > { %246 = vst [vmem:[%s1236_s7 + $0x60] sm:$0xf] %v245_v24  ;;  %248 = vst [vmem:[%s1236_s7 + $0x64] sm:$0xf] %v247_v25  ;;  %v251_v27 = vld [vmem:[%s1231_s6 + $0xd8] sm:$0xf] }
  0x2a   : > { %250 = vst [vmem:[%s1236_s7 + $0x68] sm:$0xf] %v249_v26  ;;  %v253_v28 = vld [vmem:[%s1231_s6 + $0xe0] sm:$0xf]  ;;  %v255_v29 = vld [vmem:[%s1231_s6 + $0xe8] sm:$0xf] }
  0x2b   : > { %252 = vst [vmem:[%s1236_s7 + $0x6c] sm:$0xf] %v251_v27  ;;  %254 = vst [vmem:[%s1236_s7 + $0x70] sm:$0xf] %v253_v28  ;;  %v257_v30 = vld [vmem:[%s1231_s6 + $0xf0] sm:$0xf] }
  0x2c   : > { %256 = vst [vmem:[%s1236_s7 + $0x74] sm:$0xf] %v255_v29  ;;  %v259_v31 = vld [vmem:[%s1231_s6 + $0xf8] sm:$0xf]  ;;  %v261_v32 = vld [vmem:[%s1231_s6 + $0x100] sm:$0xf] }
  0x2d   : > { %258 = vst [vmem:[%s1236_s7 + $0x78] sm:$0xf] %v257_v30  ;;  %260 = vst [vmem:[%s1236_s7 + $0x7c] sm:$0xf] %v259_v31  ;;  %v263_v33 = vld [vmem:[%s1231_s6 + $0x108] sm:$0xf] }
  0x2e   : > { %262 = vst [vmem:[%s1236_s7 + $0x80] sm:$0xf] %v261_v32  ;;  %v265_v34 = vld [vmem:[%s1231_s6 + $0x110] sm:$0xf]  ;;  %v267_v35 = vld [vmem:[%s1231_s6 + $0x118] sm:$0xf] }
  0x2f   : > { %264 = vst [vmem:[%s1236_s7 + $0x84] sm:$0xf] %v263_v33  ;;  %266 = vst [vmem:[%s1236_s7 + $0x88] sm:$0xf] %v265_v34  ;;  %v269_v36 = vld [vmem:[%s1231_s6 + $0x120] sm:$0xf] }
  0x30   : > { %268 = vst [vmem:[%s1236_s7 + $0x8c] sm:$0xf] %v267_v35  ;;  %v271_v37 = vld [vmem:[%s1231_s6 + $0x128] sm:$0xf]  ;;  %v273_v38 = vld [vmem:[%s1231_s6 + $0x130] sm:$0xf] }
  0x31   : > { %270 = vst [vmem:[%s1236_s7 + $0x90] sm:$0xf] %v269_v36  ;;  %272 = vst [vmem:[%s1236_s7 + $0x94] sm:$0xf] %v271_v37  ;;  %v275_v39 = vld [vmem:[%s1231_s6 + $0x138] sm:$0xf] }
  0x32   : > { %274 = vst [vmem:[%s1236_s7 + $0x98] sm:$0xf] %v273_v38  ;;  %v277_v40 = vld [vmem:[%s1231_s6 + $0x140] sm:$0xf]  ;;  %v279_v41 = vld [vmem:[%s1231_s6 + $0x148] sm:$0xf] }
  0x33   : > { %276 = vst [vmem:[%s1236_s7 + $0x9c] sm:$0xf] %v275_v39  ;;  %278 = vst [vmem:[%s1236_s7 + $0xa0] sm:$0xf] %v277_v40  ;;  %v281_v42 = vld [vmem:[%s1231_s6 + $0x150] sm:$0xf] }
  0x34   : > { %280 = vst [vmem:[%s1236_s7 + $0xa4] sm:$0xf] %v279_v41  ;;  %v283_v43 = vld [vmem:[%s1231_s6 + $0x158] sm:$0xf]  ;;  %v285_v44 = vld [vmem:[%s1231_s6 + $0x160] sm:$0xf] }
  0x35   : > { %282 = vst [vmem:[%s1236_s7 + $0xa8] sm:$0xf] %v281_v42  ;;  %284 = vst [vmem:[%s1236_s7 + $0xac] sm:$0xf] %v283_v43  ;;  %v287_v45 = vld [vmem:[%s1231_s6 + $0x168] sm:$0xf] }
  0x36   : > { %286 = vst [vmem:[%s1236_s7 + $0xb0] sm:$0xf] %v285_v44  ;;  %v289_v46 = vld [vmem:[%s1231_s6 + $0x170] sm:$0xf]  ;;  %v291_v47 = vld [vmem:[%s1231_s6 + $0x178] sm:$0xf] }
  0x37   : > { %288 = vst [vmem:[%s1236_s7 + $0xb4] sm:$0xf] %v287_v45  ;;  %290 = vst [vmem:[%s1236_s7 + $0xb8] sm:$0xf] %v289_v46 }
  0x38   : > { %292 = vst [vmem:[%s1236_s7 + $0xbc] sm:$0xf] %v291_v47 }
  0x39 PF: > { %p917_p7 = scmp.ge.s32.totalorder %s1146_s18, 1  ;;  %p416_p8 = scmp.lt.s32.totalorder %s1146_s18, 7 }
  0x3b   : > { %p417_p9 = pnand %p917_p7, %p416_p8 }
  0x3c   : > { %s423_s8 = sand.u32 (!%p417_p9), 1, %s1122_s12   ;;  %s461_s9 = smul.u32 (!%p417_p9), 3, %s1130_s14 }
  0x3d   : > { %420 = sbr.rel (%p417_p9) target bundleno = 345 (0x159), region = 69  ;;  %p472_p10 = scmp.lt.s32.totalorder (!%p417_p9), %s1134_s15, 1 }
  0x3e   : > { %s1005_s10 = smul.u32 (!%p417_p9), 192, %s423_s8  ;;  %p464_p11 = scmp.lt.s32.totalorder (!%p417_p9), %s461_s9, 8 }
  0x3f   : > { %p920_p12 = scmp.ne.s32.totalorder (!%p417_p9), %s1130_s14, 0 }
  0x40   : > { %s1354_s4 = scalar_lea.vmem (!%p417_p9), [#allocation3], %s1005_s10 }
  0x44   : > { %s1428_s9 = smov (!%p464_p11, %s461_s9), 8  ;;  %s1430_s15 = smov (!%p472_p10, %s1134_s15), 1 }
  0x45   : > { %s918_s11 = sshll.u32 %s1428_s9, 2  ;;  %s474_s27 = scalar_lea.vmem %s1413_s2, %s1430_s15  ;;  %v1148_v48 = vmov (!%p920_p12), 0.0  }
  0x46   : > { %s1342_s23 = scalar_lea.vmem %s1411_s0, %s918_s11  ;;  %s919_s12 = sshll.u32 %s1430_s15, 2  ;;  %488 = vst [vmem:[#allocation2] sm:$0xff] (!%p920_p12), %v1148_v48 }
  0x47   : > { %s1352_s30 = scalar_lea.vmem %s1414_s3, %s919_s12  ;;  %487 = sbr.rel (%p920_p12) target bundleno = 78 (0x4e), region = 77 }
  0x4e PF: > { %v1065_v49 = vld [vmem:[%s1354_s4 + $0x40] sm:$0xff]   ;;  %v1149_v50 = vmov 0.0   ;;  %vm1150_vm0 = vmmov 0   ;;  %v1068_v53 = vld [vmem:[%s1354_s4 + $0x48] sm:$0xff]   ;;  %v1071_v56 = vld [vmem:[%s1354_s4 + $0x50] sm:$0xff]   ;;  %p948_p13 = scmp.ne.s32.totalorder %s1130_s14, 2 }
  0x4f   : > { %984 = vmatprep.subr.bf16.mxu1 %v1149_v50  ;;  %v1066_v51 = vld [vmem:[%s1354_s4] sm:$0xff]   ;;  %953 = vmatprep.subr.bf16.mxu0 %v1065_v49  ;;  %v1069_v54 = vld [vmem:[%s1354_s4 + $0x8] sm:$0xff]   ;;  %v1072_v57 = vld [vmem:[%s1354_s4 + $0x10] sm:$0xff]  }
  0x50   : > { %v1067_v52 = vld [vmem:[%s1354_s4 + $0x80] sm:$0xff]   ;;  %1000 = vmatprep.mubr.msk.bf16.mxu1 %vm1150_vm0, %v1149_v50  ;;  %954 = vmatpush3.bf16.msra.mxu0 %v1066_v51  ;;  %v1070_v55 = vld [vmem:[%s1354_s4 + $0x88] sm:$0xff]   ;;  %v1073_v58 = vld [vmem:[%s1354_s4 + $0x90] sm:$0xff]  }
  0x51   : > { %985 = vmatpush3.bf16.msra.mxu1 %v1067_v52  ;;  %955 = vmatprep.subr.bf16.mxu0 %v1068_v53  ;;  %v1074_v59 = vld [vmem:[%s1354_s4 + $0x58] sm:$0xff]   ;;  %v1077_v62 = vld [vmem:[%s1354_s4 + $0x60] sm:$0xff]   ;;  %v1080_v1 = vld [vmem:[%s1354_s4 + $0x68] sm:$0xff]  }
  0x52   : > { %986 = vmatprep.subr.bf16.mxu1 %v1149_v50  ;;  %v1075_v60 = vld [vmem:[%s1354_s4 + $0x18] sm:$0xff]   ;;  %v1078_v63 = vld [vmem:[%s1354_s4 + $0x20] sm:$0xff]   ;;  %v1081_v2 = vld [vmem:[%s1354_s4 + $0x28] sm:$0xff]  }
  0x53   : > { %v1076_v61 = vld [vmem:[%s1354_s4 + $0x98] sm:$0xff]   ;;  %v1079_v0 = vld [vmem:[%s1354_s4 + $0xa0] sm:$0xff]   ;;  %v1082_v3 = vld [vmem:[%s1354_s4 + $0xa8] sm:$0xff]  }
  0x54   : > { %956 = vmatpush3.bf16.msra.mxu0 %v1069_v54  ;;  %v1083_v4 = vld [vmem:[%s1354_s4 + $0x70] sm:$0xff]   ;;  %v1086_v7 = vld [vmem:[%s1354_s4 + $0x78] sm:$0xff]   ;;  %v1091_v13 = vld [vmem:[%s1342_s23 + $0x8] ss:$0 sps:$4 sm:$0xff]  }
  0x55   : > { %987 = vmatpush3.bf16.msra.mxu1 %v1070_v55  ;;  %957 = vmatprep.subr.bf16.mxu0 %v1071_v56  ;;  %v1084_v5 = vld [vmem:[%s1354_s4 + $0x30] sm:$0xff]   ;;  %v490_v8 = vld [vmem:[%s1342_s23] sm:$0xff] }
  0x56   : > { %988 = vmatprep.subr.bf16.mxu1 %v1149_v50  ;;  %v1085_v6 = vld [vmem:[%s1354_s4 + $0xb0] sm:$0xff]   ;;  %v922_v9 = vcombine.high %v490_v8, %v490_v8  ;;  %v1087_v10 = vld [vmem:[%s1354_s4 + $0x38] sm:$0xff]   ;;  %v921_v12 = vcombine.low %v490_v8, %v490_v8 }
  0x57   : > { %v1088_v11 = vld [vmem:[%s1354_s4 + $0xb8] sm:$0xff]  }
  0x58   : > { %958 = vmatpush3.bf16.msra.mxu0 %v1072_v57  ;;  %727 = vmatprep.mubr.bf16.mxu0 %v922_v9  ;;  %v489_v20 = vld [vmem:[#allocation2] sm:$0xff] }
  0x59   : > { %989 = vmatpush3.bf16.msra.mxu1 %v1073_v58  ;;  %959 = vmatprep.subr.bf16.mxu0 %v1074_v59  ;;  %v949_v27 = vld [vmem:[%s474_s27] ss:$0 sm:$0xff] (!%p948_p13) }
  0x5a   : > { %990 = vmatprep.subr.bf16.mxu1 %v1149_v50 }
  0x5c   : > { %960 = vmatpush3.bf16.msra.mxu0 %v1075_v60 }
  0x5d   : > { %991 = vmatpush3.bf16.msra.mxu1 %v1076_v61  ;;  %961 = vmatprep.subr.bf16.mxu0 %v1077_v62 }
  0x5e   : > { %992 = vmatprep.subr.bf16.mxu1 %v1149_v50 }
  0x60   : > { %962 = vmatpush3.bf16.msra.mxu0 %v1078_v63 }
  0x61   : > { %993 = vmatpush3.bf16.msra.mxu1 %v1079_v0  ;;  %963 = vmatprep.subr.bf16.mxu0 %v1080_v1 }
  0x62   : > { %994 = vmatprep.subr.bf16.mxu1 %v1149_v50 }
  0x64   : > { %964 = vmatpush3.bf16.msra.mxu0 %v1081_v2 }
  0x65   : > { %995 = vmatpush3.bf16.msra.mxu1 %v1082_v3  ;;  %965 = vmatprep.subr.bf16.mxu0 %v1083_v4 }
  0x66   : > { %996 = vmatprep.subr.bf16.mxu1 %v1149_v50 }
  0x68   : > { %966 = vmatpush3.bf16.msra.mxu0 %v1084_v5 }
  0x69   : > { %997 = vmatpush3.bf16.msra.mxu1 %v1085_v6  ;;  %967 = vmatprep.subr.bf16.mxu0 %v1086_v7 }
  0x6a   : > { %998 = vmatprep.subr.bf16.mxu1 %v1149_v50 }
  0x6c   : > { %968 = vmatpush3.bf16.msra.mxu0 %v1087_v10 }
  0x6d   : > { %999 = vmatpush3.bf16.msra.mxu1 %v1088_v11 }
  0x6f   : > { %728 = vmatmul.mubr.bf16.vlgmr.msra.gmra.mrb[0].mxu0 %v921_v12 }
  0x70   : > { %1001 = vmatmul.mubr.bf16.vlgmr.msra.gmra.mrb[0].mxu1 %v1091_v13 }
 0x142   : > { %v969_v14 = vpop.f32.mrb[0].mxu0 }
 0x143   : > { %v769_v15 = vpop.f32.mrb[0].mxu1  ;;  %v970_v16 = vpop.f32.mrb[1].mxu0 }
 0x144   : > { %v971_v17 = vadd.f32 %v970_v16, %v969_v14  ;;  %v1002_v18 = vpop.f32.mrb[1].mxu1  ;;  %v972_v19 = vpop.f32.mrb[2].mxu0  ;;  %780 = sbr.rel (%p948_p13) target bundleno = 345 (0x159), region = 81 }
 0x145   : > { %v772_v21 = vpop.f32.mrb[2].mxu1  ;;  %v973_v22 = vpop.f32.mrb[3].mxu0 }
 0x146   : > { %v770_v23 = vadd.f32 %v971_v17, %v769_v15  ;;  %v1003_v24 = vpop.f32.mrb[3].mxu1 }
 0x148   : > { %v775_v25 = vadd.f32 %v770_v23, %v489_v20 }
 0x14a   : > { %776 = vst [vmem:[#allocation2] sm:$0xff] %v775_v25 }
 0x151   : > { %v781_v26 = vld [vmem:[#allocation2] sm:$0xff] }
 0x152   : > { %v789_v28 = vadd.f32 %v949_v27, %v781_v26 }
 0x154   : > { %v790_v29 = vmax.f32 %v789_v28, 0.0 }
 0x156   : > { %v791_v30 = vpack.c.bf16 %v790_v29, %v790_v29 }
 0x158   : > { %792 = vst [vmem:[%s1352_s30] sm:$0xf] %v791_v30 }
 0x159 PF: > { %s13_s18 = sadd.s32 1, %s1146_s18   ;;  %s1415_s12 = smov %s1126_s13 }
 0x15a   : > { %p10_p0 = scmp.ge.s32.totalorder %s13_s18, 8   ;;  %s1416_s13 = smov %s1222_s25 }
 0x15b   : > { %s1417_s14 = smov %s1138_s16  ;;  %s1418_s15 = smov %s1142_s17 }
 0x15c   : > { %s1419_s16 = smov %s1422_s19  ;;  %s1420_s17 = smov %s1426_s20 }
 0x15d   :  { %12 = sbr.rel (!%p10_p0) target bundleno = 4 (0x4), region = 122 }

// kernel: classifier_model_forward.34
= control target key start
LH: loop header
LB: loop body
LE: loop exit
PB: predicated region body
PF: predicated region fallthrough
CT: control target
= control target key end

     0   :  { %s753_s12 = smov 0   ;;  %s755_s13 = smov 0   ;;  %s843_s0 = inlined_call_operand.vmem [shape: bf16[8,128], index: 0, kind: input, shape index: {}]   ;;  %s844_s1 = inlined_call_operand.vmem [shape: bf16[128,256], index: 1, kind: input, shape index: {}]   ;;  %s845_s2 = inlined_call_operand.vmem [shape: f32[1,256], index: 2, kind: input, shape index: {}]   ;;  %s846_s3 = inlined_call_operand.vmem [shape: bf16[8,256], index: 3, kind: output, shape index: {}]  }
   0x1   :  { %s757_s14 = smov 0   ;;  %s759_s15 = smov 0  }
   0x2   :  { %s761_s16 = smov 0  }
   0x3 LB: > { %s28_s17 = sadd.s32 1, %s725_s15  ;;  %p76_p1 = scmp.ne.s32.totalorder %s717_s13, %s713_s12  ;;  %s729_s16 = sphi %s761_s16, %s13_s16   ;;  %s725_s15 = sphi %s759_s15, %s850_s15   ;;  %s721_s14 = sphi %s757_s14, %s849_s14   ;;  %s717_s13 = sphi %s755_s13, %s848_s13   ;;  %s713_s12 = sphi %s753_s12, %s847_s12  }
   0x4   : > { %p30_p0 = scmp.ge.s32.totalorder %s28_s17, 2  ;;  %p77_p2 = scmp.eq.s32.totalorder %s729_s16, 0 }
   0x5   : > { %s69_s19 = sadd.s32 1, %s717_s13  ;;  %p595_p5 = scmp.ge.s32.totalorder %s729_s16, 2 }
   0x6   : > { %s852_s17 = smov (%p30_p0, %s28_s17), 0  ;;  %p78_p3 = por %p77_p2, %p76_p1 }
   0x7   : > { %s65_s18 = ssub.s32 %s725_s15, %s852_s17  ;;  %166 = sbr.rel (%p595_p5) target bundleno = 28 (0x1c), region = 20 }
   0x8   : > { %p67_p4 = scmp.eq.s32.totalorder %s65_s18, 0 }
   0xa   : > { %s788_s20 = scalar_select %p67_p4, %s717_s13, %s69_s19  }
   0xe   : > { %169 = sbr.rel (!%p78_p3) target bundleno = 28 (0x1c), region = 24  ;;  %s171_s21 = sand.u32 (%p78_p3), 1, %s717_s13  }
   0xf   : > { %s597_s22 = sshll.u32 (%p78_p3), %s725_s15, 2  ;;  %s596_s23 = sshll.u32 (%p78_p3), %s171_s21, 6 }
  0x10   : > { %s796_s26 = scalar_lea.vmem (%p78_p3), %s844_s1, %s597_s22  ;;  %s173_s27 = scalar_lea.vmem (%p78_p3), [#allocation3], %s596_s23 }
  0x11   : > { %v194_v0 = vld [vmem:[%s796_s26] sm:$0xf] (%p78_p3)  ;;  %v196_v1 = vld [vmem:[%s796_s26 + $0x8] sm:$0xf] (%p78_p3)  ;;  %v198_v2 = vld [vmem:[%s796_s26 + $0x10] sm:$0xf] (%p78_p3) }
  0x12   : > { %195 = vst [vmem:[%s173_s27] sm:$0xf] (%p78_p3), %v194_v0  ;;  %197 = vst [vmem:[%s173_s27 + $0x4] sm:$0xf] (%p78_p3), %v196_v1  ;;  %v200_v3 = vld [vmem:[%s796_s26 + $0x18] sm:$0xf] (%p78_p3) }
  0x13   : > { %v202_v4 = vld [vmem:[%s796_s26 + $0x20] sm:$0xf] (%p78_p3)  ;;  %199 = vst [vmem:[%s173_s27 + $0x8] sm:$0xf] (%p78_p3), %v198_v2  ;;  %201 = vst [vmem:[%s173_s27 + $0xc] sm:$0xf] (%p78_p3), %v200_v3 }
  0x14   : > { %203 = vst [vmem:[%s173_s27 + $0x10] sm:$0xf] (%p78_p3), %v202_v4  ;;  %v204_v5 = vld [vmem:[%s796_s26 + $0x28] sm:$0xf] (%p78_p3)  ;;  %v206_v6 = vld [vmem:[%s796_s26 + $0x30] sm:$0xf] (%p78_p3) }
  0x15   : > { %v208_v7 = vld [vmem:[%s796_s26 + $0x38] sm:$0xf]  ;;  %205 = vst [vmem:[%s173_s27 + $0x14] sm:$0xf] %v204_v5  ;;  %207 = vst [vmem:[%s173_s27 + $0x18] sm:$0xf] %v206_v6 }
  0x16   : > { %209 = vst [vmem:[%s173_s27 + $0x1c] sm:$0xf] %v208_v7  ;;  %v210_v8 = vld [vmem:[%s796_s26 + $0x40] sm:$0xf]  ;;  %v212_v9 = vld [vmem:[%s796_s26 + $0x48] sm:$0xf] }
  0x17   : > { %v214_v10 = vld [vmem:[%s796_s26 + $0x50] sm:$0xf]  ;;  %211 = vst [vmem:[%s173_s27 + $0x20] sm:$0xf] %v210_v8  ;;  %213 = vst [vmem:[%s173_s27 + $0x24] sm:$0xf] %v212_v9 }
  0x18   : > { %215 = vst [vmem:[%s173_s27 + $0x28] sm:$0xf] %v214_v10  ;;  %v216_v11 = vld [vmem:[%s796_s26 + $0x58] sm:$0xf]  ;;  %v218_v12 = vld [vmem:[%s796_s26 + $0x60] sm:$0xf] }
  0x19   : > { %v220_v13 = vld [vmem:[%s796_s26 + $0x68] sm:$0xf]  ;;  %217 = vst [vmem:[%s173_s27 + $0x2c] sm:$0xf] %v216_v11  ;;  %219 = vst [vmem:[%s173_s27 + $0x30] sm:$0xf] %v218_v12 }
  0x1a   : > { %221 = vst [vmem:[%s173_s27 + $0x34] sm:$0xf] %v220_v13  ;;  %v222_v14 = vld [vmem:[%s796_s26 + $0x70] sm:$0xf]  ;;  %v224_v15 = vld [vmem:[%s796_s26 + $0x78] sm:$0xf] }
  0x1b   : > { %223 = vst [vmem:[%s173_s27 + $0x38] sm:$0xf] %v222_v14  ;;  %225 = vst [vmem:[%s173_s27 + $0x3c] sm:$0xf] %v224_v15 }
  0x1c PF: > { %p598_p6 = scmp.ge.s32.totalorder %s729_s16, 1  ;;  %p285_p7 = scmp.lt.s32.totalorder %s729_s16, 3 }
  0x1e   : > { %p286_p8 = pnand %p598_p6, %p285_p7 }
  0x1f   : > { %s292_s28 = sand.u32 (!%p286_p8), 1, %s713_s12   ;;  %v731_v16 = vmov (!%p286_p8), 0.0   ;;  %vm732_vm0 = vmmov (!%p286_p8), 0   ;;  %v354_v25 = vld [vmem:[%s843_s0] sm:$0xf] (!%p286_p8)  ;;  %p336_p9 = scmp.lt.s32.totalorder (!%p286_p8), %s721_s14, 1 }
  0x20   : > { %289 = sbr.rel (%p286_p8) target bundleno = 283 (0x11b), region = 69  ;;  %621 = vmatprep.subr.bf16.mxu0 (!%p286_p8), %v731_v16  ;;  %s599_s29 = sshll.u32 (!%p286_p8), %s292_s28, 6  ;;  %637 = vmatprep.mubr.msk.bf16.mxu0 (!%p286_p8), %vm732_vm0, %v731_v16 }
  0x21   : > { %s294_s30 = scalar_lea.vmem (!%p286_p8), [#allocation3], %s599_s29 }
  0x22   : > { %v683_v17 = vld [vmem:[%s294_s30] sm:$0xff] (!%p286_p8)   ;;  %v684_v18 = vld [vmem:[%s294_s30 + $0x8] sm:$0xff] (!%p286_p8)   ;;  %v685_v19 = vld [vmem:[%s294_s30 + $0x10] sm:$0xff] (!%p286_p8)  }
  0x23   : > { %622 = vmatpush3.bf16.msra.mxu0 (!%p286_p8), %v683_v17  ;;  %v686_v20 = vld [vmem:[%s294_s30 + $0x18] sm:$0xff] (!%p286_p8)   ;;  %v687_v21 = vld [vmem:[%s294_s30 + $0x20] sm:$0xff] (!%p286_p8)   ;;  %v688_v22 = vld [vmem:[%s294_s30 + $0x28] sm:$0xff] (!%p286_p8)  }
  0x24   : > { %623 = vmatprep.subr.bf16.mxu0 (!%p286_p8), %v731_v16  ;;  %v689_v23 = vld [vmem:[%s294_s30 + $0x30] sm:$0xff] (!%p286_p8)   ;;  %v690_v24 = vld [vmem:[%s294_s30 + $0x38] sm:$0xff] (!%p286_p8)  }
  0x27   : > { %624 = vmatpush3.bf16.msra.mxu0 %v684_v18  ;;  %s854_s14 = smov (!%p336_p9, %s721_s14), 1 }
  0x28   : > { %625 = vmatprep.subr.bf16.mxu0 %v731_v16  ;;  %s338_s8 = scalar_lea.vmem %s845_s2, %s854_s14  ;;  %s600_s9 = sshll.u32 %s854_s14, 2 }
  0x29   : > { %v609_v26 = vld [vmem:[%s338_s8] ss:$0 sm:$0xff]  ;;  %s346_s12 = scalar_lea.vmem %s846_s3, %s600_s9 }
  0x2b   : > { %626 = vmatpush3.bf16.msra.mxu0 %v685_v19 }
  0x2c   : > { %627 = vmatprep.subr.bf16.mxu0 %v731_v16 }
  0x2f   : > { %628 = vmatpush3.bf16.msra.mxu0 %v686_v20 }
  0x30   : > { %629 = vmatprep.subr.bf16.mxu0 %v731_v16 }
  0x33   : > { %630 = vmatpush3.bf16.msra.mxu0 %v687_v21 }
  0x34   : > { %631 = vmatprep.subr.bf16.mxu0 %v731_v16 }
  0x37   : > { %632 = vmatpush3.bf16.msra.mxu0 %v688_v22 }
  0x38   : > { %633 = vmatprep.subr.bf16.mxu0 %v731_v16 }
  0x3b   : > { %634 = vmatpush3.bf16.msra.mxu0 %v689_v23 }
  0x3c   : > { %635 = vmatprep.subr.bf16.mxu0 %v731_v16 }
  0x3f   : > { %636 = vmatpush3.bf16.msra.mxu0 %v690_v24 }
  0x42   : > { %638 = vmatmul.mubr.bf16.vlgmr.msra.gmra.mrb[0].mxu0 %v354_v25 }
 0x115   : > { %v453_v27 = vpop.f32.mrb[0].mxu0 }
 0x116   : > { %v472_v28 = vadd.f32 %v609_v26, %v453_v27  ;;  %v639_v29 = vpop.f32.mrb[1].mxu0 }
 0x117   : > { %v456_v30 = vpop.f32.mrb[2].mxu0 }
 0x118   : > { %v473_v31 = vpack.c.bf16 %v472_v28, %v472_v28  ;;  %v640_v32 = vpop.f32.mrb[3].mxu0 }
 0x11a   : > { %474 = vst [vmem:[%s346_s12] sm:$0xf] %v473_v31 }
 0x11b PF: > { %s13_s16 = sadd.s32 1, %s729_s16   ;;  %s847_s12 = smov %s717_s13 }
 0x11c   : > { %p10_p10 = scmp.ge.s32.totalorder %s13_s16, 4   ;;  %s848_s13 = smov %s788_s20 }
 0x11d   : > { %s849_s14 = smov %s725_s15  ;;  %s850_s15 = smov %s852_s17 }
 0x11e   :  { %12 = sbr.rel (!%p10_p10) target bundleno = 3 (0x3), region = 122 }

// kernel: classifier_model_forward.36
= control target key start
LH: loop header
LB: loop body
LE: loop exit
PB: predicated region body
PF: predicated region fallthrough
CT: control target
= control target key end

     0   :  { %s1171_s12 = smov 0   ;;  %s1173_s13 = smov 0   ;;  %s1411_s0 = inlined_call_operand.vmem [shape: bf16[8,2304], index: 0, kind: input, shape index: {}]   ;;  %s1412_s1 = inlined_call_operand.vmem [shape: bf16[2304,256], index: 1, kind: input, shape index: {}]   ;;  %s1413_s2 = inlined_call_operand.vmem [shape: f32[1,256], index: 2, kind: input, shape index: {}]   ;;  %s1414_s3 = inlined_call_operand.vmem [shape: bf16[8,256], index: 3, kind: output, shape index: {}]  }
   0x1   :  { %s1175_s14 = smov 0   ;;  %s1177_s15 = smov 0  }
   0x2   :  { %s1179_s16 = smov 0   ;;  %s1181_s17 = smov 0  }
   0x3   :  { %s1183_s18 = smov 0  }
   0x4 LB: > { %s25_s19 = sadd.s32 1, %s1138_s16  ;;  %s28_s20 = sadd.s32 1, %s1142_s17  ;;  %s1146_s18 = sphi %s1183_s18, %s13_s18   ;;  %s1142_s17 = sphi %s1181_s17, %s1420_s17   ;;  %s1138_s16 = sphi %s1179_s16, %s1419_s16   ;;  %s1134_s15 = sphi %s1177_s15, %s1418_s15   ;;  %s1130_s14 = sphi %s1175_s14, %s1417_s14   ;;  %s1126_s13 = sphi %s1173_s13, %s1416_s13   ;;  %s1122_s12 = sphi %s1171_s12, %s1415_s12  }
   0x5   : > { %p26_p0 = scmp.ge.s32.totalorder %s25_s19, 6  ;;  %p76_p1 = scmp.ne.s32.totalorder %s1126_s13, %s1122_s12 }
   0x6   : > { %p77_p2 = scmp.eq.s32.totalorder %s1146_s18, 0  ;;  %s69_s24 = sadd.s32 1, %s1126_s13 }
   0x7   : > { %s1422_s19 = smov (%p26_p0, %s25_s19), 0  ;;  %s1424_s20 = smov (!%p26_p0, %s28_s20), %s1142_s17 }
   0x8   : > { %p78_p3 = por %p77_p2, %p76_p1  ;;  %p30_p4 = scmp.ge.s32.totalorder %s1424_s20, 2 }
   0x9   : > { %s64_s21 = ssub.s32 %s1138_s16, %s1422_s19  ;;  %p914_p6 = scmp.ge.s32.totalorder %s1146_s18, 12 }
   0xa   : > { %s1426_s20 = smov (%p30_p4, %s1424_s20), 0 }
   0xb   : > { %s65_s22 = ssub.s32 %s1142_s17, %s1426_s20  ;;  %156 = sbr.rel (%p914_p6) target bundleno = 57 (0x39), region = 16 }
   0xc   : > { %s66_s23 = sor.u32 %s65_s22, %s64_s21 }
   0xd   : > { %p67_p5 = scmp.eq.s32.totalorder %s66_s23, 0 }
   0xf   : > { %s1222_s25 = scalar_select %p67_p5, %s1126_s13, %s69_s24  }
  0x12   : > { %172 = sbr.rel (!%p78_p3) target bundleno = 57 (0x39), region = 24  ;;  %s174_s26 = sand.u32 (%p78_p3), 1, %s1126_s13  }
  0x13   : > { %s952_s27 = smul.u32 (%p78_p3), 96, %s1138_s16 }
  0x14   : > { %s1004_s28 = smul.u32 (%p78_p3), 192, %s174_s26 }
  0x15   : > { %s179_s29 = sadd.s32 (%p78_p3), %s1142_s17, %s952_s27 }
  0x16   : > { %s916_s30 = sshll.u32 (%p78_p3), %s179_s29, 2  ;;  %s1236_s7 = scalar_lea.vmem (%p78_p3), [#allocation3], %s1004_s28 }
  0x17   : > { %s1231_s6 = scalar_lea.vmem (%p78_p3), %s1412_s1, %s916_s30 }
  0x18   : > { %v197_v0 = vld [vmem:[%s1231_s6] sm:$0xf] (%p78_p3)  ;;  %v199_v1 = vld [vmem:[%s1231_s6 + $0x8] sm:$0xf] (%p78_p3)  ;;  %v201_v2 = vld [vmem:[%s1231_s6 + $0x10] sm:$0xf] (%p78_p3) }
  0x19   : > { %198 = vst [vmem:[%s1236_s7] sm:$0xf] %v197_v0  ;;  %200 = vst [vmem:[%s1236_s7 + $0x4] sm:$0xf] %v199_v1  ;;  %v203_v3 = vld [vmem:[%s1231_s6 + $0x18] sm:$0xf] }
  0x1a   : > { %202 = vst [vmem:[%s1236_s7 + $0x8] sm:$0xf] %v201_v2  ;;  %v205_v4 = vld [vmem:[%s1231_s6 + $0x20] sm:$0xf]  ;;  %v207_v5 = vld [vmem:[%s1231_s6 + $0x28] sm:$0xf] }
  0x1b   : > { %204 = vst [vmem:[%s1236_s7 + $0xc] sm:$0xf] %v203_v3  ;;  %206 = vst [vmem:[%s1236_s7 + $0x10] sm:$0xf] %v205_v4  ;;  %v209_v6 = vld [vmem:[%s1231_s6 + $0x30] sm:$0xf] }
  0x1c   : > { %208 = vst [vmem:[%s1236_s7 + $0x14] sm:$0xf] %v207_v5  ;;  %v211_v7 = vld [vmem:[%s1231_s6 + $0x38] sm:$0xf]  ;;  %v213_v8 = vld [vmem:[%s1231_s6 + $0x40] sm:$0xf] }
  0x1d   : > { %210 = vst [vmem:[%s1236_s7 + $0x18] sm:$0xf] %v209_v6  ;;  %212 = vst [vmem:[%s1236_s7 + $0x1c] sm:$0xf] %v211_v7  ;;  %v215_v9 = vld [vmem:[%s1231_s6 + $0x48] sm:$0xf] }
  0x1e   : > { %214 = vst [vmem:[%s1236_s7 + $0x20] sm:$0xf] %v213_v8  ;;  %v217_v10 = vld [vmem:[%s1231_s6 + $0x50] sm:$0xf]  ;;  %v219_v11 = vld [vmem:[%s1231_s6 + $0x58] sm:$0xf] }
  0x1f   : > { %216 = vst [vmem:[%s1236_s7 + $0x24] sm:$0xf] %v215_v9  ;;  %218 = vst [vmem:[%s1236_s7 + $0x28] sm:$0xf] %v217_v10  ;;  %v221_v12 = vld [vmem:[%s1231_s6 + $0x60] sm:$0xf] }
  0x20   : > { %220 = vst [vmem:[%s1236_s7 + $0x2c] sm:$0xf] %v219_v11  ;;  %v223_v13 = vld [vmem:[%s1231_s6 + $0x68] sm:$0xf]  ;;  %v225_v14 = vld [vmem:[%s1231_s6 + $0x70] sm:$0xf] }
  0x21   : > { %222 = vst [vmem:[%s1236_s7 + $0x30] sm:$0xf] %v221_v12  ;;  %224 = vst [vmem:[%s1236_s7 + $0x34] sm:$0xf] %v223_v13  ;;  %v227_v15 = vld [vmem:[%s1231_s6 + $0x78] sm:$0xf] }
  0x22   : > { %226 = vst [vmem:[%s1236_s7 + $0x38] sm:$0xf] %v225_v14  ;;  %v229_v16 = vld [vmem:[%s1231_s6 + $0x80] sm:$0xf]  ;;  %v231_v17 = vld [vmem:[%s1231_s6 + $0x88] sm:$0xf] }
  0x23   : > { %228 = vst [vmem:[%s1236_s7 + $0x3c] sm:$0xf] %v227_v15  ;;  %230 = vst [vmem:[%s1236_s7 + $0x40] sm:$0xf] %v229_v16  ;;  %v233_v18 = vld [vmem:[%s1231_s6 + $0x90] sm:$0xf] }
  0x24   : > { %232 = vst [vmem:[%s1236_s7 + $0x44] sm:$0xf] %v231_v17  ;;  %v235_v19 = vld [vmem:[%s1231_s6 + $0x98] sm:$0xf]  ;;  %v237_v20 = vld [vmem:[%s1231_s6 + $0xa0] sm:$0xf] }
  0x25   : > { %234 = vst [vmem:[%s1236_s7 + $0x48] sm:$0xf] %v233_v18  ;;  %236 = vst [vmem:[%s1236_s7 + $0x4c] sm:$0xf] %v235_v19  ;;  %v239_v21 = vld [vmem:[%s1231_s6 + $0xa8] sm:$0xf] }
  0x26   : > { %238 = vst [vmem:[%s1236_s7 + $0x50] sm:$0xf] %v237_v20  ;;  %v241_v22 = vld [vmem:[%s1231_s6 + $0xb0] sm:$0xf]  ;;  %v243_v23 = vld [vmem:[%s1231_s6 + $0xb8] sm:$0xf] }
  0x27   : > { %240 = vst [vmem:[%s1236_s7 + $0x54] sm:$0xf] %v239_v21  ;;  %242 = vst [vmem:[%s1236_s7 + $0x58] sm:$0xf] %v241_v22  ;;  %v245_v24 = vld [vmem:[%s1231_s6 + $0xc0] sm:$0xf] }
  0x28   : > { %244 = vst [vmem:[%s1236_s7 + $0x5c] sm:$0xf] %v243_v23  ;;  %v247_v25 = vld [vmem:[%s1231_s6 + $0xc8] sm:$0xf]  ;;  %v249_v26 = vld [vmem:[%s1231_s6 + $0xd0] sm:$0xf] }
  0x29   : > { %246 = vst [vmem:[%s1236_s7 + $0x60] sm:$0xf] %v245_v24  ;;  %248 = vst [vmem:[%s1236_s7 + $0x64] sm:$0xf] %v247_v25  ;;  %v251_v27 = vld [vmem:[%s1231_s6 + $0xd8] sm:$0xf] }
  0x2a   : > { %250 = vst [vmem:[%s1236_s7 + $0x68] sm:$0xf] %v249_v26  ;;  %v253_v28 = vld [vmem:[%s1231_s6 + $0xe0] sm:$0xf]  ;;  %v255_v29 = vld [vmem:[%s1231_s6 + $0xe8] sm:$0xf] }
  0x2b   : > { %252 = vst [vmem:[%s1236_s7 + $0x6c] sm:$0xf] %v251_v27  ;;  %254 = vst [vmem:[%s1236_s7 + $0x70] sm:$0xf] %v253_v28  ;;  %v257_v30 = vld [vmem:[%s1231_s6 + $0xf0] sm:$0xf] }
  0x2c   : > { %256 = vst [vmem:[%s1236_s7 + $0x74] sm:$0xf] %v255_v29  ;;  %v259_v31 = vld [vmem:[%s1231_s6 + $0xf8] sm:$0xf]  ;;  %v261_v32 = vld [vmem:[%s1231_s6 + $0x100] sm:$0xf] }
  0x2d   : > { %258 = vst [vmem:[%s1236_s7 + $0x78] sm:$0xf] %v257_v30  ;;  %260 = vst [vmem:[%s1236_s7 + $0x7c] sm:$0xf] %v259_v31  ;;  %v263_v33 = vld [vmem:[%s1231_s6 + $0x108] sm:$0xf] }
  0x2e   : > { %262 = vst [vmem:[%s1236_s7 + $0x80] sm:$0xf] %v261_v32  ;;  %v265_v34 = vld [vmem:[%s1231_s6 + $0x110] sm:$0xf]  ;;  %v267_v35 = vld [vmem:[%s1231_s6 + $0x118] sm:$0xf] }
  0x2f   : > { %264 = vst [vmem:[%s1236_s7 + $0x84] sm:$0xf] %v263_v33  ;;  %266 = vst [vmem:[%s1236_s7 + $0x88] sm:$0xf] %v265_v34  ;;  %v269_v36 = vld [vmem:[%s1231_s6 + $0x120] sm:$0xf] }
  0x30   : > { %268 = vst [vmem:[%s1236_s7 + $0x8c] sm:$0xf] %v267_v35  ;;  %v271_v37 = vld [vmem:[%s1231_s6 + $0x128] sm:$0xf]  ;;  %v273_v38 = vld [vmem:[%s1231_s6 + $0x130] sm:$0xf] }
  0x31   : > { %270 = vst [vmem:[%s1236_s7 + $0x90] sm:$0xf] %v269_v36  ;;  %272 = vst [vmem:[%s1236_s7 + $0x94] sm:$0xf] %v271_v37  ;;  %v275_v39 = vld [vmem:[%s1231_s6 + $0x138] sm:$0xf] }
  0x32   : > { %274 = vst [vmem:[%s1236_s7 + $0x98] sm:$0xf] %v273_v38  ;;  %v277_v40 = vld [vmem:[%s1231_s6 + $0x140] sm:$0xf]  ;;  %v279_v41 = vld [vmem:[%s1231_s6 + $0x148] sm:$0xf] }
  0x33   : > { %276 = vst [vmem:[%s1236_s7 + $0x9c] sm:$0xf] %v275_v39  ;;  %278 = vst [vmem:[%s1236_s7 + $0xa0] sm:$0xf] %v277_v40  ;;  %v281_v42 = vld [vmem:[%s1231_s6 + $0x150] sm:$0xf] }
  0x34   : > { %280 = vst [vmem:[%s1236_s7 + $0xa4] sm:$0xf] %v279_v41  ;;  %v283_v43 = vld [vmem:[%s1231_s6 + $0x158] sm:$0xf]  ;;  %v285_v44 = vld [vmem:[%s1231_s6 + $0x160] sm:$0xf] }
  0x35   : > { %282 = vst [vmem:[%s1236_s7 + $0xa8] sm:$0xf] %v281_v42  ;;  %284 = vst [vmem:[%s1236_s7 + $0xac] sm:$0xf] %v283_v43  ;;  %v287_v45 = vld [vmem:[%s1231_s6 + $0x168] sm:$0xf] }
  0x36   : > { %286 = vst [vmem:[%s1236_s7 + $0xb0] sm:$0xf] %v285_v44  ;;  %v289_v46 = vld [vmem:[%s1231_s6 + $0x170] sm:$0xf]  ;;  %v291_v47 = vld [vmem:[%s1231_s6 + $0x178] sm:$0xf] }
  0x37   : > { %288 = vst [vmem:[%s1236_s7 + $0xb4] sm:$0xf] %v287_v45  ;;  %290 = vst [vmem:[%s1236_s7 + $0xb8] sm:$0xf] %v289_v46 }
  0x38   : > { %292 = vst [vmem:[%s1236_s7 + $0xbc] sm:$0xf] %v291_v47 }
  0x39 PF: > { %p917_p7 = scmp.ge.s32.totalorder %s1146_s18, 1  ;;  %p416_p8 = scmp.lt.s32.totalorder %s1146_s18, 13 }
  0x3b   : > { %p417_p9 = pnand %p917_p7, %p416_p8 }
  0x3c   : > { %s423_s8 = sand.u32 (!%p417_p9), 1, %s1122_s12   ;;  %s461_s9 = smul.u32 (!%p417_p9), 3, %s1130_s14 }
  0x3d   : > { %420 = sbr.rel (%p417_p9) target bundleno = 345 (0x159), region = 69  ;;  %p472_p10 = scmp.lt.s32.totalorder (!%p417_p9), %s1134_s15, 1 }
  0x3e   : > { %s1005_s10 = smul.u32 (!%p417_p9), 192, %s423_s8  ;;  %p464_p11 = scmp.lt.s32.totalorder (!%p417_p9), %s461_s9, 17 }
  0x3f   : > { %p920_p12 = scmp.ne.s32.totalorder (!%p417_p9), %s1130_s14, 0 }
  0x40   : > { %s1354_s4 = scalar_lea.vmem (!%p417_p9), [#allocation3], %s1005_s10 }
  0x44   : > { %s1428_s9 = smov (!%p464_p11, %s461_s9), 17  ;;  %s1430_s15 = smov (!%p472_p10, %s1134_s15), 1 }
  0x45   : > { %s918_s11 = sshll.u32 %s1428_s9, 2  ;;  %s474_s27 = scalar_lea.vmem %s1413_s2, %s1430_s15  ;;  %v1148_v48 = vmov (!%p920_p12), 0.0  }
  0x46   : > { %s1342_s23 = scalar_lea.vmem %s1411_s0, %s918_s11  ;;  %s919_s12 = sshll.u32 %s1430_s15, 2  ;;  %488 = vst [vmem:[#allocation2] sm:$0xff] (!%p920_p12), %v1148_v48 }
  0x47   : > { %s1352_s30 = scalar_lea.vmem %s1414_s3, %s919_s12  ;;  %487 = sbr.rel (%p920_p12) target bundleno = 78 (0x4e), region = 77 }
  0x4e PF: > { %v1065_v49 = vld [vmem:[%s1354_s4 + $0x40] sm:$0xff]   ;;  %v1149_v50 = vmov 0.0   ;;  %vm1150_vm0 = vmmov 0   ;;  %v1068_v53 = vld [vmem:[%s1354_s4 + $0x48] sm:$0xff]   ;;  %v1071_v56 = vld [vmem:[%s1354_s4 + $0x50] sm:$0xff]   ;;  %p948_p13 = scmp.ne.s32.totalorder %s1130_s14, 5 }
  0x4f   : > { %984 = vmatprep.subr.bf16.mxu1 %v1149_v50  ;;  %v1066_v51 = vld [vmem:[%s1354_s4] sm:$0xff]   ;;  %953 = vmatprep.subr.bf16.mxu0 %v1065_v49  ;;  %v1069_v54 = vld [vmem:[%s1354_s4 + $0x8] sm:$0xff]   ;;  %v1072_v57 = vld [vmem:[%s1354_s4 + $0x10] sm:$0xff]  }
  0x50   : > { %v1067_v52 = vld [vmem:[%s1354_s4 + $0x80] sm:$0xff]   ;;  %1000 = vmatprep.mubr.msk.bf16.mxu1 %vm1150_vm0, %v1149_v50  ;;  %954 = vmatpush3.bf16.msra.mxu0 %v1066_v51  ;;  %v1070_v55 = vld [vmem:[%s1354_s4 + $0x88] sm:$0xff]   ;;  %v1073_v58 = vld [vmem:[%s1354_s4 + $0x90] sm:$0xff]  }
  0x51   : > { %985 = vmatpush3.bf16.msra.mxu1 %v1067_v52  ;;  %955 = vmatprep.subr.bf16.mxu0 %v1068_v53  ;;  %v1074_v59 = vld [vmem:[%s1354_s4 + $0x58] sm:$0xff]   ;;  %v1077_v62 = vld [vmem:[%s1354_s4 + $0x60] sm:$0xff]   ;;  %v1080_v1 = vld [vmem:[%s1354_s4 + $0x68] sm:$0xff]  }
  0x52   : > { %986 = vmatprep.subr.bf16.mxu1 %v1149_v50  ;;  %v1075_v60 = vld [vmem:[%s1354_s4 + $0x18] sm:$0xff]   ;;  %v1078_v63 = vld [vmem:[%s1354_s4 + $0x20] sm:$0xff]   ;;  %v1081_v2 = vld [vmem:[%s1354_s4 + $0x28] sm:$0xff]  }
  0x53   : > { %v1076_v61 = vld [vmem:[%s1354_s4 + $0x98] sm:$0xff]   ;;  %v1079_v0 = vld [vmem:[%s1354_s4 + $0xa0] sm:$0xff]   ;;  %v1082_v3 = vld [vmem:[%s1354_s4 + $0xa8] sm:$0xff]  }
  0x54   : > { %956 = vmatpush3.bf16.msra.mxu0 %v1069_v54  ;;  %v1083_v4 = vld [vmem:[%s1354_s4 + $0x70] sm:$0xff]   ;;  %v1086_v7 = vld [vmem:[%s1354_s4 + $0x78] sm:$0xff]   ;;  %v1091_v13 = vld [vmem:[%s1342_s23 + $0x8] ss:$0 sps:$4 sm:$0xff]  }
  0x55   : > { %987 = vmatpush3.bf16.msra.mxu1 %v1070_v55  ;;  %957 = vmatprep.subr.bf16.mxu0 %v1071_v56  ;;  %v1084_v5 = vld [vmem:[%s1354_s4 + $0x30] sm:$0xff]   ;;  %v490_v8 = vld [vmem:[%s1342_s23] sm:$0xff] }
  0x56   : > { %988 = vmatprep.subr.bf16.mxu1 %v1149_v50  ;;  %v1085_v6 = vld [vmem:[%s1354_s4 + $0xb0] sm:$0xff]   ;;  %v922_v9 = vcombine.high %v490_v8, %v490_v8  ;;  %v1087_v10 = vld [vmem:[%s1354_s4 + $0x38] sm:$0xff]   ;;  %v921_v12 = vcombine.low %v490_v8, %v490_v8 }
  0x57   : > { %v1088_v11 = vld [vmem:[%s1354_s4 + $0xb8] sm:$0xff]  }
  0x58   : > { %958 = vmatpush3.bf16.msra.mxu0 %v1072_v57  ;;  %727 = vmatprep.mubr.bf16.mxu0 %v922_v9  ;;  %v489_v20 = vld [vmem:[#allocation2] sm:$0xff] }
  0x59   : > { %989 = vmatpush3.bf16.msra.mxu1 %v1073_v58  ;;  %959 = vmatprep.subr.bf16.mxu0 %v1074_v59  ;;  %v949_v27 = vld [vmem:[%s474_s27] ss:$0 sm:$0xff] (!%p948_p13) }
  0x5a   : > { %990 = vmatprep.subr.bf16.mxu1 %v1149_v50 }
  0x5c   : > { %960 = vmatpush3.bf16.msra.mxu0 %v1075_v60 }
  0x5d   : > { %991 = vmatpush3.bf16.msra.mxu1 %v1076_v61  ;;  %961 = vmatprep.subr.bf16.mxu0 %v1077_v62 }
  0x5e   : > { %992 = vmatprep.subr.bf16.mxu1 %v1149_v50 }
  0x60   : > { %962 = vmatpush3.bf16.msra.mxu0 %v1078_v63 }
  0x61   : > { %993 = vmatpush3.bf16.msra.mxu1 %v1079_v0  ;;  %963 = vmatprep.subr.bf16.mxu0 %v1080_v1 }
  0x62   : > { %994 = vmatprep.subr.bf16.mxu1 %v1149_v50 }
  0x64   : > { %964 = vmatpush3.bf16.msra.mxu0 %v1081_v2 }
  0x65   : > { %995 = vmatpush3.bf16.msra.mxu1 %v1082_v3  ;;  %965 = vmatprep.subr.bf16.mxu0 %v1083_v4 }
  0x66   : > { %996 = vmatprep.subr.bf16.mxu1 %v1149_v50 }
  0x68   : > { %966 = vmatpush3.bf16.msra.mxu0 %v1084_v5 }
  0x69   : > { %997 = vmatpush3.bf16.msra.mxu1 %v1085_v6  ;;  %967 = vmatprep.subr.bf16.mxu0 %v1086_v7 }
  0x6a   : > { %998 = vmatprep.subr.bf16.mxu1 %v1149_v50 }
  0x6c   : > { %968 = vmatpush3.bf16.msra.mxu0 %v1087_v10 }
  0x6d   : > { %999 = vmatpush3.bf16.msra.mxu1 %v1088_v11 }
  0x6f   : > { %728 = vmatmul.mubr.bf16.vlgmr.msra.gmra.mrb[0].mxu0 %v921_v12 }
  0x70   : > { %1001 = vmatmul.mubr.bf16.vlgmr.msra.gmra.mrb[0].mxu1 %v1091_v13 }
 0x142   : > { %v969_v14 = vpop.f32.mrb[0].mxu0 }
 0x143   : > { %v769_v15 = vpop.f32.mrb[0].mxu1  ;;  %v970_v16 = vpop.f32.mrb[1].mxu0 }
 0x144   : > { %v971_v17 = vadd.f32 %v970_v16, %v969_v14  ;;  %v1002_v18 = vpop.f32.mrb[1].mxu1  ;;  %v972_v19 = vpop.f32.mrb[2].mxu0  ;;  %780 = sbr.rel (%p948_p13) target bundleno = 345 (0x159), region = 81 }
 0x145   : > { %v772_v21 = vpop.f32.mrb[2].mxu1  ;;  %v973_v22 = vpop.f32.mrb[3].mxu0 }
 0x146   : > { %v770_v23 = vadd.f32 %v971_v17, %v769_v15  ;;  %v1003_v24 = vpop.f32.mrb[3].mxu1 }
 0x148   : > { %v775_v25 = vadd.f32 %v770_v23, %v489_v20 }
 0x14a   : > { %776 = vst [vmem:[#allocation2] sm:$0xff] %v775_v25 }
 0x151   : > { %v781_v26 = vld [vmem:[#allocation2] sm:$0xff] }
 0x152   : > { %v789_v28 = vadd.f32 %v949_v27, %v781_v26 }
 0x154   : > { %v790_v29 = vmax.f32 %v789_v28, 0.0 }
 0x156   : > { %v791_v30 = vpack.c.bf16 %v790_v29, %v790_v29 }
 0x158   : > { %792 = vst [vmem:[%s1352_s30] sm:$0xf] %v791_v30 }
 0x159 PF: > { %s13_s18 = sadd.s32 1, %s1146_s18   ;;  %s1415_s12 = smov %s1126_s13 }
 0x15a   : > { %p10_p0 = scmp.ge.s32.totalorder %s13_s18, 14   ;;  %s1416_s13 = smov %s1222_s25 }
 0x15b   : > { %s1417_s14 = smov %s1138_s16  ;;  %s1418_s15 = smov %s1142_s17 }
 0x15c   : > { %s1419_s16 = smov %s1422_s19  ;;  %s1420_s17 = smov %s1426_s20 }
 0x15d   :  { %12 = sbr.rel (!%p10_p0) target bundleno = 4 (0x4), region = 122 }

// kernel: classifier_model_forward.35
= control target key start
LH: loop header
LB: loop body
LE: loop exit
PB: predicated region body
PF: predicated region fallthrough
CT: control target
= control target key end

     0   :  { %s1256_s15 = smov 0   ;;  %s1258_s16 = smov 0   ;;  %s1502_s0 = inlined_call_operand.vmem [shape: bf16[8,2304], index: 0, kind: input, shape index: {}]   ;;  %s1503_s1 = inlined_call_operand.vmem [shape: bf16[2304,256], index: 1, kind: input, shape index: {}]   ;;  %s1504_s2 = inlined_call_operand.vmem [shape: f32[1,256], index: 2, kind: input, shape index: {}]   ;;  %s1505_s3 = inlined_call_operand.vmem [shape: bf16[8,256], index: 3, kind: input, shape index: {}]   ;;  %s1506_s4 = inlined_call_operand.vmem [shape: bf16[8,256], index: 4, kind: output, shape index: {}]  }
   0x1   :  { %s1260_s17 = smov 0   ;;  %s1262_s18 = smov 0  }
   0x2   :  { %s1264_s19 = smov 0   ;;  %s1266_s20 = smov 0  }
   0x3   :  { %s1268_s21 = smov 0  }
   0x4 LB: > { %s26_s22 = sadd.s32 1, %s1218_s19  ;;  %s29_s23 = sadd.s32 1, %s1222_s20  ;;  %s1226_s21 = sphi %s1268_s21, %s14_s21   ;;  %s1222_s20 = sphi %s1266_s20, %s1512_s20   ;;  %s1218_s19 = sphi %s1264_s19, %s1511_s19   ;;  %s1214_s18 = sphi %s1262_s18, %s1510_s18   ;;  %s1210_s17 = sphi %s1260_s17, %s1509_s17   ;;  %s1206_s16 = sphi %s1258_s16, %s1508_s16   ;;  %s1202_s15 = sphi %s1256_s15, %s1507_s15  }
   0x5   : > { %p27_p0 = scmp.ge.s32.totalorder %s26_s22, 6  ;;  %p77_p1 = scmp.ne.s32.totalorder %s1206_s16, %s1202_s15 }
   0x6   : > { %p78_p2 = scmp.eq.s32.totalorder %s1226_s21, 0  ;;  %s70_s27 = sadd.s32 1, %s1206_s16 }
   0x7   : > { %s1514_s22 = smov (%p27_p0, %s26_s22), 0  ;;  %s1516_s23 = smov (!%p27_p0, %s29_s23), %s1222_s20 }
   0x8   : > { %p79_p3 = por %p78_p2, %p77_p1  ;;  %p31_p4 = scmp.ge.s32.totalorder %s1516_s23, 2 }
   0x9   : > { %s65_s24 = ssub.s32 %s1218_s19, %s1514_s22  ;;  %p993_p6 = scmp.ge.s32.totalorder %s1226_s21, 12 }
   0xa   : > { %s1518_s23 = smov (%p31_p4, %s1516_s23), 0 }
   0xb   : > { %s66_s25 = ssub.s32 %s1222_s20, %s1518_s23  ;;  %185 = sbr.rel (%p993_p6) target bundleno = 57 (0x39), region = 16 }
   0xc   : > { %s67_s26 = sor.u32 %s66_s25, %s65_s24 }
   0xd   : > { %p68_p5 = scmp.eq.s32.totalorder %s67_s26, 0 }
   0xf   : > { %s1307_s28 = scalar_select %p68_p5, %s1206_s16, %s70_s27  }
  0x12   : > { %201 = sbr.rel (!%p79_p3) target bundleno = 57 (0x39), region = 24  ;;  %s203_s29 = sand.u32 (%p79_p3), 1, %s1206_s16  }
  0x13   : > { %s1032_s30 = smul.u32 (%p79_p3), 96, %s1218_s19 }
  0x14   : > { %s1084_s5 = smul.u32 (%p79_p3), 192, %s203_s29 }
  0x15   : > { %s208_s6 = sadd.s32 (%p79_p3), %s1222_s20, %s1032_s30 }
  0x16   : > { %s995_s7 = sshll.u32 (%p79_p3), %s208_s6, 2  ;;  %s1321_s11 = scalar_lea.vmem (%p79_p3), [#allocation3], %s1084_s5 }
  0x17   : > { %s1316_s10 = scalar_lea.vmem (%p79_p3), %s1503_s1, %s995_s7 }
  0x18   : > { %v226_v0 = vld [vmem:[%s1316_s10] sm:$0xf] (%p79_p3)  ;;  %v228_v1 = vld [vmem:[%s1316_s10 + $0x8] sm:$0xf] (%p79_p3)  ;;  %v230_v2 = vld [vmem:[%s1316_s10 + $0x10] sm:$0xf] (%p79_p3) }
  0x19   : > { %227 = vst [vmem:[%s1321_s11] sm:$0xf] %v226_v0  ;;  %229 = vst [vmem:[%s1321_s11 + $0x4] sm:$0xf] %v228_v1  ;;  %v232_v3 = vld [vmem:[%s1316_s10 + $0x18] sm:$0xf] }
  0x1a   : > { %231 = vst [vmem:[%s1321_s11 + $0x8] sm:$0xf] %v230_v2  ;;  %v234_v4 = vld [vmem:[%s1316_s10 + $0x20] sm:$0xf]  ;;  %v236_v5 = vld [vmem:[%s1316_s10 + $0x28] sm:$0xf] }
  0x1b   : > { %233 = vst [vmem:[%s1321_s11 + $0xc] sm:$0xf] %v232_v3  ;;  %235 = vst [vmem:[%s1321_s11 + $0x10] sm:$0xf] %v234_v4  ;;  %v238_v6 = vld [vmem:[%s1316_s10 + $0x30] sm:$0xf] }
  0x1c   : > { %237 = vst [vmem:[%s1321_s11 + $0x14] sm:$0xf] %v236_v5  ;;  %v240_v7 = vld [vmem:[%s1316_s10 + $0x38] sm:$0xf]  ;;  %v242_v8 = vld [vmem:[%s1316_s10 + $0x40] sm:$0xf] }
  0x1d   : > { %239 = vst [vmem:[%s1321_s11 + $0x18] sm:$0xf] %v238_v6  ;;  %241 = vst [vmem:[%s1321_s11 + $0x1c] sm:$0xf] %v240_v7  ;;  %v244_v9 = vld [vmem:[%s1316_s10 + $0x48] sm:$0xf] }
  0x1e   : > { %243 = vst [vmem:[%s1321_s11 + $0x20] sm:$0xf] %v242_v8  ;;  %v246_v10 = vld [vmem:[%s1316_s10 + $0x50] sm:$0xf]  ;;  %v248_v11 = vld [vmem:[%s1316_s10 + $0x58] sm:$0xf] }
  0x1f   : > { %245 = vst [vmem:[%s1321_s11 + $0x24] sm:$0xf] %v244_v9  ;;  %247 = vst [vmem:[%s1321_s11 + $0x28] sm:$0xf] %v246_v10  ;;  %v250_v12 = vld [vmem:[%s1316_s10 + $0x60] sm:$0xf] }
  0x20   : > { %249 = vst [vmem:[%s1321_s11 + $0x2c] sm:$0xf] %v248_v11  ;;  %v252_v13 = vld [vmem:[%s1316_s10 + $0x68] sm:$0xf]  ;;  %v254_v14 = vld [vmem:[%s1316_s10 + $0x70] sm:$0xf] }
  0x21   : > { %251 = vst [vmem:[%s1321_s11 + $0x30] sm:$0xf] %v250_v12  ;;  %253 = vst [vmem:[%s1321_s11 + $0x34] sm:$0xf] %v252_v13  ;;  %v256_v15 = vld [vmem:[%s1316_s10 + $0x78] sm:$0xf] }
  0x22   : > { %255 = vst [vmem:[%s1321_s11 + $0x38] sm:$0xf] %v254_v14  ;;  %v258_v16 = vld [vmem:[%s1316_s10 + $0x80] sm:$0xf]  ;;  %v260_v17 = vld [vmem:[%s1316_s10 + $0x88] sm:$0xf] }
  0x23   : > { %257 = vst [vmem:[%s1321_s11 + $0x3c] sm:$0xf] %v256_v15  ;;  %259 = vst [vmem:[%s1321_s11 + $0x40] sm:$0xf] %v258_v16  ;;  %v262_v18 = vld [vmem:[%s1316_s10 + $0x90] sm:$0xf] }
  0x24   : > { %261 = vst [vmem:[%s1321_s11 + $0x44] sm:$0xf] %v260_v17  ;;  %v264_v19 = vld [vmem:[%s1316_s10 + $0x98] sm:$0xf]  ;;  %v266_v20 = vld [vmem:[%s1316_s10 + $0xa0] sm:$0xf] }
  0x25   : > { %263 = vst [vmem:[%s1321_s11 + $0x48] sm:$0xf] %v262_v18  ;;  %265 = vst [vmem:[%s1321_s11 + $0x4c] sm:$0xf] %v264_v19  ;;  %v268_v21 = vld [vmem:[%s1316_s10 + $0xa8] sm:$0xf] }
  0x26   : > { %267 = vst [vmem:[%s1321_s11 + $0x50] sm:$0xf] %v266_v20  ;;  %v270_v22 = vld [vmem:[%s1316_s10 + $0xb0] sm:$0xf]  ;;  %v272_v23 = vld [vmem:[%s1316_s10 + $0xb8] sm:$0xf] }
  0x27   : > { %269 = vst [vmem:[%s1321_s11 + $0x54] sm:$0xf] %v268_v21  ;;  %271 = vst [vmem:[%s1321_s11 + $0x58] sm:$0xf] %v270_v22  ;;  %v274_v24 = vld [vmem:[%s1316_s10 + $0xc0] sm:$0xf] }
  0x28   : > { %273 = vst [vmem:[%s1321_s11 + $0x5c] sm:$0xf] %v272_v23  ;;  %v276_v25 = vld [vmem:[%s1316_s10 + $0xc8] sm:$0xf]  ;;  %v278_v26 = vld [vmem:[%s1316_s10 + $0xd0] sm:$0xf] }
  0x29   : > { %275 = vst [vmem:[%s1321_s11 + $0x60] sm:$0xf] %v274_v24  ;;  %277 = vst [vmem:[%s1321_s11 + $0x64] sm:$0xf] %v276_v25  ;;  %v280_v27 = vld [vmem:[%s1316_s10 + $0xd8] sm:$0xf] }
  0x2a   : > { %279 = vst [vmem:[%s1321_s11 + $0x68] sm:$0xf] %v278_v26  ;;  %v282_v28 = vld [vmem:[%s1316_s10 + $0xe0] sm:$0xf]  ;;  %v284_v29 = vld [vmem:[%s1316_s10 + $0xe8] sm:$0xf] }
  0x2b   : > { %281 = vst [vmem:[%s1321_s11 + $0x6c] sm:$0xf] %v280_v27  ;;  %283 = vst [vmem:[%s1321_s11 + $0x70] sm:$0xf] %v282_v28  ;;  %v286_v30 = vld [vmem:[%s1316_s10 + $0xf0] sm:$0xf] }
  0x2c   : > { %285 = vst [vmem:[%s1321_s11 + $0x74] sm:$0xf] %v284_v29  ;;  %v288_v31 = vld [vmem:[%s1316_s10 + $0xf8] sm:$0xf]  ;;  %v290_v32 = vld [vmem:[%s1316_s10 + $0x100] sm:$0xf] }
  0x2d   : > { %287 = vst [vmem:[%s1321_s11 + $0x78] sm:$0xf] %v286_v30  ;;  %289 = vst [vmem:[%s1321_s11 + $0x7c] sm:$0xf] %v288_v31  ;;  %v292_v33 = vld [vmem:[%s1316_s10 + $0x108] sm:$0xf] }
  0x2e   : > { %291 = vst [vmem:[%s1321_s11 + $0x80] sm:$0xf] %v290_v32  ;;  %v294_v34 = vld [vmem:[%s1316_s10 + $0x110] sm:$0xf]  ;;  %v296_v35 = vld [vmem:[%s1316_s10 + $0x118] sm:$0xf] }
  0x2f   : > { %293 = vst [vmem:[%s1321_s11 + $0x84] sm:$0xf] %v292_v33  ;;  %295 = vst [vmem:[%s1321_s11 + $0x88] sm:$0xf] %v294_v34  ;;  %v298_v36 = vld [vmem:[%s1316_s10 + $0x120] sm:$0xf] }
  0x30   : > { %297 = vst [vmem:[%s1321_s11 + $0x8c] sm:$0xf] %v296_v35  ;;  %v300_v37 = vld [vmem:[%s1316_s10 + $0x128] sm:$0xf]  ;;  %v302_v38 = vld [vmem:[%s1316_s10 + $0x130] sm:$0xf] }
  0x31   : > { %299 = vst [vmem:[%s1321_s11 + $0x90] sm:$0xf] %v298_v36  ;;  %301 = vst [vmem:[%s1321_s11 + $0x94] sm:$0xf] %v300_v37  ;;  %v304_v39 = vld [vmem:[%s1316_s10 + $0x138] sm:$0xf] }
  0x32   : > { %303 = vst [vmem:[%s1321_s11 + $0x98] sm:$0xf] %v302_v38  ;;  %v306_v40 = vld [vmem:[%s1316_s10 + $0x140] sm:$0xf]  ;;  %v308_v41 = vld [vmem:[%s1316_s10 + $0x148] sm:$0xf] }
  0x33   : > { %305 = vst [vmem:[%s1321_s11 + $0x9c] sm:$0xf] %v304_v39  ;;  %307 = vst [vmem:[%s1321_s11 + $0xa0] sm:$0xf] %v306_v40  ;;  %v310_v42 = vld [vmem:[%s1316_s10 + $0x150] sm:$0xf] }
  0x34   : > { %309 = vst [vmem:[%s1321_s11 + $0xa4] sm:$0xf] %v308_v41  ;;  %v312_v43 = vld [vmem:[%s1316_s10 + $0x158] sm:$0xf]  ;;  %v314_v44 = vld [vmem:[%s1316_s10 + $0x160] sm:$0xf] }
  0x35   : > { %311 = vst [vmem:[%s1321_s11 + $0xa8] sm:$0xf] %v310_v42  ;;  %313 = vst [vmem:[%s1321_s11 + $0xac] sm:$0xf] %v312_v43  ;;  %v316_v45 = vld [vmem:[%s1316_s10 + $0x168] sm:$0xf] }
  0x36   : > { %315 = vst [vmem:[%s1321_s11 + $0xb0] sm:$0xf] %v314_v44  ;;  %v318_v46 = vld [vmem:[%s1316_s10 + $0x170] sm:$0xf]  ;;  %v320_v47 = vld [vmem:[%s1316_s10 + $0x178] sm:$0xf] }
  0x37   : > { %317 = vst [vmem:[%s1321_s11 + $0xb4] sm:$0xf] %v316_v45  ;;  %319 = vst [vmem:[%s1321_s11 + $0xb8] sm:$0xf] %v318_v46 }
  0x38   : > { %321 = vst [vmem:[%s1321_s11 + $0xbc] sm:$0xf] %v320_v47 }
  0x39 PF: > { %p996_p7 = scmp.ge.s32.totalorder %s1226_s21, 1  ;;  %p456_p8 = scmp.lt.s32.totalorder %s1226_s21, 13 }
  0x3b   : > { %p457_p9 = pnand %p996_p7, %p456_p8 }
  0x3c   : > { %s463_s12 = sand.u32 (!%p457_p9), 1, %s1202_s15   ;;  %s511_s13 = smul.u32 (!%p457_p9), 3, %s1210_s17 }
  0x3d   : > { %460 = sbr.rel (%p457_p9) target bundleno = 348 (0x15c), region = 73  ;;  %p522_p10 = scmp.lt.s32.totalorder (!%p457_p9), %s1214_s18, 1 }
  0x3e   : > { %s1085_s14 = smul.u32 (!%p457_p9), 192, %s463_s12  ;;  %p514_p11 = scmp.lt.s32.totalorder (!%p457_p9), %s511_s13, 17 }
  0x3f   : > { %p1000_p12 = scmp.ne.s32.totalorder (!%p457_p9), %s1210_s17, 0 }
  0x40   : > { %s1444_s12 = scalar_lea.vmem (!%p457_p9), [#allocation3], %s1085_s14 }
  0x44   : > { %s1520_s13 = smov (!%p514_p11, %s511_s13), 17  ;;  %s1522_s18 = smov (!%p522_p10, %s1214_s18), 1 }
  0x45   : > { %s997_s24 = sshll.u32 %s1520_s13, 2  ;;  %s524_s5 = scalar_lea.vmem %s1504_s2, %s1522_s18  ;;  %v1228_v48 = vmov (!%p1000_p12), 0.0  }
  0x46   : > { %s1427_s27 = scalar_lea.vmem %s1502_s0, %s997_s24  ;;  %s998_s15 = sshll.u32 %s1522_s18, 2  ;;  %546 = vst [vmem:[#allocation2] sm:$0xff] (!%p1000_p12), %v1228_v48 }
  0x47   : > { %s1437_s8 = scalar_lea.vmem %s1505_s3, %s998_s15  ;;  %s1442_s11 = scalar_lea.vmem %s1506_s4, %s998_s15 }
  0x48   : > { %545 = sbr.rel (%p1000_p12) target bundleno = 79 (0x4f), region = 81 }
  0x4f PF: > { %v1145_v49 = vld [vmem:[%s1444_s12 + $0x40] sm:$0xff]   ;;  %v1229_v50 = vmov 0.0   ;;  %vm1230_vm0 = vmmov 0   ;;  %v1148_v53 = vld [vmem:[%s1444_s12 + $0x48] sm:$0xff]   ;;  %v1151_v56 = vld [vmem:[%s1444_s12 + $0x50] sm:$0xff]   ;;  %p1028_p13 = scmp.ne.s32.totalorder %s1210_s17, 5 }
  0x50   : > { %1064 = vmatprep.subr.bf16.mxu1 %v1229_v50  ;;  %v1146_v51 = vld [vmem:[%s1444_s12] sm:$0xff]   ;;  %1033 = vmatprep.subr.bf16.mxu0 %v1145_v49  ;;  %v1149_v54 = vld [vmem:[%s1444_s12 + $0x8] sm:$0xff]   ;;  %v1152_v57 = vld [vmem:[%s1444_s12 + $0x10] sm:$0xff]  }
  0x51   : > { %v1147_v52 = vld [vmem:[%s1444_s12 + $0x80] sm:$0xff]   ;;  %1080 = vmatprep.mubr.msk.bf16.mxu1 %vm1230_vm0, %v1229_v50  ;;  %1034 = vmatpush3.bf16.msra.mxu0 %v1146_v51  ;;  %v1150_v55 = vld [vmem:[%s1444_s12 + $0x88] sm:$0xff]   ;;  %v1153_v58 = vld [vmem:[%s1444_s12 + $0x90] sm:$0xff]  }
  0x52   : > { %1065 = vmatpush3.bf16.msra.mxu1 %v1147_v52  ;;  %1035 = vmatprep.subr.bf16.mxu0 %v1148_v53  ;;  %v1154_v59 = vld [vmem:[%s1444_s12 + $0x58] sm:$0xff]   ;;  %v1157_v62 = vld [vmem:[%s1444_s12 + $0x60] sm:$0xff]   ;;  %v1160_v1 = vld [vmem:[%s1444_s12 + $0x68] sm:$0xff]  }
  0x53   : > { %1066 = vmatprep.subr.bf16.mxu1 %v1229_v50  ;;  %v1155_v60 = vld [vmem:[%s1444_s12 + $0x18] sm:$0xff]   ;;  %v1158_v63 = vld [vmem:[%s1444_s12 + $0x20] sm:$0xff]   ;;  %v1161_v2 = vld [vmem:[%s1444_s12 + $0x28] sm:$0xff]  }
  0x54   : > { %v1156_v61 = vld [vmem:[%s1444_s12 + $0x98] sm:$0xff]   ;;  %v1159_v0 = vld [vmem:[%s1444_s12 + $0xa0] sm:$0xff]   ;;  %v1162_v3 = vld [vmem:[%s1444_s12 + $0xa8] sm:$0xff]  }
  0x55   : > { %1036 = vmatpush3.bf16.msra.mxu0 %v1149_v54  ;;  %v1163_v4 = vld [vmem:[%s1444_s12 + $0x70] sm:$0xff]   ;;  %v1166_v7 = vld [vmem:[%s1444_s12 + $0x78] sm:$0xff]   ;;  %v1171_v13 = vld [vmem:[%s1427_s27 + $0x8] ss:$0 sps:$4 sm:$0xff]  }
  0x56   : > { %1067 = vmatpush3.bf16.msra.mxu1 %v1150_v55  ;;  %1037 = vmatprep.subr.bf16.mxu0 %v1151_v56  ;;  %v1164_v5 = vld [vmem:[%s1444_s12 + $0x30] sm:$0xff]   ;;  %v548_v8 = vld [vmem:[%s1427_s27] sm:$0xff] }
  0x57   : > { %1068 = vmatprep.subr.bf16.mxu1 %v1229_v50  ;;  %v1165_v6 = vld [vmem:[%s1444_s12 + $0xb0] sm:$0xff]   ;;  %v1002_v9 = vcombine.high %v548_v8, %v548_v8  ;;  %v1167_v10 = vld [vmem:[%s1444_s12 + $0x38] sm:$0xff]   ;;  %v1001_v12 = vcombine.low %v548_v8, %v548_v8 }
  0x58   : > { %v1168_v11 = vld [vmem:[%s1444_s12 + $0xb8] sm:$0xff]  }
  0x59   : > { %1038 = vmatpush3.bf16.msra.mxu0 %v1152_v57  ;;  %785 = vmatprep.mubr.bf16.mxu0 %v1002_v9  ;;  %v547_v20 = vld [vmem:[#allocation2] sm:$0xff] }
  0x5a   : > { %1069 = vmatpush3.bf16.msra.mxu1 %v1153_v58  ;;  %1039 = vmatprep.subr.bf16.mxu0 %v1154_v59  ;;  %v1029_v27 = vld [vmem:[%s524_s5] ss:$0 sm:$0xff] (!%p1028_p13) }
  0x5b   : > { %1070 = vmatprep.subr.bf16.mxu1 %v1229_v50  ;;  %v848_v28 = vld [vmem:[%s1437_s8] sm:$0xf] (!%p1028_p13) }
  0x5c   : > { %v849_v30 = vunpack.c.l.bf16 (!%p1028_p13), %v848_v28 }
  0x5d   : > { %1040 = vmatpush3.bf16.msra.mxu0 %v1155_v60 }
  0x5e   : > { %1071 = vmatpush3.bf16.msra.mxu1 %v1156_v61  ;;  %1041 = vmatprep.subr.bf16.mxu0 %v1157_v62 }
  0x5f   : > { %1072 = vmatprep.subr.bf16.mxu1 %v1229_v50 }
  0x61   : > { %1042 = vmatpush3.bf16.msra.mxu0 %v1158_v63 }
  0x62   : > { %1073 = vmatpush3.bf16.msra.mxu1 %v1159_v0  ;;  %1043 = vmatprep.subr.bf16.mxu0 %v1160_v1 }
  0x63   : > { %1074 = vmatprep.subr.bf16.mxu1 %v1229_v50 }
  0x65   : > { %1044 = vmatpush3.bf16.msra.mxu0 %v1161_v2 }
  0x66   : > { %1075 = vmatpush3.bf16.msra.mxu1 %v1162_v3  ;;  %1045 = vmatprep.subr.bf16.mxu0 %v1163_v4 }
  0x67   : > { %1076 = vmatprep.subr.bf16.mxu1 %v1229_v50 }
  0x69   : > { %1046 = vmatpush3.bf16.msra.mxu0 %v1164_v5 }
  0x6a   : > { %1077 = vmatpush3.bf16.msra.mxu1 %v1165_v6  ;;  %1047 = vmatprep.subr.bf16.mxu0 %v1166_v7 }
  0x6b   : > { %1078 = vmatprep.subr.bf16.mxu1 %v1229_v50 }
  0x6d   : > { %1048 = vmatpush3.bf16.msra.mxu0 %v1167_v10 }
  0x6e   : > { %1079 = vmatpush3.bf16.msra.mxu1 %v1168_v11 }
  0x70   : > { %786 = vmatmul.mubr.bf16.vlgmr.msra.gmra.mrb[0].mxu0 %v1001_v12 }
  0x71   : > { %1081 = vmatmul.mubr.bf16.vlgmr.msra.gmra.mrb[0].mxu1 %v1171_v13 }
 0x143   : > { %v1049_v14 = vpop.f32.mrb[0].mxu0 }
 0x144   : > { %v827_v15 = vpop.f32.mrb[0].mxu1  ;;  %v1050_v16 = vpop.f32.mrb[1].mxu0 }
 0x145   : > { %v1051_v17 = vadd.f32 %v1050_v16, %v1049_v14  ;;  %v1082_v18 = vpop.f32.mrb[1].mxu1  ;;  %v1052_v19 = vpop.f32.mrb[2].mxu0  ;;  %838 = sbr.rel (%p1028_p13) target bundleno = 348 (0x15c), region = 85 }
 0x146   : > { %v830_v21 = vpop.f32.mrb[2].mxu1  ;;  %v1053_v22 = vpop.f32.mrb[3].mxu0 }
 0x147   : > { %v828_v23 = vadd.f32 %v1051_v17, %v827_v15  ;;  %v1083_v24 = vpop.f32.mrb[3].mxu1 }
 0x149   : > { %v833_v25 = vadd.f32 %v828_v23, %v547_v20 }
 0x14b   : > { %834 = vst [vmem:[#allocation2] sm:$0xff] %v833_v25 }
 0x152   : > { %v839_v26 = vld [vmem:[#allocation2] sm:$0xff] }
 0x153   : > { %v847_v29 = vadd.f32 %v1029_v27, %v839_v26 }
 0x155   : > { %v850_v31 = vadd.f32 %v849_v30, %v847_v29 }
 0x157   : > { %v851_v32 = vmax.f32 %v850_v31, 0.0 }
 0x159   : > { %v852_v33 = vpack.c.bf16 %v851_v32, %v851_v32 }
 0x15b   : > { %853 = vst [vmem:[%s1442_s11] sm:$0xf] %v852_v33 }
 0x15c PF: > { %s14_s21 = sadd.s32 1, %s1226_s21   ;;  %s1507_s15 = smov %s1206_s16 }
 0x15d   : > { %p11_p0 = scmp.ge.s32.totalorder %s14_s21, 14   ;;  %s1508_s16 = smov %s1307_s28 }
 0x15e   : > { %s1509_s17 = smov %s1218_s19  ;;  %s1510_s18 = smov %s1222_s20 }
 0x15f   : > { %s1511_s19 = smov %s1514_s22  ;;  %s1512_s20 = smov %s1518_s23 }
 0x160   :  { %13 = sbr.rel (!%p11_p0) target bundleno = 4 (0x4), region = 129 }

// kernel: classifier_model_forward.38
= control target key start
LH: loop header
LB: loop body
LE: loop exit
PB: predicated region body
PF: predicated region fallthrough
CT: control target
= control target key end

     0   :  { %s1319_s12 = smov 0   ;;  %s1321_s13 = smov 0   ;;  %s1582_s0 = inlined_call_operand.vmem [shape: bf16[8,2304], index: 0, kind: input, shape index: {}]   ;;  %s1583_s1 = inlined_call_operand.vmem [shape: bf16[2304,512], index: 1, kind: input, shape index: {}]   ;;  %s1584_s2 = inlined_call_operand.vmem [shape: f32[1,512], index: 2, kind: input, shape index: {}]   ;;  %s1585_s3 = inlined_call_operand.vmem [shape: bf16[8,512], index: 3, kind: output, shape index: {}]  }
   0x1   :  { %s1323_s14 = smov 0   ;;  %s1325_s15 = smov 0  }
   0x2   :  { %s1327_s16 = smov 0   ;;  %s1329_s17 = smov 0  }
   0x3   :  { %s1331_s18 = smov 0  }
   0x4 LB: > { %s25_s19 = sadd.s32 1, %s1287_s16  ;;  %s28_s20 = sadd.s32 1, %s1291_s17  ;;  %s1295_s18 = sphi %s1331_s18, %s13_s18   ;;  %s1291_s17 = sphi %s1329_s17, %s1591_s17   ;;  %s1287_s16 = sphi %s1327_s16, %s1590_s16   ;;  %s1283_s15 = sphi %s1325_s15, %s1589_s15   ;;  %s1279_s14 = sphi %s1323_s14, %s1588_s14   ;;  %s1275_s13 = sphi %s1321_s13, %s1587_s13   ;;  %s1271_s12 = sphi %s1319_s12, %s1586_s12  }
   0x5   : > { %p26_p0 = scmp.ge.s32.totalorder %s25_s19, 6  ;;  %p76_p1 = scmp.ne.s32.totalorder %s1275_s13, %s1271_s12 }
   0x6   : > { %p77_p2 = scmp.eq.s32.totalorder %s1295_s18, 0  ;;  %s69_s24 = sadd.s32 1, %s1275_s13 }
   0x7   : > { %s1593_s19 = smov (%p26_p0, %s25_s19), 0  ;;  %s1595_s20 = smov (!%p26_p0, %s28_s20), %s1291_s17 }
   0x8   : > { %p78_p3 = por %p77_p2, %p76_p1  ;;  %p30_p4 = scmp.ge.s32.totalorder %s1595_s20, 2 }
   0x9   : > { %s64_s21 = ssub.s32 %s1287_s16, %s1593_s19  ;;  %p1039_p6 = scmp.ge.s32.totalorder %s1295_s18, 12 }
   0xa   : > { %s1597_s20 = smov (%p30_p4, %s1595_s20), 0 }
   0xb   : > { %s65_s22 = ssub.s32 %s1291_s17, %s1597_s20  ;;  %156 = sbr.rel (%p1039_p6) target bundleno = 50 (0x32), region = 16 }
   0xc   : > { %s66_s23 = sor.u32 %s65_s22, %s64_s21 }
   0xd   : > { %p67_p5 = scmp.eq.s32.totalorder %s66_s23, 0 }
   0xf   : > { %s1370_s25 = scalar_select %p67_p5, %s1275_s13, %s69_s24  }
  0x12   : > { %172 = sbr.rel (!%p78_p3) target bundleno = 50 (0x32), region = 24  ;;  %s174_s26 = sand.u32 (%p78_p3), 1, %s1275_s13  }
  0x13   : > { %s1106_s27 = smul.u32 (%p78_p3), 384, %s174_s26  ;;  %s1040_s28 = sshll.u32 (%p78_p3), %s1291_s17, 1 }
  0x14   : > { %s1104_s29 = smul.u32 (%p78_p3), 192, %s1287_s16 }
  0x15   : > { %s1384_s8 = scalar_lea.vmem (%p78_p3), [#allocation3], %s1106_s27 }
  0x16   : > { %s180_s30 = sadd.s32 (%p78_p3), %s1104_s29, %s1040_s28 }
  0x17   : > { %s1042_s4 = sshll.u32 (%p78_p3), %s180_s30, 2 }
  0x18   : > { %s1379_s7 = scalar_lea.vmem (%p78_p3), %s1583_s1, %s1042_s4 }
  0x19   : > { %v304_v0 = vld [vmem:[%s1379_s7] sm:$0xff]  ;;  %v306_v1 = vld [vmem:[%s1379_s7 + $0x10] sm:$0xff] }
  0x1a   : > { %v308_v2 = vld [vmem:[%s1379_s7 + $0x20] sm:$0xff]  ;;  %305 = vst [vmem:[%s1384_s8] sm:$0xff] %v304_v0  ;;  %307 = vst [vmem:[%s1384_s8 + $0x8] sm:$0xff] %v306_v1  ;;  %v310_v3 = vld [vmem:[%s1379_s7 + $0x30] sm:$0xff] }
  0x1b   : > { %309 = vst [vmem:[%s1384_s8 + $0x10] sm:$0xff] %v308_v2  ;;  %v312_v4 = vld [vmem:[%s1379_s7 + $0x40] sm:$0xff]  ;;  %v314_v5 = vld [vmem:[%s1379_s7 + $0x50] sm:$0xff]  ;;  %311 = vst [vmem:[%s1384_s8 + $0x18] sm:$0xff] %v310_v3 }
  0x1c   : > { %313 = vst [vmem:[%s1384_s8 + $0x20] sm:$0xff] %v312_v4  ;;  %315 = vst [vmem:[%s1384_s8 + $0x28] sm:$0xff] %v314_v5  ;;  %v316_v6 = vld [vmem:[%s1379_s7 + $0x60] sm:$0xff]  ;;  %v318_v7 = vld [vmem:[%s1379_s7 + $0x70] sm:$0xff] }
  0x1d   : > { %v320_v8 = vld [vmem:[%s1379_s7 + $0x80] sm:$0xff]  ;;  %317 = vst [vmem:[%s1384_s8 + $0x30] sm:$0xff] %v316_v6  ;;  %319 = vst [vmem:[%s1384_s8 + $0x38] sm:$0xff] %v318_v7  ;;  %v322_v9 = vld [vmem:[%s1379_s7 + $0x90] sm:$0xff] }
  0x1e   : > { %321 = vst [vmem:[%s1384_s8 + $0x40] sm:$0xff] %v320_v8  ;;  %v324_v10 = vld [vmem:[%s1379_s7 + $0xa0] sm:$0xff]  ;;  %v326_v11 = vld [vmem:[%s1379_s7 + $0xb0] sm:$0xff]  ;;  %323 = vst [vmem:[%s1384_s8 + $0x48] sm:$0xff] %v322_v9 }
  0x1f   : > { %325 = vst [vmem:[%s1384_s8 + $0x50] sm:$0xff] %v324_v10  ;;  %327 = vst [vmem:[%s1384_s8 + $0x58] sm:$0xff] %v326_v11  ;;  %v328_v12 = vld [vmem:[%s1379_s7 + $0xc0] sm:$0xff]  ;;  %v330_v13 = vld [vmem:[%s1379_s7 + $0xd0] sm:$0xff] }
  0x20   : > { %v332_v14 = vld [vmem:[%s1379_s7 + $0xe0] sm:$0xff]  ;;  %329 = vst [vmem:[%s1384_s8 + $0x60] sm:$0xff] %v328_v12  ;;  %331 = vst [vmem:[%s1384_s8 + $0x68] sm:$0xff] %v330_v13  ;;  %v334_v15 = vld [vmem:[%s1379_s7 + $0xf0] sm:$0xff] }
  0x21   : > { %333 = vst [vmem:[%s1384_s8 + $0x70] sm:$0xff] %v332_v14  ;;  %v336_v16 = vld [vmem:[%s1379_s7 + $0x100] sm:$0xff]  ;;  %v338_v17 = vld [vmem:[%s1379_s7 + $0x110] sm:$0xff]  ;;  %335 = vst [vmem:[%s1384_s8 + $0x78] sm:$0xff] %v334_v15 }
  0x22   : > { %337 = vst [vmem:[%s1384_s8 + $0x80] sm:$0xff] %v336_v16  ;;  %339 = vst [vmem:[%s1384_s8 + $0x88] sm:$0xff] %v338_v17  ;;  %v340_v18 = vld [vmem:[%s1379_s7 + $0x120] sm:$0xff]  ;;  %v342_v19 = vld [vmem:[%s1379_s7 + $0x130] sm:$0xff] }
  0x23   : > { %v344_v20 = vld [vmem:[%s1379_s7 + $0x140] sm:$0xff]  ;;  %341 = vst [vmem:[%s1384_s8 + $0x90] sm:$0xff] %v340_v18  ;;  %343 = vst [vmem:[%s1384_s8 + $0x98] sm:$0xff] %v342_v19  ;;  %v346_v21 = vld [vmem:[%s1379_s7 + $0x150] sm:$0xff] }
  0x24   : > { %345 = vst [vmem:[%s1384_s8 + $0xa0] sm:$0xff] %v344_v20  ;;  %v348_v22 = vld [vmem:[%s1379_s7 + $0x160] sm:$0xff]  ;;  %v350_v23 = vld [vmem:[%s1379_s7 + $0x170] sm:$0xff]  ;;  %347 = vst [vmem:[%s1384_s8 + $0xa8] sm:$0xff] %v346_v21 }
  0x25   : > { %349 = vst [vmem:[%s1384_s8 + $0xb0] sm:$0xff] %v348_v22  ;;  %351 = vst [vmem:[%s1384_s8 + $0xb8] sm:$0xff] %v350_v23  ;;  %v352_v24 = vld [vmem:[%s1379_s7 + $0x180] sm:$0xff]  ;;  %v354_v25 = vld [vmem:[%s1379_s7 + $0x190] sm:$0xff] }
  0x26   : > { %v356_v26 = vld [vmem:[%s1379_s7 + $0x1a0] sm:$0xff]  ;;  %353 = vst [vmem:[%s1384_s8 + $0xc0] sm:$0xff] %v352_v24  ;;  %355 = vst [vmem:[%s1384_s8 + $0xc8] sm:$0xff] %v354_v25  ;;  %v358_v27 = vld [vmem:[%s1379_s7 + $0x1b0] sm:$0xff] }
  0x27   : > { %357 = vst [vmem:[%s1384_s8 + $0xd0] sm:$0xff] %v356_v26  ;;  %v360_v28 = vld [vmem:[%s1379_s7 + $0x1c0] sm:$0xff]  ;;  %v362_v29 = vld [vmem:[%s1379_s7 + $0x1d0] sm:$0xff]  ;;  %359 = vst [vmem:[%s1384_s8 + $0xd8] sm:$0xff] %v358_v27 }
  0x28   : > { %361 = vst [vmem:[%s1384_s8 + $0xe0] sm:$0xff] %v360_v28  ;;  %363 = vst [vmem:[%s1384_s8 + $0xe8] sm:$0xff] %v362_v29  ;;  %v364_v30 = vld [vmem:[%s1379_s7 + $0x1e0] sm:$0xff]  ;;  %v366_v31 = vld [vmem:[%s1379_s7 + $0x1f0] sm:$0xff] }
  0x29   : > { %v368_v32 = vld [vmem:[%s1379_s7 + $0x200] sm:$0xff]  ;;  %365 = vst [vmem:[%s1384_s8 + $0xf0] sm:$0xff] %v364_v30  ;;  %367 = vst [vmem:[%s1384_s8 + $0xf8] sm:$0xff] %v366_v31  ;;  %v370_v33 = vld [vmem:[%s1379_s7 + $0x210] sm:$0xff] }
  0x2a   : > { %369 = vst [vmem:[%s1384_s8 + $0x100] sm:$0xff] %v368_v32  ;;  %v372_v34 = vld [vmem:[%s1379_s7 + $0x220] sm:$0xff]  ;;  %v374_v35 = vld [vmem:[%s1379_s7 + $0x230] sm:$0xff]  ;;  %371 = vst [vmem:[%s1384_s8 + $0x108] sm:$0xff] %v370_v33 }
  0x2b   : > { %373 = vst [vmem:[%s1384_s8 + $0x110] sm:$0xff] %v372_v34  ;;  %375 = vst [vmem:[%s1384_s8 + $0x118] sm:$0xff] %v374_v35  ;;  %v376_v36 = vld [vmem:[%s1379_s7 + $0x240] sm:$0xff]  ;;  %v378_v37 = vld [vmem:[%s1379_s7 + $0x250] sm:$0xff] }
  0x2c   : > { %v380_v38 = vld [vmem:[%s1379_s7 + $0x260] sm:$0xff]  ;;  %377 = vst [vmem:[%s1384_s8 + $0x120] sm:$0xff] %v376_v36  ;;  %379 = vst [vmem:[%s1384_s8 + $0x128] sm:$0xff] %v378_v37  ;;  %v382_v39 = vld [vmem:[%s1379_s7 + $0x270] sm:$0xff] }
  0x2d   : > { %381 = vst [vmem:[%s1384_s8 + $0x130] sm:$0xff] %v380_v38  ;;  %v384_v40 = vld [vmem:[%s1379_s7 + $0x280] sm:$0xff]  ;;  %v386_v41 = vld [vmem:[%s1379_s7 + $0x290] sm:$0xff]  ;;  %383 = vst [vmem:[%s1384_s8 + $0x138] sm:$0xff] %v382_v39 }
  0x2e   : > { %385 = vst [vmem:[%s1384_s8 + $0x140] sm:$0xff] %v384_v40  ;;  %387 = vst [vmem:[%s1384_s8 + $0x148] sm:$0xff] %v386_v41  ;;  %v388_v42 = vld [vmem:[%s1379_s7 + $0x2a0] sm:$0xff]  ;;  %v390_v43 = vld [vmem:[%s1379_s7 + $0x2b0] sm:$0xff] }
  0x2f   : > { %v392_v44 = vld [vmem:[%s1379_s7 + $0x2c0] sm:$0xff]  ;;  %389 = vst [vmem:[%s1384_s8 + $0x150] sm:$0xff] %v388_v42  ;;  %391 = vst [vmem:[%s1384_s8 + $0x158] sm:$0xff] %v390_v43  ;;  %v394_v45 = vld [vmem:[%s1379_s7 + $0x2d0] sm:$0xff] }
  0x30   : > { %393 = vst [vmem:[%s1384_s8 + $0x160] sm:$0xff] %v392_v44  ;;  %v396_v46 = vld [vmem:[%s1379_s7 + $0x2e0] sm:$0xff]  ;;  %v398_v47 = vld [vmem:[%s1379_s7 + $0x2f0] sm:$0xff]  ;;  %395 = vst [vmem:[%s1384_s8 + $0x168] sm:$0xff] %v394_v45 }
  0x31   : > { %397 = vst [vmem:[%s1384_s8 + $0x170] sm:$0xff] %v396_v46  ;;  %399 = vst [vmem:[%s1384_s8 + $0x178] sm:$0xff] %v398_v47 }
  0x32 PF: > { %p1043_p7 = scmp.ge.s32.totalorder %s1295_s18, 1  ;;  %p412_p8 = scmp.lt.s32.totalorder %s1295_s18, 13 }
  0x34   : > { %p413_p9 = pnand %p1043_p7, %p412_p8 }
  0x35   : > { %s419_s9 = sand.u32 (!%p413_p9), 1, %s1271_s12   ;;  %s459_s10 = smul.u32 (!%p413_p9), 3, %s1279_s14 }
  0x36   : > { %416 = sbr.rel (%p413_p9) target bundleno = 368 (0x170), region = 66  ;;  %s1045_s21 = sshll.u32 (!%p413_p9), %s1283_s15, 1 }
  0x37   : > { %s1107_s11 = smul.u32 (!%p413_p9), 384, %s419_s9  ;;  %p462_p10 = scmp.lt.s32.totalorder (!%p413_p9), %s459_s10, 17 }
  0x38   : > { %p472_p11 = scmp.lt.s32.totalorder (!%p413_p9), %s1045_s21, 3  ;;  %p1048_p12 = scmp.ne.s32.totalorder (!%p413_p9), %s1279_s14, 0 }
  0x39   : > { %s1501_s5 = scalar_lea.vmem (!%p413_p9), [#allocation3], %s1107_s11 }
  0x3d   : > { %s1599_s10 = smov (!%p462_p10, %s459_s10), 17  ;;  %s1601_s21 = smov (!%p472_p11, %s1045_s21), 3 }
  0x3e   : > { %s1044_s22 = sshll.u32 %s1599_s10, 2  ;;  %s474_s12 = scalar_lea.vmem %s1584_s2, %s1601_s21  ;;  %v1297_v48 = vmov (!%p1048_p12), 0.0  }
  0x3f   : > { %s1489_s26 = scalar_lea.vmem %s1582_s0, %s1044_s22  ;;  %s1047_s29 = sshll.u32 %s1601_s21, 2  ;;  %491 = vst [vmem:[#allocation2] sm:$0xff] (!%p1048_p12), %v1297_v48  ;;  %492 = vst [vmem:[#allocation2 + $0x8] sm:$0xff] (!%p1048_p12), %v1297_v48 }
  0x40   : > { %s1499_s4 = scalar_lea.vmem %s1585_s3, %s1047_s29  ;;  %490 = sbr.rel (%p1048_p12) target bundleno = 71 (0x47), region = 74 }
  0x47 PF: > { %v1166_v49 = vld [vmem:[%s1501_s5 + $0x4] ss:$8 sps:$4 sm:$0xff]   ;;  %v1168_v50 = vld [vmem:[%s1501_s5] ss:$8 sps:$4 sm:$0xff]   ;;  %v1298_v51 = vmov 0   ;;  %v495_v18 = vld [vmem:[%s1489_s26] sm:$0xff] }
  0x48   : > { %869 = vmatprep.mubr.bf16.mxu1 %v1298_v51  ;;  %796 = vmatprep.subr.bf16.mxu0 %v1166_v49  ;;  %v1169_v52 = vld [vmem:[%s1501_s5 + $0x14] ss:$8 sps:$4 sm:$0xff]   ;;  %v1171_v53 = vld [vmem:[%s1501_s5 + $0x10] ss:$8 sps:$4 sm:$0xff]   ;;  %v1172_v54 = vld [vmem:[%s1501_s5 + $0x24] ss:$8 sps:$4 sm:$0xff]   ;;  %v1050_v19 = vcombine.high %v495_v18, %v495_v18  ;;  %v1049_v37 = vcombine.low %v495_v18, %v495_v18 }
  0x49   : > { %797 = vmatpush1.bf16.msra.mxu0 %v1168_v50  ;;  %v1174_v55 = vld [vmem:[%s1501_s5 + $0x20] ss:$8 sps:$4 sm:$0xff]   ;;  %v1175_v56 = vld [vmem:[%s1501_s5 + $0x34] ss:$8 sps:$4 sm:$0xff]   ;;  %v1177_v57 = vld [vmem:[%s1501_s5 + $0x30] ss:$8 sps:$4 sm:$0xff]  }
  0x4a   : > { %798 = vmatprep.subr.bf16.mxu0 %v1169_v52  ;;  %v1190_v58 = vld [vmem:[%s1501_s5 + $0x104] ss:$8 sps:$4 sm:$0xff]   ;;  %v1192_v59 = vld [vmem:[%s1501_s5 + $0x100] ss:$8 sps:$4 sm:$0xff]   ;;  %v1196_v61 = vld [vmem:[%s1501_s5 + $0x114] ss:$8 sps:$4 sm:$0xff]   ;;  %828 = vmatprep.mubr.bf16.mxu0 %v1050_v19 }
  0x4b   : > { %v1178_v60 = vld [vmem:[%s1501_s5 + $0x44] ss:$8 sps:$4 sm:$0xff]   ;;  %837 = vmatprep.subr.bf16.mxu1 %v1190_v58  ;;  %v1198_v62 = vld [vmem:[%s1501_s5 + $0x110] ss:$8 sps:$4 sm:$0xff]   ;;  %v1180_v63 = vld [vmem:[%s1501_s5 + $0x40] ss:$8 sps:$4 sm:$0xff]  }
  0x4c   : > { %838 = vmatpush1.bf16.msra.mxu1 %v1192_v59  ;;  %v1181_v0 = vld [vmem:[%s1501_s5 + $0x54] ss:$8 sps:$4 sm:$0xff]   ;;  %v1202_v1 = vld [vmem:[%s1501_s5 + $0x124] ss:$8 sps:$4 sm:$0xff]   ;;  %v1204_v2 = vld [vmem:[%s1501_s5 + $0x120] ss:$8 sps:$4 sm:$0xff]  }
  0x4d   : > { %799 = vmatpush1.bf16.msra.mxu0 %v1171_v53  ;;  %839 = vmatprep.subr.bf16.mxu1 %v1196_v61  ;;  %v1183_v3 = vld [vmem:[%s1501_s5 + $0x50] ss:$8 sps:$4 sm:$0xff]   ;;  %v1208_v4 = vld [vmem:[%s1501_s5 + $0x134] ss:$8 sps:$4 sm:$0xff]   ;;  %v1184_v5 = vld [vmem:[%s1501_s5 + $0x64] ss:$8 sps:$4 sm:$0xff]  }
  0x4e   : > { %800 = vmatprep.subr.bf16.mxu0 %v1172_v54  ;;  %v1210_v6 = vld [vmem:[%s1501_s5 + $0x130] ss:$8 sps:$4 sm:$0xff]   ;;  %v1186_v7 = vld [vmem:[%s1501_s5 + $0x60] ss:$8 sps:$4 sm:$0xff]   ;;  %v1214_v8 = vld [vmem:[%s1501_s5 + $0x144] ss:$8 sps:$4 sm:$0xff]  }
  0x4f   : > { %v1187_v9 = vld [vmem:[%s1501_s5 + $0x74] ss:$8 sps:$4 sm:$0xff]   ;;  %v1216_v10 = vld [vmem:[%s1501_s5 + $0x140] ss:$8 sps:$4 sm:$0xff]   ;;  %v1189_v11 = vld [vmem:[%s1501_s5 + $0x70] ss:$8 sps:$4 sm:$0xff]  }
  0x50   : > { %840 = vmatpush1.bf16.msra.mxu1 %v1198_v62  ;;  %v1220_v12 = vld [vmem:[%s1501_s5 + $0x154] ss:$8 sps:$4 sm:$0xff]   ;;  %v1193_v13 = vld [vmem:[%s1501_s5 + $0x84] ss:$8 sps:$4 sm:$0xff]   ;;  %v1222_v14 = vld [vmem:[%s1501_s5 + $0x150] ss:$8 sps:$4 sm:$0xff]  }
  0x51   : > { %801 = vmatpush1.bf16.msra.mxu0 %v1174_v55  ;;  %841 = vmatprep.subr.bf16.mxu1 %v1202_v1  ;;  %v1195_v15 = vld [vmem:[%s1501_s5 + $0x80] ss:$8 sps:$4 sm:$0xff]   ;;  %v1226_v16 = vld [vmem:[%s1501_s5 + $0x164] ss:$8 sps:$4 sm:$0xff]   ;;  %v1199_v17 = vld [vmem:[%s1501_s5 + $0x94] ss:$8 sps:$4 sm:$0xff]  }
  0x52   : > { %802 = vmatprep.subr.bf16.mxu0 %v1175_v56  ;;  %v1228_v20 = vld [vmem:[%s1501_s5 + $0x160] ss:$8 sps:$4 sm:$0xff]   ;;  %v1201_v21 = vld [vmem:[%s1501_s5 + $0x90] ss:$8 sps:$4 sm:$0xff]   ;;  %v1232_v22 = vld [vmem:[%s1501_s5 + $0x174] ss:$8 sps:$4 sm:$0xff]  }
  0x53   : > { %v1205_v23 = vld [vmem:[%s1501_s5 + $0xa4] ss:$8 sps:$4 sm:$0xff]   ;;  %v1234_v24 = vld [vmem:[%s1501_s5 + $0x170] ss:$8 sps:$4 sm:$0xff]   ;;  %v1207_v25 = vld [vmem:[%s1501_s5 + $0xa0] ss:$8 sps:$4 sm:$0xff]  }
  0x54   : > { %842 = vmatpush1.bf16.msra.mxu1 %v1204_v2  ;;  %v1211_v26 = vld [vmem:[%s1501_s5 + $0xb4] ss:$8 sps:$4 sm:$0xff]   ;;  %v1238_v27 = vld [vmem:[%s1489_s26 + $0x8] ss:$0 sps:$4 sm:$0xff]   ;;  %v1217_v29 = vld [vmem:[%s1501_s5 + $0xc4] ss:$8 sps:$4 sm:$0xff]  }
  0x55   : > { %803 = vmatpush1.bf16.msra.mxu0 %v1177_v57  ;;  %843 = vmatprep.subr.bf16.mxu1 %v1208_v4  ;;  %v1213_v28 = vld [vmem:[%s1501_s5 + $0xb0] ss:$8 sps:$4 sm:$0xff]   ;;  %v1219_v30 = vld [vmem:[%s1501_s5 + $0xc0] ss:$8 sps:$4 sm:$0xff]   ;;  %v1223_v31 = vld [vmem:[%s1501_s5 + $0xd4] ss:$8 sps:$4 sm:$0xff]  }
  0x56   : > { %804 = vmatprep.subr.bf16.mxu0 %v1178_v60  ;;  %v1225_v32 = vld [vmem:[%s1501_s5 + $0xd0] ss:$8 sps:$4 sm:$0xff]   ;;  %v1229_v33 = vld [vmem:[%s1501_s5 + $0xe4] ss:$8 sps:$4 sm:$0xff]   ;;  %v1231_v34 = vld [vmem:[%s1501_s5 + $0xe0] ss:$8 sps:$4 sm:$0xff]  }
  0x57   : > { %v1235_v35 = vld [vmem:[%s1501_s5 + $0xf4] ss:$8 sps:$4 sm:$0xff]   ;;  %v1237_v36 = vld [vmem:[%s1501_s5 + $0xf0] ss:$8 sps:$4 sm:$0xff]   ;;  %p1100_p13 = scmp.ne.s32.totalorder %s1279_s14, 5 }
  0x58   : > { %844 = vmatpush1.bf16.msra.mxu1 %v1210_v6  ;;  %v493_v42 = vld [vmem:[#allocation2] sm:$0xff]  ;;  %v494_v45 = vld [vmem:[#allocation2 + $0x8] sm:$0xff]  ;;  %v890_v52 = vlaneseq (!%p1100_p13) }
  0x59   : > { %805 = vmatpush1.bf16.msra.mxu0 %v1180_v63  ;;  %845 = vmatprep.subr.bf16.mxu1 %v1214_v8  ;;  %v888_v54 = vld [vmem:[%s474_s12] sm:$0x3] (!%p1100_p13) }
  0x5a   : > { %806 = vmatprep.subr.bf16.mxu0 %v1181_v0  ;;  %v891_v53 = vshrl.u32 (!%p1100_p13), %v890_v52, 7 }
  0x5c   : > { %846 = vmatpush1.bf16.msra.mxu1 %v1216_v10  ;;  %v892_v55 = vsub.s32 (!%p1100_p13), 0, %v891_v53  ;;  %v896_v56 = vsub.s32 (!%p1100_p13), 1, %v891_v53 }
  0x5d   : > { %807 = vmatpush1.bf16.msra.mxu0 %v1183_v3  ;;  %847 = vmatprep.subr.bf16.mxu1 %v1220_v12 }
  0x5e   : > { %808 = vmatprep.subr.bf16.mxu0 %v1184_v5  ;;  %v893_v59 = vrot.slane (!%p1100_p13), %v888_v54, %v892_v55  ;;  %v897_v60 = vrot.slane (!%p1100_p13), %v888_v54, %v896_v56 }
  0x60   : > { %848 = vmatpush1.bf16.msra.mxu1 %v1222_v14 }
  0x61   : > { %809 = vmatpush1.bf16.msra.mxu0 %v1186_v7  ;;  %849 = vmatprep.subr.bf16.mxu1 %v1226_v16 }
  0x62   : > { %810 = vmatprep.subr.bf16.mxu0 %v1187_v9 }
  0x64   : > { %850 = vmatpush1.bf16.msra.mxu1 %v1228_v20 }
  0x65   : > { %811 = vmatpush1.bf16.msra.mxu0 %v1189_v11  ;;  %851 = vmatprep.subr.bf16.mxu1 %v1232_v22 }
  0x66   : > { %812 = vmatprep.subr.bf16.mxu0 %v1193_v13 }
  0x68   : > { %852 = vmatpush1.bf16.msra.mxu1 %v1234_v24 }
  0x69   : > { %813 = vmatpush1.bf16.msra.mxu0 %v1195_v15 }
  0x6a   : > { %814 = vmatprep.subr.bf16.mxu0 %v1199_v17 }
  0x6b   : > { %870 = vmatmul.mubr.bf16.vlgmr.msra.gmra.mrb[0].mxu1 %v1238_v27 }
  0x6d   : > { %815 = vmatpush1.bf16.msra.mxu0 %v1201_v21 }
  0x6e   : > { %816 = vmatprep.subr.bf16.mxu0 %v1205_v23 }
  0x71   : > { %817 = vmatpush1.bf16.msra.mxu0 %v1207_v25 }
  0x72   : > { %818 = vmatprep.subr.bf16.mxu0 %v1211_v26 }
  0x75   : > { %819 = vmatpush1.bf16.msra.mxu0 %v1213_v28 }
  0x76   : > { %820 = vmatprep.subr.bf16.mxu0 %v1217_v29 }
  0x79   : > { %821 = vmatpush1.bf16.msra.mxu0 %v1219_v30 }
  0x7a   : > { %822 = vmatprep.subr.bf16.mxu0 %v1223_v31 }
  0x7d   : > { %823 = vmatpush1.bf16.msra.mxu0 %v1225_v32 }
  0x7e   : > { %824 = vmatprep.subr.bf16.mxu0 %v1229_v33 }
  0x81   : > { %825 = vmatpush1.bf16.msra.mxu0 %v1231_v34 }
  0x82   : > { %826 = vmatprep.subr.bf16.mxu0 %v1235_v35 }
  0x85   : > { %827 = vmatpush1.bf16.msra.mxu0 %v1237_v36 }
  0x88   : > { %829 = vmatmul.mubr.bf16.vlgmr.msra.gmra.mrb[0].mxu0 %v1049_v37 }
 0x13e   : > { %v871_v38 = vpop.f32.mrb[0].mxu1 }
 0x13f   : > { %v873_v39 = vpop.f32.mrb[1].mxu1 }
 0x140   : > { %v875_v40 = vpop.f32.mrb[2].mxu1 }
 0x141   : > { %v876_v41 = vpop.f32.mrb[3].mxu1 }
 0x15b   : > { %v830_v43 = vpop.f32.mrb[0].mxu0  ;;  %885 = sbr.rel (%p1100_p13) target bundleno = 368 (0x170), region = 78 }
 0x15c   : > { %v872_v44 = vadd.f32 %v871_v38, %v830_v43  ;;  %v832_v46 = vpop.f32.mrb[1].mxu0 }
 0x15d   : > { %v874_v47 = vadd.f32 %v873_v39, %v832_v46  ;;  %v834_v48 = vpop.f32.mrb[2].mxu0 }
 0x15e   : > { %v878_v49 = vadd.f32 %v872_v44, %v493_v42  ;;  %v835_v50 = vpop.f32.mrb[3].mxu0 }
 0x15f   : > { %v879_v51 = vadd.f32 %v874_v47, %v494_v45 }
 0x160   : > { %880 = vst [vmem:[#allocation2] sm:$0xff] %v878_v49 }
 0x161   : > { %881 = vst [vmem:[#allocation2 + $0x8] sm:$0xff] %v879_v51 }
 0x167   : > { %v886_v57 = vld [vmem:[#allocation2] sm:$0xff] }
 0x168   : > { %v887_v58 = vld [vmem:[#allocation2 + $0x8] sm:$0xff]  ;;  %v900_v61 = vadd.f32 %v893_v59, %v886_v57 }
 0x169   : > { %v901_v62 = vadd.f32 %v897_v60, %v887_v58 }
 0x16a   : > { %v902_v63 = vmax.f32 %v900_v61, 0.0 }
 0x16b   : > { %v903_v0 = vmax.f32 %v901_v62, 0.0 }
 0x16d   : > { %v1105_v1 = vpack.c.bf16 %v903_v0, %v902_v63 }
 0x16f   : > { %912 = vst [vmem:[%s1499_s4] sm:$0xff] %v1105_v1 }
 0x170 PF: > { %s13_s18 = sadd.s32 1, %s1295_s18   ;;  %s1586_s12 = smov %s1275_s13 }
 0x171   : > { %p10_p0 = scmp.ge.s32.totalorder %s13_s18, 14   ;;  %s1587_s13 = smov %s1370_s25 }
 0x172   : > { %s1588_s14 = smov %s1287_s16  ;;  %s1589_s15 = smov %s1291_s17 }
 0x173   : > { %s1590_s16 = smov %s1593_s19  ;;  %s1591_s17 = smov %s1597_s20 }
 0x174   :  { %12 = sbr.rel (!%p10_p0) target bundleno = 4 (0x4), region = 119 }

// kernel: classifier_model_forward.39
= control target key start
LH: loop header
LB: loop body
LE: loop exit
PB: predicated region body
PF: predicated region fallthrough
CT: control target
= control target key end

     0   :  { %s1028_s12 = smov 0   ;;  %s1030_s13 = smov 0   ;;  %s1207_s0 = inlined_call_operand.vmem [shape: bf16[8,256], index: 0, kind: input, shape index: {}]   ;;  %s1208_s1 = inlined_call_operand.vmem [shape: bf16[256,512], index: 1, kind: input, shape index: {}]   ;;  %s1209_s2 = inlined_call_operand.vmem [shape: f32[1,512], index: 2, kind: input, shape index: {}]   ;;  %s1210_s3 = inlined_call_operand.vmem [shape: bf16[8,512], index: 3, kind: output, shape index: {}]  }
   0x1   :  { %s1032_s14 = smov 0   ;;  %s1034_s15 = smov 0  }
   0x2   :  { %s1036_s16 = smov 0  }
   0x3 LB: > { %s28_s17 = sadd.s32 1, %s1002_s15  ;;  %p76_p1 = scmp.ne.s32.totalorder %s994_s13, %s990_s12  ;;  %s1006_s16 = sphi %s1036_s16, %s13_s16   ;;  %s1002_s15 = sphi %s1034_s15, %s1214_s15   ;;  %s998_s14 = sphi %s1032_s14, %s1213_s14   ;;  %s994_s13 = sphi %s1030_s13, %s1212_s13   ;;  %s990_s12 = sphi %s1028_s12, %s1211_s12  }
   0x4   : > { %p30_p0 = scmp.ge.s32.totalorder %s28_s17, 2  ;;  %p77_p2 = scmp.eq.s32.totalorder %s1006_s16, 0 }
   0x5   : > { %s69_s19 = sadd.s32 1, %s994_s13  ;;  %p830_p5 = scmp.ge.s32.totalorder %s1006_s16, 2 }
   0x6   : > { %s1216_s17 = smov (%p30_p0, %s28_s17), 0  ;;  %p78_p3 = por %p77_p2, %p76_p1 }
   0x7   : > { %s65_s18 = ssub.s32 %s1002_s15, %s1216_s17  ;;  %169 = sbr.rel (%p830_p5) target bundleno = 34 (0x22), region = 20 }
   0x8   : > { %p67_p4 = scmp.eq.s32.totalorder %s65_s18, 0 }
   0xa   : > { %s1063_s20 = scalar_select %p67_p4, %s994_s13, %s69_s19  }
   0xe   : > { %172 = sbr.rel (!%p78_p3) target bundleno = 34 (0x22), region = 24  ;;  %s174_s21 = sand.u32 (%p78_p3), 1, %s994_s13  }
   0xf   : > { %s876_s22 = sshll.u32 (%p78_p3), %s1002_s15, 3  ;;  %s831_s23 = sshll.u32 (%p78_p3), %s174_s21, 8 }
  0x10   : > { %s1071_s26 = scalar_lea.vmem (%p78_p3), %s1208_s1, %s876_s22  ;;  %s1076_s27 = scalar_lea.vmem (%p78_p3), [#allocation3], %s831_s23 }
  0x11   : > { %v272_v0 = vld [vmem:[%s1071_s26] sm:$0xff] (%p78_p3)  ;;  %v274_v1 = vld [vmem:[%s1071_s26 + $0x10] sm:$0xff] (%p78_p3) }
  0x12   : > { %v276_v2 = vld [vmem:[%s1071_s26 + $0x20] sm:$0xff] (%p78_p3)  ;;  %273 = vst [vmem:[%s1076_s27] sm:$0xff] (%p78_p3), %v272_v0  ;;  %275 = vst [vmem:[%s1076_s27 + $0x8] sm:$0xff] (%p78_p3), %v274_v1  ;;  %v278_v3 = vld [vmem:[%s1071_s26 + $0x30] sm:$0xff] (%p78_p3) }
  0x13   : > { %277 = vst [vmem:[%s1076_s27 + $0x10] sm:$0xff] (%p78_p3), %v276_v2  ;;  %v280_v4 = vld [vmem:[%s1071_s26 + $0x40] sm:$0xff] (%p78_p3)  ;;  %v282_v5 = vld [vmem:[%s1071_s26 + $0x50] sm:$0xff] (%p78_p3)  ;;  %279 = vst [vmem:[%s1076_s27 + $0x18] sm:$0xff] (%p78_p3), %v278_v3 }
  0x14   : > { %281 = vst [vmem:[%s1076_s27 + $0x20] sm:$0xff] (%p78_p3), %v280_v4  ;;  %283 = vst [vmem:[%s1076_s27 + $0x28] sm:$0xff] (%p78_p3), %v282_v5  ;;  %v284_v6 = vld [vmem:[%s1071_s26 + $0x60] sm:$0xff] (%p78_p3)  ;;  %v286_v7 = vld [vmem:[%s1071_s26 + $0x70] sm:$0xff] (%p78_p3) }
  0x15   : > { %v288_v8 = vld [vmem:[%s1071_s26 + $0x80] sm:$0xff]  ;;  %285 = vst [vmem:[%s1076_s27 + $0x30] sm:$0xff] %v284_v6  ;;  %287 = vst [vmem:[%s1076_s27 + $0x38] sm:$0xff] %v286_v7  ;;  %v290_v9 = vld [vmem:[%s1071_s26 + $0x90] sm:$0xff] }
  0x16   : > { %289 = vst [vmem:[%s1076_s27 + $0x40] sm:$0xff] %v288_v8  ;;  %v292_v10 = vld [vmem:[%s1071_s26 + $0xa0] sm:$0xff]  ;;  %v294_v11 = vld [vmem:[%s1071_s26 + $0xb0] sm:$0xff]  ;;  %291 = vst [vmem:[%s1076_s27 + $0x48] sm:$0xff] %v290_v9 }
  0x17   : > { %293 = vst [vmem:[%s1076_s27 + $0x50] sm:$0xff] %v292_v10  ;;  %295 = vst [vmem:[%s1076_s27 + $0x58] sm:$0xff] %v294_v11  ;;  %v296_v12 = vld [vmem:[%s1071_s26 + $0xc0] sm:$0xff]  ;;  %v298_v13 = vld [vmem:[%s1071_s26 + $0xd0] sm:$0xff] }
  0x18   : > { %v300_v14 = vld [vmem:[%s1071_s26 + $0xe0] sm:$0xff]  ;;  %297 = vst [vmem:[%s1076_s27 + $0x60] sm:$0xff] %v296_v12  ;;  %299 = vst [vmem:[%s1076_s27 + $0x68] sm:$0xff] %v298_v13  ;;  %v302_v15 = vld [vmem:[%s1071_s26 + $0xf0] sm:$0xff] }
  0x19   : > { %301 = vst [vmem:[%s1076_s27 + $0x70] sm:$0xff] %v300_v14  ;;  %v304_v16 = vld [vmem:[%s1071_s26 + $0x100] sm:$0xff]  ;;  %v306_v17 = vld [vmem:[%s1071_s26 + $0x110] sm:$0xff]  ;;  %303 = vst [vmem:[%s1076_s27 + $0x78] sm:$0xff] %v302_v15 }
  0x1a   : > { %305 = vst [vmem:[%s1076_s27 + $0x80] sm:$0xff] %v304_v16  ;;  %307 = vst [vmem:[%s1076_s27 + $0x88] sm:$0xff] %v306_v17  ;;  %v308_v18 = vld [vmem:[%s1071_s26 + $0x120] sm:$0xff]  ;;  %v310_v19 = vld [vmem:[%s1071_s26 + $0x130] sm:$0xff] }
  0x1b   : > { %v312_v20 = vld [vmem:[%s1071_s26 + $0x140] sm:$0xff]  ;;  %309 = vst [vmem:[%s1076_s27 + $0x90] sm:$0xff] %v308_v18  ;;  %311 = vst [vmem:[%s1076_s27 + $0x98] sm:$0xff] %v310_v19  ;;  %v314_v21 = vld [vmem:[%s1071_s26 + $0x150] sm:$0xff] }
  0x1c   : > { %313 = vst [vmem:[%s1076_s27 + $0xa0] sm:$0xff] %v312_v20  ;;  %v316_v22 = vld [vmem:[%s1071_s26 + $0x160] sm:$0xff]  ;;  %v318_v23 = vld [vmem:[%s1071_s26 + $0x170] sm:$0xff]  ;;  %315 = vst [vmem:[%s1076_s27 + $0xa8] sm:$0xff] %v314_v21 }
  0x1d   : > { %317 = vst [vmem:[%s1076_s27 + $0xb0] sm:$0xff] %v316_v22  ;;  %319 = vst [vmem:[%s1076_s27 + $0xb8] sm:$0xff] %v318_v23  ;;  %v320_v24 = vld [vmem:[%s1071_s26 + $0x180] sm:$0xff]  ;;  %v322_v25 = vld [vmem:[%s1071_s26 + $0x190] sm:$0xff] }
  0x1e   : > { %v324_v26 = vld [vmem:[%s1071_s26 + $0x1a0] sm:$0xff]  ;;  %321 = vst [vmem:[%s1076_s27 + $0xc0] sm:$0xff] %v320_v24  ;;  %323 = vst [vmem:[%s1076_s27 + $0xc8] sm:$0xff] %v322_v25  ;;  %v326_v27 = vld [vmem:[%s1071_s26 + $0x1b0] sm:$0xff] }
  0x1f   : > { %325 = vst [vmem:[%s1076_s27 + $0xd0] sm:$0xff] %v324_v26  ;;  %v328_v28 = vld [vmem:[%s1071_s26 + $0x1c0] sm:$0xff]  ;;  %v330_v29 = vld [vmem:[%s1071_s26 + $0x1d0] sm:$0xff]  ;;  %327 = vst [vmem:[%s1076_s27 + $0xd8] sm:$0xff] %v326_v27 }
  0x20   : > { %329 = vst [vmem:[%s1076_s27 + $0xe0] sm:$0xff] %v328_v28  ;;  %331 = vst [vmem:[%s1076_s27 + $0xe8] sm:$0xff] %v330_v29  ;;  %v332_v30 = vld [vmem:[%s1071_s26 + $0x1e0] sm:$0xff]  ;;  %v334_v31 = vld [vmem:[%s1071_s26 + $0x1f0] sm:$0xff] }
  0x21   : > { %333 = vst [vmem:[%s1076_s27 + $0xf0] sm:$0xff] %v332_v30  ;;  %335 = vst [vmem:[%s1076_s27 + $0xf8] sm:$0xff] %v334_v31 }
  0x22 PF: > { %p834_p6 = scmp.ge.s32.totalorder %s1006_s16, 1  ;;  %p348_p7 = scmp.lt.s32.totalorder %s1006_s16, 3 }
  0x24   : > { %p349_p8 = pnand %p834_p6, %p348_p7 }
  0x25   : > { %s355_s28 = sand.u32 (!%p349_p8), 1, %s990_s12   ;;  %v1145_v32 = vld [vmem:[%s1207_s0] sm:$0xff] (!%p349_p8)  ;;  %s836_s6 = sshll.u32 (!%p349_p8), %s998_s14, 1  ;;  %v682_v3 = vlaneseq (!%p349_p8) }
  0x26   : > { %352 = sbr.rel (%p349_p8) target bundleno = 323 (0x143), region = 66  ;;  %s835_s4 = sshll.u32 (!%p349_p8), %s355_s28, 8  ;;  %v840_v33 = vcombine.high (!%p349_p8), %v1145_v32, %v1145_v32  ;;  %v839_v2 = vcombine.low (!%p349_p8), %v1145_v32, %v1145_v32 }
  0x27   : > { %s1149_s5 = scalar_lea.vmem (!%p349_p8), [#allocation3], %s835_s4  ;;  %p408_p9 = scmp.lt.s32.totalorder (!%p349_p8), %s836_s6, 3  ;;  %v683_v4 = vshrl.u32 (!%p349_p8), %v682_v3, 7 }
  0x28   : > { %v918_v34 = vld [vmem:[%s1149_s5 + $0x4] ss:$8 sps:$4 sm:$0xff] (!%p349_p8)   ;;  %662 = vmatprep.mubr.bf16.mxu0 (!%p349_p8), %v840_v33  ;;  %v920_v35 = vld [vmem:[%s1149_s5] ss:$8 sps:$4 sm:$0xff] (!%p349_p8)   ;;  %v921_v36 = vld [vmem:[%s1149_s5 + $0x14] ss:$8 sps:$4 sm:$0xff] (!%p349_p8)  }
  0x29   : > { %630 = vmatprep.subr.bf16.mxu0 (!%p349_p8), %v918_v34  ;;  %v923_v37 = vld [vmem:[%s1149_s5 + $0x10] ss:$8 sps:$4 sm:$0xff] (!%p349_p8)   ;;  %v924_v38 = vld [vmem:[%s1149_s5 + $0x24] ss:$8 sps:$4 sm:$0xff] (!%p349_p8)   ;;  %v926_v39 = vld [vmem:[%s1149_s5 + $0x20] ss:$8 sps:$4 sm:$0xff] (!%p349_p8)  }
  0x2a   : > { %631 = vmatpush1.bf16.msra.mxu0 (!%p349_p8), %v920_v35  ;;  %v927_v40 = vld [vmem:[%s1149_s5 + $0x34] ss:$8 sps:$4 sm:$0xff] (!%p349_p8)   ;;  %v929_v41 = vld [vmem:[%s1149_s5 + $0x30] ss:$8 sps:$4 sm:$0xff] (!%p349_p8)   ;;  %v930_v42 = vld [vmem:[%s1149_s5 + $0x44] ss:$8 sps:$4 sm:$0xff] (!%p349_p8)  }
  0x2b   : > { %632 = vmatprep.subr.bf16.mxu0 (!%p349_p8), %v921_v36  ;;  %v932_v43 = vld [vmem:[%s1149_s5 + $0x40] ss:$8 sps:$4 sm:$0xff] (!%p349_p8)   ;;  %v933_v44 = vld [vmem:[%s1149_s5 + $0x54] ss:$8 sps:$4 sm:$0xff] (!%p349_p8)   ;;  %v935_v45 = vld [vmem:[%s1149_s5 + $0x50] ss:$8 sps:$4 sm:$0xff] (!%p349_p8)  }
  0x2c   : > { %v936_v46 = vld [vmem:[%s1149_s5 + $0x64] ss:$8 sps:$4 sm:$0xff] (!%p349_p8)   ;;  %v938_v47 = vld [vmem:[%s1149_s5 + $0x60] ss:$8 sps:$4 sm:$0xff] (!%p349_p8)   ;;  %v939_v48 = vld [vmem:[%s1149_s5 + $0x74] ss:$8 sps:$4 sm:$0xff] (!%p349_p8)  }
  0x2d   : > { %v941_v49 = vld [vmem:[%s1149_s5 + $0x70] ss:$8 sps:$4 sm:$0xff]   ;;  %v942_v50 = vld [vmem:[%s1149_s5 + $0x84] ss:$8 sps:$4 sm:$0xff]   ;;  %v944_v51 = vld [vmem:[%s1149_s5 + $0x80] ss:$8 sps:$4 sm:$0xff]  }
  0x2e   : > { %633 = vmatpush1.bf16.msra.mxu0 %v923_v37  ;;  %v945_v52 = vld [vmem:[%s1149_s5 + $0x94] ss:$8 sps:$4 sm:$0xff]   ;;  %v947_v53 = vld [vmem:[%s1149_s5 + $0x90] ss:$8 sps:$4 sm:$0xff]   ;;  %v948_v54 = vld [vmem:[%s1149_s5 + $0xa4] ss:$8 sps:$4 sm:$0xff]  }
  0x2f   : > { %634 = vmatprep.subr.bf16.mxu0 %v924_v38  ;;  %v950_v55 = vld [vmem:[%s1149_s5 + $0xa0] ss:$8 sps:$4 sm:$0xff]   ;;  %v951_v56 = vld [vmem:[%s1149_s5 + $0xb4] ss:$8 sps:$4 sm:$0xff]   ;;  %v953_v57 = vld [vmem:[%s1149_s5 + $0xb0] ss:$8 sps:$4 sm:$0xff]  }
  0x30   : > { %v954_v58 = vld [vmem:[%s1149_s5 + $0xc4] ss:$8 sps:$4 sm:$0xff]   ;;  %v956_v59 = vld [vmem:[%s1149_s5 + $0xc0] ss:$8 sps:$4 sm:$0xff]   ;;  %v957_v60 = vld [vmem:[%s1149_s5 + $0xd4] ss:$8 sps:$4 sm:$0xff]  }
  0x31   : > { %v959_v61 = vld [vmem:[%s1149_s5 + $0xd0] ss:$8 sps:$4 sm:$0xff]   ;;  %v960_v62 = vld [vmem:[%s1149_s5 + $0xe4] ss:$8 sps:$4 sm:$0xff]   ;;  %v962_v63 = vld [vmem:[%s1149_s5 + $0xe0] ss:$8 sps:$4 sm:$0xff]  }
  0x32   : > { %635 = vmatpush1.bf16.msra.mxu0 %v926_v39  ;;  %v963_v0 = vld [vmem:[%s1149_s5 + $0xf4] ss:$8 sps:$4 sm:$0xff]   ;;  %v965_v1 = vld [vmem:[%s1149_s5 + $0xf0] ss:$8 sps:$4 sm:$0xff]   ;;  %s1218_s6 = smov (!%p408_p9, %s836_s6), 3  ;;  %v684_v5 = vsub.s32 0, %v683_v4 }
  0x33   : > { %636 = vmatprep.subr.bf16.mxu0 %v927_v40  ;;  %s410_s9 = scalar_lea.vmem %s1209_s2, %s1218_s6  ;;  %v688_v7 = vsub.s32 1, %v683_v4  ;;  %s838_s10 = sshll.u32 %s1218_s6, 2 }
  0x34   : > { %v680_v6 = vld [vmem:[%s410_s9] sm:$0x3]  ;;  %s420_s14 = scalar_lea.vmem %s1210_s3, %s838_s10 }
  0x35   : > { %v685_v8 = vrot.slane %v680_v6, %v684_v5  ;;  %v689_v9 = vrot.slane %v680_v6, %v688_v7 }
  0x36   : > { %637 = vmatpush1.bf16.msra.mxu0 %v929_v41 }
  0x37   : > { %638 = vmatprep.subr.bf16.mxu0 %v930_v42 }
  0x3a   : > { %639 = vmatpush1.bf16.msra.mxu0 %v932_v43 }
  0x3b   : > { %640 = vmatprep.subr.bf16.mxu0 %v933_v44 }
  0x3e   : > { %641 = vmatpush1.bf16.msra.mxu0 %v935_v45 }
  0x3f   : > { %642 = vmatprep.subr.bf16.mxu0 %v936_v46 }
  0x42   : > { %643 = vmatpush1.bf16.msra.mxu0 %v938_v47 }
  0x43   : > { %644 = vmatprep.subr.bf16.mxu0 %v939_v48 }
  0x46   : > { %645 = vmatpush1.bf16.msra.mxu0 %v941_v49 }
  0x47   : > { %646 = vmatprep.subr.bf16.mxu0 %v942_v50 }
  0x4a   : > { %647 = vmatpush1.bf16.msra.mxu0 %v944_v51 }
  0x4b   : > { %648 = vmatprep.subr.bf16.mxu0 %v945_v52 }
  0x4e   : > { %649 = vmatpush1.bf16.msra.mxu0 %v947_v53 }
  0x4f   : > { %650 = vmatprep.subr.bf16.mxu0 %v948_v54 }
  0x52   : > { %651 = vmatpush1.bf16.msra.mxu0 %v950_v55 }
  0x53   : > { %652 = vmatprep.subr.bf16.mxu0 %v951_v56 }
  0x56   : > { %653 = vmatpush1.bf16.msra.mxu0 %v953_v57 }
  0x57   : > { %654 = vmatprep.subr.bf16.mxu0 %v954_v58 }
  0x5a   : > { %655 = vmatpush1.bf16.msra.mxu0 %v956_v59 }
  0x5b   : > { %656 = vmatprep.subr.bf16.mxu0 %v957_v60 }
  0x5e   : > { %657 = vmatpush1.bf16.msra.mxu0 %v959_v61 }
  0x5f   : > { %658 = vmatprep.subr.bf16.mxu0 %v960_v62 }
  0x62   : > { %659 = vmatpush1.bf16.msra.mxu0 %v962_v63 }
  0x63   : > { %660 = vmatprep.subr.bf16.mxu0 %v963_v0 }
  0x66   : > { %661 = vmatpush1.bf16.msra.mxu0 %v965_v1 }
  0x69   : > { %663 = vmatmul.mubr.bf16.vlgmr.msra.gmra.mrb[0].mxu0 %v839_v2 }
 0x13c   : > { %v664_v10 = vpop.f32.mrb[0].mxu0 }
 0x13d   : > { %v692_v11 = vadd.f32 %v685_v8, %v664_v10  ;;  %v666_v12 = vpop.f32.mrb[1].mxu0 }
 0x13e   : > { %v693_v13 = vadd.f32 %v689_v9, %v666_v12  ;;  %v668_v14 = vpop.f32.mrb[2].mxu0 }
 0x13f   : > { %v669_v15 = vpop.f32.mrb[3].mxu0 }
 0x140   : > { %v877_v16 = vpack.c.bf16 %v693_v13, %v692_v11 }
 0x142   : > { %702 = vst [vmem:[%s420_s14] sm:$0xff] %v877_v16 }
 0x143 PF: > { %s13_s16 = sadd.s32 1, %s1006_s16   ;;  %s1211_s12 = smov %s994_s13 }
 0x144   : > { %p10_p10 = scmp.ge.s32.totalorder %s13_s16, 4   ;;  %s1212_s13 = smov %s1063_s20 }
 0x145   : > { %s1213_s14 = smov %s1002_s15  ;;  %s1214_s15 = smov %s1216_s17 }
 0x146   :  { %12 = sbr.rel (!%p10_p10) target bundleno = 3 (0x3), region = 119 }

// kernel: classifier_model_forward.40
= control target key start
LH: loop header
LB: loop body
LE: loop exit
PB: predicated region body
PF: predicated region fallthrough
CT: control target
= control target key end

     0   :  { %s1616_s15 = smov 0   ;;  %s1618_s16 = smov 0   ;;  %s1933_s0 = inlined_call_operand.vmem [shape: bf16[8,4608], index: 0, kind: input, shape index: {}]   ;;  %s1934_s1 = inlined_call_operand.vmem [shape: bf16[4608,512], index: 1, kind: input, shape index: {}]   ;;  %s1935_s2 = inlined_call_operand.vmem [shape: f32[1,512], index: 2, kind: input, shape index: {}]   ;;  %s1936_s3 = inlined_call_operand.vmem [shape: bf16[8,512], index: 3, kind: input, shape index: {}]   ;;  %s1937_s4 = inlined_call_operand.vmem [shape: bf16[8,512], index: 4, kind: output, shape index: {}]  }
   0x1   :  { %s1620_s17 = smov 0   ;;  %s1622_s18 = smov 0  }
   0x2   :  { %s1624_s19 = smov 0   ;;  %s1626_s20 = smov 0  }
   0x3   :  { %s1628_s21 = smov 0  }
   0x4 LB: > { %s26_s22 = sadd.s32 1, %s1580_s19  ;;  %s29_s23 = sadd.s32 1, %s1584_s20  ;;  %s1588_s21 = sphi %s1628_s21, %s14_s21   ;;  %s1584_s20 = sphi %s1626_s20, %s1943_s20   ;;  %s1580_s19 = sphi %s1624_s19, %s1942_s19   ;;  %s1576_s18 = sphi %s1622_s18, %s1941_s18   ;;  %s1572_s17 = sphi %s1620_s17, %s1940_s17   ;;  %s1568_s16 = sphi %s1618_s16, %s1939_s16   ;;  %s1564_s15 = sphi %s1616_s15, %s1938_s15  }
   0x5   : > { %p27_p0 = scmp.ge.s32.totalorder %s26_s22, 9  ;;  %p77_p1 = scmp.ne.s32.totalorder %s1568_s16, %s1564_s15 }
   0x6   : > { %p78_p2 = scmp.eq.s32.totalorder %s1588_s21, 0  ;;  %s70_s27 = sadd.s32 1, %s1568_s16 }
   0x7   : > { %s1945_s22 = smov (%p27_p0, %s26_s22), 0  ;;  %s1947_s23 = smov (!%p27_p0, %s29_s23), %s1584_s20 }
   0x8   : > { %p79_p3 = por %p78_p2, %p77_p1  ;;  %p31_p4 = scmp.ge.s32.totalorder %s1947_s23, 2 }
   0x9   : > { %s65_s24 = ssub.s32 %s1580_s19, %s1945_s22  ;;  %p1287_p6 = scmp.ge.s32.totalorder %s1588_s21, 18 }
   0xa   : > { %s1949_s23 = smov (%p31_p4, %s1947_s23), 0 }
   0xb   : > { %s66_s25 = ssub.s32 %s1584_s20, %s1949_s23  ;;  %185 = sbr.rel (%p1287_p6) target bundleno = 57 (0x39), region = 16 }
   0xc   : > { %s67_s26 = sor.u32 %s66_s25, %s65_s24 }
   0xd   : > { %p68_p5 = scmp.eq.s32.totalorder %s67_s26, 0 }
   0xf   : > { %s1667_s28 = scalar_select %p68_p5, %s1568_s16, %s70_s27  }
  0x12   : > { %201 = sbr.rel (!%p79_p3) target bundleno = 57 (0x39), region = 24  ;;  %s203_s29 = sand.u32 (%p79_p3), 1, %s1568_s16  }
  0x13   : > { %s1290_s30 = sshll.u32 (%p79_p3), %s1584_s20, 1  ;;  %s1288_s5 = sshll.u32 (%p79_p3), %s203_s29, 9 }
  0x14   : > { %s1375_s6 = sshll.u32 (%p79_p3), %s1580_s19, 8  ;;  %s1681_s12 = scalar_lea.vmem (%p79_p3), [#allocation3], %s1288_s5 }
  0x15   : > { %s209_s7 = sadd.s32 (%p79_p3), %s1375_s6, %s1290_s30 }
  0x16   : > { %s1292_s8 = sshll.u32 (%p79_p3), %s209_s7, 2 }
  0x17   : > { %s1676_s11 = scalar_lea.vmem (%p79_p3), %s1934_s1, %s1292_s8 }
  0x18   : > { %v365_v0 = vld [vmem:[%s1676_s11] sm:$0xff] (%p79_p3)  ;;  %v367_v1 = vld [vmem:[%s1676_s11 + $0x10] sm:$0xff] (%p79_p3) }
  0x19   : > { %v369_v2 = vld [vmem:[%s1676_s11 + $0x20] sm:$0xff]  ;;  %366 = vst [vmem:[%s1681_s12] sm:$0xff] %v365_v0  ;;  %368 = vst [vmem:[%s1681_s12 + $0x8] sm:$0xff] %v367_v1  ;;  %v371_v3 = vld [vmem:[%s1676_s11 + $0x30] sm:$0xff] }
  0x1a   : > { %370 = vst [vmem:[%s1681_s12 + $0x10] sm:$0xff] %v369_v2  ;;  %v373_v4 = vld [vmem:[%s1676_s11 + $0x40] sm:$0xff]  ;;  %v375_v5 = vld [vmem:[%s1676_s11 + $0x50] sm:$0xff]  ;;  %372 = vst [vmem:[%s1681_s12 + $0x18] sm:$0xff] %v371_v3 }
  0x1b   : > { %374 = vst [vmem:[%s1681_s12 + $0x20] sm:$0xff] %v373_v4  ;;  %376 = vst [vmem:[%s1681_s12 + $0x28] sm:$0xff] %v375_v5  ;;  %v377_v6 = vld [vmem:[%s1676_s11 + $0x60] sm:$0xff]  ;;  %v379_v7 = vld [vmem:[%s1676_s11 + $0x70] sm:$0xff] }
  0x1c   : > { %v381_v8 = vld [vmem:[%s1676_s11 + $0x80] sm:$0xff]  ;;  %378 = vst [vmem:[%s1681_s12 + $0x30] sm:$0xff] %v377_v6  ;;  %380 = vst [vmem:[%s1681_s12 + $0x38] sm:$0xff] %v379_v7  ;;  %v383_v9 = vld [vmem:[%s1676_s11 + $0x90] sm:$0xff] }
  0x1d   : > { %382 = vst [vmem:[%s1681_s12 + $0x40] sm:$0xff] %v381_v8  ;;  %v385_v10 = vld [vmem:[%s1676_s11 + $0xa0] sm:$0xff]  ;;  %v387_v11 = vld [vmem:[%s1676_s11 + $0xb0] sm:$0xff]  ;;  %384 = vst [vmem:[%s1681_s12 + $0x48] sm:$0xff] %v383_v9 }
  0x1e   : > { %386 = vst [vmem:[%s1681_s12 + $0x50] sm:$0xff] %v385_v10  ;;  %388 = vst [vmem:[%s1681_s12 + $0x58] sm:$0xff] %v387_v11  ;;  %v389_v12 = vld [vmem:[%s1676_s11 + $0xc0] sm:$0xff]  ;;  %v391_v13 = vld [vmem:[%s1676_s11 + $0xd0] sm:$0xff] }
  0x1f   : > { %v393_v14 = vld [vmem:[%s1676_s11 + $0xe0] sm:$0xff]  ;;  %390 = vst [vmem:[%s1681_s12 + $0x60] sm:$0xff] %v389_v12  ;;  %392 = vst [vmem:[%s1681_s12 + $0x68] sm:$0xff] %v391_v13  ;;  %v395_v15 = vld [vmem:[%s1676_s11 + $0xf0] sm:$0xff] }
  0x20   : > { %394 = vst [vmem:[%s1681_s12 + $0x70] sm:$0xff] %v393_v14  ;;  %v397_v16 = vld [vmem:[%s1676_s11 + $0x100] sm:$0xff]  ;;  %v399_v17 = vld [vmem:[%s1676_s11 + $0x110] sm:$0xff]  ;;  %396 = vst [vmem:[%s1681_s12 + $0x78] sm:$0xff] %v395_v15 }
  0x21   : > { %398 = vst [vmem:[%s1681_s12 + $0x80] sm:$0xff] %v397_v16  ;;  %400 = vst [vmem:[%s1681_s12 + $0x88] sm:$0xff] %v399_v17  ;;  %v401_v18 = vld [vmem:[%s1676_s11 + $0x120] sm:$0xff]  ;;  %v403_v19 = vld [vmem:[%s1676_s11 + $0x130] sm:$0xff] }
  0x22   : > { %v405_v20 = vld [vmem:[%s1676_s11 + $0x140] sm:$0xff]  ;;  %402 = vst [vmem:[%s1681_s12 + $0x90] sm:$0xff] %v401_v18  ;;  %404 = vst [vmem:[%s1681_s12 + $0x98] sm:$0xff] %v403_v19  ;;  %v407_v21 = vld [vmem:[%s1676_s11 + $0x150] sm:$0xff] }
  0x23   : > { %406 = vst [vmem:[%s1681_s12 + $0xa0] sm:$0xff] %v405_v20  ;;  %v409_v22 = vld [vmem:[%s1676_s11 + $0x160] sm:$0xff]  ;;  %v411_v23 = vld [vmem:[%s1676_s11 + $0x170] sm:$0xff]  ;;  %408 = vst [vmem:[%s1681_s12 + $0xa8] sm:$0xff] %v407_v21 }
  0x24   : > { %410 = vst [vmem:[%s1681_s12 + $0xb0] sm:$0xff] %v409_v22  ;;  %412 = vst [vmem:[%s1681_s12 + $0xb8] sm:$0xff] %v411_v23  ;;  %v413_v24 = vld [vmem:[%s1676_s11 + $0x180] sm:$0xff]  ;;  %v415_v25 = vld [vmem:[%s1676_s11 + $0x190] sm:$0xff] }
  0x25   : > { %v417_v26 = vld [vmem:[%s1676_s11 + $0x1a0] sm:$0xff]  ;;  %414 = vst [vmem:[%s1681_s12 + $0xc0] sm:$0xff] %v413_v24  ;;  %416 = vst [vmem:[%s1681_s12 + $0xc8] sm:$0xff] %v415_v25  ;;  %v419_v27 = vld [vmem:[%s1676_s11 + $0x1b0] sm:$0xff] }
  0x26   : > { %418 = vst [vmem:[%s1681_s12 + $0xd0] sm:$0xff] %v417_v26  ;;  %v421_v28 = vld [vmem:[%s1676_s11 + $0x1c0] sm:$0xff]  ;;  %v423_v29 = vld [vmem:[%s1676_s11 + $0x1d0] sm:$0xff]  ;;  %420 = vst [vmem:[%s1681_s12 + $0xd8] sm:$0xff] %v419_v27 }
  0x27   : > { %422 = vst [vmem:[%s1681_s12 + $0xe0] sm:$0xff] %v421_v28  ;;  %424 = vst [vmem:[%s1681_s12 + $0xe8] sm:$0xff] %v423_v29  ;;  %v425_v30 = vld [vmem:[%s1676_s11 + $0x1e0] sm:$0xff]  ;;  %v427_v31 = vld [vmem:[%s1676_s11 + $0x1f0] sm:$0xff] }
  0x28   : > { %v429_v32 = vld [vmem:[%s1676_s11 + $0x200] sm:$0xff]  ;;  %426 = vst [vmem:[%s1681_s12 + $0xf0] sm:$0xff] %v425_v30  ;;  %428 = vst [vmem:[%s1681_s12 + $0xf8] sm:$0xff] %v427_v31  ;;  %v431_v33 = vld [vmem:[%s1676_s11 + $0x210] sm:$0xff] }
  0x29   : > { %430 = vst [vmem:[%s1681_s12 + $0x100] sm:$0xff] %v429_v32  ;;  %v433_v34 = vld [vmem:[%s1676_s11 + $0x220] sm:$0xff]  ;;  %v435_v35 = vld [vmem:[%s1676_s11 + $0x230] sm:$0xff]  ;;  %432 = vst [vmem:[%s1681_s12 + $0x108] sm:$0xff] %v431_v33 }
  0x2a   : > { %434 = vst [vmem:[%s1681_s12 + $0x110] sm:$0xff] %v433_v34  ;;  %436 = vst [vmem:[%s1681_s12 + $0x118] sm:$0xff] %v435_v35  ;;  %v437_v36 = vld [vmem:[%s1676_s11 + $0x240] sm:$0xff]  ;;  %v439_v37 = vld [vmem:[%s1676_s11 + $0x250] sm:$0xff] }
  0x2b   : > { %v441_v38 = vld [vmem:[%s1676_s11 + $0x260] sm:$0xff]  ;;  %438 = vst [vmem:[%s1681_s12 + $0x120] sm:$0xff] %v437_v36  ;;  %440 = vst [vmem:[%s1681_s12 + $0x128] sm:$0xff] %v439_v37  ;;  %v443_v39 = vld [vmem:[%s1676_s11 + $0x270] sm:$0xff] }
  0x2c   : > { %442 = vst [vmem:[%s1681_s12 + $0x130] sm:$0xff] %v441_v38  ;;  %v445_v40 = vld [vmem:[%s1676_s11 + $0x280] sm:$0xff]  ;;  %v447_v41 = vld [vmem:[%s1676_s11 + $0x290] sm:$0xff]  ;;  %444 = vst [vmem:[%s1681_s12 + $0x138] sm:$0xff] %v443_v39 }
  0x2d   : > { %446 = vst [vmem:[%s1681_s12 + $0x140] sm:$0xff] %v445_v40  ;;  %448 = vst [vmem:[%s1681_s12 + $0x148] sm:$0xff] %v447_v41  ;;  %v449_v42 = vld [vmem:[%s1676_s11 + $0x2a0] sm:$0xff]  ;;  %v451_v43 = vld [vmem:[%s1676_s11 + $0x2b0] sm:$0xff] }
  0x2e   : > { %v453_v44 = vld [vmem:[%s1676_s11 + $0x2c0] sm:$0xff]  ;;  %450 = vst [vmem:[%s1681_s12 + $0x150] sm:$0xff] %v449_v42  ;;  %452 = vst [vmem:[%s1681_s12 + $0x158] sm:$0xff] %v451_v43  ;;  %v455_v45 = vld [vmem:[%s1676_s11 + $0x2d0] sm:$0xff] }
  0x2f   : > { %454 = vst [vmem:[%s1681_s12 + $0x160] sm:$0xff] %v453_v44  ;;  %v457_v46 = vld [vmem:[%s1676_s11 + $0x2e0] sm:$0xff]  ;;  %v459_v47 = vld [vmem:[%s1676_s11 + $0x2f0] sm:$0xff]  ;;  %456 = vst [vmem:[%s1681_s12 + $0x168] sm:$0xff] %v455_v45 }
  0x30   : > { %458 = vst [vmem:[%s1681_s12 + $0x170] sm:$0xff] %v457_v46  ;;  %460 = vst [vmem:[%s1681_s12 + $0x178] sm:$0xff] %v459_v47  ;;  %v461_v48 = vld [vmem:[%s1676_s11 + $0x300] sm:$0xff]  ;;  %v463_v49 = vld [vmem:[%s1676_s11 + $0x310] sm:$0xff] }
  0x31   : > { %v465_v50 = vld [vmem:[%s1676_s11 + $0x320] sm:$0xff]  ;;  %462 = vst [vmem:[%s1681_s12 + $0x180] sm:$0xff] %v461_v48  ;;  %464 = vst [vmem:[%s1681_s12 + $0x188] sm:$0xff] %v463_v49  ;;  %v467_v51 = vld [vmem:[%s1676_s11 + $0x330] sm:$0xff] }
  0x32   : > { %466 = vst [vmem:[%s1681_s12 + $0x190] sm:$0xff] %v465_v50  ;;  %v469_v52 = vld [vmem:[%s1676_s11 + $0x340] sm:$0xff]  ;;  %v471_v53 = vld [vmem:[%s1676_s11 + $0x350] sm:$0xff]  ;;  %468 = vst [vmem:[%s1681_s12 + $0x198] sm:$0xff] %v467_v51 }
  0x33   : > { %470 = vst [vmem:[%s1681_s12 + $0x1a0] sm:$0xff] %v469_v52  ;;  %472 = vst [vmem:[%s1681_s12 + $0x1a8] sm:$0xff] %v471_v53  ;;  %v473_v54 = vld [vmem:[%s1676_s11 + $0x360] sm:$0xff]  ;;  %v475_v55 = vld [vmem:[%s1676_s11 + $0x370] sm:$0xff] }
  0x34   : > { %v477_v56 = vld [vmem:[%s1676_s11 + $0x380] sm:$0xff]  ;;  %474 = vst [vmem:[%s1681_s12 + $0x1b0] sm:$0xff] %v473_v54  ;;  %476 = vst [vmem:[%s1681_s12 + $0x1b8] sm:$0xff] %v475_v55  ;;  %v479_v57 = vld [vmem:[%s1676_s11 + $0x390] sm:$0xff] }
  0x35   : > { %478 = vst [vmem:[%s1681_s12 + $0x1c0] sm:$0xff] %v477_v56  ;;  %v481_v58 = vld [vmem:[%s1676_s11 + $0x3a0] sm:$0xff]  ;;  %v483_v59 = vld [vmem:[%s1676_s11 + $0x3b0] sm:$0xff]  ;;  %480 = vst [vmem:[%s1681_s12 + $0x1c8] sm:$0xff] %v479_v57 }
  0x36   : > { %482 = vst [vmem:[%s1681_s12 + $0x1d0] sm:$0xff] %v481_v58  ;;  %484 = vst [vmem:[%s1681_s12 + $0x1d8] sm:$0xff] %v483_v59  ;;  %v485_v60 = vld [vmem:[%s1676_s11 + $0x3c0] sm:$0xff]  ;;  %v487_v61 = vld [vmem:[%s1676_s11 + $0x3d0] sm:$0xff] }
  0x37   : > { %v489_v62 = vld [vmem:[%s1676_s11 + $0x3e0] sm:$0xff]  ;;  %486 = vst [vmem:[%s1681_s12 + $0x1e0] sm:$0xff] %v485_v60  ;;  %488 = vst [vmem:[%s1681_s12 + $0x1e8] sm:$0xff] %v487_v61  ;;  %v491_v63 = vld [vmem:[%s1676_s11 + $0x3f0] sm:$0xff] }
  0x38   : > { %490 = vst [vmem:[%s1681_s12 + $0x1f0] sm:$0xff] %v489_v62  ;;  %492 = vst [vmem:[%s1681_s12 + $0x1f8] sm:$0xff] %v491_v63 }
  0x39 PF: > { %p1293_p7 = scmp.ge.s32.totalorder %s1588_s21, 1  ;;  %p518_p8 = scmp.lt.s32.totalorder %s1588_s21, 19 }
  0x3b   : > { %p519_p9 = pnand %p1293_p7, %p518_p8 }
  0x3c   : > { %s525_s13 = sand.u32 (!%p519_p9), 1, %s1564_s15   ;;  %s1295_s14 = sshll.u32 (!%p519_p9), %s1572_s17, 2 }
  0x3d   : > { %522 = sbr.rel (%p519_p9) target bundleno = 379 (0x17b), region = 70  ;;  %s1294_s24 = sshll.u32 (!%p519_p9), %s525_s13, 9 }
  0x3e   : > { %p579_p10 = scmp.lt.s32.totalorder (!%p519_p9), %s1295_s14, 35  ;;  %s1297_s25 = sshll.u32 (!%p519_p9), %s1576_s18, 1 }
  0x3f   : > { %p589_p11 = scmp.lt.s32.totalorder (!%p519_p9), %s1297_s25, 3  ;;  %s1835_s13 = scalar_lea.vmem (!%p519_p9), [#allocation3], %s1294_s24 }
  0x40   : > { %p1302_p12 = scmp.ne.s32.totalorder (!%p519_p9), %s1572_s17, 0 }
  0x44   : > { %s1951_s14 = smov (!%p579_p10, %s1295_s14), 35  ;;  %s1953_s25 = smov (!%p589_p11, %s1297_s25), 3 }
  0x45   : > { %s1296_s26 = sshll.u32 %s1951_s14, 2  ;;  %s591_s15 = scalar_lea.vmem %s1935_s2, %s1953_s25  ;;  %v1590_v0 = vmov (!%p1302_p12), 0.0  }
  0x46   : > { %s1816_s30 = scalar_lea.vmem %s1933_s0, %s1296_s26  ;;  %s1299_s7 = sshll.u32 %s1953_s25, 2  ;;  %617 = vst [vmem:[#allocation2] sm:$0xff] (!%p1302_p12), %v1590_v0  ;;  %618 = vst [vmem:[#allocation2 + $0x8] sm:$0xff] (!%p1302_p12), %v1590_v0 }
  0x47   : > { %s1828_s18 = scalar_lea.vmem %s1936_s3, %s1299_s7  ;;  %s1833_s12 = scalar_lea.vmem %s1937_s4, %s1299_s7 }
  0x48   : > { %616 = sbr.rel (%p1302_p12) target bundleno = 79 (0x4f), region = 78 }
  0x4f PF: > { %v1434_v1 = vld [vmem:[%s1835_s13 + $0x4] ss:$8 sps:$4 sm:$0xff]   ;;  %v1438_v3 = vld [vmem:[%s1835_s13] ss:$8 sps:$4 sm:$0xff]   ;;  %v1440_v5 = vld [vmem:[%s1835_s13 + $0x14] ss:$8 sps:$4 sm:$0xff]  }
  0x50   : > { %v1436_v2 = vld [vmem:[%s1835_s13 + $0x104] ss:$8 sps:$4 sm:$0xff]   ;;  %1021 = vmatprep.subr.bf16.mxu0 %v1434_v1  ;;  %v1439_v4 = vld [vmem:[%s1835_s13 + $0x100] ss:$8 sps:$4 sm:$0xff]   ;;  %v1442_v6 = vld [vmem:[%s1835_s13 + $0x114] ss:$8 sps:$4 sm:$0xff]  }
  0x51   : > { %1062 = vmatprep.subr.bf16.mxu1 %v1436_v2  ;;  %1022 = vmatpush1.bf16.msra.mxu0 %v1438_v3  ;;  %v1444_v7 = vld [vmem:[%s1835_s13 + $0x10] ss:$8 sps:$4 sm:$0xff]   ;;  %v1446_v9 = vld [vmem:[%s1835_s13 + $0x24] ss:$8 sps:$4 sm:$0xff]   ;;  %v1450_v11 = vld [vmem:[%s1835_s13 + $0x20] ss:$8 sps:$4 sm:$0xff]  }
  0x52   : > { %1063 = vmatpush1.bf16.msra.mxu1 %v1439_v4  ;;  %1023 = vmatprep.subr.bf16.mxu0 %v1440_v5  ;;  %v1445_v8 = vld [vmem:[%s1835_s13 + $0x110] ss:$8 sps:$4 sm:$0xff]   ;;  %v1448_v10 = vld [vmem:[%s1835_s13 + $0x124] ss:$8 sps:$4 sm:$0xff]   ;;  %v1451_v12 = vld [vmem:[%s1835_s13 + $0x120] ss:$8 sps:$4 sm:$0xff]  }
  0x53   : > { %1064 = vmatprep.subr.bf16.mxu1 %v1442_v6  ;;  %v1452_v13 = vld [vmem:[%s1835_s13 + $0x34] ss:$8 sps:$4 sm:$0xff]   ;;  %v1456_v15 = vld [vmem:[%s1835_s13 + $0x30] ss:$8 sps:$4 sm:$0xff]   ;;  %v1458_v17 = vld [vmem:[%s1835_s13 + $0x44] ss:$8 sps:$4 sm:$0xff]  }
  0x54   : > { %v1454_v14 = vld [vmem:[%s1835_s13 + $0x134] ss:$8 sps:$4 sm:$0xff]   ;;  %v1457_v16 = vld [vmem:[%s1835_s13 + $0x130] ss:$8 sps:$4 sm:$0xff]   ;;  %v1460_v18 = vld [vmem:[%s1835_s13 + $0x144] ss:$8 sps:$4 sm:$0xff]  }
  0x55   : > { %1024 = vmatpush1.bf16.msra.mxu0 %v1444_v7  ;;  %v1462_v19 = vld [vmem:[%s1835_s13 + $0x40] ss:$8 sps:$4 sm:$0xff]   ;;  %v1464_v21 = vld [vmem:[%s1835_s13 + $0x54] ss:$8 sps:$4 sm:$0xff]   ;;  %v1468_v23 = vld [vmem:[%s1835_s13 + $0x50] ss:$8 sps:$4 sm:$0xff]  }
  0x56   : > { %1065 = vmatpush1.bf16.msra.mxu1 %v1445_v8  ;;  %1025 = vmatprep.subr.bf16.mxu0 %v1446_v9  ;;  %v1463_v20 = vld [vmem:[%s1835_s13 + $0x140] ss:$8 sps:$4 sm:$0xff]   ;;  %v1466_v22 = vld [vmem:[%s1835_s13 + $0x154] ss:$8 sps:$4 sm:$0xff]   ;;  %v1469_v24 = vld [vmem:[%s1835_s13 + $0x150] ss:$8 sps:$4 sm:$0xff]  }
  0x57   : > { %1066 = vmatprep.subr.bf16.mxu1 %v1448_v10  ;;  %v1470_v25 = vld [vmem:[%s1835_s13 + $0x64] ss:$8 sps:$4 sm:$0xff]   ;;  %v1474_v27 = vld [vmem:[%s1835_s13 + $0x60] ss:$8 sps:$4 sm:$0xff]   ;;  %v1476_v29 = vld [vmem:[%s1835_s13 + $0x74] ss:$8 sps:$4 sm:$0xff]  }
  0x58   : > { %v1472_v26 = vld [vmem:[%s1835_s13 + $0x164] ss:$8 sps:$4 sm:$0xff]   ;;  %v1475_v28 = vld [vmem:[%s1835_s13 + $0x160] ss:$8 sps:$4 sm:$0xff]   ;;  %v1478_v30 = vld [vmem:[%s1835_s13 + $0x174] ss:$8 sps:$4 sm:$0xff]  }
  0x59   : > { %1026 = vmatpush1.bf16.msra.mxu0 %v1450_v11  ;;  %v1480_v31 = vld [vmem:[%s1835_s13 + $0x70] ss:$8 sps:$4 sm:$0xff]   ;;  %v1482_v33 = vld [vmem:[%s1835_s13 + $0x84] ss:$8 sps:$4 sm:$0xff]   ;;  %v1486_v35 = vld [vmem:[%s1835_s13 + $0x80] ss:$8 sps:$4 sm:$0xff]  }
  0x5a   : > { %1067 = vmatpush1.bf16.msra.mxu1 %v1451_v12  ;;  %1027 = vmatprep.subr.bf16.mxu0 %v1452_v13  ;;  %v1481_v32 = vld [vmem:[%s1835_s13 + $0x170] ss:$8 sps:$4 sm:$0xff]   ;;  %v1484_v34 = vld [vmem:[%s1835_s13 + $0x184] ss:$8 sps:$4 sm:$0xff]   ;;  %v1487_v36 = vld [vmem:[%s1835_s13 + $0x180] ss:$8 sps:$4 sm:$0xff]  }
  0x5b   : > { %1068 = vmatprep.subr.bf16.mxu1 %v1454_v14  ;;  %v1488_v37 = vld [vmem:[%s1835_s13 + $0x94] ss:$8 sps:$4 sm:$0xff]   ;;  %v1492_v39 = vld [vmem:[%s1835_s13 + $0x90] ss:$8 sps:$4 sm:$0xff]   ;;  %v1494_v41 = vld [vmem:[%s1835_s13 + $0xa4] ss:$8 sps:$4 sm:$0xff]  }
  0x5c   : > { %v1490_v38 = vld [vmem:[%s1835_s13 + $0x194] ss:$8 sps:$4 sm:$0xff]   ;;  %v1493_v40 = vld [vmem:[%s1835_s13 + $0x190] ss:$8 sps:$4 sm:$0xff]   ;;  %v1496_v42 = vld [vmem:[%s1835_s13 + $0x1a4] ss:$8 sps:$4 sm:$0xff]  }
  0x5d   : > { %1028 = vmatpush1.bf16.msra.mxu0 %v1456_v15  ;;  %v1498_v43 = vld [vmem:[%s1835_s13 + $0xa0] ss:$8 sps:$4 sm:$0xff]   ;;  %v1500_v45 = vld [vmem:[%s1835_s13 + $0xb4] ss:$8 sps:$4 sm:$0xff]   ;;  %v1504_v50 = vld [vmem:[%s1835_s13 + $0xb0] ss:$8 sps:$4 sm:$0xff]  }
  0x5e   : > { %1069 = vmatpush1.bf16.msra.mxu1 %v1457_v16  ;;  %1029 = vmatprep.subr.bf16.mxu0 %v1458_v17  ;;  %v1499_v44 = vld [vmem:[%s1835_s13 + $0x1a0] ss:$8 sps:$4 sm:$0xff]   ;;  %v1502_v46 = vld [vmem:[%s1835_s13 + $0x1b4] ss:$8 sps:$4 sm:$0xff]   ;;  %v1505_v51 = vld [vmem:[%s1835_s13 + $0x1b0] ss:$8 sps:$4 sm:$0xff]  }
  0x5f   : > { %1070 = vmatprep.subr.bf16.mxu1 %v1460_v18  ;;  %v621_v47 = vld [vmem:[%s1816_s30] sm:$0xff]  ;;  %v622_v49 = vld [vmem:[%s1816_s30 + $0x8] sm:$0xff]  ;;  %v1506_v53 = vld [vmem:[%s1835_s13 + $0xc4] ss:$8 sps:$4 sm:$0xff]   ;;  %p1371_p13 = scmp.ne.s32.totalorder %s1572_s17, 8 }
  0x60   : > { %v1304_v48 = vcombine.high %v621_v47, %v621_v47  ;;  %v1306_v52 = vcombine.high %v622_v49, %v622_v49  ;;  %v1508_v54 = vld [vmem:[%s1835_s13 + $0x1c4] ss:$8 sps:$4 sm:$0xff]   ;;  %v1510_v55 = vld [vmem:[%s1835_s13 + $0xc0] ss:$8 sps:$4 sm:$0xff]   ;;  %v1512_v57 = vld [vmem:[%s1835_s13 + $0xd4] ss:$8 sps:$4 sm:$0xff]   ;;  %v1303_v5 = vcombine.low %v621_v47, %v621_v47  ;;  %v1305_v6 = vcombine.low %v622_v49, %v622_v49 }
  0x61   : > { %1030 = vmatpush1.bf16.msra.mxu0 %v1462_v19  ;;  %v1511_v56 = vld [vmem:[%s1835_s13 + $0x1c0] ss:$8 sps:$4 sm:$0xff]   ;;  %v1514_v58 = vld [vmem:[%s1835_s13 + $0x1d4] ss:$8 sps:$4 sm:$0xff]   ;;  %v1516_v59 = vld [vmem:[%s1835_s13 + $0xd0] ss:$8 sps:$4 sm:$0xff]  }
  0x62   : > { %1071 = vmatpush1.bf16.msra.mxu1 %v1463_v20  ;;  %1031 = vmatprep.subr.bf16.mxu0 %v1464_v21  ;;  %v1517_v60 = vld [vmem:[%s1835_s13 + $0x1d0] ss:$8 sps:$4 sm:$0xff]   ;;  %v1518_v61 = vld [vmem:[%s1835_s13 + $0xe4] ss:$8 sps:$4 sm:$0xff]   ;;  %v1522_v63 = vld [vmem:[%s1835_s13 + $0xe0] ss:$8 sps:$4 sm:$0xff]   ;;  %v1115_v21 = vlaneseq (!%p1371_p13) }
  0x63   : > { %1072 = vmatprep.subr.bf16.mxu1 %v1466_v22  ;;  %1053 = vmatprep.mubr.bf16.mxu0 %v1304_v48  ;;  %v1520_v62 = vld [vmem:[%s1835_s13 + $0x1e4] ss:$8 sps:$4 sm:$0xff]   ;;  %v1523_v0 = vld [vmem:[%s1835_s13 + $0x1e0] ss:$8 sps:$4 sm:$0xff]   ;;  %v1524_v1 = vld [vmem:[%s1835_s13 + $0xf4] ss:$8 sps:$4 sm:$0xff]  }
  0x64   : > { %1094 = vmatprep.mubr.bf16.mxu1 %v1306_v52  ;;  %v1526_v2 = vld [vmem:[%s1835_s13 + $0x1f4] ss:$8 sps:$4 sm:$0xff]   ;;  %v1528_v3 = vld [vmem:[%s1835_s13 + $0xf0] ss:$8 sps:$4 sm:$0xff]   ;;  %v1116_v22 = vshrl.u32 (!%p1371_p13), %v1115_v21, 7 }
  0x65   : > { %1032 = vmatpush1.bf16.msra.mxu0 %v1468_v23  ;;  %v1529_v4 = vld [vmem:[%s1835_s13 + $0x1f0] ss:$8 sps:$4 sm:$0xff]  }
  0x66   : > { %1073 = vmatpush1.bf16.msra.mxu1 %v1469_v24  ;;  %1033 = vmatprep.subr.bf16.mxu0 %v1470_v25  ;;  %v619_v8 = vld [vmem:[#allocation2] sm:$0xff]  ;;  %v620_v12 = vld [vmem:[#allocation2 + $0x8] sm:$0xff]  ;;  %v1117_v25 = vsub.s32 (!%p1371_p13), 0, %v1116_v22 }
  0x67   : > { %1074 = vmatprep.subr.bf16.mxu1 %v1472_v26  ;;  %v1113_v23 = vld [vmem:[%s591_s15] sm:$0x3] (!%p1371_p13)  ;;  %v1121_v26 = vsub.s32 (!%p1371_p13), 1, %v1116_v22 }
  0x68   : > { %v1127_v24 = vld [vmem:[%s1828_s18] sm:$0xff] (!%p1371_p13) }
  0x69   : > { %1034 = vmatpush1.bf16.msra.mxu0 %v1474_v27 }
  0x6a   : > { %1075 = vmatpush1.bf16.msra.mxu1 %v1475_v28  ;;  %1035 = vmatprep.subr.bf16.mxu0 %v1476_v29  ;;  %v1118_v29 = vrot.slane (!%p1371_p13), %v1113_v23, %v1117_v25 }
  0x6b   : > { %1076 = vmatprep.subr.bf16.mxu1 %v1478_v30  ;;  %v1122_v30 = vrot.slane (!%p1371_p13), %v1113_v23, %v1121_v26 }
  0x6d   : > { %1036 = vmatpush1.bf16.msra.mxu0 %v1480_v31  ;;  %v1128_v31 = vunpack.c.l.bf16 (!%p1371_p13), %v1127_v24 }
  0x6e   : > { %1077 = vmatpush1.bf16.msra.mxu1 %v1481_v32  ;;  %1037 = vmatprep.subr.bf16.mxu0 %v1482_v33  ;;  %v1129_v32 = vunpack.c.h.bf16 (!%p1371_p13), %v1127_v24 }
  0x6f   : > { %1078 = vmatprep.subr.bf16.mxu1 %v1484_v34 }
  0x71   : > { %1038 = vmatpush1.bf16.msra.mxu0 %v1486_v35 }
  0x72   : > { %1079 = vmatpush1.bf16.msra.mxu1 %v1487_v36  ;;  %1039 = vmatprep.subr.bf16.mxu0 %v1488_v37 }
  0x73   : > { %1080 = vmatprep.subr.bf16.mxu1 %v1490_v38 }
  0x75   : > { %1040 = vmatpush1.bf16.msra.mxu0 %v1492_v39 }
  0x76   : > { %1081 = vmatpush1.bf16.msra.mxu1 %v1493_v40  ;;  %1041 = vmatprep.subr.bf16.mxu0 %v1494_v41 }
  0x77   : > { %1082 = vmatprep.subr.bf16.mxu1 %v1496_v42 }
  0x79   : > { %1042 = vmatpush1.bf16.msra.mxu0 %v1498_v43 }
  0x7a   : > { %1083 = vmatpush1.bf16.msra.mxu1 %v1499_v44  ;;  %1043 = vmatprep.subr.bf16.mxu0 %v1500_v45 }
  0x7b   : > { %1084 = vmatprep.subr.bf16.mxu1 %v1502_v46 }
  0x7d   : > { %1044 = vmatpush1.bf16.msra.mxu0 %v1504_v50 }
  0x7e   : > { %1085 = vmatpush1.bf16.msra.mxu1 %v1505_v51  ;;  %1045 = vmatprep.subr.bf16.mxu0 %v1506_v53 }
  0x7f   : > { %1086 = vmatprep.subr.bf16.mxu1 %v1508_v54 }
  0x81   : > { %1046 = vmatpush1.bf16.msra.mxu0 %v1510_v55 }
  0x82   : > { %1087 = vmatpush1.bf16.msra.mxu1 %v1511_v56  ;;  %1047 = vmatprep.subr.bf16.mxu0 %v1512_v57 }
  0x83   : > { %1088 = vmatprep.subr.bf16.mxu1 %v1514_v58 }
  0x85   : > { %1048 = vmatpush1.bf16.msra.mxu0 %v1516_v59 }
  0x86   : > { %1089 = vmatpush1.bf16.msra.mxu1 %v1517_v60  ;;  %1049 = vmatprep.subr.bf16.mxu0 %v1518_v61 }
  0x87   : > { %1090 = vmatprep.subr.bf16.mxu1 %v1520_v62 }
  0x89   : > { %1050 = vmatpush1.bf16.msra.mxu0 %v1522_v63 }
  0x8a   : > { %1091 = vmatpush1.bf16.msra.mxu1 %v1523_v0  ;;  %1051 = vmatprep.subr.bf16.mxu0 %v1524_v1 }
  0x8b   : > { %1092 = vmatprep.subr.bf16.mxu1 %v1526_v2 }
  0x8d   : > { %1052 = vmatpush1.bf16.msra.mxu0 %v1528_v3 }
  0x8e   : > { %1093 = vmatpush1.bf16.msra.mxu1 %v1529_v4 }
  0x90   : > { %1054 = vmatmul.mubr.bf16.vlgmr.msra.gmra.mrb[0].mxu0 %v1303_v5 }
  0x91   : > { %1095 = vmatmul.mubr.bf16.vlgmr.msra.gmra.mrb[0].mxu1 %v1305_v6 }
 0x163   : > { %v1055_v7 = vpop.f32.mrb[0].mxu0 }
 0x164   : > { %v1096_v9 = vpop.f32.mrb[0].mxu1  ;;  %v1057_v11 = vpop.f32.mrb[1].mxu0  ;;  %1110 = sbr.rel (%p1371_p13) target bundleno = 379 (0x17b), region = 82 }
 0x165   : > { %v1097_v10 = vadd.f32 %v1096_v9, %v1055_v7  ;;  %v1098_v13 = vpop.f32.mrb[1].mxu1  ;;  %v1059_v15 = vpop.f32.mrb[2].mxu0 }
 0x166   : > { %v1099_v14 = vadd.f32 %v1098_v13, %v1057_v11  ;;  %v1100_v16 = vpop.f32.mrb[2].mxu1  ;;  %v1060_v18 = vpop.f32.mrb[3].mxu0 }
 0x167   : > { %v1103_v17 = vadd.f32 %v1097_v10, %v619_v8  ;;  %v1101_v19 = vpop.f32.mrb[3].mxu1 }
 0x168   : > { %v1104_v20 = vadd.f32 %v1099_v14, %v620_v12 }
 0x169   : > { %1105 = vst [vmem:[#allocation2] sm:$0xff] %v1103_v17 }
 0x16a   : > { %1106 = vst [vmem:[#allocation2 + $0x8] sm:$0xff] %v1104_v20 }
 0x170   : > { %v1111_v27 = vld [vmem:[#allocation2] sm:$0xff] }
 0x171   : > { %v1112_v28 = vld [vmem:[#allocation2 + $0x8] sm:$0xff]  ;;  %v1125_v33 = vadd.f32 %v1118_v29, %v1111_v27 }
 0x172   : > { %v1126_v34 = vadd.f32 %v1122_v30, %v1112_v28 }
 0x173   : > { %v1130_v35 = vadd.f32 %v1128_v31, %v1125_v33 }
 0x174   : > { %v1131_v36 = vadd.f32 %v1129_v32, %v1126_v34 }
 0x175   : > { %v1132_v37 = vmax.f32 %v1130_v35, 0.0 }
 0x176   : > { %v1133_v38 = vmax.f32 %v1131_v36, 0.0 }
 0x178   : > { %v1376_v39 = vpack.c.bf16 %v1133_v38, %v1132_v37 }
 0x17a   : > { %1142 = vst [vmem:[%s1833_s12] sm:$0xff] %v1376_v39 }
 0x17b PF: > { %s14_s21 = sadd.s32 1, %s1588_s21   ;;  %s1938_s15 = smov %s1568_s16 }
 0x17c   : > { %p11_p0 = scmp.ge.s32.totalorder %s14_s21, 20   ;;  %s1939_s16 = smov %s1667_s28 }
 0x17d   : > { %s1940_s17 = smov %s1580_s19  ;;  %s1941_s18 = smov %s1584_s20 }
 0x17e   : > { %s1942_s19 = smov %s1945_s22  ;;  %s1943_s20 = smov %s1949_s23 }
 0x17f   :  { %13 = sbr.rel (!%p11_p0) target bundleno = 4 (0x4), region = 126 }

// kernel: classifier_model_forward.41
= control target key start
LH: loop header
LB: loop body
LE: loop exit
PB: predicated region body
PF: predicated region fallthrough
CT: control target
= control target key end

     0   :  { %s1523_s12 = smov 0   ;;  %s1525_s13 = smov 0   ;;  %s1834_s0 = inlined_call_operand.vmem [shape: bf16[8,4608], index: 0, kind: input, shape index: {}]   ;;  %s1835_s1 = inlined_call_operand.vmem [shape: bf16[4608,512], index: 1, kind: input, shape index: {}]   ;;  %s1836_s2 = inlined_call_operand.vmem [shape: f32[1,512], index: 2, kind: input, shape index: {}]   ;;  %s1837_s3 = inlined_call_operand.vmem [shape: bf16[8,512], index: 3, kind: output, shape index: {}]  }
   0x1   :  { %s1527_s14 = smov 0   ;;  %s1529_s15 = smov 0  }
   0x2   :  { %s1531_s16 = smov 0   ;;  %s1533_s17 = smov 0  }
   0x3   :  { %s1535_s18 = smov 0  }
   0x4 LB: > { %s25_s19 = sadd.s32 1, %s1492_s16  ;;  %s28_s20 = sadd.s32 1, %s1496_s17  ;;  %s1500_s18 = sphi %s1535_s18, %s13_s18   ;;  %s1496_s17 = sphi %s1533_s17, %s1843_s17   ;;  %s1492_s16 = sphi %s1531_s16, %s1842_s16   ;;  %s1488_s15 = sphi %s1529_s15, %s1841_s15   ;;  %s1484_s14 = sphi %s1527_s14, %s1840_s14   ;;  %s1480_s13 = sphi %s1525_s13, %s1839_s13   ;;  %s1476_s12 = sphi %s1523_s12, %s1838_s12  }
   0x5   : > { %p26_p0 = scmp.ge.s32.totalorder %s25_s19, 9  ;;  %p76_p1 = scmp.ne.s32.totalorder %s1480_s13, %s1476_s12 }
   0x6   : > { %p77_p2 = scmp.eq.s32.totalorder %s1500_s18, 0  ;;  %s69_s24 = sadd.s32 1, %s1480_s13 }
   0x7   : > { %s1845_s19 = smov (%p26_p0, %s25_s19), 0  ;;  %s1847_s20 = smov (!%p26_p0, %s28_s20), %s1496_s17 }
   0x8   : > { %p78_p3 = por %p77_p2, %p76_p1  ;;  %p30_p4 = scmp.ge.s32.totalorder %s1847_s20, 2 }
   0x9   : > { %s64_s21 = ssub.s32 %s1492_s16, %s1845_s19  ;;  %p1201_p6 = scmp.ge.s32.totalorder %s1500_s18, 18 }
   0xa   : > { %s1849_s20 = smov (%p30_p4, %s1847_s20), 0 }
   0xb   : > { %s65_s22 = ssub.s32 %s1496_s17, %s1849_s20  ;;  %156 = sbr.rel (%p1201_p6) target bundleno = 57 (0x39), region = 16 }
   0xc   : > { %s66_s23 = sor.u32 %s65_s22, %s64_s21 }
   0xd   : > { %p67_p5 = scmp.eq.s32.totalorder %s66_s23, 0 }
   0xf   : > { %s1574_s25 = scalar_select %p67_p5, %s1480_s13, %s69_s24  }
  0x12   : > { %172 = sbr.rel (!%p78_p3) target bundleno = 57 (0x39), region = 24  ;;  %s174_s26 = sand.u32 (%p78_p3), 1, %s1480_s13  }
  0x13   : > { %s1204_s27 = sshll.u32 (%p78_p3), %s1496_s17, 1  ;;  %s1202_s28 = sshll.u32 (%p78_p3), %s174_s26, 9 }
  0x14   : > { %s1287_s29 = sshll.u32 (%p78_p3), %s1492_s16, 8  ;;  %s1588_s8 = scalar_lea.vmem (%p78_p3), [#allocation3], %s1202_s28 }
  0x15   : > { %s180_s30 = sadd.s32 (%p78_p3), %s1287_s29, %s1204_s27 }
  0x16   : > { %s1206_s4 = sshll.u32 (%p78_p3), %s180_s30, 2 }
  0x17   : > { %s1583_s7 = scalar_lea.vmem (%p78_p3), %s1835_s1, %s1206_s4 }
  0x18   : > { %v336_v0 = vld [vmem:[%s1583_s7] sm:$0xff] (%p78_p3)  ;;  %v338_v1 = vld [vmem:[%s1583_s7 + $0x10] sm:$0xff] (%p78_p3) }
  0x19   : > { %v340_v2 = vld [vmem:[%s1583_s7 + $0x20] sm:$0xff]  ;;  %337 = vst [vmem:[%s1588_s8] sm:$0xff] %v336_v0  ;;  %339 = vst [vmem:[%s1588_s8 + $0x8] sm:$0xff] %v338_v1  ;;  %v342_v3 = vld [vmem:[%s1583_s7 + $0x30] sm:$0xff] }
  0x1a   : > { %341 = vst [vmem:[%s1588_s8 + $0x10] sm:$0xff] %v340_v2  ;;  %v344_v4 = vld [vmem:[%s1583_s7 + $0x40] sm:$0xff]  ;;  %v346_v5 = vld [vmem:[%s1583_s7 + $0x50] sm:$0xff]  ;;  %343 = vst [vmem:[%s1588_s8 + $0x18] sm:$0xff] %v342_v3 }
  0x1b   : > { %345 = vst [vmem:[%s1588_s8 + $0x20] sm:$0xff] %v344_v4  ;;  %347 = vst [vmem:[%s1588_s8 + $0x28] sm:$0xff] %v346_v5  ;;  %v348_v6 = vld [vmem:[%s1583_s7 + $0x60] sm:$0xff]  ;;  %v350_v7 = vld [vmem:[%s1583_s7 + $0x70] sm:$0xff] }
  0x1c   : > { %v352_v8 = vld [vmem:[%s1583_s7 + $0x80] sm:$0xff]  ;;  %349 = vst [vmem:[%s1588_s8 + $0x30] sm:$0xff] %v348_v6  ;;  %351 = vst [vmem:[%s1588_s8 + $0x38] sm:$0xff] %v350_v7  ;;  %v354_v9 = vld [vmem:[%s1583_s7 + $0x90] sm:$0xff] }
  0x1d   : > { %353 = vst [vmem:[%s1588_s8 + $0x40] sm:$0xff] %v352_v8  ;;  %v356_v10 = vld [vmem:[%s1583_s7 + $0xa0] sm:$0xff]  ;;  %v358_v11 = vld [vmem:[%s1583_s7 + $0xb0] sm:$0xff]  ;;  %355 = vst [vmem:[%s1588_s8 + $0x48] sm:$0xff] %v354_v9 }
  0x1e   : > { %357 = vst [vmem:[%s1588_s8 + $0x50] sm:$0xff] %v356_v10  ;;  %359 = vst [vmem:[%s1588_s8 + $0x58] sm:$0xff] %v358_v11  ;;  %v360_v12 = vld [vmem:[%s1583_s7 + $0xc0] sm:$0xff]  ;;  %v362_v13 = vld [vmem:[%s1583_s7 + $0xd0] sm:$0xff] }
  0x1f   : > { %v364_v14 = vld [vmem:[%s1583_s7 + $0xe0] sm:$0xff]  ;;  %361 = vst [vmem:[%s1588_s8 + $0x60] sm:$0xff] %v360_v12  ;;  %363 = vst [vmem:[%s1588_s8 + $0x68] sm:$0xff] %v362_v13  ;;  %v366_v15 = vld [vmem:[%s1583_s7 + $0xf0] sm:$0xff] }
  0x20   : > { %365 = vst [vmem:[%s1588_s8 + $0x70] sm:$0xff] %v364_v14  ;;  %v368_v16 = vld [vmem:[%s1583_s7 + $0x100] sm:$0xff]  ;;  %v370_v17 = vld [vmem:[%s1583_s7 + $0x110] sm:$0xff]  ;;  %367 = vst [vmem:[%s1588_s8 + $0x78] sm:$0xff] %v366_v15 }
  0x21   : > { %369 = vst [vmem:[%s1588_s8 + $0x80] sm:$0xff] %v368_v16  ;;  %371 = vst [vmem:[%s1588_s8 + $0x88] sm:$0xff] %v370_v17  ;;  %v372_v18 = vld [vmem:[%s1583_s7 + $0x120] sm:$0xff]  ;;  %v374_v19 = vld [vmem:[%s1583_s7 + $0x130] sm:$0xff] }
  0x22   : > { %v376_v20 = vld [vmem:[%s1583_s7 + $0x140] sm:$0xff]  ;;  %373 = vst [vmem:[%s1588_s8 + $0x90] sm:$0xff] %v372_v18  ;;  %375 = vst [vmem:[%s1588_s8 + $0x98] sm:$0xff] %v374_v19  ;;  %v378_v21 = vld [vmem:[%s1583_s7 + $0x150] sm:$0xff] }
  0x23   : > { %377 = vst [vmem:[%s1588_s8 + $0xa0] sm:$0xff] %v376_v20  ;;  %v380_v22 = vld [vmem:[%s1583_s7 + $0x160] sm:$0xff]  ;;  %v382_v23 = vld [vmem:[%s1583_s7 + $0x170] sm:$0xff]  ;;  %379 = vst [vmem:[%s1588_s8 + $0xa8] sm:$0xff] %v378_v21 }
  0x24   : > { %381 = vst [vmem:[%s1588_s8 + $0xb0] sm:$0xff] %v380_v22  ;;  %383 = vst [vmem:[%s1588_s8 + $0xb8] sm:$0xff] %v382_v23  ;;  %v384_v24 = vld [vmem:[%s1583_s7 + $0x180] sm:$0xff]  ;;  %v386_v25 = vld [vmem:[%s1583_s7 + $0x190] sm:$0xff] }
  0x25   : > { %v388_v26 = vld [vmem:[%s1583_s7 + $0x1a0] sm:$0xff]  ;;  %385 = vst [vmem:[%s1588_s8 + $0xc0] sm:$0xff] %v384_v24  ;;  %387 = vst [vmem:[%s1588_s8 + $0xc8] sm:$0xff] %v386_v25  ;;  %v390_v27 = vld [vmem:[%s1583_s7 + $0x1b0] sm:$0xff] }
  0x26   : > { %389 = vst [vmem:[%s1588_s8 + $0xd0] sm:$0xff] %v388_v26  ;;  %v392_v28 = vld [vmem:[%s1583_s7 + $0x1c0] sm:$0xff]  ;;  %v394_v29 = vld [vmem:[%s1583_s7 + $0x1d0] sm:$0xff]  ;;  %391 = vst [vmem:[%s1588_s8 + $0xd8] sm:$0xff] %v390_v27 }
  0x27   : > { %393 = vst [vmem:[%s1588_s8 + $0xe0] sm:$0xff] %v392_v28  ;;  %395 = vst [vmem:[%s1588_s8 + $0xe8] sm:$0xff] %v394_v29  ;;  %v396_v30 = vld [vmem:[%s1583_s7 + $0x1e0] sm:$0xff]  ;;  %v398_v31 = vld [vmem:[%s1583_s7 + $0x1f0] sm:$0xff] }
  0x28   : > { %v400_v32 = vld [vmem:[%s1583_s7 + $0x200] sm:$0xff]  ;;  %397 = vst [vmem:[%s1588_s8 + $0xf0] sm:$0xff] %v396_v30  ;;  %399 = vst [vmem:[%s1588_s8 + $0xf8] sm:$0xff] %v398_v31  ;;  %v402_v33 = vld [vmem:[%s1583_s7 + $0x210] sm:$0xff] }
  0x29   : > { %401 = vst [vmem:[%s1588_s8 + $0x100] sm:$0xff] %v400_v32  ;;  %v404_v34 = vld [vmem:[%s1583_s7 + $0x220] sm:$0xff]  ;;  %v406_v35 = vld [vmem:[%s1583_s7 + $0x230] sm:$0xff]  ;;  %403 = vst [vmem:[%s1588_s8 + $0x108] sm:$0xff] %v402_v33 }
  0x2a   : > { %405 = vst [vmem:[%s1588_s8 + $0x110] sm:$0xff] %v404_v34  ;;  %407 = vst [vmem:[%s1588_s8 + $0x118] sm:$0xff] %v406_v35  ;;  %v408_v36 = vld [vmem:[%s1583_s7 + $0x240] sm:$0xff]  ;;  %v410_v37 = vld [vmem:[%s1583_s7 + $0x250] sm:$0xff] }
  0x2b   : > { %v412_v38 = vld [vmem:[%s1583_s7 + $0x260] sm:$0xff]  ;;  %409 = vst [vmem:[%s1588_s8 + $0x120] sm:$0xff] %v408_v36  ;;  %411 = vst [vmem:[%s1588_s8 + $0x128] sm:$0xff] %v410_v37  ;;  %v414_v39 = vld [vmem:[%s1583_s7 + $0x270] sm:$0xff] }
  0x2c   : > { %413 = vst [vmem:[%s1588_s8 + $0x130] sm:$0xff] %v412_v38  ;;  %v416_v40 = vld [vmem:[%s1583_s7 + $0x280] sm:$0xff]  ;;  %v418_v41 = vld [vmem:[%s1583_s7 + $0x290] sm:$0xff]  ;;  %415 = vst [vmem:[%s1588_s8 + $0x138] sm:$0xff] %v414_v39 }
  0x2d   : > { %417 = vst [vmem:[%s1588_s8 + $0x140] sm:$0xff] %v416_v40  ;;  %419 = vst [vmem:[%s1588_s8 + $0x148] sm:$0xff] %v418_v41  ;;  %v420_v42 = vld [vmem:[%s1583_s7 + $0x2a0] sm:$0xff]  ;;  %v422_v43 = vld [vmem:[%s1583_s7 + $0x2b0] sm:$0xff] }
  0x2e   : > { %v424_v44 = vld [vmem:[%s1583_s7 + $0x2c0] sm:$0xff]  ;;  %421 = vst [vmem:[%s1588_s8 + $0x150] sm:$0xff] %v420_v42  ;;  %423 = vst [vmem:[%s1588_s8 + $0x158] sm:$0xff] %v422_v43  ;;  %v426_v45 = vld [vmem:[%s1583_s7 + $0x2d0] sm:$0xff] }
  0x2f   : > { %425 = vst [vmem:[%s1588_s8 + $0x160] sm:$0xff] %v424_v44  ;;  %v428_v46 = vld [vmem:[%s1583_s7 + $0x2e0] sm:$0xff]  ;;  %v430_v47 = vld [vmem:[%s1583_s7 + $0x2f0] sm:$0xff]  ;;  %427 = vst [vmem:[%s1588_s8 + $0x168] sm:$0xff] %v426_v45 }
  0x30   : > { %429 = vst [vmem:[%s1588_s8 + $0x170] sm:$0xff] %v428_v46  ;;  %431 = vst [vmem:[%s1588_s8 + $0x178] sm:$0xff] %v430_v47  ;;  %v432_v48 = vld [vmem:[%s1583_s7 + $0x300] sm:$0xff]  ;;  %v434_v49 = vld [vmem:[%s1583_s7 + $0x310] sm:$0xff] }
  0x31   : > { %v436_v50 = vld [vmem:[%s1583_s7 + $0x320] sm:$0xff]  ;;  %433 = vst [vmem:[%s1588_s8 + $0x180] sm:$0xff] %v432_v48  ;;  %435 = vst [vmem:[%s1588_s8 + $0x188] sm:$0xff] %v434_v49  ;;  %v438_v51 = vld [vmem:[%s1583_s7 + $0x330] sm:$0xff] }
  0x32   : > { %437 = vst [vmem:[%s1588_s8 + $0x190] sm:$0xff] %v436_v50  ;;  %v440_v52 = vld [vmem:[%s1583_s7 + $0x340] sm:$0xff]  ;;  %v442_v53 = vld [vmem:[%s1583_s7 + $0x350] sm:$0xff]  ;;  %439 = vst [vmem:[%s1588_s8 + $0x198] sm:$0xff] %v438_v51 }
  0x33   : > { %441 = vst [vmem:[%s1588_s8 + $0x1a0] sm:$0xff] %v440_v52  ;;  %443 = vst [vmem:[%s1588_s8 + $0x1a8] sm:$0xff] %v442_v53  ;;  %v444_v54 = vld [vmem:[%s1583_s7 + $0x360] sm:$0xff]  ;;  %v446_v55 = vld [vmem:[%s1583_s7 + $0x370] sm:$0xff] }
  0x34   : > { %v448_v56 = vld [vmem:[%s1583_s7 + $0x380] sm:$0xff]  ;;  %445 = vst [vmem:[%s1588_s8 + $0x1b0] sm:$0xff] %v444_v54  ;;  %447 = vst [vmem:[%s1588_s8 + $0x1b8] sm:$0xff] %v446_v55  ;;  %v450_v57 = vld [vmem:[%s1583_s7 + $0x390] sm:$0xff] }
  0x35   : > { %449 = vst [vmem:[%s1588_s8 + $0x1c0] sm:$0xff] %v448_v56  ;;  %v452_v58 = vld [vmem:[%s1583_s7 + $0x3a0] sm:$0xff]  ;;  %v454_v59 = vld [vmem:[%s1583_s7 + $0x3b0] sm:$0xff]  ;;  %451 = vst [vmem:[%s1588_s8 + $0x1c8] sm:$0xff] %v450_v57 }
  0x36   : > { %453 = vst [vmem:[%s1588_s8 + $0x1d0] sm:$0xff] %v452_v58  ;;  %455 = vst [vmem:[%s1588_s8 + $0x1d8] sm:$0xff] %v454_v59  ;;  %v456_v60 = vld [vmem:[%s1583_s7 + $0x3c0] sm:$0xff]  ;;  %v458_v61 = vld [vmem:[%s1583_s7 + $0x3d0] sm:$0xff] }
  0x37   : > { %v460_v62 = vld [vmem:[%s1583_s7 + $0x3e0] sm:$0xff]  ;;  %457 = vst [vmem:[%s1588_s8 + $0x1e0] sm:$0xff] %v456_v60  ;;  %459 = vst [vmem:[%s1588_s8 + $0x1e8] sm:$0xff] %v458_v61  ;;  %v462_v63 = vld [vmem:[%s1583_s7 + $0x3f0] sm:$0xff] }
  0x38   : > { %461 = vst [vmem:[%s1588_s8 + $0x1f0] sm:$0xff] %v460_v62  ;;  %463 = vst [vmem:[%s1588_s8 + $0x1f8] sm:$0xff] %v462_v63 }
  0x39 PF: > { %p1207_p7 = scmp.ge.s32.totalorder %s1500_s18, 1  ;;  %p476_p8 = scmp.lt.s32.totalorder %s1500_s18, 19 }
  0x3b   : > { %p477_p9 = pnand %p1207_p7, %p476_p8 }
  0x3c   : > { %s483_s9 = sand.u32 (!%p477_p9), 1, %s1476_s12   ;;  %s1209_s10 = sshll.u32 (!%p477_p9), %s1484_s14, 2 }
  0x3d   : > { %480 = sbr.rel (%p477_p9) target bundleno = 376 (0x178), region = 66  ;;  %s1208_s11 = sshll.u32 (!%p477_p9), %s483_s9, 9 }
  0x3e   : > { %p526_p10 = scmp.lt.s32.totalorder (!%p477_p9), %s1209_s10, 35  ;;  %s1211_s21 = sshll.u32 (!%p477_p9), %s1488_s15, 1 }
  0x3f   : > { %p536_p11 = scmp.lt.s32.totalorder (!%p477_p9), %s1211_s21, 3  ;;  %s1737_s5 = scalar_lea.vmem (!%p477_p9), [#allocation3], %s1208_s11 }
  0x40   : > { %p1214_p12 = scmp.ne.s32.totalorder (!%p477_p9), %s1484_s14, 0 }
  0x44   : > { %s1851_s10 = smov (!%p526_p10, %s1209_s10), 35  ;;  %s1853_s21 = smov (!%p536_p11, %s1211_s21), 3 }
  0x45   : > { %s1210_s22 = sshll.u32 %s1851_s10, 2  ;;  %s538_s12 = scalar_lea.vmem %s1836_s2, %s1853_s21  ;;  %v1502_v0 = vmov (!%p1214_p12), 0.0  }
  0x46   : > { %s1723_s26 = scalar_lea.vmem %s1834_s0, %s1210_s22  ;;  %s1213_s29 = sshll.u32 %s1853_s21, 2  ;;  %554 = vst [vmem:[#allocation2] sm:$0xff] (!%p1214_p12), %v1502_v0  ;;  %555 = vst [vmem:[#allocation2 + $0x8] sm:$0xff] (!%p1214_p12), %v1502_v0 }
  0x47   : > { %s1735_s15 = scalar_lea.vmem %s1837_s3, %s1213_s29  ;;  %553 = sbr.rel (%p1214_p12) target bundleno = 78 (0x4e), region = 74 }
  0x4e PF: > { %v1346_v1 = vld [vmem:[%s1737_s5 + $0x4] ss:$8 sps:$4 sm:$0xff]   ;;  %v1350_v3 = vld [vmem:[%s1737_s5] ss:$8 sps:$4 sm:$0xff]   ;;  %v1352_v5 = vld [vmem:[%s1737_s5 + $0x14] ss:$8 sps:$4 sm:$0xff]  }
  0x4f   : > { %v1348_v2 = vld [vmem:[%s1737_s5 + $0x104] ss:$8 sps:$4 sm:$0xff]   ;;  %958 = vmatprep.subr.bf16.mxu0 %v1346_v1  ;;  %v1351_v4 = vld [vmem:[%s1737_s5 + $0x100] ss:$8 sps:$4 sm:$0xff]   ;;  %v1354_v6 = vld [vmem:[%s1737_s5 + $0x114] ss:$8 sps:$4 sm:$0xff]  }
  0x50   : > { %999 = vmatprep.subr.bf16.mxu1 %v1348_v2  ;;  %959 = vmatpush1.bf16.msra.mxu0 %v1350_v3  ;;  %v1356_v7 = vld [vmem:[%s1737_s5 + $0x10] ss:$8 sps:$4 sm:$0xff]   ;;  %v1358_v9 = vld [vmem:[%s1737_s5 + $0x24] ss:$8 sps:$4 sm:$0xff]   ;;  %v1362_v11 = vld [vmem:[%s1737_s5 + $0x20] ss:$8 sps:$4 sm:$0xff]  }
  0x51   : > { %1000 = vmatpush1.bf16.msra.mxu1 %v1351_v4  ;;  %960 = vmatprep.subr.bf16.mxu0 %v1352_v5  ;;  %v1357_v8 = vld [vmem:[%s1737_s5 + $0x110] ss:$8 sps:$4 sm:$0xff]   ;;  %v1360_v10 = vld [vmem:[%s1737_s5 + $0x124] ss:$8 sps:$4 sm:$0xff]   ;;  %v1363_v12 = vld [vmem:[%s1737_s5 + $0x120] ss:$8 sps:$4 sm:$0xff]  }
  0x52   : > { %1001 = vmatprep.subr.bf16.mxu1 %v1354_v6  ;;  %v1364_v13 = vld [vmem:[%s1737_s5 + $0x34] ss:$8 sps:$4 sm:$0xff]   ;;  %v1368_v15 = vld [vmem:[%s1737_s5 + $0x30] ss:$8 sps:$4 sm:$0xff]   ;;  %v1370_v17 = vld [vmem:[%s1737_s5 + $0x44] ss:$8 sps:$4 sm:$0xff]  }
  0x53   : > { %v1366_v14 = vld [vmem:[%s1737_s5 + $0x134] ss:$8 sps:$4 sm:$0xff]   ;;  %v1369_v16 = vld [vmem:[%s1737_s5 + $0x130] ss:$8 sps:$4 sm:$0xff]   ;;  %v1372_v18 = vld [vmem:[%s1737_s5 + $0x144] ss:$8 sps:$4 sm:$0xff]  }
  0x54   : > { %961 = vmatpush1.bf16.msra.mxu0 %v1356_v7  ;;  %v1374_v19 = vld [vmem:[%s1737_s5 + $0x40] ss:$8 sps:$4 sm:$0xff]   ;;  %v1376_v21 = vld [vmem:[%s1737_s5 + $0x54] ss:$8 sps:$4 sm:$0xff]   ;;  %v1380_v23 = vld [vmem:[%s1737_s5 + $0x50] ss:$8 sps:$4 sm:$0xff]  }
  0x55   : > { %1002 = vmatpush1.bf16.msra.mxu1 %v1357_v8  ;;  %962 = vmatprep.subr.bf16.mxu0 %v1358_v9  ;;  %v1375_v20 = vld [vmem:[%s1737_s5 + $0x140] ss:$8 sps:$4 sm:$0xff]   ;;  %v1378_v22 = vld [vmem:[%s1737_s5 + $0x154] ss:$8 sps:$4 sm:$0xff]   ;;  %v1381_v24 = vld [vmem:[%s1737_s5 + $0x150] ss:$8 sps:$4 sm:$0xff]  }
  0x56   : > { %1003 = vmatprep.subr.bf16.mxu1 %v1360_v10  ;;  %v1382_v25 = vld [vmem:[%s1737_s5 + $0x64] ss:$8 sps:$4 sm:$0xff]   ;;  %v1386_v27 = vld [vmem:[%s1737_s5 + $0x60] ss:$8 sps:$4 sm:$0xff]   ;;  %v1388_v29 = vld [vmem:[%s1737_s5 + $0x74] ss:$8 sps:$4 sm:$0xff]  }
  0x57   : > { %v1384_v26 = vld [vmem:[%s1737_s5 + $0x164] ss:$8 sps:$4 sm:$0xff]   ;;  %v1387_v28 = vld [vmem:[%s1737_s5 + $0x160] ss:$8 sps:$4 sm:$0xff]   ;;  %v1390_v30 = vld [vmem:[%s1737_s5 + $0x174] ss:$8 sps:$4 sm:$0xff]  }
  0x58   : > { %963 = vmatpush1.bf16.msra.mxu0 %v1362_v11  ;;  %v1392_v31 = vld [vmem:[%s1737_s5 + $0x70] ss:$8 sps:$4 sm:$0xff]   ;;  %v1394_v33 = vld [vmem:[%s1737_s5 + $0x84] ss:$8 sps:$4 sm:$0xff]   ;;  %v1398_v35 = vld [vmem:[%s1737_s5 + $0x80] ss:$8 sps:$4 sm:$0xff]  }
  0x59   : > { %1004 = vmatpush1.bf16.msra.mxu1 %v1363_v12  ;;  %964 = vmatprep.subr.bf16.mxu0 %v1364_v13  ;;  %v1393_v32 = vld [vmem:[%s1737_s5 + $0x170] ss:$8 sps:$4 sm:$0xff]   ;;  %v1396_v34 = vld [vmem:[%s1737_s5 + $0x184] ss:$8 sps:$4 sm:$0xff]   ;;  %v1399_v36 = vld [vmem:[%s1737_s5 + $0x180] ss:$8 sps:$4 sm:$0xff]  }
  0x5a   : > { %1005 = vmatprep.subr.bf16.mxu1 %v1366_v14  ;;  %v1400_v37 = vld [vmem:[%s1737_s5 + $0x94] ss:$8 sps:$4 sm:$0xff]   ;;  %v1404_v39 = vld [vmem:[%s1737_s5 + $0x90] ss:$8 sps:$4 sm:$0xff]   ;;  %v1406_v41 = vld [vmem:[%s1737_s5 + $0xa4] ss:$8 sps:$4 sm:$0xff]  }
  0x5b   : > { %v1402_v38 = vld [vmem:[%s1737_s5 + $0x194] ss:$8 sps:$4 sm:$0xff]   ;;  %v1405_v40 = vld [vmem:[%s1737_s5 + $0x190] ss:$8 sps:$4 sm:$0xff]   ;;  %v1408_v42 = vld [vmem:[%s1737_s5 + $0x1a4] ss:$8 sps:$4 sm:$0xff]  }
  0x5c   : > { %965 = vmatpush1.bf16.msra.mxu0 %v1368_v15  ;;  %v1410_v43 = vld [vmem:[%s1737_s5 + $0xa0] ss:$8 sps:$4 sm:$0xff]   ;;  %v1412_v45 = vld [vmem:[%s1737_s5 + $0xb4] ss:$8 sps:$4 sm:$0xff]   ;;  %v1416_v50 = vld [vmem:[%s1737_s5 + $0xb0] ss:$8 sps:$4 sm:$0xff]  }
  0x5d   : > { %1006 = vmatpush1.bf16.msra.mxu1 %v1369_v16  ;;  %966 = vmatprep.subr.bf16.mxu0 %v1370_v17  ;;  %v1411_v44 = vld [vmem:[%s1737_s5 + $0x1a0] ss:$8 sps:$4 sm:$0xff]   ;;  %v1414_v46 = vld [vmem:[%s1737_s5 + $0x1b4] ss:$8 sps:$4 sm:$0xff]   ;;  %v1417_v51 = vld [vmem:[%s1737_s5 + $0x1b0] ss:$8 sps:$4 sm:$0xff]  }
  0x5e   : > { %1007 = vmatprep.subr.bf16.mxu1 %v1372_v18  ;;  %v558_v47 = vld [vmem:[%s1723_s26] sm:$0xff]  ;;  %v559_v49 = vld [vmem:[%s1723_s26 + $0x8] sm:$0xff]  ;;  %v1418_v53 = vld [vmem:[%s1737_s5 + $0xc4] ss:$8 sps:$4 sm:$0xff]   ;;  %p1283_p13 = scmp.ne.s32.totalorder %s1484_s14, 8 }
  0x5f   : > { %v1216_v48 = vcombine.high %v558_v47, %v558_v47  ;;  %v1218_v52 = vcombine.high %v559_v49, %v559_v49  ;;  %v1420_v54 = vld [vmem:[%s1737_s5 + $0x1c4] ss:$8 sps:$4 sm:$0xff]   ;;  %v1422_v55 = vld [vmem:[%s1737_s5 + $0xc0] ss:$8 sps:$4 sm:$0xff]   ;;  %v1424_v57 = vld [vmem:[%s1737_s5 + $0xd4] ss:$8 sps:$4 sm:$0xff]   ;;  %v1215_v5 = vcombine.low %v558_v47, %v558_v47  ;;  %v1217_v6 = vcombine.low %v559_v49, %v559_v49 }
  0x60   : > { %967 = vmatpush1.bf16.msra.mxu0 %v1374_v19  ;;  %v1423_v56 = vld [vmem:[%s1737_s5 + $0x1c0] ss:$8 sps:$4 sm:$0xff]   ;;  %v1426_v58 = vld [vmem:[%s1737_s5 + $0x1d4] ss:$8 sps:$4 sm:$0xff]   ;;  %v1428_v59 = vld [vmem:[%s1737_s5 + $0xd0] ss:$8 sps:$4 sm:$0xff]  }
  0x61   : > { %1008 = vmatpush1.bf16.msra.mxu1 %v1375_v20  ;;  %968 = vmatprep.subr.bf16.mxu0 %v1376_v21  ;;  %v1429_v60 = vld [vmem:[%s1737_s5 + $0x1d0] ss:$8 sps:$4 sm:$0xff]   ;;  %v1430_v61 = vld [vmem:[%s1737_s5 + $0xe4] ss:$8 sps:$4 sm:$0xff]   ;;  %v1434_v63 = vld [vmem:[%s1737_s5 + $0xe0] ss:$8 sps:$4 sm:$0xff]   ;;  %v1052_v21 = vlaneseq (!%p1283_p13) }
  0x62   : > { %1009 = vmatprep.subr.bf16.mxu1 %v1378_v22  ;;  %990 = vmatprep.mubr.bf16.mxu0 %v1216_v48  ;;  %v1432_v62 = vld [vmem:[%s1737_s5 + $0x1e4] ss:$8 sps:$4 sm:$0xff]   ;;  %v1435_v0 = vld [vmem:[%s1737_s5 + $0x1e0] ss:$8 sps:$4 sm:$0xff]   ;;  %v1436_v1 = vld [vmem:[%s1737_s5 + $0xf4] ss:$8 sps:$4 sm:$0xff]  }
  0x63   : > { %1031 = vmatprep.mubr.bf16.mxu1 %v1218_v52  ;;  %v1438_v2 = vld [vmem:[%s1737_s5 + $0x1f4] ss:$8 sps:$4 sm:$0xff]   ;;  %v1440_v3 = vld [vmem:[%s1737_s5 + $0xf0] ss:$8 sps:$4 sm:$0xff]   ;;  %v1053_v22 = vshrl.u32 (!%p1283_p13), %v1052_v21, 7 }
  0x64   : > { %969 = vmatpush1.bf16.msra.mxu0 %v1380_v23  ;;  %v1441_v4 = vld [vmem:[%s1737_s5 + $0x1f0] ss:$8 sps:$4 sm:$0xff]  }
  0x65   : > { %1010 = vmatpush1.bf16.msra.mxu1 %v1381_v24  ;;  %970 = vmatprep.subr.bf16.mxu0 %v1382_v25  ;;  %v556_v8 = vld [vmem:[#allocation2] sm:$0xff]  ;;  %v557_v12 = vld [vmem:[#allocation2 + $0x8] sm:$0xff]  ;;  %v1054_v24 = vsub.s32 (!%p1283_p13), 0, %v1053_v22  ;;  %v1058_v25 = vsub.s32 (!%p1283_p13), 1, %v1053_v22 }
  0x66   : > { %1011 = vmatprep.subr.bf16.mxu1 %v1384_v26  ;;  %v1050_v23 = vld [vmem:[%s538_s12] sm:$0x3] (!%p1283_p13) }
  0x68   : > { %971 = vmatpush1.bf16.msra.mxu0 %v1386_v27 }
  0x69   : > { %1012 = vmatpush1.bf16.msra.mxu1 %v1387_v28  ;;  %972 = vmatprep.subr.bf16.mxu0 %v1388_v29  ;;  %v1055_v28 = vrot.slane (!%p1283_p13), %v1050_v23, %v1054_v24  ;;  %v1059_v29 = vrot.slane (!%p1283_p13), %v1050_v23, %v1058_v25 }
  0x6a   : > { %1013 = vmatprep.subr.bf16.mxu1 %v1390_v30 }
  0x6c   : > { %973 = vmatpush1.bf16.msra.mxu0 %v1392_v31 }
  0x6d   : > { %1014 = vmatpush1.bf16.msra.mxu1 %v1393_v32  ;;  %974 = vmatprep.subr.bf16.mxu0 %v1394_v33 }
  0x6e   : > { %1015 = vmatprep.subr.bf16.mxu1 %v1396_v34 }
  0x70   : > { %975 = vmatpush1.bf16.msra.mxu0 %v1398_v35 }
  0x71   : > { %1016 = vmatpush1.bf16.msra.mxu1 %v1399_v36  ;;  %976 = vmatprep.subr.bf16.mxu0 %v1400_v37 }
  0x72   : > { %1017 = vmatprep.subr.bf16.mxu1 %v1402_v38 }
  0x74   : > { %977 = vmatpush1.bf16.msra.mxu0 %v1404_v39 }
  0x75   : > { %1018 = vmatpush1.bf16.msra.mxu1 %v1405_v40  ;;  %978 = vmatprep.subr.bf16.mxu0 %v1406_v41 }
  0x76   : > { %1019 = vmatprep.subr.bf16.mxu1 %v1408_v42 }
  0x78   : > { %979 = vmatpush1.bf16.msra.mxu0 %v1410_v43 }
  0x79   : > { %1020 = vmatpush1.bf16.msra.mxu1 %v1411_v44  ;;  %980 = vmatprep.subr.bf16.mxu0 %v1412_v45 }
  0x7a   : > { %1021 = vmatprep.subr.bf16.mxu1 %v1414_v46 }
  0x7c   : > { %981 = vmatpush1.bf16.msra.mxu0 %v1416_v50 }
  0x7d   : > { %1022 = vmatpush1.bf16.msra.mxu1 %v1417_v51  ;;  %982 = vmatprep.subr.bf16.mxu0 %v1418_v53 }
  0x7e   : > { %1023 = vmatprep.subr.bf16.mxu1 %v1420_v54 }
  0x80   : > { %983 = vmatpush1.bf16.msra.mxu0 %v1422_v55 }
  0x81   : > { %1024 = vmatpush1.bf16.msra.mxu1 %v1423_v56  ;;  %984 = vmatprep.subr.bf16.mxu0 %v1424_v57 }
  0x82   : > { %1025 = vmatprep.subr.bf16.mxu1 %v1426_v58 }
  0x84   : > { %985 = vmatpush1.bf16.msra.mxu0 %v1428_v59 }
  0x85   : > { %1026 = vmatpush1.bf16.msra.mxu1 %v1429_v60  ;;  %986 = vmatprep.subr.bf16.mxu0 %v1430_v61 }
  0x86   : > { %1027 = vmatprep.subr.bf16.mxu1 %v1432_v62 }
  0x88   : > { %987 = vmatpush1.bf16.msra.mxu0 %v1434_v63 }
  0x89   : > { %1028 = vmatpush1.bf16.msra.mxu1 %v1435_v0  ;;  %988 = vmatprep.subr.bf16.mxu0 %v1436_v1 }
  0x8a   : > { %1029 = vmatprep.subr.bf16.mxu1 %v1438_v2 }
  0x8c   : > { %989 = vmatpush1.bf16.msra.mxu0 %v1440_v3 }
  0x8d   : > { %1030 = vmatpush1.bf16.msra.mxu1 %v1441_v4 }
  0x8f   : > { %991 = vmatmul.mubr.bf16.vlgmr.msra.gmra.mrb[0].mxu0 %v1215_v5 }
  0x90   : > { %1032 = vmatmul.mubr.bf16.vlgmr.msra.gmra.mrb[0].mxu1 %v1217_v6 }
 0x162   : > { %v992_v7 = vpop.f32.mrb[0].mxu0 }
 0x163   : > { %v1033_v9 = vpop.f32.mrb[0].mxu1  ;;  %v994_v11 = vpop.f32.mrb[1].mxu0  ;;  %1047 = sbr.rel (%p1283_p13) target bundleno = 376 (0x178), region = 78 }
 0x164   : > { %v1034_v10 = vadd.f32 %v1033_v9, %v992_v7  ;;  %v1035_v13 = vpop.f32.mrb[1].mxu1  ;;  %v996_v15 = vpop.f32.mrb[2].mxu0 }
 0x165   : > { %v1036_v14 = vadd.f32 %v1035_v13, %v994_v11  ;;  %v1037_v16 = vpop.f32.mrb[2].mxu1  ;;  %v997_v18 = vpop.f32.mrb[3].mxu0 }
 0x166   : > { %v1040_v17 = vadd.f32 %v1034_v10, %v556_v8  ;;  %v1038_v19 = vpop.f32.mrb[3].mxu1 }
 0x167   : > { %v1041_v20 = vadd.f32 %v1036_v14, %v557_v12 }
 0x168   : > { %1042 = vst [vmem:[#allocation2] sm:$0xff] %v1040_v17 }
 0x169   : > { %1043 = vst [vmem:[#allocation2 + $0x8] sm:$0xff] %v1041_v20 }
 0x16f   : > { %v1048_v26 = vld [vmem:[#allocation2] sm:$0xff] }
 0x170   : > { %v1049_v27 = vld [vmem:[#allocation2 + $0x8] sm:$0xff]  ;;  %v1062_v30 = vadd.f32 %v1055_v28, %v1048_v26 }
 0x171   : > { %v1063_v31 = vadd.f32 %v1059_v29, %v1049_v27 }
 0x172   : > { %v1064_v32 = vmax.f32 %v1062_v30, 0.0 }
 0x173   : > { %v1065_v33 = vmax.f32 %v1063_v31, 0.0 }
 0x175   : > { %v1288_v34 = vpack.c.bf16 %v1065_v33, %v1064_v32 }
 0x177   : > { %1074 = vst [vmem:[%s1735_s15] sm:$0xff] %v1288_v34 }
 0x178 PF: > { %s13_s18 = sadd.s32 1, %s1500_s18   ;;  %s1838_s12 = smov %s1480_s13 }
 0x179   : > { %p10_p0 = scmp.ge.s32.totalorder %s13_s18, 20   ;;  %s1839_s13 = smov %s1574_s25 }
 0x17a   : > { %s1840_s14 = smov %s1492_s16  ;;  %s1841_s15 = smov %s1496_s17 }
 0x17b   : > { %s1842_s16 = smov %s1845_s19  ;;  %s1843_s17 = smov %s1849_s20 }
 0x17c   :  { %12 = sbr.rel (!%p10_p0) target bundleno = 4 (0x4), region = 119 }

// kernel: classifier_model_forward.43
= control target key start
LH: loop header
LB: loop body
LE: loop exit
PB: predicated region body
PF: predicated region fallthrough
CT: control target
= control target key end

     0   :  { %v53_v24 = vlaneseq  ;;  %vm381_vm0 = vcmask 1041409   ;;  %vm384_vm1 = vcmask 1042434   ;;  %v1017_v46 = vmov 0.0   ;;  %s1305_s1 = inlined_call_operand.vmem [shape: bf16[512,128], index: 1, kind: input, shape index: {}]   ;;  %s1306_s0 = inlined_call_operand.vmem [shape: bf16[8,1,512], index: 0, kind: input, shape index: {}]   ;;  %s1307_s3 = inlined_call_operand.vmem [shape: bf16[128,128], index: 3, kind: input, shape index: {}]   ;;  %s1308_s2 = inlined_call_operand.vmem [shape: f32[1,128], index: 2, kind: input, shape index: {}]   ;;  %s1309_s4 = inlined_call_operand.vmem [shape: f32[1,128], index: 4, kind: input, shape index: {}]   ;;  %s1310_s5 = inlined_call_operand.vmem [shape: f32[8,128], index: 5, kind: output, shape index: {}]  }
   0x1   :  { %v977_v0 = vld [vmem:[%s1305_s1 + $0x40] sm:$0xff]   ;;  %v981_v4 = vld [vmem:[%s1305_s1 + $0x48] sm:$0xff]   ;;  %v985_v8 = vld [vmem:[%s1305_s1 + $0x50] sm:$0xff]   ;;  %vm387_vm2 = vcmask 1043459   ;;  %vm390_vm3 = vcmask 1044484   ;;  %vm393_vm4 = vcmask 1045509  }
   0x2   :  { %v978_v1 = vld [vmem:[%s1305_s1 + $0xc0] sm:$0xff]   ;;  %902 = vmatprep.subr.bf16.mxu0 %v977_v0  ;;  %v982_v5 = vld [vmem:[%s1305_s1 + $0xc8] sm:$0xff]   ;;  %v986_v9 = vld [vmem:[%s1305_s1 + $0xd0] sm:$0xff]   ;;  %v54_v29 = vshrl.u32 %v53_v24, 7  ;;  %vm396_vm5 = vcmask 1046534   ;;  %vm399_vm6 = vcmask 1047559  }
   0x3   :  { %v979_v2 = vld [vmem:[%s1305_s1] sm:$0xff]   ;;  %924 = vmatprep.subr.bf16.mxu1 %v978_v1  ;;  %v983_v6 = vld [vmem:[%s1305_s1 + $0x8] sm:$0xff]   ;;  %v987_v10 = vld [vmem:[%s1305_s1 + $0x10] sm:$0xff]   ;;  %vm1018_vm7 = vmmov 0  }
   0x4   :  { %v980_v3 = vld [vmem:[%s1305_s1 + $0x80] sm:$0xff]   ;;  %903 = vmatpush3.bf16.msra.mxu0 %v979_v2  ;;  %v984_v7 = vld [vmem:[%s1305_s1 + $0x88] sm:$0xff]   ;;  %v988_v11 = vld [vmem:[%s1305_s1 + $0x90] sm:$0xff]   ;;  %v59_v34 = vsub.s32 2, %v54_v29  ;;  %v1154_v38 = vsub.s32 6, %v54_v29  ;;  %v1156_v39 = vsub.s32 0, %v54_v29 }
   0x5   :  { %925 = vmatpush3.bf16.msra.mxu1 %v980_v3  ;;  %904 = vmatprep.subr.bf16.mxu0 %v981_v4  ;;  %v989_v12 = vld [vmem:[%s1305_s1 + $0x58] sm:$0xff]   ;;  %v993_v16 = vld [vmem:[%s1305_s1 + $0x60] sm:$0xff]   ;;  %v997_v20 = vld [vmem:[%s1305_s1 + $0x68] sm:$0xff]   ;;  %v1158_v40 = vsub.s32 4, %v54_v29 }
   0x6   :  { %926 = vmatprep.subr.bf16.mxu1 %v982_v5  ;;  %v990_v13 = vld [vmem:[%s1305_s1 + $0xd8] sm:$0xff]   ;;  %v994_v17 = vld [vmem:[%s1305_s1 + $0xe0] sm:$0xff]   ;;  %v998_v21 = vld [vmem:[%s1305_s1 + $0xe8] sm:$0xff]  }
   0x7   :  { %v991_v14 = vld [vmem:[%s1305_s1 + $0x18] sm:$0xff]   ;;  %v995_v18 = vld [vmem:[%s1305_s1 + $0x20] sm:$0xff]   ;;  %v999_v22 = vld [vmem:[%s1305_s1 + $0x28] sm:$0xff]  }
   0x8   :  { %905 = vmatpush3.bf16.msra.mxu0 %v983_v6  ;;  %v992_v15 = vld [vmem:[%s1305_s1 + $0x98] sm:$0xff]   ;;  %v996_v19 = vld [vmem:[%s1305_s1 + $0xa0] sm:$0xff]   ;;  %v1000_v23 = vld [vmem:[%s1305_s1 + $0xa8] sm:$0xff]  }
   0x9   :  { %927 = vmatpush3.bf16.msra.mxu1 %v984_v7  ;;  %906 = vmatprep.subr.bf16.mxu0 %v985_v8  ;;  %v1001_v25 = vld [vmem:[%s1305_s1 + $0x70] sm:$0xff]   ;;  %v1005_v30 = vld [vmem:[%s1305_s1 + $0x78] sm:$0xff]   ;;  %v884_v35 = vld [vmem:[%s1306_s0] sm:$0xff]  }
   0xa   :  { %928 = vmatprep.subr.bf16.mxu1 %v986_v9  ;;  %v1002_v26 = vld [vmem:[%s1305_s1 + $0xf0] sm:$0xff]   ;;  %v1006_v31 = vld [vmem:[%s1305_s1 + $0xf8] sm:$0xff]   ;;  %v899_v36 = vld [vmem:[%s1306_s0 + $0x8] sm:$0xff]   ;;  %v1160_v41 = vunpack.c.l.bf16 %v884_v35  ;;  %v1162_v42 = vunpack.c.h.bf16 %v884_v35 }
   0xb   :  { %v1003_v27 = vld [vmem:[%s1305_s1 + $0x30] sm:$0xff]   ;;  %v1007_v32 = vld [vmem:[%s1305_s1 + $0x38] sm:$0xff]   ;;  %v1164_v43 = vunpack.c.l.bf16 %v899_v36  ;;  %v1166_v44 = vunpack.c.h.bf16 %v899_v36 }
   0xc   :  { %907 = vmatpush3.bf16.msra.mxu0 %v987_v10  ;;  %v1004_v28 = vld [vmem:[%s1305_s1 + $0xb0] sm:$0xff]   ;;  %v1008_v33 = vld [vmem:[%s1305_s1 + $0xb8] sm:$0xff]   ;;  %v60_v51 = vrot.slane %v1160_v41, %v59_v34  ;;  %v76_v52 = vrot.slane %v1162_v42, %v59_v34 }
   0xd   :  { %929 = vmatpush3.bf16.msra.mxu1 %v988_v11  ;;  %908 = vmatprep.subr.bf16.mxu0 %v989_v12  ;;  %v900_v37 = vld [vmem:[%s1306_s0 + $0x10] sm:$0xff]   ;;  %v901_v45 = vld [vmem:[%s1306_s0 + $0x18] sm:$0xff]   ;;  %v92_v53 = vrot.slane %v1164_v43, %v59_v34  ;;  %v108_v54 = vrot.slane %v1166_v44, %v59_v34 }
   0xe   :  { %930 = vmatprep.subr.bf16.mxu1 %v990_v13  ;;  %v1172_v47 = vunpack.c.l.bf16 %v900_v37  ;;  %v1174_v48 = vunpack.c.h.bf16 %v900_v37  ;;  %v1176_v49 = vunpack.c.l.bf16 %v901_v45  ;;  %v1178_v50 = vunpack.c.h.bf16 %v901_v45 }
   0xf   :  { %v214_v59 = vpack.c.bf16 %v60_v51, %v60_v51  ;;  %v218_v60 = vpack.c.bf16 %v76_v52, %v76_v52  ;;  %v222_v61 = vpack.c.bf16 %v92_v53, %v92_v53  ;;  %v226_v62 = vpack.c.bf16 %v108_v54, %v108_v54 }
  0x10   :  { %909 = vmatpush3.bf16.msra.mxu0 %v991_v14  ;;  %v124_v55 = vrot.slane %v1172_v47, %v59_v34  ;;  %v140_v56 = vrot.slane %v1174_v48, %v59_v34  ;;  %v156_v57 = vrot.slane %v1176_v49, %v59_v34  ;;  %v172_v58 = vrot.slane %v1178_v50, %v59_v34 }
  0x11   :  { %931 = vmatpush3.bf16.msra.mxu1 %v992_v15  ;;  %910 = vmatprep.subr.bf16.mxu0 %v993_v16  ;;  %v349_v3 = vunpack.c.l.b16 %v214_v59  ;;  %v353_v4 = vunpack.c.l.b16 %v218_v60  ;;  %v357_v5 = vunpack.c.l.b16 %v222_v61  ;;  %v361_v6 = vunpack.c.l.b16 %v226_v62 }
  0x12   :  { %932 = vmatprep.subr.bf16.mxu1 %v994_v17  ;;  %v230_v63 = vpack.c.bf16 %v124_v55, %v124_v55  ;;  %v234_v0 = vpack.c.bf16 %v140_v56, %v140_v56  ;;  %v238_v1 = vpack.c.bf16 %v156_v57, %v156_v57  ;;  %v242_v2 = vpack.c.bf16 %v172_v58, %v172_v58 }
  0x13   :  { %v401_v11 = vrot.slane %v353_v4, 7  ;;  %v403_v12 = vrot.slane %v357_v5, 6  ;;  %v405_v13 = vrot.slane %v361_v6, 5  ;;  %v68_v14 = vrot.slane %v1160_v41, %v1154_v38 }
  0x14   :  { %911 = vmatpush3.bf16.msra.mxu0 %v995_v18  ;;  %v365_v7 = vunpack.c.l.b16 %v230_v63  ;;  %v369_v8 = vunpack.c.l.b16 %v234_v0  ;;  %v373_v9 = vunpack.c.l.b16 %v238_v1  ;;  %v377_v10 = vunpack.c.l.b16 %v242_v2 }
  0x15   :  { %933 = vmatpush3.bf16.msra.mxu1 %v996_v19  ;;  %912 = vmatprep.subr.bf16.mxu0 %v997_v20  ;;  %v402_v19 = vsel %vm381_vm0, %v401_v11, %v349_v3  ;;  %v84_v20 = vrot.slane %v1162_v42, %v1154_v38  ;;  %v132_v24 = vrot.slane %v1172_v47, %v1154_v38 }
  0x16   :  { %934 = vmatprep.subr.bf16.mxu1 %v998_v21  ;;  %v407_v15 = vrot.slane %v365_v7, 4  ;;  %v409_v16 = vrot.slane %v369_v8, 3  ;;  %v411_v17 = vrot.slane %v373_v9, 2  ;;  %v413_v18 = vrot.slane %v377_v10, 1 }
  0x17   :  { %v100_v21 = vrot.slane %v1164_v43, %v1154_v38  ;;  %v216_v29 = vpack.c.bf16 %v68_v14, %v68_v14  ;;  %v232_v34 = vpack.c.bf16 %v132_v24, %v132_v24  ;;  %v56_v5 = vrot.slane %v1160_v41, %v1156_v39 }
  0x18   :  { %913 = vmatpush3.bf16.msra.mxu0 %v999_v22  ;;  %v116_v22 = vrot.slane %v1166_v44, %v1154_v38  ;;  %v72_v7 = vrot.slane %v1162_v42, %v1156_v39  ;;  %v88_v8 = vrot.slane %v1164_v43, %v1156_v39  ;;  %v104_v9 = vrot.slane %v1166_v44, %v1156_v39 }
  0x19   :  { %935 = vmatpush3.bf16.msra.mxu1 %v1000_v23  ;;  %914 = vmatprep.subr.bf16.mxu0 %v1001_v25  ;;  %v404_v23 = vsel %vm384_vm1, %v403_v12, %v402_v19  ;;  %v148_v25 = vrot.slane %v1174_v48, %v1154_v38  ;;  %v351_v52 = vunpack.c.l.b16 %v216_v29  ;;  %v367_v56 = vunpack.c.l.b16 %v232_v34 }
  0x1a   :  { %936 = vmatprep.subr.bf16.mxu1 %v1002_v26  ;;  %v164_v26 = vrot.slane %v1176_v49, %v1154_v38  ;;  %v120_v11 = vrot.slane %v1172_v47, %v1156_v39  ;;  %v136_v12 = vrot.slane %v1174_v48, %v1156_v39  ;;  %v221_v19 = vpack.c.bf16 %v88_v8, %v88_v8 }
  0x1b   :  { %v236_v36 = vpack.c.bf16 %v148_v25, %v148_v25  ;;  %v435_v0 = vrot.slane %v367_v56, 4 }
  0x1c   :  { %915 = vmatpush3.bf16.msra.mxu0 %v1003_v27  ;;  %v406_v27 = vsel %vm387_vm2, %v405_v13, %v404_v23  ;;  %v240_v37 = vpack.c.bf16 %v164_v26, %v164_v26  ;;  %v152_v13 = vrot.slane %v1176_v49, %v1156_v39  ;;  %v233_v23 = vpack.c.bf16 %v136_v12, %v136_v12 }
  0x1d   :  { %937 = vmatpush3.bf16.msra.mxu1 %v1004_v28  ;;  %916 = vmatprep.subr.bf16.mxu0 %v1005_v30  ;;  %v180_v28 = vrot.slane %v1178_v50, %v1154_v38  ;;  %v220_v30 = vpack.c.bf16 %v84_v20, %v84_v20  ;;  %v371_v57 = vunpack.c.l.b16 %v236_v36  ;;  %v225_v20 = vpack.c.bf16 %v104_v9, %v104_v9 }
  0x1e   :  { %938 = vmatprep.subr.bf16.mxu1 %v1006_v31  ;;  %v408_v31 = vsel %vm390_vm3, %v407_v15, %v406_v27  ;;  %v375_v59 = vunpack.c.l.b16 %v240_v37  ;;  %v168_v15 = vrot.slane %v1178_v50, %v1156_v39  ;;  %v237_v24 = vpack.c.bf16 %v152_v13, %v152_v13 }
  0x1f   :  { %v410_v35 = vsel %vm393_vm4, %v409_v16, %v408_v31  ;;  %v244_v45 = vpack.c.bf16 %v180_v28, %v180_v28  ;;  %v355_v53 = vunpack.c.l.b16 %v220_v30  ;;  %v437_v1 = vrot.slane %v371_v57, 3 }
  0x20   :  { %917 = vmatpush3.bf16.msra.mxu0 %v1007_v32  ;;  %v224_v32 = vpack.c.bf16 %v100_v21, %v100_v21  ;;  %v412_v51 = vsel %vm396_vm5, %v411_v17, %v410_v35  ;;  %v439_v3 = vrot.slane %v375_v59, 2  ;;  %v213_v16 = vpack.c.bf16 %v56_v5, %v56_v5 }
  0x21   :  { %939 = vmatpush3.bf16.msra.mxu1 %v1008_v33  ;;  %955 = vmatprep.subr.bf16.mxu0 %v1017_v46  ;;  %v228_v33 = vpack.c.bf16 %v116_v22, %v116_v22  ;;  %v414_v55 = vsel %vm399_vm6, %v413_v18, %v412_v51  ;;  %v379_v60 = vunpack.c.l.b16 %v244_v45  ;;  %v429_v61 = vrot.slane %v355_v53, 7 }
  0x22   :  { %v359_v54 = vunpack.c.l.b16 %v224_v32  ;;  %v444_v58 = vpack.c.b16 %v414_v55, %v414_v55  ;;  %v217_v17 = vpack.c.bf16 %v72_v7, %v72_v7  ;;  %v229_v21 = vpack.c.bf16 %v120_v11, %v120_v11 }
  0x23   :  { %v363_v38 = vunpack.c.l.b16 %v228_v33  ;;  %v430_v2 = vsel %vm381_vm0, %v429_v61, %v351_v52  ;;  %v441_v4 = vrot.slane %v379_v60, 1  ;;  %v241_v25 = vpack.c.bf16 %v168_v15, %v168_v15 }
  0x24   :  { %v431_v62 = vrot.slane %v359_v54, 6  ;;  %675 = vmatprep.mubr.bf16.mxu0 %v444_v58  ;;  %v348_v27 = vunpack.c.l.b16 %v213_v16  ;;  %v352_v28 = vunpack.c.l.b16 %v217_v17  ;;  %v356_v29 = vunpack.c.l.b16 %v221_v19  ;;  %v1010_v19 = vld [vmem:[%s1307_s3 + $0x8] sm:$0xff]  }
  0x25   :  { %v433_v63 = vrot.slane %v363_v38, 5  ;;  %v360_v31 = vunpack.c.l.b16 %v225_v20  ;;  %v364_v39 = vunpack.c.l.b16 %v229_v21  ;;  %v368_v32 = vunpack.c.l.b16 %v233_v23 }
  0x26   :  { %v432_v6 = vsel %vm384_vm1, %v431_v62, %v430_v2  ;;  %v372_v33 = vunpack.c.l.b16 %v237_v24  ;;  %v376_v34 = vunpack.c.l.b16 %v241_v25  ;;  %v380_v35 = vrot.slane %v352_v28, 7 }
  0x27   :  { %v434_v10 = vsel %vm387_vm2, %v433_v63, %v432_v6  ;;  %v383_v36 = vrot.slane %v356_v29, 6  ;;  %v386_v37 = vrot.slane %v360_v31, 5  ;;  %v389_v45 = vrot.slane %v364_v39, 4  ;;  %v1013_v31 = vld [vmem:[%s1307_s3 + $0x20] sm:$0xff]   ;;  %v1014_v39 = vld [vmem:[%s1307_s3 + $0x28] sm:$0xff]  }
  0x28   :  { %v436_v14 = vsel %vm390_vm3, %v435_v0, %v434_v10  ;;  %v392_v51 = vrot.slane %v368_v32, 3  ;;  %v64_v52 = vrot.slane %v1160_v41, %v1158_v40  ;;  %v382_v53 = vsel %vm381_vm0, %v380_v35, %v348_v27  ;;  %v1015_v32 = vld [vmem:[%s1307_s3 + $0x30] sm:$0xff]  }
  0x29   :  { %v438_v18 = vsel %vm393_vm4, %v437_v1, %v436_v14  ;;  %v395_v54 = vrot.slane %v372_v33, 2  ;;  %v398_v55 = vrot.slane %v376_v34, 1  ;;  %v80_v38 = vrot.slane %v1162_v42, %v1158_v40  ;;  %v1016_v33 = vld [vmem:[%s1307_s3 + $0x38] sm:$0xff]  }
  0x2a   :  { %v440_v22 = vsel %vm396_vm5, %v439_v3, %v438_v18  ;;  %v385_v56 = vsel %vm384_vm1, %v383_v36, %v382_v53  ;;  %v96_v57 = vrot.slane %v1164_v43, %v1158_v40  ;;  %v112_v58 = vrot.slane %v1166_v44, %v1158_v40 }
  0x2b   :  { %v442_v26 = vsel %vm399_vm6, %v441_v4, %v440_v22  ;;  %v128_v59 = vrot.slane %v1172_v47, %v1158_v40  ;;  %v388_v41 = vsel %vm387_vm2, %v386_v37, %v385_v56  ;;  %v144_v60 = vrot.slane %v1174_v48, %v1158_v40 }
  0x2c   :  { %v446_v30 = vpack.c.b16 %v442_v26, %v442_v26  ;;  %v160_v61 = vrot.slane %v1176_v49, %v1158_v40  ;;  %v176_v42 = vrot.slane %v1178_v50, %v1158_v40  ;;  %v391_v62 = vsel %vm390_vm3, %v389_v45, %v388_v41  ;;  %v1009_v50 = vld [vmem:[%s1307_s3] sm:$0xff]   ;;  %v1011_v26 = vld [vmem:[%s1307_s3 + $0x10] sm:$0xff]  }
  0x2d   :  { %v215_v43 = vpack.c.bf16 %v64_v52, %v64_v52  ;;  %v219_v63 = vpack.c.bf16 %v80_v38, %v80_v38  ;;  %v223_v0 = vpack.c.bf16 %v96_v57, %v96_v57  ;;  %v394_v44 = vsel %vm393_vm4, %v392_v51, %v391_v62  ;;  %v841_v51 = vld [vmem:[%s1308_s2] ss:$0 sm:$0xff] }
  0x2e   :  { %715 = vmatprep.mubr.bf16.mxu1 %v446_v30  ;;  %v227_v1 = vpack.c.bf16 %v112_v58, %v112_v58  ;;  %v231_v47 = vpack.c.bf16 %v128_v59, %v128_v59  ;;  %v235_v2 = vpack.c.bf16 %v144_v60, %v144_v60  ;;  %v397_v3 = vsel %vm396_vm5, %v395_v54, %v394_v44  ;;  %v1012_v30 = vld [vmem:[%s1307_s3 + $0x18] sm:$0xff]  }
  0x2f   :  { %v239_v4 = vpack.c.bf16 %v160_v61, %v160_v61  ;;  %v243_v48 = vpack.c.bf16 %v176_v42, %v176_v42  ;;  %v350_v5 = vunpack.c.l.b16 %v215_v43  ;;  %v400_v49 = vsel %vm399_vm6, %v398_v55, %v397_v3 }
  0x30   :  { %v354_v6 = vunpack.c.l.b16 %v219_v63  ;;  %v358_v7 = vunpack.c.l.b16 %v223_v0  ;;  %v362_v40 = vunpack.c.l.b16 %v227_v1  ;;  %v443_v8 = vpack.c.b16 %v400_v49, %v400_v49 }
  0x31   :  { %v366_v9 = vunpack.c.l.b16 %v231_v47  ;;  %v370_v10 = vunpack.c.l.b16 %v235_v2  ;;  %v374_v11 = vunpack.c.l.b16 %v239_v4  ;;  %v378_v12 = vunpack.c.l.b16 %v243_v48 }
  0x32   :  { %v415_v13 = vrot.slane %v354_v6, 7  ;;  %v417_v14 = vrot.slane %v358_v7, 6  ;;  %v419_v15 = vrot.slane %v362_v40, 5  ;;  %676 = vmatmul.mubr.bf16.vlgmr.msra.gmra.mrb[0].mxu0 %v443_v8 }
  0x33   :  { %v421_v16 = vrot.slane %v366_v9, 4  ;;  %v423_v18 = vrot.slane %v370_v10, 3  ;;  %956 = vmatpush3.bf16.msra.mxu0 %v1009_v50  ;;  %v425_v21 = vrot.slane %v374_v11, 2  ;;  %v427_v23 = vrot.slane %v378_v12, 1  ;;  %971 = vmatprep.mubr.msk.bf16.mxu0 %vm1018_vm7, %v1017_v46 }
  0x34   :  { %v416_v17 = vsel %vm381_vm0, %v415_v13, %v350_v5  ;;  %957 = vmatprep.subr.bf16.mxu0 %v1017_v46 }
  0x35   :  { %v418_v20 = vsel %vm384_vm1, %v417_v14, %v416_v17 }
  0x36   :  { %v420_v22 = vsel %vm387_vm2, %v419_v15, %v418_v20 }
  0x37   :  { %v422_v24 = vsel %vm390_vm3, %v421_v16, %v420_v22  ;;  %958 = vmatpush3.bf16.msra.mxu0 %v1010_v19 }
  0x38   :  { %v424_v25 = vsel %vm393_vm4, %v423_v18, %v422_v24  ;;  %959 = vmatprep.subr.bf16.mxu0 %v1017_v46 }
  0x39   :  { %v426_v27 = vsel %vm396_vm5, %v425_v21, %v424_v25 }
  0x3a   :  { %v428_v28 = vsel %vm399_vm6, %v427_v23, %v426_v27 }
  0x3b   :  { %v445_v29 = vpack.c.b16 %v428_v28, %v428_v28  ;;  %960 = vmatpush3.bf16.msra.mxu0 %v1011_v26 }
  0x3c   :  { %961 = vmatprep.subr.bf16.mxu0 %v1017_v46 }
  0x3d   :  { %716 = vmatmul.mubr.bf16.vlgmr.msra.gmra.mrb[0].mxu1 %v445_v29 }
  0x3f   :  { %962 = vmatpush3.bf16.msra.mxu0 %v1012_v30 }
  0x40   :  { %963 = vmatprep.subr.bf16.mxu0 %v1017_v46 }
  0x43   :  { %964 = vmatpush3.bf16.msra.mxu0 %v1013_v31 }
  0x44   :  { %965 = vmatprep.subr.bf16.mxu0 %v1017_v46 }
  0x47   :  { %966 = vmatpush3.bf16.msra.mxu0 %v1014_v39 }
  0x48   :  { %967 = vmatprep.subr.bf16.mxu0 %v1017_v46 }
  0x4b   :  { %968 = vmatpush3.bf16.msra.mxu0 %v1015_v32 }
  0x4c   :  { %969 = vmatprep.subr.bf16.mxu0 %v1017_v46  ;;  %v874_v46 = vld [vmem:[%s1309_s4] ss:$0 sm:$0xff] }
  0x4f   :  { %970 = vmatpush3.bf16.msra.mxu0 %v1016_v33 }
 0x105   :  { %v918_v34 = vpop.f32.mrb[0].mxu0 }
 0x106   :  { %v919_v35 = vpop.f32.mrb[1].mxu0 }
 0x107   :  { %v920_v36 = vadd.f32 %v919_v35, %v918_v34  ;;  %v921_v37 = vpop.f32.mrb[2].mxu0 }
 0x108   :  { %v922_v45 = vpop.f32.mrb[3].mxu0 }
 0x109   :  { %v678_v53 = vadd.f32 %v920_v36, %v841_v51 }
 0x110   :  { %v940_v52 = vpop.f32.mrb[0].mxu1 }
 0x111   :  { %v941_v54 = vpop.f32.mrb[1].mxu1 }
 0x112   :  { %v942_v55 = vadd.f32 %v941_v54, %v940_v52  ;;  %v943_v38 = vpop.f32.mrb[2].mxu1 }
 0x113   :  { %v944_v56 = vpop.f32.mrb[3].mxu1 }
 0x114   :  { %v718_v57 = vadd.f32 %v942_v55, %v678_v53 }
 0x116   :  { %v723_v58 = vmax.f32 %v718_v57, 0.0 }
 0x118   :  { %v724_v59 = vpack.c.bf16 %v723_v58, %v723_v58 }
 0x11a   :  { %972 = vmatmul.mubr.bf16.vlgmr.msra.gmra.mrb[4].mxu0 %v724_v59 }
 0x1ed   :  { %v830_v41 = vpop.f32.mrb[4].mxu0 }
 0x1ee   :  { %v831_v60 = vadd.f32 %v874_v46, %v830_v41  ;;  %v973_v61 = vpop.f32.mrb[5].mxu0 }
 0x1ef   :  { %v833_v42 = vpop.f32.mrb[6].mxu0 }
 0x1f0   :  { %836 = vst [vmem:[%s1310_s5] sm:$0xff] %v831_v60  ;;  %v974_v62 = vpop.f32.mrb[7].mxu0 }

</bundles_post_ra>
